<compile_context>
chip_gen: v5e
topology: v5e:2x2
jax: 0.10.0
libtpu: 0.0.40
codegen_flags: <defaults>
</compile_context>

<pallas_src>
import numpy as np
import jax
import jax.numpy as jnp
from jax import lax
from jax.experimental import pallas as pl
from jax.experimental.pallas import tpu as pltpu

# ----------------------------------------------------------------------------
# f_real polynomial coefficients (power -> coefficient), powers 0..43.
# ----------------------------------------------------------------------------
_TERMS = {
    0: -0.025839343299501445, 1: 1.9084885835784648, 2: 14.750915324056038,
    3: -37.912361708295, 4: 27.356146847071678, 5: -39.90957387435231,
    6: 117.92481866485281, 7: -89.72485042925268, 8: -211.8890939616365,
    9: 587.641146145812, 10: -530.6197704678854, 11: -207.5518152750119,
    12: 1151.7860139286006, 13: -1459.2587702691008, 14: 770.1813433767503,
    15: 483.9313302232636, 16: -1556.288314943953, 17: 1977.2126294449358,
    18: -1741.0625908701109, 19: 1134.742838728226, 20: -483.5919157920183,
    21: -4.839262613328451, 22: 269.41855847955685, 23: -348.0217957546191,
    24: 314.81454933124627, 25: -236.86026697775043, 26: 156.85044383258023,
    27: -93.87530820196191, 28: 51.54068298636804, 29: -26.20094487838345,
    30: 12.40928168228315, 31: -5.49938715116297, 32: 2.287442533306094,
    33: -0.8949406112502072, 34: 0.32982557751174424, 35: -0.11460589608135148,
    36: 0.03755971834942448, 37: -0.01160830950124202, 38: 0.003381044708888333,
    39: -0.0009268531081299575, 40: 0.00023866383909264125,
    41: -5.756274046647313e-05, 42: 1.2952979452796207e-05,
    43: -2.7050265951207157e-06,
}
_F_COEF = np.zeros(44, dtype=np.float64)
for _p, _c in _TERMS.items():
    _F_COEF[_p] = _c
# analytic derivative coefficients (powers 0..42), replaces torch.autograd.grad
_DF_COEF = np.array([p * _F_COEF[p] for p in range(1, 44)], dtype=np.float64)


def _split_mod4(coef):
    """Split low-to-high coefficients into the 4 residue classes mod 4 (Estrin)."""
    return tuple(np.asarray(coef[i::4], dtype=np.float64) for i in range(4))


_F_GROUPS = _split_mod4(_F_COEF)
_DF_GROUPS = _split_mod4(_DF_COEF)


def _horner(coef_low_to_high, x):
    """Evaluate sum_k coef[k] * x**k with Horner's rule (unrolled FMA chain)."""
    acc = jnp.full(x.shape, float(coef_low_to_high[-1]), dtype=x.dtype)
    for c in coef_low_to_high[-2::-1]:
        acc = acc * x + float(c)
    return acc


def _poly_estrin4(groups, x, x2, x4):
    """4-way Estrin split: P(x) = C0(x^4) + x*C1(x^4) + x^2*C2(x^4) + x^3*C3(x^4).

    Gives 4 independent short Horner chains per polynomial (8 when f and f' are
    evaluated together) instead of a single 43-deep dependent FMA chain."""
    p0 = _horner(groups[0], x4)
    p1 = _horner(groups[1], x4)
    p2 = _horner(groups[2], x4)
    p3 = _horner(groups[3], x4)
    return (p0 + x * p1) + x2 * (p2 + x * p3)


def _a_real(u):
    """Piecewise |linear| diffusion coefficient a_real(u) (is_train=False path)."""
    one = jnp.ones_like(u)
    zero = jnp.zeros_like(u)
    a1 = jnp.abs(0.10131260368113672 * u + -0.01019366137761922)
    a2 = jnp.abs(-0.05844199267150074 * u + 0.05122971899458784)
    a3 = jnp.abs(0.6929562125370112 * u + -0.3562683837245876)
    a4 = jnp.abs(-0.37134620917119565 * u + 0.033752880145923335)
    u1 = jnp.where(u >= -0.1, one, zero) * jnp.where(u < 0.25, one, zero)
    u2 = jnp.where(u >= 0.25, one, zero) * jnp.where(u < 0.5, one, zero)
    u3 = jnp.where(u >= 0.5, one, zero) * jnp.where(u < 0.75, one, zero)
    u4 = jnp.where(u >= 0.75, one, zero) * jnp.where(u <= 1.1, one, zero)
    return jnp.abs(a1 * u1 + a2 * u2 + a3 * u3 + a4 * u4)


# ----------------------------------------------------------------------------
# One-time precompute of everything that depends only on u_a (time-invariant):
# segment slopes of the cumulative trapezoid A_a, expressed as a hinge basis.
#   A_u(q) = slope[0]*(q - ua[0]) + sum_{k=1}^{Na-1} (slope[k]-slope[k-1]) * relu(q - ua[k])
# which is exactly the clamped-segment linear interpolation of Interp1d(u_a, A_a)
# (end segments extrapolate, ties at grid points are continuous).
# ----------------------------------------------------------------------------
def _precompute_interp(u_a):
    ua = u_a.astype(jnp.float32)                              # (B, Na+1)
    a = 0.5 * _a_real(ua)                                     # (B, Na+1)
    dua = ua[:, 1:] - ua[:, :-1]                              # (B, Na)
    t = 0.5 * (a[:, 1:] + a[:, :-1]) * dua                    # (B, Na) segment areas
    slope = t / dua                                           # (B, Na)
    dslope = slope[:, 1:] - slope[:, :-1]                     # (B, Na-1)
    ua_mid = ua[:, 1:-1]                                      # (B, Na-1) breakpoints 1..Na-1
    slope0 = slope[:, 0:1]                                    # (B, 1)
    off0 = slope0 * ua[:, 0:1]                                # (B, 1)
    c_lin = jnp.concatenate([slope0, off0], axis=1)           # (B, 2)
    return ua_mid, dslope, c_lin


# ----------------------------------------------------------------------------
# One optimized finite-volume step (pure jnp, used inside the Pallas kernel).
# ----------------------------------------------------------------------------
def _step_fast(u, ua_mid, dslope, slope0, off0, r, inv_dx, N):
    # flux f(u) and |f'(u)| via shared-powers Estrin evaluation
    x2 = u * u
    x4 = x2 * x2
    f = _poly_estrin4(_F_GROUPS, u, x2, x4)                   # (B, N)
    dfdu = jnp.abs(_poly_estrin4(_DF_GROUPS, u, x2, x4))      # (B, N)

    M = jnp.maximum(dfdu[:, 0:N - 1], dfdu[:, 1:N])
    f_half = (0.5 * (f[:, 0:N - 1] + f[:, 1:N])
              - 0.5 * M * (u[:, 1:N] - u[:, 0:N - 1]))        # (B, N-1)

    # diffusion: A_u(u) via the precomputed hinge basis (no searchsorted/one-hot)
    hinge = jnp.maximum(u[:, None, :] - ua_mid[:, :, None], 0.0)   # (B, Na-1, N)
    A_h = jnp.sum(dslope[:, :, None] * hinge, axis=1)               # (B, N)
    A_u = slope0 * u - off0 + A_h                                   # (B, N)
    A_half = (A_u[:, 1:N] - A_u[:, 0:N - 1]) * inv_dx               # (B, N-1)

    # finite-volume update + Neumann-like boundary copy
    g = A_half - f_half                                             # (B, N-1)
    interior = u[:, 1:N - 1] + r * (g[:, 1:N - 1] - g[:, 0:N - 2])  # (B, N-2)
    u_new = jnp.concatenate(
        [interior[:, 0:1], interior, interior[:, N - 3:N - 2]], axis=1)  # (B, N)
    return u_new


# ----------------------------------------------------------------------------
# Pallas kernel: grid over chunks of K time steps; u carried in VMEM scratch.
# Output block (K, B, N): row 0 of chunk 0 is the initial condition, so the
# full (stepnum+1, B, N) trajectory is produced in-kernel (no wrapper concat).
# ----------------------------------------------------------------------------
def _make_kernel(B, N, K, dt, dx):
    r = float(dt) / float(dx)
    inv_dx = 1.0 / float(dx)

    def kernel(u0_ref, uam_ref, dsl_ref, lin_ref, traj_ref, u_state):
        chunk = pl.program_id(0)

        @pl.when(chunk == 0)
        def _():
            u_state[...] = u0_ref[...]

        ua_mid = uam_ref[...]          # (B, Na-1)
        dslope = dsl_ref[...]          # (B, Na-1)
        slope0 = lin_ref[:, 0:1]       # (B, 1)
        off0 = lin_ref[:, 1:2]         # (B, 1)

        u = u_state[...]
        traj_ref[0] = u                # state at the start of this chunk
        for j in range(1, K):          # statically unrolled K-1 steps
            u = _step_fast(u, ua_mid, dslope, slope0, off0, r, inv_dx, N)
            traj_ref[j] = u

        # advance once more so the next chunk's row 0 is correct
        @pl.when(chunk + 1 < pl.num_programs(0))
        def _():
            u_state[...] = _step_fast(u, ua_mid, dslope, slope0, off0,
                                      r, inv_dx, N)

    return kernel


def variant_coe_forward(init, u_a, dt, dx, stepnum, max_steps_per_chunk=8):
    """Pallas implementation of VariantCoeLinear1d.forward(init, stepnum).

    init: (B, N) float32, u_a: (B, N_a+1) float32.
    Returns trajectories of shape (stepnum+1, B, N)."""
    B, N = init.shape
    N_a = u_a.shape[1] - 1
    total = stepnum + 1

    # largest K <= max_steps_per_chunk dividing (stepnum+1)
    K = 1
    for cand in range(min(max_steps_per_chunk, total), 0, -1):
        if total % cand == 0:
            K = cand
            break
    num_chunks = total // K

    ua_mid, dslope, c_lin = _precompute_interp(u_a)
    kernel = _make_kernel(B, N, K, float(dt), float(dx))

    traj = pl.pallas_call(
        kernel,
        out_shape=jax.ShapeDtypeStruct((total, B, N), jnp.float32),
        grid_spec=pltpu.PrefetchScalarGridSpec(
            num_scalar_prefetch=0,
            grid=(num_chunks,),
            in_specs=[
                pl.BlockSpec((B, N), lambda i: (0, 0)),            # init
                pl.BlockSpec((B, N_a - 1), lambda i: (0, 0)),      # ua_mid
                pl.BlockSpec((B, N_a - 1), lambda i: (0, 0)),      # dslope
                pl.BlockSpec((B, 2), lambda i: (0, 0)),            # [slope0, slope0*ua0]
            ],
            out_specs=pl.BlockSpec((K, B, N), lambda i: (i, 0, 0)),
            scratch_shapes=[pltpu.VMEM((B, N), jnp.float32)],      # carried u state
        ),
        compiler_params=pltpu.CompilerParams(
            dimension_semantics=("arbitrary",)),                   # sequential in time
    )(init.astype(jnp.float32), ua_mid, dslope, c_lin)
    return traj


# ----------------------------------------------------------------------------
# Pure-JAX reference using the ORIGINAL formulation (Horner polynomial, in-loop
# cumulative trapezoid via triangular mask, searchsorted/one-hot Interp1d) —
# an independent check of both the reformulation and the Pallas lowering.
# ----------------------------------------------------------------------------
def _step_reference(u, ua, dt, dx, N, N_a):
    B = u.shape[0]
    dtype = u.dtype

    f = _horner(_F_COEF, u)                        # (B, N)
    dfdu = jnp.abs(_horner(_DF_COEF, u))           # (B, N)

    f_left, f_right = f[:, 0:N - 1], f[:, 1:N]
    u_left, u_right = u[:, 0:N - 1], u[:, 1:N]
    M = jnp.maximum(dfdu[:, 0:N - 1], dfdu[:, 1:N])
    f_half = 0.5 * (f_left + f_right) - 0.5 * M * (u_right - u_left)   # (B, N-1)

    a = 0.5 * _a_real(ua)                          # (B, N_a+1)
    dua = ua[:, 1:] - ua[:, :-1]                   # (B, N_a)
    t = 0.5 * (a[:, 1:] + a[:, :-1]) * dua         # (B, N_a)
    k_idx = lax.broadcasted_iota(jnp.int32, (N_a, N_a), 0)
    j_idx = lax.broadcasted_iota(jnp.int32, (N_a, N_a), 1)
    tri = jnp.where(j_idx < k_idx, 1.0, 0.0).astype(dtype)             # (N_a, N_a)
    A_a = jnp.sum(t[:, None, :] * tri[None, :, :], axis=-1)            # (B, N_a)
    slope = t / dua                                                    # (B, N_a)

    q = u[:, :, None]                                                  # (B, N, 1)
    lt = jnp.where(ua[:, None, :] < q, 1.0, 0.0).astype(dtype)         # (B, N, N_a+1)
    cnt = jnp.sum(lt, axis=-1)                                         # (B, N)
    seg = jnp.clip(cnt - 1.0, 0.0, float(N_a - 1))                     # (B, N)
    k_sel = lax.broadcasted_iota(jnp.int32, (B, N, N_a), 2).astype(dtype)
    onehot = jnp.where(seg[:, :, None] == k_sel, 1.0, 0.0).astype(dtype)
    val = A_a[:, None, :] + slope[:, None, :] * (q - ua[:, None, 0:N_a])
    A_u = jnp.sum(onehot * val, axis=-1)                               # (B, N)
    A_half = (A_u[:, 1:N] - A_u[:, 0:N - 1]) / dx                      # (B, N-1)

    r = dt / dx
    interior = (u[:, 1:N - 1]
                - r * (f_half[:, 1:N - 1] - f_half[:, 0:N - 2])
                + r * (A_half[:, 1:N - 1] - A_half[:, 0:N - 2]))       # (B, N-2)
    u_new = jnp.concatenate(
        [interior[:, 0:1], interior, interior[:, N - 3:N - 2]], axis=1)
    return u_new


def reference_forward(init, u_a, dt, dx, stepnum):
    B, N = init.shape
    N_a = u_a.shape[1] - 1
    u = init
    traj = [init]
    for _ in range(stepnum):
        u = _step_reference(u, u_a, float(dt), float(dx), N, N_a)
        traj.append(u)
    return jnp.stack(traj, axis=0)


if __name__ == "__main__":
    key = jax.random.PRNGKey(0)
    B, N, N_a = 2, 128, 64
    stepnum = 15                    # stepnum+1 = 16 rows -> chunks of K=8
    dx = 0.05
    dt = 1e-3

    # smooth deterministic initial condition in (0, 1) plus small noise
    xg = jnp.linspace(0.0, 1.0, N, dtype=jnp.float32)
    base = 0.5 + 0.4 * jnp.sin(2.0 * jnp.pi * xg)
    noise = 0.01 * jax.random.uniform(key, (B, N), dtype=jnp.float32)
    init = jnp.tile(base[None, :], (B, 1)) + noise                    # (B, N)

    # u_a grid buffer spanning the piecewise-linear support [-0.1, 1.1]
    ua_row = jnp.linspace(-0.1, 1.1, N_a + 1, dtype=jnp.float32)
    u_a = jnp.tile(ua_row[None, :], (B, 1))                           # (B, N_a+1)

    out = variant_coe_forward(init, u_a, dt, dx, stepnum)
    out = jax.block_until_ready(out)

    assert out.shape == (stepnum + 1, B, N)
    assert bool(jnp.all(jnp.isfinite(out))), "non-finite output"

    ref = reference_forward(init, u_a, dt, dx, stepnum)
    assert bool(jnp.allclose(out, ref, rtol=3e-3, atol=3e-3)), "mismatch vs reference"

    print("KERNEL_OK")
</pallas_src>

<mosaic_0001>
module attributes {stable_mosaic.version = 11 : i64} {
  func.func @kernel(%arg0: i32, %arg1: memref<2x128xf32, #tpu.memory_space<vmem>>, %arg2: memref<2x63xf32, #tpu.memory_space<vmem>>, %arg3: memref<2x63xf32, #tpu.memory_space<vmem>>, %arg4: memref<2x2xf32, #tpu.memory_space<vmem>>, %arg5: memref<8x2x128xf32, #tpu.memory_space<vmem>>, %arg6: memref<2x128xf32, #tpu.memory_space<vmem>>) attributes {dimension_semantics = [#tpu.dimension_semantics<arbitrary>], iteration_bounds = array<i64: 2>, scalar_prefetch = 0 : i64, scratch_operands = 1 : i64, tpu.core_type = #tpu.core_type<tc>, window_params = [{pipeline_mode = #tpu.pipeline_mode<synchronous>, transform_indices = @transform_0, window_bounds = array<i64: 2, 128>}, {pipeline_mode = #tpu.pipeline_mode<synchronous>, transform_indices = @transform_1, window_bounds = array<i64: 2, 63>}, {pipeline_mode = #tpu.pipeline_mode<synchronous>, transform_indices = @transform_2, window_bounds = array<i64: 2, 63>}, {pipeline_mode = #tpu.pipeline_mode<synchronous>, transform_indices = @transform_3, window_bounds = array<i64: 2, 2>}, {transform_indices = @transform_4, window_bounds = array<i64: 8, 2, 128>}]} {
    %c0_i32 = arith.constant 0 : i32
    %0 = arith.cmpi eq, %arg0, %c0_i32 : i32
    %1 = arith.extui %0 : i1 to i32
    %c0_i32_0 = arith.constant 0 : i32
    %2 = arith.cmpi ne, %1, %c0_i32_0 : i32
    scf.if %2 {
      %c0_678 = arith.constant 0 : index
      %c0_679 = arith.constant 0 : index
      %2185 = vector.load %arg1[%c0_678, %c0_679] : memref<2x128xf32, #tpu.memory_space<vmem>>, vector<2x128xf32>
      %c0_680 = arith.constant 0 : index
      %c0_681 = arith.constant 0 : index
      %2186 = vector.load %arg6[%c0_680, %c0_681] : memref<2x128xf32, #tpu.memory_space<vmem>>, vector<2x128xf32>
      tpu.vector_store %arg6[%c0_680, %c0_681], %2185 {strides = array<i32>} : memref<2x128xf32, #tpu.memory_space<vmem>>, vector<2x128xf32>,
    } else {
    }
    %c0 = arith.constant 0 : index
    %c0_1 = arith.constant 0 : index
    %3 = vector.load %arg2[%c0, %c0_1] : memref<2x63xf32, #tpu.memory_space<vmem>>, vector<2x63xf32>
    %c0_2 = arith.constant 0 : index
    %c0_3 = arith.constant 0 : index
    %4 = vector.load %arg3[%c0_2, %c0_3] : memref<2x63xf32, #tpu.memory_space<vmem>>, vector<2x63xf32>
    %c0_4 = arith.constant 0 : index
    %c0_5 = arith.constant 0 : index
    %5 = vector.load %arg4[%c0_4, %c0_5] : memref<2x2xf32, #tpu.memory_space<vmem>>, vector<2x1xf32>
    %c0_6 = arith.constant 0 : index
    %c1 = arith.constant 1 : index
    %6 = vector.load %arg4[%c0_6, %c1] : memref<2x2xf32, #tpu.memory_space<vmem>>, vector<2x1xf32>
    %c0_7 = arith.constant 0 : index
    %c0_8 = arith.constant 0 : index
    %7 = vector.load %arg6[%c0_7, %c0_8] : memref<2x128xf32, #tpu.memory_space<vmem>>, vector<2x128xf32>
    %c0_9 = arith.constant 0 : index
    %c0_10 = arith.constant 0 : index
    %c0_11 = arith.constant 0 : index
    %8 = vector.load %arg5[%c0_9, %c0_10, %c0_11] : memref<8x2x128xf32, #tpu.memory_space<vmem>>, vector<1x2x128xf32>
    %9 = vector.shape_cast %8 : vector<1x2x128xf32> to vector<2x128xf32>
    %10 = vector.shape_cast %7 : vector<2x128xf32> to vector<1x2x128xf32>
    tpu.vector_store %arg5[%c0_9, %c0_10, %c0_11], %10 {strides = array<i32>} : memref<8x2x128xf32, #tpu.memory_space<vmem>>, vector<1x2x128xf32>,
    %11 = arith.mulf %7, %7 : vector<2x128xf32>
    %12 = arith.mulf %11, %11 : vector<2x128xf32>
    %cst = arith.constant 2.38663837E-4 : f32
    %13 = vector.broadcast %cst : f32 to vector<2x128xf32>
    %14 = arith.mulf %13, %12 : vector<2x128xf32>
    %cst_12 = arith.constant 0.0375597179 : f32
    %15 = vector.broadcast %cst_12 : f32 to vector<2x128xf32>
    %16 = arith.addf %14, %15 : vector<2x128xf32>
    %17 = arith.mulf %16, %12 : vector<2x128xf32>
    %cst_13 = arith.constant 2.28744245 : f32
    %18 = vector.broadcast %cst_13 : f32 to vector<2x128xf32>
    %19 = arith.addf %17, %18 : vector<2x128xf32>
    %20 = arith.mulf %19, %12 : vector<2x128xf32>
    %cst_14 = arith.constant 51.5406837 : f32
    %21 = vector.broadcast %cst_14 : f32 to vector<2x128xf32>
    %22 = arith.addf %20, %21 : vector<2x128xf32>
    %23 = arith.mulf %22, %12 : vector<2x128xf32>
    %cst_15 = arith.constant 314.814545 : f32
    %24 = vector.broadcast %cst_15 : f32 to vector<2x128xf32>
    %25 = arith.addf %23, %24 : vector<2x128xf32>
    %26 = arith.mulf %25, %12 : vector<2x128xf32>
    %cst_16 = arith.constant -483.591919 : f32
    %27 = vector.broadcast %cst_16 : f32 to vector<2x128xf32>
    %28 = arith.addf %26, %27 : vector<2x128xf32>
    %29 = arith.mulf %28, %12 : vector<2x128xf32>
    %cst_17 = arith.constant -1556.28833 : f32
    %30 = vector.broadcast %cst_17 : f32 to vector<2x128xf32>
    %31 = arith.addf %29, %30 : vector<2x128xf32>
    %32 = arith.mulf %31, %12 : vector<2x128xf32>
    %cst_18 = arith.constant 1151.78601 : f32
    %33 = vector.broadcast %cst_18 : f32 to vector<2x128xf32>
    %34 = arith.addf %32, %33 : vector<2x128xf32>
    %35 = arith.mulf %34, %12 : vector<2x128xf32>
    %cst_19 = arith.constant -211.889099 : f32
    %36 = vector.broadcast %cst_19 : f32 to vector<2x128xf32>
    %37 = arith.addf %35, %36 : vector<2x128xf32>
    %38 = arith.mulf %37, %12 : vector<2x128xf32>
    %cst_20 = arith.constant 27.3561478 : f32
    %39 = vector.broadcast %cst_20 : f32 to vector<2x128xf32>
    %40 = arith.addf %38, %39 : vector<2x128xf32>
    %41 = arith.mulf %40, %12 : vector<2x128xf32>
    %cst_21 = arith.constant -0.0258393437 : f32
    %42 = vector.broadcast %cst_21 : f32 to vector<2x128xf32>
    %43 = arith.addf %41, %42 : vector<2x128xf32>
    %cst_22 = arith.constant -5.75627419E-5 : f32
    %44 = vector.broadcast %cst_22 : f32 to vector<2x128xf32>
    %45 = arith.mulf %44, %12 : vector<2x128xf32>
    %cst_23 = arith.constant -0.0116083091 : f32
    %46 = vector.broadcast %cst_23 : f32 to vector<2x128xf32>
    %47 = arith.addf %45, %46 : vector<2x128xf32>
    %48 = arith.mulf %47, %12 : vector<2x128xf32>
    %cst_24 = arith.constant -0.894940615 : f32
    %49 = vector.broadcast %cst_24 : f32 to vector<2x128xf32>
    %50 = arith.addf %48, %49 : vector<2x128xf32>
    %51 = arith.mulf %50, %12 : vector<2x128xf32>
    %cst_25 = arith.constant -26.2009449 : f32
    %52 = vector.broadcast %cst_25 : f32 to vector<2x128xf32>
    %53 = arith.addf %51, %52 : vector<2x128xf32>
    %54 = arith.mulf %53, %12 : vector<2x128xf32>
    %cst_26 = arith.constant -236.86026 : f32
    %55 = vector.broadcast %cst_26 : f32 to vector<2x128xf32>
    %56 = arith.addf %54, %55 : vector<2x128xf32>
    %57 = arith.mulf %56, %12 : vector<2x128xf32>
    %cst_27 = arith.constant -4.83926249 : f32
    %58 = vector.broadcast %cst_27 : f32 to vector<2x128xf32>
    %59 = arith.addf %57, %58 : vector<2x128xf32>
    %60 = arith.mulf %59, %12 : vector<2x128xf32>
    %cst_28 = arith.constant 1977.21265 : f32
    %61 = vector.broadcast %cst_28 : f32 to vector<2x128xf32>
    %62 = arith.addf %60, %61 : vector<2x128xf32>
    %63 = arith.mulf %62, %12 : vector<2x128xf32>
    %cst_29 = arith.constant -1459.25879 : f32
    %64 = vector.broadcast %cst_29 : f32 to vector<2x128xf32>
    %65 = arith.addf %63, %64 : vector<2x128xf32>
    %66 = arith.mulf %65, %12 : vector<2x128xf32>
    %cst_30 = arith.constant 587.641174 : f32
    %67 = vector.broadcast %cst_30 : f32 to vector<2x128xf32>
    %68 = arith.addf %66, %67 : vector<2x128xf32>
    %69 = arith.mulf %68, %12 : vector<2x128xf32>
    %cst_31 = arith.constant -39.9095726 : f32
    %70 = vector.broadcast %cst_31 : f32 to vector<2x128xf32>
    %71 = arith.addf %69, %70 : vector<2x128xf32>
    %72 = arith.mulf %71, %12 : vector<2x128xf32>
    %cst_32 = arith.constant 1.90848863 : f32
    %73 = vector.broadcast %cst_32 : f32 to vector<2x128xf32>
    %74 = arith.addf %72, %73 : vector<2x128xf32>
    %cst_33 = arith.constant 1.29529799E-5 : f32
    %75 = vector.broadcast %cst_33 : f32 to vector<2x128xf32>
    %76 = arith.mulf %75, %12 : vector<2x128xf32>
    %cst_34 = arith.constant 0.0033810446 : f32
    %77 = vector.broadcast %cst_34 : f32 to vector<2x128xf32>
    %78 = arith.addf %76, %77 : vector<2x128xf32>
    %79 = arith.mulf %78, %12 : vector<2x128xf32>
    %cst_35 = arith.constant 0.32982558 : f32
    %80 = vector.broadcast %cst_35 : f32 to vector<2x128xf32>
    %81 = arith.addf %79, %80 : vector<2x128xf32>
    %82 = arith.mulf %81, %12 : vector<2x128xf32>
    %cst_36 = arith.constant 12.4092817 : f32
    %83 = vector.broadcast %cst_36 : f32 to vector<2x128xf32>
    %84 = arith.addf %82, %83 : vector<2x128xf32>
    %85 = arith.mulf %84, %12 : vector<2x128xf32>
    %cst_37 = arith.constant 156.850449 : f32
    %86 = vector.broadcast %cst_37 : f32 to vector<2x128xf32>
    %87 = arith.addf %85, %86 : vector<2x128xf32>
    %88 = arith.mulf %87, %12 : vector<2x128xf32>
    %cst_38 = arith.constant 269.418549 : f32
    %89 = vector.broadcast %cst_38 : f32 to vector<2x128xf32>
    %90 = arith.addf %88, %89 : vector<2x128xf32>
    %91 = arith.mulf %90, %12 : vector<2x128xf32>
    %cst_39 = arith.constant -1741.06262 : f32
    %92 = vector.broadcast %cst_39 : f32 to vector<2x128xf32>
    %93 = arith.addf %91, %92 : vector<2x128xf32>
    %94 = arith.mulf %93, %12 : vector<2x128xf32>
    %cst_40 = arith.constant 770.181335 : f32
    %95 = vector.broadcast %cst_40 : f32 to vector<2x128xf32>
    %96 = arith.addf %94, %95 : vector<2x128xf32>
    %97 = arith.mulf %96, %12 : vector<2x128xf32>
    %cst_41 = arith.constant -530.619751 : f32
    %98 = vector.broadcast %cst_41 : f32 to vector<2x128xf32>
    %99 = arith.addf %97, %98 : vector<2x128xf32>
    %100 = arith.mulf %99, %12 : vector<2x128xf32>
    %cst_42 = arith.constant 117.92482 : f32
    %101 = vector.broadcast %cst_42 : f32 to vector<2x128xf32>
    %102 = arith.addf %100, %101 : vector<2x128xf32>
    %103 = arith.mulf %102, %12 : vector<2x128xf32>
    %cst_43 = arith.constant 14.7509155 : f32
    %104 = vector.broadcast %cst_43 : f32 to vector<2x128xf32>
    %105 = arith.addf %103, %104 : vector<2x128xf32>
    %cst_44 = arith.constant -2.70502665E-6 : f32
    %106 = vector.broadcast %cst_44 : f32 to vector<2x128xf32>
    %107 = arith.mulf %106, %12 : vector<2x128xf32>
    %cst_45 = arith.constant -9.26853099E-4 : f32
    %108 = vector.broadcast %cst_45 : f32 to vector<2x128xf32>
    %109 = arith.addf %107, %108 : vector<2x128xf32>
    %110 = arith.mulf %109, %12 : vector<2x128xf32>
    %cst_46 = arith.constant -0.114605896 : f32
    %111 = vector.broadcast %cst_46 : f32 to vector<2x128xf32>
    %112 = arith.addf %110, %111 : vector<2x128xf32>
    %113 = arith.mulf %112, %12 : vector<2x128xf32>
    %cst_47 = arith.constant -5.49938726 : f32
    %114 = vector.broadcast %cst_47 : f32 to vector<2x128xf32>
    %115 = arith.addf %113, %114 : vector<2x128xf32>
    %116 = arith.mulf %115, %12 : vector<2x128xf32>
    %cst_48 = arith.constant -93.8753051 : f32
    %117 = vector.broadcast %cst_48 : f32 to vector<2x128xf32>
    %118 = arith.addf %116, %117 : vector<2x128xf32>
    %119 = arith.mulf %118, %12 : vector<2x128xf32>
    %cst_49 = arith.constant -348.02179 : f32
    %120 = vector.broadcast %cst_49 : f32 to vector<2x128xf32>
    %121 = arith.addf %119, %120 : vector<2x128xf32>
    %122 = arith.mulf %121, %12 : vector<2x128xf32>
    %cst_50 = arith.constant 1134.7428 : f32
    %123 = vector.broadcast %cst_50 : f32 to vector<2x128xf32>
    %124 = arith.addf %122, %123 : vector<2x128xf32>
    %125 = arith.mulf %124, %12 : vector<2x128xf32>
    %cst_51 = arith.constant 483.931335 : f32
    %126 = vector.broadcast %cst_51 : f32 to vector<2x128xf32>
    %127 = arith.addf %125, %126 : vector<2x128xf32>
    %128 = arith.mulf %127, %12 : vector<2x128xf32>
    %cst_52 = arith.constant -207.551819 : f32
    %129 = vector.broadcast %cst_52 : f32 to vector<2x128xf32>
    %130 = arith.addf %128, %129 : vector<2x128xf32>
    %131 = arith.mulf %130, %12 : vector<2x128xf32>
    %cst_53 = arith.constant -89.7248535 : f32
    %132 = vector.broadcast %cst_53 : f32 to vector<2x128xf32>
    %133 = arith.addf %131, %132 : vector<2x128xf32>
    %134 = arith.mulf %133, %12 : vector<2x128xf32>
    %cst_54 = arith.constant -37.9123611 : f32
    %135 = vector.broadcast %cst_54 : f32 to vector<2x128xf32>
    %136 = arith.addf %134, %135 : vector<2x128xf32>
    %137 = arith.mulf %7, %74 : vector<2x128xf32>
    %138 = arith.addf %43, %137 : vector<2x128xf32>
    %139 = arith.mulf %7, %136 : vector<2x128xf32>
    %140 = arith.addf %105, %139 : vector<2x128xf32>
    %141 = arith.mulf %11, %140 : vector<2x128xf32>
    %142 = arith.addf %138, %141 : vector<2x128xf32>
    %cst_55 = arith.constant -0.00236007245 : f32
    %143 = vector.broadcast %cst_55 : f32 to vector<2x128xf32>
    %144 = arith.mulf %143, %12 : vector<2x128xf32>
    %cst_56 = arith.constant -0.429507464 : f32
    %145 = vector.broadcast %cst_56 : f32 to vector<2x128xf32>
    %146 = arith.addf %144, %145 : vector<2x128xf32>
    %147 = arith.mulf %146, %12 : vector<2x128xf32>
    %cst_57 = arith.constant -29.533041 : f32
    %148 = vector.broadcast %cst_57 : f32 to vector<2x128xf32>
    %149 = arith.addf %147, %148 : vector<2x128xf32>
    %150 = arith.mulf %149, %12 : vector<2x128xf32>
    %cst_58 = arith.constant -759.827392 : f32
    %151 = vector.broadcast %cst_58 : f32 to vector<2x128xf32>
    %152 = arith.addf %150, %151 : vector<2x128xf32>
    %153 = arith.mulf %152, %12 : vector<2x128xf32>
    %cst_59 = arith.constant -5921.50684 : f32
    %154 = vector.broadcast %cst_59 : f32 to vector<2x128xf32>
    %155 = arith.addf %153, %154 : vector<2x128xf32>
    %156 = arith.mulf %155, %12 : vector<2x128xf32>
    %cst_60 = arith.constant -101.624512 : f32
    %157 = vector.broadcast %cst_60 : f32 to vector<2x128xf32>
    %158 = arith.addf %156, %157 : vector<2x128xf32>
    %159 = arith.mulf %158, %12 : vector<2x128xf32>
    %cst_61 = arith.constant 33612.6133 : f32
    %160 = vector.broadcast %cst_61 : f32 to vector<2x128xf32>
    %161 = arith.addf %159, %160 : vector<2x128xf32>
    %162 = arith.mulf %161, %12 : vector<2x128xf32>
    %cst_62 = arith.constant -18970.3633 : f32
    %163 = vector.broadcast %cst_62 : f32 to vector<2x128xf32>
    %164 = arith.addf %162, %163 : vector<2x128xf32>
    %165 = arith.mulf %164, %12 : vector<2x128xf32>
    %cst_63 = arith.constant 5288.77051 : f32
    %166 = vector.broadcast %cst_63 : f32 to vector<2x128xf32>
    %167 = arith.addf %165, %166 : vector<2x128xf32>
    %168 = arith.mulf %167, %12 : vector<2x128xf32>
    %cst_64 = arith.constant -199.547867 : f32
    %169 = vector.broadcast %cst_64 : f32 to vector<2x128xf32>
    %170 = arith.addf %168, %169 : vector<2x128xf32>
    %171 = arith.mulf %170, %12 : vector<2x128xf32>
    %cst_65 = arith.constant 1.90848863 : f32
    %172 = vector.broadcast %cst_65 : f32 to vector<2x128xf32>
    %173 = arith.addf %171, %172 : vector<2x128xf32>
    %cst_66 = arith.constant 5.44025155E-4 : f32
    %174 = vector.broadcast %cst_66 : f32 to vector<2x128xf32>
    %175 = arith.mulf %174, %12 : vector<2x128xf32>
    %cst_67 = arith.constant 0.128479704 : f32
    %176 = vector.broadcast %cst_67 : f32 to vector<2x128xf32>
    %177 = arith.addf %175, %176 : vector<2x128xf32>
    %178 = arith.mulf %177, %12 : vector<2x128xf32>
    %cst_68 = arith.constant 11.2140694 : f32
    %179 = vector.broadcast %cst_68 : f32 to vector<2x128xf32>
    %180 = arith.addf %178, %179 : vector<2x128xf32>
    %181 = arith.mulf %180, %12 : vector<2x128xf32>
    %cst_69 = arith.constant 372.278442 : f32
    %182 = vector.broadcast %cst_69 : f32 to vector<2x128xf32>
    %183 = arith.addf %181, %182 : vector<2x128xf32>
    %184 = arith.mulf %183, %12 : vector<2x128xf32>
    %cst_70 = arith.constant 4078.11157 : f32
    %185 = vector.broadcast %cst_70 : f32 to vector<2x128xf32>
    %186 = arith.addf %184, %185 : vector<2x128xf32>
    %187 = arith.mulf %186, %12 : vector<2x128xf32>
    %cst_71 = arith.constant 5927.20849 : f32
    %188 = vector.broadcast %cst_71 : f32 to vector<2x128xf32>
    %189 = arith.addf %187, %188 : vector<2x128xf32>
    %190 = arith.mulf %189, %12 : vector<2x128xf32>
    %cst_72 = arith.constant -31339.127 : f32
    %191 = vector.broadcast %cst_72 : f32 to vector<2x128xf32>
    %192 = arith.addf %190, %191 : vector<2x128xf32>
    %193 = arith.mulf %192, %12 : vector<2x128xf32>
    %cst_73 = arith.constant 10782.5391 : f32
    %194 = vector.broadcast %cst_73 : f32 to vector<2x128xf32>
    %195 = arith.addf %193, %194 : vector<2x128xf32>
    %196 = arith.mulf %195, %12 : vector<2x128xf32>
    %cst_74 = arith.constant -5306.19775 : f32
    %197 = vector.broadcast %cst_74 : f32 to vector<2x128xf32>
    %198 = arith.addf %196, %197 : vector<2x128xf32>
    %199 = arith.mulf %198, %12 : vector<2x128xf32>
    %cst_75 = arith.constant 707.548889 : f32
    %200 = vector.broadcast %cst_75 : f32 to vector<2x128xf32>
    %201 = arith.addf %199, %200 : vector<2x128xf32>
    %202 = arith.mulf %201, %12 : vector<2x128xf32>
    %cst_76 = arith.constant 29.5018311 : f32
    %203 = vector.broadcast %cst_76 : f32 to vector<2x128xf32>
    %204 = arith.addf %202, %203 : vector<2x128xf32>
    %cst_77 = arith.constant -1.16316143E-4 : f32
    %205 = vector.broadcast %cst_77 : f32 to vector<2x128xf32>
    %206 = arith.mulf %205, %12 : vector<2x128xf32>
    %cst_78 = arith.constant -0.0361472704 : f32
    %207 = vector.broadcast %cst_78 : f32 to vector<2x128xf32>
    %208 = arith.addf %206, %207 : vector<2x128xf32>
    %209 = arith.mulf %208, %12 : vector<2x128xf32>
    %cst_79 = arith.constant -4.01120615 : f32
    %210 = vector.broadcast %cst_79 : f32 to vector<2x128xf32>
    %211 = arith.addf %209, %210 : vector<2x128xf32>
    %212 = arith.mulf %211, %12 : vector<2x128xf32>
    %cst_80 = arith.constant -1.704810e+02 : f32
    %213 = vector.broadcast %cst_80 : f32 to vector<2x128xf32>
    %214 = arith.addf %212, %213 : vector<2x128xf32>
    %215 = arith.mulf %214, %12 : vector<2x128xf32>
    %cst_81 = arith.constant -2534.6333 : f32
    %216 = vector.broadcast %cst_81 : f32 to vector<2x128xf32>
    %217 = arith.addf %215, %216 : vector<2x128xf32>
    %218 = arith.mulf %217, %12 : vector<2x128xf32>
    %cst_82 = arith.constant -8004.50146 : f32
    %219 = vector.broadcast %cst_82 : f32 to vector<2x128xf32>
    %220 = arith.addf %218, %219 : vector<2x128xf32>
    %221 = arith.mulf %220, %12 : vector<2x128xf32>
    %cst_83 = arith.constant 21560.1133 : f32
    %222 = vector.broadcast %cst_83 : f32 to vector<2x128xf32>
    %223 = arith.addf %221, %222 : vector<2x128xf32>
    %224 = arith.mulf %223, %12 : vector<2x128xf32>
    %cst_84 = arith.constant 7258.96972 : f32
    %225 = vector.broadcast %cst_84 : f32 to vector<2x128xf32>
    %226 = arith.addf %224, %225 : vector<2x128xf32>
    %227 = arith.mulf %226, %12 : vector<2x128xf32>
    %cst_85 = arith.constant -2.283070e+03 : f32
    %228 = vector.broadcast %cst_85 : f32 to vector<2x128xf32>
    %229 = arith.addf %227, %228 : vector<2x128xf32>
    %230 = arith.mulf %229, %12 : vector<2x128xf32>
    %cst_86 = arith.constant -628.073974 : f32
    %231 = vector.broadcast %cst_86 : f32 to vector<2x128xf32>
    %232 = arith.addf %230, %231 : vector<2x128xf32>
    %233 = arith.mulf %232, %12 : vector<2x128xf32>
    %cst_87 = arith.constant -113.737083 : f32
    %234 = vector.broadcast %cst_87 : f32 to vector<2x128xf32>
    %235 = arith.addf %233, %234 : vector<2x128xf32>
    %cst_88 = arith.constant 0.00954655371 : f32
    %236 = vector.broadcast %cst_88 : f32 to vector<2x128xf32>
    %237 = arith.mulf %236, %12 : vector<2x128xf32>
    %cst_89 = arith.constant 1.35214984 : f32
    %238 = vector.broadcast %cst_89 : f32 to vector<2x128xf32>
    %239 = arith.addf %237, %238 : vector<2x128xf32>
    %240 = arith.mulf %239, %12 : vector<2x128xf32>
    %cst_90 = arith.constant 73.1981583 : f32
    %241 = vector.broadcast %cst_90 : f32 to vector<2x128xf32>
    %242 = arith.addf %240, %241 : vector<2x128xf32>
    %243 = arith.mulf %242, %12 : vector<2x128xf32>
    %cst_91 = arith.constant 1443.13916 : f32
    %244 = vector.broadcast %cst_91 : f32 to vector<2x128xf32>
    %245 = arith.addf %243, %244 : vector<2x128xf32>
    %246 = arith.mulf %245, %12 : vector<2x128xf32>
    %cst_92 = arith.constant 7555.54931 : f32
    %247 = vector.broadcast %cst_92 : f32 to vector<2x128xf32>
    %248 = arith.addf %246, %247 : vector<2x128xf32>
    %249 = arith.mulf %248, %12 : vector<2x128xf32>
    %cst_93 = arith.constant -9671.83789 : f32
    %250 = vector.broadcast %cst_93 : f32 to vector<2x128xf32>
    %251 = arith.addf %249, %250 : vector<2x128xf32>
    %252 = arith.mulf %251, %12 : vector<2x128xf32>
    %cst_94 = arith.constant -24900.6133 : f32
    %253 = vector.broadcast %cst_94 : f32 to vector<2x128xf32>
    %254 = arith.addf %252, %253 : vector<2x128xf32>
    %255 = arith.mulf %254, %12 : vector<2x128xf32>
    %cst_95 = arith.constant 13821.4326 : f32
    %256 = vector.broadcast %cst_95 : f32 to vector<2x128xf32>
    %257 = arith.addf %255, %256 : vector<2x128xf32>
    %258 = arith.mulf %257, %12 : vector<2x128xf32>
    %cst_96 = arith.constant -1695.11279 : f32
    %259 = vector.broadcast %cst_96 : f32 to vector<2x128xf32>
    %260 = arith.addf %258, %259 : vector<2x128xf32>
    %261 = arith.mulf %260, %12 : vector<2x128xf32>
    %cst_97 = arith.constant 109.424591 : f32
    %262 = vector.broadcast %cst_97 : f32 to vector<2x128xf32>
    %263 = arith.addf %261, %262 : vector<2x128xf32>
    %264 = arith.mulf %7, %204 : vector<2x128xf32>
    %265 = arith.addf %173, %264 : vector<2x128xf32>
    %266 = arith.mulf %7, %263 : vector<2x128xf32>
    %267 = arith.addf %235, %266 : vector<2x128xf32>
    %268 = arith.mulf %11, %267 : vector<2x128xf32>
    %269 = arith.addf %265, %268 : vector<2x128xf32>
    %270 = math.absf %269 : vector<2x128xf32>
    %271 = vector.extract_strided_slice %270 {offsets = [0, 0], sizes = [2, 127], strides = [1, 1]} : vector<2x128xf32> to vector<2x127xf32>
    %272 = vector.extract_strided_slice %270 {offsets = [0, 1], sizes = [2, 127], strides = [1, 1]} : vector<2x128xf32> to vector<2x127xf32>
    %273 = arith.maximumf %271, %272 : vector<2x127xf32>
    %274 = vector.extract_strided_slice %142 {offsets = [0, 0], sizes = [2, 127], strides = [1, 1]} : vector<2x128xf32> to vector<2x127xf32>
    %275 = vector.extract_strided_slice %142 {offsets = [0, 1], sizes = [2, 127], strides = [1, 1]} : vector<2x128xf32> to vector<2x127xf32>
    %276 = arith.addf %274, %275 : vector<2x127xf32>
    %cst_98 = arith.constant 5.000000e-01 : f32
    %277 = vector.broadcast %cst_98 : f32 to vector<2x127xf32>
    %278 = arith.mulf %277, %276 : vector<2x127xf32>
    %cst_99 = arith.constant 5.000000e-01 : f32
    %279 = vector.broadcast %cst_99 : f32 to vector<2x127xf32>
    %280 = arith.mulf %279, %273 : vector<2x127xf32>
    %281 = vector.extract_strided_slice %7 {offsets = [0, 1], sizes = [2, 127], strides = [1, 1]} : vector<2x128xf32> to vector<2x127xf32>
    %282 = vector.extract_strided_slice %7 {offsets = [0, 0], sizes = [2, 127], strides = [1, 1]} : vector<2x128xf32> to vector<2x127xf32>
    %283 = arith.subf %281, %282 : vector<2x127xf32>
    %284 = arith.mulf %280, %283 : vector<2x127xf32>
    %285 = arith.subf %278, %284 : vector<2x127xf32>
    %286 = vector.shape_cast %7 : vector<2x128xf32> to vector<2x1x128xf32>
    %287 = vector.shape_cast %3 : vector<2x63xf32> to vector<2x63x1xf32>
    %288 = vector.broadcast %286 : vector<2x1x128xf32> to vector<2x63x128xf32>
    %289 = vector.broadcast %287 : vector<2x63x1xf32> to vector<2x63x128xf32>
    %290 = arith.subf %288, %289 : vector<2x63x128xf32>
    %cst_100 = arith.constant 0.000000e+00 : f32
    %291 = vector.broadcast %cst_100 : f32 to vector<2x63x128xf32>
    %292 = arith.maximumf %290, %291 : vector<2x63x128xf32>
    %293 = vector.shape_cast %4 : vector<2x63xf32> to vector<2x63x1xf32>
    %294 = vector.broadcast %293 : vector<2x63x1xf32> to vector<2x63x128xf32>
    %295 = arith.mulf %294, %292 : vector<2x63x128xf32>
    %cst_101 = arith.constant dense<0.000000e+00> : vector<2x128xf32>
    %296 = vector.multi_reduction <add>, %295, %cst_101 [1] : vector<2x63x128xf32> to vector<2x128xf32>
    %297 = vector.broadcast %5 : vector<2x1xf32> to vector<2x128xf32>
    %298 = arith.mulf %297, %7 : vector<2x128xf32>
    %299 = vector.broadcast %6 : vector<2x1xf32> to vector<2x128xf32>
    %300 = arith.subf %298, %299 : vector<2x128xf32>
    %301 = arith.addf %300, %296 : vector<2x128xf32>
    %302 = vector.extract_strided_slice %301 {offsets = [0, 1], sizes = [2, 127], strides = [1, 1]} : vector<2x128xf32> to vector<2x127xf32>
    %303 = vector.extract_strided_slice %301 {offsets = [0, 0], sizes = [2, 127], strides = [1, 1]} : vector<2x128xf32> to vector<2x127xf32>
    %304 = arith.subf %302, %303 : vector<2x127xf32>
    %cst_102 = arith.constant 2.000000e+01 : f32
    %305 = vector.broadcast %cst_102 : f32 to vector<2x127xf32>
    %306 = arith.mulf %304, %305 : vector<2x127xf32>
    %307 = arith.subf %306, %285 : vector<2x127xf32>
    %308 = vector.extract_strided_slice %7 {offsets = [0, 1], sizes = [2, 126], strides = [1, 1]} : vector<2x128xf32> to vector<2x126xf32>
    %309 = vector.extract_strided_slice %307 {offsets = [0, 1], sizes = [2, 126], strides = [1, 1]} : vector<2x127xf32> to vector<2x126xf32>
    %310 = vector.extract_strided_slice %307 {offsets = [0, 0], sizes = [2, 126], strides = [1, 1]} : vector<2x127xf32> to vector<2x126xf32>
    %311 = arith.subf %309, %310 : vector<2x126xf32>
    %cst_103 = arith.constant 2.000000e-02 : f32
    %312 = vector.broadcast %cst_103 : f32 to vector<2x126xf32>
    %313 = arith.mulf %312, %311 : vector<2x126xf32>
    %314 = arith.addf %308, %313 : vector<2x126xf32>
    %315 = vector.extract_strided_slice %314 {offsets = [0, 0], sizes = [2, 1], strides = [1, 1]} : vector<2x126xf32> to vector<2x1xf32>
    %316 = vector.extract_strided_slice %314 {offsets = [0, 125], sizes = [2, 1], strides = [1, 1]} : vector<2x126xf32> to vector<2x1xf32>
    %317 = tpu.concatenate %315, %314, %316 in 1 : vector<2x1xf32>, vector<2x126xf32>, vector<2x1xf32> -> vector<2x128xf32>
    %c1_104 = arith.constant 1 : index
    %c0_105 = arith.constant 0 : index
    %c0_106 = arith.constant 0 : index
    %318 = vector.load %arg5[%c1_104, %c0_105, %c0_106] : memref<8x2x128xf32, #tpu.memory_space<vmem>>, vector<1x2x128xf32>
    %319 = vector.shape_cast %318 : vector<1x2x128xf32> to vector<2x128xf32>
    %320 = vector.shape_cast %317 : vector<2x128xf32> to vector<1x2x128xf32>
    tpu.vector_store %arg5[%c1_104, %c0_105, %c0_106], %320 {strides = array<i32>} : memref<8x2x128xf32, #tpu.memory_space<vmem>>, vector<1x2x128xf32>,
    %321 = arith.mulf %317, %317 : vector<2x128xf32>
    %322 = arith.mulf %321, %321 : vector<2x128xf32>
    %cst_107 = arith.constant 2.38663837E-4 : f32
    %323 = vector.broadcast %cst_107 : f32 to vector<2x128xf32>
    %324 = arith.mulf %323, %322 : vector<2x128xf32>
    %cst_108 = arith.constant 0.0375597179 : f32
    %325 = vector.broadcast %cst_108 : f32 to vector<2x128xf32>
    %326 = arith.addf %324, %325 : vector<2x128xf32>
    %327 = arith.mulf %326, %322 : vector<2x128xf32>
    %cst_109 = arith.constant 2.28744245 : f32
    %328 = vector.broadcast %cst_109 : f32 to vector<2x128xf32>
    %329 = arith.addf %327, %328 : vector<2x128xf32>
    %330 = arith.mulf %329, %322 : vector<2x128xf32>
    %cst_110 = arith.constant 51.5406837 : f32
    %331 = vector.broadcast %cst_110 : f32 to vector<2x128xf32>
    %332 = arith.addf %330, %331 : vector<2x128xf32>
    %333 = arith.mulf %332, %322 : vector<2x128xf32>
    %cst_111 = arith.constant 314.814545 : f32
    %334 = vector.broadcast %cst_111 : f32 to vector<2x128xf32>
    %335 = arith.addf %333, %334 : vector<2x128xf32>
    %336 = arith.mulf %335, %322 : vector<2x128xf32>
    %cst_112 = arith.constant -483.591919 : f32
    %337 = vector.broadcast %cst_112 : f32 to vector<2x128xf32>
    %338 = arith.addf %336, %337 : vector<2x128xf32>
    %339 = arith.mulf %338, %322 : vector<2x128xf32>
    %cst_113 = arith.constant -1556.28833 : f32
    %340 = vector.broadcast %cst_113 : f32 to vector<2x128xf32>
    %341 = arith.addf %339, %340 : vector<2x128xf32>
    %342 = arith.mulf %341, %322 : vector<2x128xf32>
    %cst_114 = arith.constant 1151.78601 : f32
    %343 = vector.broadcast %cst_114 : f32 to vector<2x128xf32>
    %344 = arith.addf %342, %343 : vector<2x128xf32>
    %345 = arith.mulf %344, %322 : vector<2x128xf32>
    %cst_115 = arith.constant -211.889099 : f32
    %346 = vector.broadcast %cst_115 : f32 to vector<2x128xf32>
    %347 = arith.addf %345, %346 : vector<2x128xf32>
    %348 = arith.mulf %347, %322 : vector<2x128xf32>
    %cst_116 = arith.constant 27.3561478 : f32
    %349 = vector.broadcast %cst_116 : f32 to vector<2x128xf32>
    %350 = arith.addf %348, %349 : vector<2x128xf32>
    %351 = arith.mulf %350, %322 : vector<2x128xf32>
    %cst_117 = arith.constant -0.0258393437 : f32
    %352 = vector.broadcast %cst_117 : f32 to vector<2x128xf32>
    %353 = arith.addf %351, %352 : vector<2x128xf32>
    %cst_118 = arith.constant -5.75627419E-5 : f32
    %354 = vector.broadcast %cst_118 : f32 to vector<2x128xf32>
    %355 = arith.mulf %354, %322 : vector<2x128xf32>
    %cst_119 = arith.constant -0.0116083091 : f32
    %356 = vector.broadcast %cst_119 : f32 to vector<2x128xf32>
    %357 = arith.addf %355, %356 : vector<2x128xf32>
    %358 = arith.mulf %357, %322 : vector<2x128xf32>
    %cst_120 = arith.constant -0.894940615 : f32
    %359 = vector.broadcast %cst_120 : f32 to vector<2x128xf32>
    %360 = arith.addf %358, %359 : vector<2x128xf32>
    %361 = arith.mulf %360, %322 : vector<2x128xf32>
    %cst_121 = arith.constant -26.2009449 : f32
    %362 = vector.broadcast %cst_121 : f32 to vector<2x128xf32>
    %363 = arith.addf %361, %362 : vector<2x128xf32>
    %364 = arith.mulf %363, %322 : vector<2x128xf32>
    %cst_122 = arith.constant -236.86026 : f32
    %365 = vector.broadcast %cst_122 : f32 to vector<2x128xf32>
    %366 = arith.addf %364, %365 : vector<2x128xf32>
    %367 = arith.mulf %366, %322 : vector<2x128xf32>
    %cst_123 = arith.constant -4.83926249 : f32
    %368 = vector.broadcast %cst_123 : f32 to vector<2x128xf32>
    %369 = arith.addf %367, %368 : vector<2x128xf32>
    %370 = arith.mulf %369, %322 : vector<2x128xf32>
    %cst_124 = arith.constant 1977.21265 : f32
    %371 = vector.broadcast %cst_124 : f32 to vector<2x128xf32>
    %372 = arith.addf %370, %371 : vector<2x128xf32>
    %373 = arith.mulf %372, %322 : vector<2x128xf32>
    %cst_125 = arith.constant -1459.25879 : f32
    %374 = vector.broadcast %cst_125 : f32 to vector<2x128xf32>
    %375 = arith.addf %373, %374 : vector<2x128xf32>
    %376 = arith.mulf %375, %322 : vector<2x128xf32>
    %cst_126 = arith.constant 587.641174 : f32
    %377 = vector.broadcast %cst_126 : f32 to vector<2x128xf32>
    %378 = arith.addf %376, %377 : vector<2x128xf32>
    %379 = arith.mulf %378, %322 : vector<2x128xf32>
    %cst_127 = arith.constant -39.9095726 : f32
    %380 = vector.broadcast %cst_127 : f32 to vector<2x128xf32>
    %381 = arith.addf %379, %380 : vector<2x128xf32>
    %382 = arith.mulf %381, %322 : vector<2x128xf32>
    %cst_128 = arith.constant 1.90848863 : f32
    %383 = vector.broadcast %cst_128 : f32 to vector<2x128xf32>
    %384 = arith.addf %382, %383 : vector<2x128xf32>
    %cst_129 = arith.constant 1.29529799E-5 : f32
    %385 = vector.broadcast %cst_129 : f32 to vector<2x128xf32>
    %386 = arith.mulf %385, %322 : vector<2x128xf32>
    %cst_130 = arith.constant 0.0033810446 : f32
    %387 = vector.broadcast %cst_130 : f32 to vector<2x128xf32>
    %388 = arith.addf %386, %387 : vector<2x128xf32>
    %389 = arith.mulf %388, %322 : vector<2x128xf32>
    %cst_131 = arith.constant 0.32982558 : f32
    %390 = vector.broadcast %cst_131 : f32 to vector<2x128xf32>
    %391 = arith.addf %389, %390 : vector<2x128xf32>
    %392 = arith.mulf %391, %322 : vector<2x128xf32>
    %cst_132 = arith.constant 12.4092817 : f32
    %393 = vector.broadcast %cst_132 : f32 to vector<2x128xf32>
    %394 = arith.addf %392, %393 : vector<2x128xf32>
    %395 = arith.mulf %394, %322 : vector<2x128xf32>
    %cst_133 = arith.constant 156.850449 : f32
    %396 = vector.broadcast %cst_133 : f32 to vector<2x128xf32>
    %397 = arith.addf %395, %396 : vector<2x128xf32>
    %398 = arith.mulf %397, %322 : vector<2x128xf32>
    %cst_134 = arith.constant 269.418549 : f32
    %399 = vector.broadcast %cst_134 : f32 to vector<2x128xf32>
    %400 = arith.addf %398, %399 : vector<2x128xf32>
    %401 = arith.mulf %400, %322 : vector<2x128xf32>
    %cst_135 = arith.constant -1741.06262 : f32
    %402 = vector.broadcast %cst_135 : f32 to vector<2x128xf32>
    %403 = arith.addf %401, %402 : vector<2x128xf32>
    %404 = arith.mulf %403, %322 : vector<2x128xf32>
    %cst_136 = arith.constant 770.181335 : f32
    %405 = vector.broadcast %cst_136 : f32 to vector<2x128xf32>
    %406 = arith.addf %404, %405 : vector<2x128xf32>
    %407 = arith.mulf %406, %322 : vector<2x128xf32>
    %cst_137 = arith.constant -530.619751 : f32
    %408 = vector.broadcast %cst_137 : f32 to vector<2x128xf32>
    %409 = arith.addf %407, %408 : vector<2x128xf32>
    %410 = arith.mulf %409, %322 : vector<2x128xf32>
    %cst_138 = arith.constant 117.92482 : f32
    %411 = vector.broadcast %cst_138 : f32 to vector<2x128xf32>
    %412 = arith.addf %410, %411 : vector<2x128xf32>
    %413 = arith.mulf %412, %322 : vector<2x128xf32>
    %cst_139 = arith.constant 14.7509155 : f32
    %414 = vector.broadcast %cst_139 : f32 to vector<2x128xf32>
    %415 = arith.addf %413, %414 : vector<2x128xf32>
    %cst_140 = arith.constant -2.70502665E-6 : f32
    %416 = vector.broadcast %cst_140 : f32 to vector<2x128xf32>
    %417 = arith.mulf %416, %322 : vector<2x128xf32>
    %cst_141 = arith.constant -9.26853099E-4 : f32
    %418 = vector.broadcast %cst_141 : f32 to vector<2x128xf32>
    %419 = arith.addf %417, %418 : vector<2x128xf32>
    %420 = arith.mulf %419, %322 : vector<2x128xf32>
    %cst_142 = arith.constant -0.114605896 : f32
    %421 = vector.broadcast %cst_142 : f32 to vector<2x128xf32>
    %422 = arith.addf %420, %421 : vector<2x128xf32>
    %423 = arith.mulf %422, %322 : vector<2x128xf32>
    %cst_143 = arith.constant -5.49938726 : f32
    %424 = vector.broadcast %cst_143 : f32 to vector<2x128xf32>
    %425 = arith.addf %423, %424 : vector<2x128xf32>
    %426 = arith.mulf %425, %322 : vector<2x128xf32>
    %cst_144 = arith.constant -93.8753051 : f32
    %427 = vector.broadcast %cst_144 : f32 to vector<2x128xf32>
    %428 = arith.addf %426, %427 : vector<2x128xf32>
    %429 = arith.mulf %428, %322 : vector<2x128xf32>
    %cst_145 = arith.constant -348.02179 : f32
    %430 = vector.broadcast %cst_145 : f32 to vector<2x128xf32>
    %431 = arith.addf %429, %430 : vector<2x128xf32>
    %432 = arith.mulf %431, %322 : vector<2x128xf32>
    %cst_146 = arith.constant 1134.7428 : f32
    %433 = vector.broadcast %cst_146 : f32 to vector<2x128xf32>
    %434 = arith.addf %432, %433 : vector<2x128xf32>
    %435 = arith.mulf %434, %322 : vector<2x128xf32>
    %cst_147 = arith.constant 483.931335 : f32
    %436 = vector.broadcast %cst_147 : f32 to vector<2x128xf32>
    %437 = arith.addf %435, %436 : vector<2x128xf32>
    %438 = arith.mulf %437, %322 : vector<2x128xf32>
    %cst_148 = arith.constant -207.551819 : f32
    %439 = vector.broadcast %cst_148 : f32 to vector<2x128xf32>
    %440 = arith.addf %438, %439 : vector<2x128xf32>
    %441 = arith.mulf %440, %322 : vector<2x128xf32>
    %cst_149 = arith.constant -89.7248535 : f32
    %442 = vector.broadcast %cst_149 : f32 to vector<2x128xf32>
    %443 = arith.addf %441, %442 : vector<2x128xf32>
    %444 = arith.mulf %443, %322 : vector<2x128xf32>
    %cst_150 = arith.constant -37.9123611 : f32
    %445 = vector.broadcast %cst_150 : f32 to vector<2x128xf32>
    %446 = arith.addf %444, %445 : vector<2x128xf32>
    %447 = arith.mulf %317, %384 : vector<2x128xf32>
    %448 = arith.addf %353, %447 : vector<2x128xf32>
    %449 = arith.mulf %317, %446 : vector<2x128xf32>
    %450 = arith.addf %415, %449 : vector<2x128xf32>
    %451 = arith.mulf %321, %450 : vector<2x128xf32>
    %452 = arith.addf %448, %451 : vector<2x128xf32>
    %cst_151 = arith.constant -0.00236007245 : f32
    %453 = vector.broadcast %cst_151 : f32 to vector<2x128xf32>
    %454 = arith.mulf %453, %322 : vector<2x128xf32>
    %cst_152 = arith.constant -0.429507464 : f32
    %455 = vector.broadcast %cst_152 : f32 to vector<2x128xf32>
    %456 = arith.addf %454, %455 : vector<2x128xf32>
    %457 = arith.mulf %456, %322 : vector<2x128xf32>
    %cst_153 = arith.constant -29.533041 : f32
    %458 = vector.broadcast %cst_153 : f32 to vector<2x128xf32>
    %459 = arith.addf %457, %458 : vector<2x128xf32>
    %460 = arith.mulf %459, %322 : vector<2x128xf32>
    %cst_154 = arith.constant -759.827392 : f32
    %461 = vector.broadcast %cst_154 : f32 to vector<2x128xf32>
    %462 = arith.addf %460, %461 : vector<2x128xf32>
    %463 = arith.mulf %462, %322 : vector<2x128xf32>
    %cst_155 = arith.constant -5921.50684 : f32
    %464 = vector.broadcast %cst_155 : f32 to vector<2x128xf32>
    %465 = arith.addf %463, %464 : vector<2x128xf32>
    %466 = arith.mulf %465, %322 : vector<2x128xf32>
    %cst_156 = arith.constant -101.624512 : f32
    %467 = vector.broadcast %cst_156 : f32 to vector<2x128xf32>
    %468 = arith.addf %466, %467 : vector<2x128xf32>
    %469 = arith.mulf %468, %322 : vector<2x128xf32>
    %cst_157 = arith.constant 33612.6133 : f32
    %470 = vector.broadcast %cst_157 : f32 to vector<2x128xf32>
    %471 = arith.addf %469, %470 : vector<2x128xf32>
    %472 = arith.mulf %471, %322 : vector<2x128xf32>
    %cst_158 = arith.constant -18970.3633 : f32
    %473 = vector.broadcast %cst_158 : f32 to vector<2x128xf32>
    %474 = arith.addf %472, %473 : vector<2x128xf32>
    %475 = arith.mulf %474, %322 : vector<2x128xf32>
    %cst_159 = arith.constant 5288.77051 : f32
    %476 = vector.broadcast %cst_159 : f32 to vector<2x128xf32>
    %477 = arith.addf %475, %476 : vector<2x128xf32>
    %478 = arith.mulf %477, %322 : vector<2x128xf32>
    %cst_160 = arith.constant -199.547867 : f32
    %479 = vector.broadcast %cst_160 : f32 to vector<2x128xf32>
    %480 = arith.addf %478, %479 : vector<2x128xf32>
    %481 = arith.mulf %480, %322 : vector<2x128xf32>
    %cst_161 = arith.constant 1.90848863 : f32
    %482 = vector.broadcast %cst_161 : f32 to vector<2x128xf32>
    %483 = arith.addf %481, %482 : vector<2x128xf32>
    %cst_162 = arith.constant 5.44025155E-4 : f32
    %484 = vector.broadcast %cst_162 : f32 to vector<2x128xf32>
    %485 = arith.mulf %484, %322 : vector<2x128xf32>
    %cst_163 = arith.constant 0.128479704 : f32
    %486 = vector.broadcast %cst_163 : f32 to vector<2x128xf32>
    %487 = arith.addf %485, %486 : vector<2x128xf32>
    %488 = arith.mulf %487, %322 : vector<2x128xf32>
    %cst_164 = arith.constant 11.2140694 : f32
    %489 = vector.broadcast %cst_164 : f32 to vector<2x128xf32>
    %490 = arith.addf %488, %489 : vector<2x128xf32>
    %491 = arith.mulf %490, %322 : vector<2x128xf32>
    %cst_165 = arith.constant 372.278442 : f32
    %492 = vector.broadcast %cst_165 : f32 to vector<2x128xf32>
    %493 = arith.addf %491, %492 : vector<2x128xf32>
    %494 = arith.mulf %493, %322 : vector<2x128xf32>
    %cst_166 = arith.constant 4078.11157 : f32
    %495 = vector.broadcast %cst_166 : f32 to vector<2x128xf32>
    %496 = arith.addf %494, %495 : vector<2x128xf32>
    %497 = arith.mulf %496, %322 : vector<2x128xf32>
    %cst_167 = arith.constant 5927.20849 : f32
    %498 = vector.broadcast %cst_167 : f32 to vector<2x128xf32>
    %499 = arith.addf %497, %498 : vector<2x128xf32>
    %500 = arith.mulf %499, %322 : vector<2x128xf32>
    %cst_168 = arith.constant -31339.127 : f32
    %501 = vector.broadcast %cst_168 : f32 to vector<2x128xf32>
    %502 = arith.addf %500, %501 : vector<2x128xf32>
    %503 = arith.mulf %502, %322 : vector<2x128xf32>
    %cst_169 = arith.constant 10782.5391 : f32
    %504 = vector.broadcast %cst_169 : f32 to vector<2x128xf32>
    %505 = arith.addf %503, %504 : vector<2x128xf32>
    %506 = arith.mulf %505, %322 : vector<2x128xf32>
    %cst_170 = arith.constant -5306.19775 : f32
    %507 = vector.broadcast %cst_170 : f32 to vector<2x128xf32>
    %508 = arith.addf %506, %507 : vector<2x128xf32>
    %509 = arith.mulf %508, %322 : vector<2x128xf32>
    %cst_171 = arith.constant 707.548889 : f32
    %510 = vector.broadcast %cst_171 : f32 to vector<2x128xf32>
    %511 = arith.addf %509, %510 : vector<2x128xf32>
    %512 = arith.mulf %511, %322 : vector<2x128xf32>
    %cst_172 = arith.constant 29.5018311 : f32
    %513 = vector.broadcast %cst_172 : f32 to vector<2x128xf32>
    %514 = arith.addf %512, %513 : vector<2x128xf32>
    %cst_173 = arith.constant -1.16316143E-4 : f32
    %515 = vector.broadcast %cst_173 : f32 to vector<2x128xf32>
    %516 = arith.mulf %515, %322 : vector<2x128xf32>
    %cst_174 = arith.constant -0.0361472704 : f32
    %517 = vector.broadcast %cst_174 : f32 to vector<2x128xf32>
    %518 = arith.addf %516, %517 : vector<2x128xf32>
    %519 = arith.mulf %518, %322 : vector<2x128xf32>
    %cst_175 = arith.constant -4.01120615 : f32
    %520 = vector.broadcast %cst_175 : f32 to vector<2x128xf32>
    %521 = arith.addf %519, %520 : vector<2x128xf32>
    %522 = arith.mulf %521, %322 : vector<2x128xf32>
    %cst_176 = arith.constant -1.704810e+02 : f32
    %523 = vector.broadcast %cst_176 : f32 to vector<2x128xf32>
    %524 = arith.addf %522, %523 : vector<2x128xf32>
    %525 = arith.mulf %524, %322 : vector<2x128xf32>
    %cst_177 = arith.constant -2534.6333 : f32
    %526 = vector.broadcast %cst_177 : f32 to vector<2x128xf32>
    %527 = arith.addf %525, %526 : vector<2x128xf32>
    %528 = arith.mulf %527, %322 : vector<2x128xf32>
    %cst_178 = arith.constant -8004.50146 : f32
    %529 = vector.broadcast %cst_178 : f32 to vector<2x128xf32>
    %530 = arith.addf %528, %529 : vector<2x128xf32>
    %531 = arith.mulf %530, %322 : vector<2x128xf32>
    %cst_179 = arith.constant 21560.1133 : f32
    %532 = vector.broadcast %cst_179 : f32 to vector<2x128xf32>
    %533 = arith.addf %531, %532 : vector<2x128xf32>
    %534 = arith.mulf %533, %322 : vector<2x128xf32>
    %cst_180 = arith.constant 7258.96972 : f32
    %535 = vector.broadcast %cst_180 : f32 to vector<2x128xf32>
    %536 = arith.addf %534, %535 : vector<2x128xf32>
    %537 = arith.mulf %536, %322 : vector<2x128xf32>
    %cst_181 = arith.constant -2.283070e+03 : f32
    %538 = vector.broadcast %cst_181 : f32 to vector<2x128xf32>
    %539 = arith.addf %537, %538 : vector<2x128xf32>
    %540 = arith.mulf %539, %322 : vector<2x128xf32>
    %cst_182 = arith.constant -628.073974 : f32
    %541 = vector.broadcast %cst_182 : f32 to vector<2x128xf32>
    %542 = arith.addf %540, %541 : vector<2x128xf32>
    %543 = arith.mulf %542, %322 : vector<2x128xf32>
    %cst_183 = arith.constant -113.737083 : f32
    %544 = vector.broadcast %cst_183 : f32 to vector<2x128xf32>
    %545 = arith.addf %543, %544 : vector<2x128xf32>
    %cst_184 = arith.constant 0.00954655371 : f32
    %546 = vector.broadcast %cst_184 : f32 to vector<2x128xf32>
    %547 = arith.mulf %546, %322 : vector<2x128xf32>
    %cst_185 = arith.constant 1.35214984 : f32
    %548 = vector.broadcast %cst_185 : f32 to vector<2x128xf32>
    %549 = arith.addf %547, %548 : vector<2x128xf32>
    %550 = arith.mulf %549, %322 : vector<2x128xf32>
    %cst_186 = arith.constant 73.1981583 : f32
    %551 = vector.broadcast %cst_186 : f32 to vector<2x128xf32>
    %552 = arith.addf %550, %551 : vector<2x128xf32>
    %553 = arith.mulf %552, %322 : vector<2x128xf32>
    %cst_187 = arith.constant 1443.13916 : f32
    %554 = vector.broadcast %cst_187 : f32 to vector<2x128xf32>
    %555 = arith.addf %553, %554 : vector<2x128xf32>
    %556 = arith.mulf %555, %322 : vector<2x128xf32>
    %cst_188 = arith.constant 7555.54931 : f32
    %557 = vector.broadcast %cst_188 : f32 to vector<2x128xf32>
    %558 = arith.addf %556, %557 : vector<2x128xf32>
    %559 = arith.mulf %558, %322 : vector<2x128xf32>
    %cst_189 = arith.constant -9671.83789 : f32
    %560 = vector.broadcast %cst_189 : f32 to vector<2x128xf32>
    %561 = arith.addf %559, %560 : vector<2x128xf32>
    %562 = arith.mulf %561, %322 : vector<2x128xf32>
    %cst_190 = arith.constant -24900.6133 : f32
    %563 = vector.broadcast %cst_190 : f32 to vector<2x128xf32>
    %564 = arith.addf %562, %563 : vector<2x128xf32>
    %565 = arith.mulf %564, %322 : vector<2x128xf32>
    %cst_191 = arith.constant 13821.4326 : f32
    %566 = vector.broadcast %cst_191 : f32 to vector<2x128xf32>
    %567 = arith.addf %565, %566 : vector<2x128xf32>
    %568 = arith.mulf %567, %322 : vector<2x128xf32>
    %cst_192 = arith.constant -1695.11279 : f32
    %569 = vector.broadcast %cst_192 : f32 to vector<2x128xf32>
    %570 = arith.addf %568, %569 : vector<2x128xf32>
    %571 = arith.mulf %570, %322 : vector<2x128xf32>
    %cst_193 = arith.constant 109.424591 : f32
    %572 = vector.broadcast %cst_193 : f32 to vector<2x128xf32>
    %573 = arith.addf %571, %572 : vector<2x128xf32>
    %574 = arith.mulf %317, %514 : vector<2x128xf32>
    %575 = arith.addf %483, %574 : vector<2x128xf32>
    %576 = arith.mulf %317, %573 : vector<2x128xf32>
    %577 = arith.addf %545, %576 : vector<2x128xf32>
    %578 = arith.mulf %321, %577 : vector<2x128xf32>
    %579 = arith.addf %575, %578 : vector<2x128xf32>
    %580 = math.absf %579 : vector<2x128xf32>
    %581 = vector.extract_strided_slice %580 {offsets = [0, 0], sizes = [2, 127], strides = [1, 1]} : vector<2x128xf32> to vector<2x127xf32>
    %582 = vector.extract_strided_slice %580 {offsets = [0, 1], sizes = [2, 127], strides = [1, 1]} : vector<2x128xf32> to vector<2x127xf32>
    %583 = arith.maximumf %581, %582 : vector<2x127xf32>
    %584 = vector.extract_strided_slice %452 {offsets = [0, 0], sizes = [2, 127], strides = [1, 1]} : vector<2x128xf32> to vector<2x127xf32>
    %585 = vector.extract_strided_slice %452 {offsets = [0, 1], sizes = [2, 127], strides = [1, 1]} : vector<2x128xf32> to vector<2x127xf32>
    %586 = arith.addf %584, %585 : vector<2x127xf32>
    %cst_194 = arith.constant 5.000000e-01 : f32
    %587 = vector.broadcast %cst_194 : f32 to vector<2x127xf32>
    %588 = arith.mulf %587, %586 : vector<2x127xf32>
    %cst_195 = arith.constant 5.000000e-01 : f32
    %589 = vector.broadcast %cst_195 : f32 to vector<2x127xf32>
    %590 = arith.mulf %589, %583 : vector<2x127xf32>
    %591 = vector.extract_strided_slice %317 {offsets = [0, 1], sizes = [2, 127], strides = [1, 1]} : vector<2x128xf32> to vector<2x127xf32>
    %592 = vector.extract_strided_slice %317 {offsets = [0, 0], sizes = [2, 127], strides = [1, 1]} : vector<2x128xf32> to vector<2x127xf32>
    %593 = arith.subf %591, %592 : vector<2x127xf32>
    %594 = arith.mulf %590, %593 : vector<2x127xf32>
    %595 = arith.subf %588, %594 : vector<2x127xf32>
    %596 = vector.shape_cast %317 : vector<2x128xf32> to vector<2x1x128xf32>
    %597 = vector.shape_cast %3 : vector<2x63xf32> to vector<2x63x1xf32>
    %598 = vector.broadcast %596 : vector<2x1x128xf32> to vector<2x63x128xf32>
    %599 = vector.broadcast %597 : vector<2x63x1xf32> to vector<2x63x128xf32>
    %600 = arith.subf %598, %599 : vector<2x63x128xf32>
    %cst_196 = arith.constant 0.000000e+00 : f32
    %601 = vector.broadcast %cst_196 : f32 to vector<2x63x128xf32>
    %602 = arith.maximumf %600, %601 : vector<2x63x128xf32>
    %603 = vector.shape_cast %4 : vector<2x63xf32> to vector<2x63x1xf32>
    %604 = vector.broadcast %603 : vector<2x63x1xf32> to vector<2x63x128xf32>
    %605 = arith.mulf %604, %602 : vector<2x63x128xf32>
    %cst_197 = arith.constant dense<0.000000e+00> : vector<2x128xf32>
    %606 = vector.multi_reduction <add>, %605, %cst_197 [1] : vector<2x63x128xf32> to vector<2x128xf32>
    %607 = vector.broadcast %5 : vector<2x1xf32> to vector<2x128xf32>
    %608 = arith.mulf %607, %317 : vector<2x128xf32>
    %609 = vector.broadcast %6 : vector<2x1xf32> to vector<2x128xf32>
    %610 = arith.subf %608, %609 : vector<2x128xf32>
    %611 = arith.addf %610, %606 : vector<2x128xf32>
    %612 = vector.extract_strided_slice %611 {offsets = [0, 1], sizes = [2, 127], strides = [1, 1]} : vector<2x128xf32> to vector<2x127xf32>
    %613 = vector.extract_strided_slice %611 {offsets = [0, 0], sizes = [2, 127], strides = [1, 1]} : vector<2x128xf32> to vector<2x127xf32>
    %614 = arith.subf %612, %613 : vector<2x127xf32>
    %cst_198 = arith.constant 2.000000e+01 : f32
    %615 = vector.broadcast %cst_198 : f32 to vector<2x127xf32>
    %616 = arith.mulf %614, %615 : vector<2x127xf32>
    %617 = arith.subf %616, %595 : vector<2x127xf32>
    %618 = vector.extract_strided_slice %317 {offsets = [0, 1], sizes = [2, 126], strides = [1, 1]} : vector<2x128xf32> to vector<2x126xf32>
    %619 = vector.extract_strided_slice %617 {offsets = [0, 1], sizes = [2, 126], strides = [1, 1]} : vector<2x127xf32> to vector<2x126xf32>
    %620 = vector.extract_strided_slice %617 {offsets = [0, 0], sizes = [2, 126], strides = [1, 1]} : vector<2x127xf32> to vector<2x126xf32>
    %621 = arith.subf %619, %620 : vector<2x126xf32>
    %cst_199 = arith.constant 2.000000e-02 : f32
    %622 = vector.broadcast %cst_199 : f32 to vector<2x126xf32>
    %623 = arith.mulf %622, %621 : vector<2x126xf32>
    %624 = arith.addf %618, %623 : vector<2x126xf32>
    %625 = vector.extract_strided_slice %624 {offsets = [0, 0], sizes = [2, 1], strides = [1, 1]} : vector<2x126xf32> to vector<2x1xf32>
    %626 = vector.extract_strided_slice %624 {offsets = [0, 125], sizes = [2, 1], strides = [1, 1]} : vector<2x126xf32> to vector<2x1xf32>
    %627 = tpu.concatenate %625, %624, %626 in 1 : vector<2x1xf32>, vector<2x126xf32>, vector<2x1xf32> -> vector<2x128xf32>
    %c2 = arith.constant 2 : index
    %c0_200 = arith.constant 0 : index
    %c0_201 = arith.constant 0 : index
    %628 = vector.load %arg5[%c2, %c0_200, %c0_201] : memref<8x2x128xf32, #tpu.memory_space<vmem>>, vector<1x2x128xf32>
    %629 = vector.shape_cast %628 : vector<1x2x128xf32> to vector<2x128xf32>
    %630 = vector.shape_cast %627 : vector<2x128xf32> to vector<1x2x128xf32>
    tpu.vector_store %arg5[%c2, %c0_200, %c0_201], %630 {strides = array<i32>} : memref<8x2x128xf32, #tpu.memory_space<vmem>>, vector<1x2x128xf32>,
    %631 = arith.mulf %627, %627 : vector<2x128xf32>
    %632 = arith.mulf %631, %631 : vector<2x128xf32>
    %cst_202 = arith.constant 2.38663837E-4 : f32
    %633 = vector.broadcast %cst_202 : f32 to vector<2x128xf32>
    %634 = arith.mulf %633, %632 : vector<2x128xf32>
    %cst_203 = arith.constant 0.0375597179 : f32
    %635 = vector.broadcast %cst_203 : f32 to vector<2x128xf32>
    %636 = arith.addf %634, %635 : vector<2x128xf32>
    %637 = arith.mulf %636, %632 : vector<2x128xf32>
    %cst_204 = arith.constant 2.28744245 : f32
    %638 = vector.broadcast %cst_204 : f32 to vector<2x128xf32>
    %639 = arith.addf %637, %638 : vector<2x128xf32>
    %640 = arith.mulf %639, %632 : vector<2x128xf32>
    %cst_205 = arith.constant 51.5406837 : f32
    %641 = vector.broadcast %cst_205 : f32 to vector<2x128xf32>
    %642 = arith.addf %640, %641 : vector<2x128xf32>
    %643 = arith.mulf %642, %632 : vector<2x128xf32>
    %cst_206 = arith.constant 314.814545 : f32
    %644 = vector.broadcast %cst_206 : f32 to vector<2x128xf32>
    %645 = arith.addf %643, %644 : vector<2x128xf32>
    %646 = arith.mulf %645, %632 : vector<2x128xf32>
    %cst_207 = arith.constant -483.591919 : f32
    %647 = vector.broadcast %cst_207 : f32 to vector<2x128xf32>
    %648 = arith.addf %646, %647 : vector<2x128xf32>
    %649 = arith.mulf %648, %632 : vector<2x128xf32>
    %cst_208 = arith.constant -1556.28833 : f32
    %650 = vector.broadcast %cst_208 : f32 to vector<2x128xf32>
    %651 = arith.addf %649, %650 : vector<2x128xf32>
    %652 = arith.mulf %651, %632 : vector<2x128xf32>
    %cst_209 = arith.constant 1151.78601 : f32
    %653 = vector.broadcast %cst_209 : f32 to vector<2x128xf32>
    %654 = arith.addf %652, %653 : vector<2x128xf32>
    %655 = arith.mulf %654, %632 : vector<2x128xf32>
    %cst_210 = arith.constant -211.889099 : f32
    %656 = vector.broadcast %cst_210 : f32 to vector<2x128xf32>
    %657 = arith.addf %655, %656 : vector<2x128xf32>
    %658 = arith.mulf %657, %632 : vector<2x128xf32>
    %cst_211 = arith.constant 27.3561478 : f32
    %659 = vector.broadcast %cst_211 : f32 to vector<2x128xf32>
    %660 = arith.addf %658, %659 : vector<2x128xf32>
    %661 = arith.mulf %660, %632 : vector<2x128xf32>
    %cst_212 = arith.constant -0.0258393437 : f32
    %662 = vector.broadcast %cst_212 : f32 to vector<2x128xf32>
    %663 = arith.addf %661, %662 : vector<2x128xf32>
    %cst_213 = arith.constant -5.75627419E-5 : f32
    %664 = vector.broadcast %cst_213 : f32 to vector<2x128xf32>
    %665 = arith.mulf %664, %632 : vector<2x128xf32>
    %cst_214 = arith.constant -0.0116083091 : f32
    %666 = vector.broadcast %cst_214 : f32 to vector<2x128xf32>
    %667 = arith.addf %665, %666 : vector<2x128xf32>
    %668 = arith.mulf %667, %632 : vector<2x128xf32>
    %cst_215 = arith.constant -0.894940615 : f32
    %669 = vector.broadcast %cst_215 : f32 to vector<2x128xf32>
    %670 = arith.addf %668, %669 : vector<2x128xf32>
    %671 = arith.mulf %670, %632 : vector<2x128xf32>
    %cst_216 = arith.constant -26.2009449 : f32
    %672 = vector.broadcast %cst_216 : f32 to vector<2x128xf32>
    %673 = arith.addf %671, %672 : vector<2x128xf32>
    %674 = arith.mulf %673, %632 : vector<2x128xf32>
    %cst_217 = arith.constant -236.86026 : f32
    %675 = vector.broadcast %cst_217 : f32 to vector<2x128xf32>
    %676 = arith.addf %674, %675 : vector<2x128xf32>
    %677 = arith.mulf %676, %632 : vector<2x128xf32>
    %cst_218 = arith.constant -4.83926249 : f32
    %678 = vector.broadcast %cst_218 : f32 to vector<2x128xf32>
    %679 = arith.addf %677, %678 : vector<2x128xf32>
    %680 = arith.mulf %679, %632 : vector<2x128xf32>
    %cst_219 = arith.constant 1977.21265 : f32
    %681 = vector.broadcast %cst_219 : f32 to vector<2x128xf32>
    %682 = arith.addf %680, %681 : vector<2x128xf32>
    %683 = arith.mulf %682, %632 : vector<2x128xf32>
    %cst_220 = arith.constant -1459.25879 : f32
    %684 = vector.broadcast %cst_220 : f32 to vector<2x128xf32>
    %685 = arith.addf %683, %684 : vector<2x128xf32>
    %686 = arith.mulf %685, %632 : vector<2x128xf32>
    %cst_221 = arith.constant 587.641174 : f32
    %687 = vector.broadcast %cst_221 : f32 to vector<2x128xf32>
    %688 = arith.addf %686, %687 : vector<2x128xf32>
    %689 = arith.mulf %688, %632 : vector<2x128xf32>
    %cst_222 = arith.constant -39.9095726 : f32
    %690 = vector.broadcast %cst_222 : f32 to vector<2x128xf32>
    %691 = arith.addf %689, %690 : vector<2x128xf32>
    %692 = arith.mulf %691, %632 : vector<2x128xf32>
    %cst_223 = arith.constant 1.90848863 : f32
    %693 = vector.broadcast %cst_223 : f32 to vector<2x128xf32>
    %694 = arith.addf %692, %693 : vector<2x128xf32>
    %cst_224 = arith.constant 1.29529799E-5 : f32
    %695 = vector.broadcast %cst_224 : f32 to vector<2x128xf32>
    %696 = arith.mulf %695, %632 : vector<2x128xf32>
    %cst_225 = arith.constant 0.0033810446 : f32
    %697 = vector.broadcast %cst_225 : f32 to vector<2x128xf32>
    %698 = arith.addf %696, %697 : vector<2x128xf32>
    %699 = arith.mulf %698, %632 : vector<2x128xf32>
    %cst_226 = arith.constant 0.32982558 : f32
    %700 = vector.broadcast %cst_226 : f32 to vector<2x128xf32>
    %701 = arith.addf %699, %700 : vector<2x128xf32>
    %702 = arith.mulf %701, %632 : vector<2x128xf32>
    %cst_227 = arith.constant 12.4092817 : f32
    %703 = vector.broadcast %cst_227 : f32 to vector<2x128xf32>
    %704 = arith.addf %702, %703 : vector<2x128xf32>
    %705 = arith.mulf %704, %632 : vector<2x128xf32>
    %cst_228 = arith.constant 156.850449 : f32
    %706 = vector.broadcast %cst_228 : f32 to vector<2x128xf32>
    %707 = arith.addf %705, %706 : vector<2x128xf32>
    %708 = arith.mulf %707, %632 : vector<2x128xf32>
    %cst_229 = arith.constant 269.418549 : f32
    %709 = vector.broadcast %cst_229 : f32 to vector<2x128xf32>
    %710 = arith.addf %708, %709 : vector<2x128xf32>
    %711 = arith.mulf %710, %632 : vector<2x128xf32>
    %cst_230 = arith.constant -1741.06262 : f32
    %712 = vector.broadcast %cst_230 : f32 to vector<2x128xf32>
    %713 = arith.addf %711, %712 : vector<2x128xf32>
    %714 = arith.mulf %713, %632 : vector<2x128xf32>
    %cst_231 = arith.constant 770.181335 : f32
    %715 = vector.broadcast %cst_231 : f32 to vector<2x128xf32>
    %716 = arith.addf %714, %715 : vector<2x128xf32>
    %717 = arith.mulf %716, %632 : vector<2x128xf32>
    %cst_232 = arith.constant -530.619751 : f32
    %718 = vector.broadcast %cst_232 : f32 to vector<2x128xf32>
    %719 = arith.addf %717, %718 : vector<2x128xf32>
    %720 = arith.mulf %719, %632 : vector<2x128xf32>
    %cst_233 = arith.constant 117.92482 : f32
    %721 = vector.broadcast %cst_233 : f32 to vector<2x128xf32>
    %722 = arith.addf %720, %721 : vector<2x128xf32>
    %723 = arith.mulf %722, %632 : vector<2x128xf32>
    %cst_234 = arith.constant 14.7509155 : f32
    %724 = vector.broadcast %cst_234 : f32 to vector<2x128xf32>
    %725 = arith.addf %723, %724 : vector<2x128xf32>
    %cst_235 = arith.constant -2.70502665E-6 : f32
    %726 = vector.broadcast %cst_235 : f32 to vector<2x128xf32>
    %727 = arith.mulf %726, %632 : vector<2x128xf32>
    %cst_236 = arith.constant -9.26853099E-4 : f32
    %728 = vector.broadcast %cst_236 : f32 to vector<2x128xf32>
    %729 = arith.addf %727, %728 : vector<2x128xf32>
    %730 = arith.mulf %729, %632 : vector<2x128xf32>
    %cst_237 = arith.constant -0.114605896 : f32
    %731 = vector.broadcast %cst_237 : f32 to vector<2x128xf32>
    %732 = arith.addf %730, %731 : vector<2x128xf32>
    %733 = arith.mulf %732, %632 : vector<2x128xf32>
    %cst_238 = arith.constant -5.49938726 : f32
    %734 = vector.broadcast %cst_238 : f32 to vector<2x128xf32>
    %735 = arith.addf %733, %734 : vector<2x128xf32>
    %736 = arith.mulf %735, %632 : vector<2x128xf32>
    %cst_239 = arith.constant -93.8753051 : f32
    %737 = vector.broadcast %cst_239 : f32 to vector<2x128xf32>
    %738 = arith.addf %736, %737 : vector<2x128xf32>
    %739 = arith.mulf %738, %632 : vector<2x128xf32>
    %cst_240 = arith.constant -348.02179 : f32
    %740 = vector.broadcast %cst_240 : f32 to vector<2x128xf32>
    %741 = arith.addf %739, %740 : vector<2x128xf32>
    %742 = arith.mulf %741, %632 : vector<2x128xf32>
    %cst_241 = arith.constant 1134.7428 : f32
    %743 = vector.broadcast %cst_241 : f32 to vector<2x128xf32>
    %744 = arith.addf %742, %743 : vector<2x128xf32>
    %745 = arith.mulf %744, %632 : vector<2x128xf32>
    %cst_242 = arith.constant 483.931335 : f32
    %746 = vector.broadcast %cst_242 : f32 to vector<2x128xf32>
    %747 = arith.addf %745, %746 : vector<2x128xf32>
    %748 = arith.mulf %747, %632 : vector<2x128xf32>
    %cst_243 = arith.constant -207.551819 : f32
    %749 = vector.broadcast %cst_243 : f32 to vector<2x128xf32>
    %750 = arith.addf %748, %749 : vector<2x128xf32>
    %751 = arith.mulf %750, %632 : vector<2x128xf32>
    %cst_244 = arith.constant -89.7248535 : f32
    %752 = vector.broadcast %cst_244 : f32 to vector<2x128xf32>
    %753 = arith.addf %751, %752 : vector<2x128xf32>
    %754 = arith.mulf %753, %632 : vector<2x128xf32>
    %cst_245 = arith.constant -37.9123611 : f32
    %755 = vector.broadcast %cst_245 : f32 to vector<2x128xf32>
    %756 = arith.addf %754, %755 : vector<2x128xf32>
    %757 = arith.mulf %627, %694 : vector<2x128xf32>
    %758 = arith.addf %663, %757 : vector<2x128xf32>
    %759 = arith.mulf %627, %756 : vector<2x128xf32>
    %760 = arith.addf %725, %759 : vector<2x128xf32>
    %761 = arith.mulf %631, %760 : vector<2x128xf32>
    %762 = arith.addf %758, %761 : vector<2x128xf32>
    %cst_246 = arith.constant -0.00236007245 : f32
    %763 = vector.broadcast %cst_246 : f32 to vector<2x128xf32>
    %764 = arith.mulf %763, %632 : vector<2x128xf32>
    %cst_247 = arith.constant -0.429507464 : f32
    %765 = vector.broadcast %cst_247 : f32 to vector<2x128xf32>
    %766 = arith.addf %764, %765 : vector<2x128xf32>
    %767 = arith.mulf %766, %632 : vector<2x128xf32>
    %cst_248 = arith.constant -29.533041 : f32
    %768 = vector.broadcast %cst_248 : f32 to vector<2x128xf32>
    %769 = arith.addf %767, %768 : vector<2x128xf32>
    %770 = arith.mulf %769, %632 : vector<2x128xf32>
    %cst_249 = arith.constant -759.827392 : f32
    %771 = vector.broadcast %cst_249 : f32 to vector<2x128xf32>
    %772 = arith.addf %770, %771 : vector<2x128xf32>
    %773 = arith.mulf %772, %632 : vector<2x128xf32>
    %cst_250 = arith.constant -5921.50684 : f32
    %774 = vector.broadcast %cst_250 : f32 to vector<2x128xf32>
    %775 = arith.addf %773, %774 : vector<2x128xf32>
    %776 = arith.mulf %775, %632 : vector<2x128xf32>
    %cst_251 = arith.constant -101.624512 : f32
    %777 = vector.broadcast %cst_251 : f32 to vector<2x128xf32>
    %778 = arith.addf %776, %777 : vector<2x128xf32>
    %779 = arith.mulf %778, %632 : vector<2x128xf32>
    %cst_252 = arith.constant 33612.6133 : f32
    %780 = vector.broadcast %cst_252 : f32 to vector<2x128xf32>
    %781 = arith.addf %779, %780 : vector<2x128xf32>
    %782 = arith.mulf %781, %632 : vector<2x128xf32>
    %cst_253 = arith.constant -18970.3633 : f32
    %783 = vector.broadcast %cst_253 : f32 to vector<2x128xf32>
    %784 = arith.addf %782, %783 : vector<2x128xf32>
    %785 = arith.mulf %784, %632 : vector<2x128xf32>
    %cst_254 = arith.constant 5288.77051 : f32
    %786 = vector.broadcast %cst_254 : f32 to vector<2x128xf32>
    %787 = arith.addf %785, %786 : vector<2x128xf32>
    %788 = arith.mulf %787, %632 : vector<2x128xf32>
    %cst_255 = arith.constant -199.547867 : f32
    %789 = vector.broadcast %cst_255 : f32 to vector<2x128xf32>
    %790 = arith.addf %788, %789 : vector<2x128xf32>
    %791 = arith.mulf %790, %632 : vector<2x128xf32>
    %cst_256 = arith.constant 1.90848863 : f32
    %792 = vector.broadcast %cst_256 : f32 to vector<2x128xf32>
    %793 = arith.addf %791, %792 : vector<2x128xf32>
    %cst_257 = arith.constant 5.44025155E-4 : f32
    %794 = vector.broadcast %cst_257 : f32 to vector<2x128xf32>
    %795 = arith.mulf %794, %632 : vector<2x128xf32>
    %cst_258 = arith.constant 0.128479704 : f32
    %796 = vector.broadcast %cst_258 : f32 to vector<2x128xf32>
    %797 = arith.addf %795, %796 : vector<2x128xf32>
    %798 = arith.mulf %797, %632 : vector<2x128xf32>
    %cst_259 = arith.constant 11.2140694 : f32
    %799 = vector.broadcast %cst_259 : f32 to vector<2x128xf32>
    %800 = arith.addf %798, %799 : vector<2x128xf32>
    %801 = arith.mulf %800, %632 : vector<2x128xf32>
    %cst_260 = arith.constant 372.278442 : f32
    %802 = vector.broadcast %cst_260 : f32 to vector<2x128xf32>
    %803 = arith.addf %801, %802 : vector<2x128xf32>
    %804 = arith.mulf %803, %632 : vector<2x128xf32>
    %cst_261 = arith.constant 4078.11157 : f32
    %805 = vector.broadcast %cst_261 : f32 to vector<2x128xf32>
    %806 = arith.addf %804, %805 : vector<2x128xf32>
    %807 = arith.mulf %806, %632 : vector<2x128xf32>
    %cst_262 = arith.constant 5927.20849 : f32
    %808 = vector.broadcast %cst_262 : f32 to vector<2x128xf32>
    %809 = arith.addf %807, %808 : vector<2x128xf32>
    %810 = arith.mulf %809, %632 : vector<2x128xf32>
    %cst_263 = arith.constant -31339.127 : f32
    %811 = vector.broadcast %cst_263 : f32 to vector<2x128xf32>
    %812 = arith.addf %810, %811 : vector<2x128xf32>
    %813 = arith.mulf %812, %632 : vector<2x128xf32>
    %cst_264 = arith.constant 10782.5391 : f32
    %814 = vector.broadcast %cst_264 : f32 to vector<2x128xf32>
    %815 = arith.addf %813, %814 : vector<2x128xf32>
    %816 = arith.mulf %815, %632 : vector<2x128xf32>
    %cst_265 = arith.constant -5306.19775 : f32
    %817 = vector.broadcast %cst_265 : f32 to vector<2x128xf32>
    %818 = arith.addf %816, %817 : vector<2x128xf32>
    %819 = arith.mulf %818, %632 : vector<2x128xf32>
    %cst_266 = arith.constant 707.548889 : f32
    %820 = vector.broadcast %cst_266 : f32 to vector<2x128xf32>
    %821 = arith.addf %819, %820 : vector<2x128xf32>
    %822 = arith.mulf %821, %632 : vector<2x128xf32>
    %cst_267 = arith.constant 29.5018311 : f32
    %823 = vector.broadcast %cst_267 : f32 to vector<2x128xf32>
    %824 = arith.addf %822, %823 : vector<2x128xf32>
    %cst_268 = arith.constant -1.16316143E-4 : f32
    %825 = vector.broadcast %cst_268 : f32 to vector<2x128xf32>
    %826 = arith.mulf %825, %632 : vector<2x128xf32>
    %cst_269 = arith.constant -0.0361472704 : f32
    %827 = vector.broadcast %cst_269 : f32 to vector<2x128xf32>
    %828 = arith.addf %826, %827 : vector<2x128xf32>
    %829 = arith.mulf %828, %632 : vector<2x128xf32>
    %cst_270 = arith.constant -4.01120615 : f32
    %830 = vector.broadcast %cst_270 : f32 to vector<2x128xf32>
    %831 = arith.addf %829, %830 : vector<2x128xf32>
    %832 = arith.mulf %831, %632 : vector<2x128xf32>
    %cst_271 = arith.constant -1.704810e+02 : f32
    %833 = vector.broadcast %cst_271 : f32 to vector<2x128xf32>
    %834 = arith.addf %832, %833 : vector<2x128xf32>
    %835 = arith.mulf %834, %632 : vector<2x128xf32>
    %cst_272 = arith.constant -2534.6333 : f32
    %836 = vector.broadcast %cst_272 : f32 to vector<2x128xf32>
    %837 = arith.addf %835, %836 : vector<2x128xf32>
    %838 = arith.mulf %837, %632 : vector<2x128xf32>
    %cst_273 = arith.constant -8004.50146 : f32
    %839 = vector.broadcast %cst_273 : f32 to vector<2x128xf32>
    %840 = arith.addf %838, %839 : vector<2x128xf32>
    %841 = arith.mulf %840, %632 : vector<2x128xf32>
    %cst_274 = arith.constant 21560.1133 : f32
    %842 = vector.broadcast %cst_274 : f32 to vector<2x128xf32>
    %843 = arith.addf %841, %842 : vector<2x128xf32>
    %844 = arith.mulf %843, %632 : vector<2x128xf32>
    %cst_275 = arith.constant 7258.96972 : f32
    %845 = vector.broadcast %cst_275 : f32 to vector<2x128xf32>
    %846 = arith.addf %844, %845 : vector<2x128xf32>
    %847 = arith.mulf %846, %632 : vector<2x128xf32>
    %cst_276 = arith.constant -2.283070e+03 : f32
    %848 = vector.broadcast %cst_276 : f32 to vector<2x128xf32>
    %849 = arith.addf %847, %848 : vector<2x128xf32>
    %850 = arith.mulf %849, %632 : vector<2x128xf32>
    %cst_277 = arith.constant -628.073974 : f32
    %851 = vector.broadcast %cst_277 : f32 to vector<2x128xf32>
    %852 = arith.addf %850, %851 : vector<2x128xf32>
    %853 = arith.mulf %852, %632 : vector<2x128xf32>
    %cst_278 = arith.constant -113.737083 : f32
    %854 = vector.broadcast %cst_278 : f32 to vector<2x128xf32>
    %855 = arith.addf %853, %854 : vector<2x128xf32>
    %cst_279 = arith.constant 0.00954655371 : f32
    %856 = vector.broadcast %cst_279 : f32 to vector<2x128xf32>
    %857 = arith.mulf %856, %632 : vector<2x128xf32>
    %cst_280 = arith.constant 1.35214984 : f32
    %858 = vector.broadcast %cst_280 : f32 to vector<2x128xf32>
    %859 = arith.addf %857, %858 : vector<2x128xf32>
    %860 = arith.mulf %859, %632 : vector<2x128xf32>
    %cst_281 = arith.constant 73.1981583 : f32
    %861 = vector.broadcast %cst_281 : f32 to vector<2x128xf32>
    %862 = arith.addf %860, %861 : vector<2x128xf32>
    %863 = arith.mulf %862, %632 : vector<2x128xf32>
    %cst_282 = arith.constant 1443.13916 : f32
    %864 = vector.broadcast %cst_282 : f32 to vector<2x128xf32>
    %865 = arith.addf %863, %864 : vector<2x128xf32>
    %866 = arith.mulf %865, %632 : vector<2x128xf32>
    %cst_283 = arith.constant 7555.54931 : f32
    %867 = vector.broadcast %cst_283 : f32 to vector<2x128xf32>
    %868 = arith.addf %866, %867 : vector<2x128xf32>
    %869 = arith.mulf %868, %632 : vector<2x128xf32>
    %cst_284 = arith.constant -9671.83789 : f32
    %870 = vector.broadcast %cst_284 : f32 to vector<2x128xf32>
    %871 = arith.addf %869, %870 : vector<2x128xf32>
    %872 = arith.mulf %871, %632 : vector<2x128xf32>
    %cst_285 = arith.constant -24900.6133 : f32
    %873 = vector.broadcast %cst_285 : f32 to vector<2x128xf32>
    %874 = arith.addf %872, %873 : vector<2x128xf32>
    %875 = arith.mulf %874, %632 : vector<2x128xf32>
    %cst_286 = arith.constant 13821.4326 : f32
    %876 = vector.broadcast %cst_286 : f32 to vector<2x128xf32>
    %877 = arith.addf %875, %876 : vector<2x128xf32>
    %878 = arith.mulf %877, %632 : vector<2x128xf32>
    %cst_287 = arith.constant -1695.11279 : f32
    %879 = vector.broadcast %cst_287 : f32 to vector<2x128xf32>
    %880 = arith.addf %878, %879 : vector<2x128xf32>
    %881 = arith.mulf %880, %632 : vector<2x128xf32>
    %cst_288 = arith.constant 109.424591 : f32
    %882 = vector.broadcast %cst_288 : f32 to vector<2x128xf32>
    %883 = arith.addf %881, %882 : vector<2x128xf32>
    %884 = arith.mulf %627, %824 : vector<2x128xf32>
    %885 = arith.addf %793, %884 : vector<2x128xf32>
    %886 = arith.mulf %627, %883 : vector<2x128xf32>
    %887 = arith.addf %855, %886 : vector<2x128xf32>
    %888 = arith.mulf %631, %887 : vector<2x128xf32>
    %889 = arith.addf %885, %888 : vector<2x128xf32>
    %890 = math.absf %889 : vector<2x128xf32>
    %891 = vector.extract_strided_slice %890 {offsets = [0, 0], sizes = [2, 127], strides = [1, 1]} : vector<2x128xf32> to vector<2x127xf32>
    %892 = vector.extract_strided_slice %890 {offsets = [0, 1], sizes = [2, 127], strides = [1, 1]} : vector<2x128xf32> to vector<2x127xf32>
    %893 = arith.maximumf %891, %892 : vector<2x127xf32>
    %894 = vector.extract_strided_slice %762 {offsets = [0, 0], sizes = [2, 127], strides = [1, 1]} : vector<2x128xf32> to vector<2x127xf32>
    %895 = vector.extract_strided_slice %762 {offsets = [0, 1], sizes = [2, 127], strides = [1, 1]} : vector<2x128xf32> to vector<2x127xf32>
    %896 = arith.addf %894, %895 : vector<2x127xf32>
    %cst_289 = arith.constant 5.000000e-01 : f32
    %897 = vector.broadcast %cst_289 : f32 to vector<2x127xf32>
    %898 = arith.mulf %897, %896 : vector<2x127xf32>
    %cst_290 = arith.constant 5.000000e-01 : f32
    %899 = vector.broadcast %cst_290 : f32 to vector<2x127xf32>
    %900 = arith.mulf %899, %893 : vector<2x127xf32>
    %901 = vector.extract_strided_slice %627 {offsets = [0, 1], sizes = [2, 127], strides = [1, 1]} : vector<2x128xf32> to vector<2x127xf32>
    %902 = vector.extract_strided_slice %627 {offsets = [0, 0], sizes = [2, 127], strides = [1, 1]} : vector<2x128xf32> to vector<2x127xf32>
    %903 = arith.subf %901, %902 : vector<2x127xf32>
    %904 = arith.mulf %900, %903 : vector<2x127xf32>
    %905 = arith.subf %898, %904 : vector<2x127xf32>
    %906 = vector.shape_cast %627 : vector<2x128xf32> to vector<2x1x128xf32>
    %907 = vector.shape_cast %3 : vector<2x63xf32> to vector<2x63x1xf32>
    %908 = vector.broadcast %906 : vector<2x1x128xf32> to vector<2x63x128xf32>
    %909 = vector.broadcast %907 : vector<2x63x1xf32> to vector<2x63x128xf32>
    %910 = arith.subf %908, %909 : vector<2x63x128xf32>
    %cst_291 = arith.constant 0.000000e+00 : f32
    %911 = vector.broadcast %cst_291 : f32 to vector<2x63x128xf32>
    %912 = arith.maximumf %910, %911 : vector<2x63x128xf32>
    %913 = vector.shape_cast %4 : vector<2x63xf32> to vector<2x63x1xf32>
    %914 = vector.broadcast %913 : vector<2x63x1xf32> to vector<2x63x128xf32>
    %915 = arith.mulf %914, %912 : vector<2x63x128xf32>
    %cst_292 = arith.constant dense<0.000000e+00> : vector<2x128xf32>
    %916 = vector.multi_reduction <add>, %915, %cst_292 [1] : vector<2x63x128xf32> to vector<2x128xf32>
    %917 = vector.broadcast %5 : vector<2x1xf32> to vector<2x128xf32>
    %918 = arith.mulf %917, %627 : vector<2x128xf32>
    %919 = vector.broadcast %6 : vector<2x1xf32> to vector<2x128xf32>
    %920 = arith.subf %918, %919 : vector<2x128xf32>
    %921 = arith.addf %920, %916 : vector<2x128xf32>
    %922 = vector.extract_strided_slice %921 {offsets = [0, 1], sizes = [2, 127], strides = [1, 1]} : vector<2x128xf32> to vector<2x127xf32>
    %923 = vector.extract_strided_slice %921 {offsets = [0, 0], sizes = [2, 127], strides = [1, 1]} : vector<2x128xf32> to vector<2x127xf32>
    %924 = arith.subf %922, %923 : vector<2x127xf32>
    %cst_293 = arith.constant 2.000000e+01 : f32
    %925 = vector.broadcast %cst_293 : f32 to vector<2x127xf32>
    %926 = arith.mulf %924, %925 : vector<2x127xf32>
    %927 = arith.subf %926, %905 : vector<2x127xf32>
    %928 = vector.extract_strided_slice %627 {offsets = [0, 1], sizes = [2, 126], strides = [1, 1]} : vector<2x128xf32> to vector<2x126xf32>
    %929 = vector.extract_strided_slice %927 {offsets = [0, 1], sizes = [2, 126], strides = [1, 1]} : vector<2x127xf32> to vector<2x126xf32>
    %930 = vector.extract_strided_slice %927 {offsets = [0, 0], sizes = [2, 126], strides = [1, 1]} : vector<2x127xf32> to vector<2x126xf32>
    %931 = arith.subf %929, %930 : vector<2x126xf32>
    %cst_294 = arith.constant 2.000000e-02 : f32
    %932 = vector.broadcast %cst_294 : f32 to vector<2x126xf32>
    %933 = arith.mulf %932, %931 : vector<2x126xf32>
    %934 = arith.addf %928, %933 : vector<2x126xf32>
    %935 = vector.extract_strided_slice %934 {offsets = [0, 0], sizes = [2, 1], strides = [1, 1]} : vector<2x126xf32> to vector<2x1xf32>
    %936 = vector.extract_strided_slice %934 {offsets = [0, 125], sizes = [2, 1], strides = [1, 1]} : vector<2x126xf32> to vector<2x1xf32>
    %937 = tpu.concatenate %935, %934, %936 in 1 : vector<2x1xf32>, vector<2x126xf32>, vector<2x1xf32> -> vector<2x128xf32>
    %c3 = arith.constant 3 : index
    %c0_295 = arith.constant 0 : index
    %c0_296 = arith.constant 0 : index
    %938 = vector.load %arg5[%c3, %c0_295, %c0_296] : memref<8x2x128xf32, #tpu.memory_space<vmem>>, vector<1x2x128xf32>
    %939 = vector.shape_cast %938 : vector<1x2x128xf32> to vector<2x128xf32>
    %940 = vector.shape_cast %937 : vector<2x128xf32> to vector<1x2x128xf32>
    tpu.vector_store %arg5[%c3, %c0_295, %c0_296], %940 {strides = array<i32>} : memref<8x2x128xf32, #tpu.memory_space<vmem>>, vector<1x2x128xf32>,
    %941 = arith.mulf %937, %937 : vector<2x128xf32>
    %942 = arith.mulf %941, %941 : vector<2x128xf32>
    %cst_297 = arith.constant 2.38663837E-4 : f32
    %943 = vector.broadcast %cst_297 : f32 to vector<2x128xf32>
    %944 = arith.mulf %943, %942 : vector<2x128xf32>
    %cst_298 = arith.constant 0.0375597179 : f32
    %945 = vector.broadcast %cst_298 : f32 to vector<2x128xf32>
    %946 = arith.addf %944, %945 : vector<2x128xf32>
    %947 = arith.mulf %946, %942 : vector<2x128xf32>
    %cst_299 = arith.constant 2.28744245 : f32
    %948 = vector.broadcast %cst_299 : f32 to vector<2x128xf32>
    %949 = arith.addf %947, %948 : vector<2x128xf32>
    %950 = arith.mulf %949, %942 : vector<2x128xf32>
    %cst_300 = arith.constant 51.5406837 : f32
    %951 = vector.broadcast %cst_300 : f32 to vector<2x128xf32>
    %952 = arith.addf %950, %951 : vector<2x128xf32>
    %953 = arith.mulf %952, %942 : vector<2x128xf32>
    %cst_301 = arith.constant 314.814545 : f32
    %954 = vector.broadcast %cst_301 : f32 to vector<2x128xf32>
    %955 = arith.addf %953, %954 : vector<2x128xf32>
    %956 = arith.mulf %955, %942 : vector<2x128xf32>
    %cst_302 = arith.constant -483.591919 : f32
    %957 = vector.broadcast %cst_302 : f32 to vector<2x128xf32>
    %958 = arith.addf %956, %957 : vector<2x128xf32>
    %959 = arith.mulf %958, %942 : vector<2x128xf32>
    %cst_303 = arith.constant -1556.28833 : f32
    %960 = vector.broadcast %cst_303 : f32 to vector<2x128xf32>
    %961 = arith.addf %959, %960 : vector<2x128xf32>
    %962 = arith.mulf %961, %942 : vector<2x128xf32>
    %cst_304 = arith.constant 1151.78601 : f32
    %963 = vector.broadcast %cst_304 : f32 to vector<2x128xf32>
    %964 = arith.addf %962, %963 : vector<2x128xf32>
    %965 = arith.mulf %964, %942 : vector<2x128xf32>
    %cst_305 = arith.constant -211.889099 : f32
    %966 = vector.broadcast %cst_305 : f32 to vector<2x128xf32>
    %967 = arith.addf %965, %966 : vector<2x128xf32>
    %968 = arith.mulf %967, %942 : vector<2x128xf32>
    %cst_306 = arith.constant 27.3561478 : f32
    %969 = vector.broadcast %cst_306 : f32 to vector<2x128xf32>
    %970 = arith.addf %968, %969 : vector<2x128xf32>
    %971 = arith.mulf %970, %942 : vector<2x128xf32>
    %cst_307 = arith.constant -0.0258393437 : f32
    %972 = vector.broadcast %cst_307 : f32 to vector<2x128xf32>
    %973 = arith.addf %971, %972 : vector<2x128xf32>
    %cst_308 = arith.constant -5.75627419E-5 : f32
    %974 = vector.broadcast %cst_308 : f32 to vector<2x128xf32>
    %975 = arith.mulf %974, %942 : vector<2x128xf32>
    %cst_309 = arith.constant -0.0116083091 : f32
    %976 = vector.broadcast %cst_309 : f32 to vector<2x128xf32>
    %977 = arith.addf %975, %976 : vector<2x128xf32>
    %978 = arith.mulf %977, %942 : vector<2x128xf32>
    %cst_310 = arith.constant -0.894940615 : f32
    %979 = vector.broadcast %cst_310 : f32 to vector<2x128xf32>
    %980 = arith.addf %978, %979 : vector<2x128xf32>
    %981 = arith.mulf %980, %942 : vector<2x128xf32>
    %cst_311 = arith.constant -26.2009449 : f32
    %982 = vector.broadcast %cst_311 : f32 to vector<2x128xf32>
    %983 = arith.addf %981, %982 : vector<2x128xf32>
    %984 = arith.mulf %983, %942 : vector<2x128xf32>
    %cst_312 = arith.constant -236.86026 : f32
    %985 = vector.broadcast %cst_312 : f32 to vector<2x128xf32>
    %986 = arith.addf %984, %985 : vector<2x128xf32>
    %987 = arith.mulf %986, %942 : vector<2x128xf32>
    %cst_313 = arith.constant -4.83926249 : f32
    %988 = vector.broadcast %cst_313 : f32 to vector<2x128xf32>
    %989 = arith.addf %987, %988 : vector<2x128xf32>
    %990 = arith.mulf %989, %942 : vector<2x128xf32>
    %cst_314 = arith.constant 1977.21265 : f32
    %991 = vector.broadcast %cst_314 : f32 to vector<2x128xf32>
    %992 = arith.addf %990, %991 : vector<2x128xf32>
    %993 = arith.mulf %992, %942 : vector<2x128xf32>
    %cst_315 = arith.constant -1459.25879 : f32
    %994 = vector.broadcast %cst_315 : f32 to vector<2x128xf32>
    %995 = arith.addf %993, %994 : vector<2x128xf32>
    %996 = arith.mulf %995, %942 : vector<2x128xf32>
    %cst_316 = arith.constant 587.641174 : f32
    %997 = vector.broadcast %cst_316 : f32 to vector<2x128xf32>
    %998 = arith.addf %996, %997 : vector<2x128xf32>
    %999 = arith.mulf %998, %942 : vector<2x128xf32>
    %cst_317 = arith.constant -39.9095726 : f32
    %1000 = vector.broadcast %cst_317 : f32 to vector<2x128xf32>
    %1001 = arith.addf %999, %1000 : vector<2x128xf32>
    %1002 = arith.mulf %1001, %942 : vector<2x128xf32>
    %cst_318 = arith.constant 1.90848863 : f32
    %1003 = vector.broadcast %cst_318 : f32 to vector<2x128xf32>
    %1004 = arith.addf %1002, %1003 : vector<2x128xf32>
    %cst_319 = arith.constant 1.29529799E-5 : f32
    %1005 = vector.broadcast %cst_319 : f32 to vector<2x128xf32>
    %1006 = arith.mulf %1005, %942 : vector<2x128xf32>
    %cst_320 = arith.constant 0.0033810446 : f32
    %1007 = vector.broadcast %cst_320 : f32 to vector<2x128xf32>
    %1008 = arith.addf %1006, %1007 : vector<2x128xf32>
    %1009 = arith.mulf %1008, %942 : vector<2x128xf32>
    %cst_321 = arith.constant 0.32982558 : f32
    %1010 = vector.broadcast %cst_321 : f32 to vector<2x128xf32>
    %1011 = arith.addf %1009, %1010 : vector<2x128xf32>
    %1012 = arith.mulf %1011, %942 : vector<2x128xf32>
    %cst_322 = arith.constant 12.4092817 : f32
    %1013 = vector.broadcast %cst_322 : f32 to vector<2x128xf32>
    %1014 = arith.addf %1012, %1013 : vector<2x128xf32>
    %1015 = arith.mulf %1014, %942 : vector<2x128xf32>
    %cst_323 = arith.constant 156.850449 : f32
    %1016 = vector.broadcast %cst_323 : f32 to vector<2x128xf32>
    %1017 = arith.addf %1015, %1016 : vector<2x128xf32>
    %1018 = arith.mulf %1017, %942 : vector<2x128xf32>
    %cst_324 = arith.constant 269.418549 : f32
    %1019 = vector.broadcast %cst_324 : f32 to vector<2x128xf32>
    %1020 = arith.addf %1018, %1019 : vector<2x128xf32>
    %1021 = arith.mulf %1020, %942 : vector<2x128xf32>
    %cst_325 = arith.constant -1741.06262 : f32
    %1022 = vector.broadcast %cst_325 : f32 to vector<2x128xf32>
    %1023 = arith.addf %1021, %1022 : vector<2x128xf32>
    %1024 = arith.mulf %1023, %942 : vector<2x128xf32>
    %cst_326 = arith.constant 770.181335 : f32
    %1025 = vector.broadcast %cst_326 : f32 to vector<2x128xf32>
    %1026 = arith.addf %1024, %1025 : vector<2x128xf32>
    %1027 = arith.mulf %1026, %942 : vector<2x128xf32>
    %cst_327 = arith.constant -530.619751 : f32
    %1028 = vector.broadcast %cst_327 : f32 to vector<2x128xf32>
    %1029 = arith.addf %1027, %1028 : vector<2x128xf32>
    %1030 = arith.mulf %1029, %942 : vector<2x128xf32>
    %cst_328 = arith.constant 117.92482 : f32
    %1031 = vector.broadcast %cst_328 : f32 to vector<2x128xf32>
    %1032 = arith.addf %1030, %1031 : vector<2x128xf32>
    %1033 = arith.mulf %1032, %942 : vector<2x128xf32>
    %cst_329 = arith.constant 14.7509155 : f32
    %1034 = vector.broadcast %cst_329 : f32 to vector<2x128xf32>
    %1035 = arith.addf %1033, %1034 : vector<2x128xf32>
    %cst_330 = arith.constant -2.70502665E-6 : f32
    %1036 = vector.broadcast %cst_330 : f32 to vector<2x128xf32>
    %1037 = arith.mulf %1036, %942 : vector<2x128xf32>
    %cst_331 = arith.constant -9.26853099E-4 : f32
    %1038 = vector.broadcast %cst_331 : f32 to vector<2x128xf32>
    %1039 = arith.addf %1037, %1038 : vector<2x128xf32>
    %1040 = arith.mulf %1039, %942 : vector<2x128xf32>
    %cst_332 = arith.constant -0.114605896 : f32
    %1041 = vector.broadcast %cst_332 : f32 to vector<2x128xf32>
    %1042 = arith.addf %1040, %1041 : vector<2x128xf32>
    %1043 = arith.mulf %1042, %942 : vector<2x128xf32>
    %cst_333 = arith.constant -5.49938726 : f32
    %1044 = vector.broadcast %cst_333 : f32 to vector<2x128xf32>
    %1045 = arith.addf %1043, %1044 : vector<2x128xf32>
    %1046 = arith.mulf %1045, %942 : vector<2x128xf32>
    %cst_334 = arith.constant -93.8753051 : f32
    %1047 = vector.broadcast %cst_334 : f32 to vector<2x128xf32>
    %1048 = arith.addf %1046, %1047 : vector<2x128xf32>
    %1049 = arith.mulf %1048, %942 : vector<2x128xf32>
    %cst_335 = arith.constant -348.02179 : f32
    %1050 = vector.broadcast %cst_335 : f32 to vector<2x128xf32>
    %1051 = arith.addf %1049, %1050 : vector<2x128xf32>
    %1052 = arith.mulf %1051, %942 : vector<2x128xf32>
    %cst_336 = arith.constant 1134.7428 : f32
    %1053 = vector.broadcast %cst_336 : f32 to vector<2x128xf32>
    %1054 = arith.addf %1052, %1053 : vector<2x128xf32>
    %1055 = arith.mulf %1054, %942 : vector<2x128xf32>
    %cst_337 = arith.constant 483.931335 : f32
    %1056 = vector.broadcast %cst_337 : f32 to vector<2x128xf32>
    %1057 = arith.addf %1055, %1056 : vector<2x128xf32>
    %1058 = arith.mulf %1057, %942 : vector<2x128xf32>
    %cst_338 = arith.constant -207.551819 : f32
    %1059 = vector.broadcast %cst_338 : f32 to vector<2x128xf32>
    %1060 = arith.addf %1058, %1059 : vector<2x128xf32>
    %1061 = arith.mulf %1060, %942 : vector<2x128xf32>
    %cst_339 = arith.constant -89.7248535 : f32
    %1062 = vector.broadcast %cst_339 : f32 to vector<2x128xf32>
    %1063 = arith.addf %1061, %1062 : vector<2x128xf32>
    %1064 = arith.mulf %1063, %942 : vector<2x128xf32>
    %cst_340 = arith.constant -37.9123611 : f32
    %1065 = vector.broadcast %cst_340 : f32 to vector<2x128xf32>
    %1066 = arith.addf %1064, %1065 : vector<2x128xf32>
    %1067 = arith.mulf %937, %1004 : vector<2x128xf32>
    %1068 = arith.addf %973, %1067 : vector<2x128xf32>
    %1069 = arith.mulf %937, %1066 : vector<2x128xf32>
    %1070 = arith.addf %1035, %1069 : vector<2x128xf32>
    %1071 = arith.mulf %941, %1070 : vector<2x128xf32>
    %1072 = arith.addf %1068, %1071 : vector<2x128xf32>
    %cst_341 = arith.constant -0.00236007245 : f32
    %1073 = vector.broadcast %cst_341 : f32 to vector<2x128xf32>
    %1074 = arith.mulf %1073, %942 : vector<2x128xf32>
    %cst_342 = arith.constant -0.429507464 : f32
    %1075 = vector.broadcast %cst_342 : f32 to vector<2x128xf32>
    %1076 = arith.addf %1074, %1075 : vector<2x128xf32>
    %1077 = arith.mulf %1076, %942 : vector<2x128xf32>
    %cst_343 = arith.constant -29.533041 : f32
    %1078 = vector.broadcast %cst_343 : f32 to vector<2x128xf32>
    %1079 = arith.addf %1077, %1078 : vector<2x128xf32>
    %1080 = arith.mulf %1079, %942 : vector<2x128xf32>
    %cst_344 = arith.constant -759.827392 : f32
    %1081 = vector.broadcast %cst_344 : f32 to vector<2x128xf32>
    %1082 = arith.addf %1080, %1081 : vector<2x128xf32>
    %1083 = arith.mulf %1082, %942 : vector<2x128xf32>
    %cst_345 = arith.constant -5921.50684 : f32
    %1084 = vector.broadcast %cst_345 : f32 to vector<2x128xf32>
    %1085 = arith.addf %1083, %1084 : vector<2x128xf32>
    %1086 = arith.mulf %1085, %942 : vector<2x128xf32>
    %cst_346 = arith.constant -101.624512 : f32
    %1087 = vector.broadcast %cst_346 : f32 to vector<2x128xf32>
    %1088 = arith.addf %1086, %1087 : vector<2x128xf32>
    %1089 = arith.mulf %1088, %942 : vector<2x128xf32>
    %cst_347 = arith.constant 33612.6133 : f32
    %1090 = vector.broadcast %cst_347 : f32 to vector<2x128xf32>
    %1091 = arith.addf %1089, %1090 : vector<2x128xf32>
    %1092 = arith.mulf %1091, %942 : vector<2x128xf32>
    %cst_348 = arith.constant -18970.3633 : f32
    %1093 = vector.broadcast %cst_348 : f32 to vector<2x128xf32>
    %1094 = arith.addf %1092, %1093 : vector<2x128xf32>
    %1095 = arith.mulf %1094, %942 : vector<2x128xf32>
    %cst_349 = arith.constant 5288.77051 : f32
    %1096 = vector.broadcast %cst_349 : f32 to vector<2x128xf32>
    %1097 = arith.addf %1095, %1096 : vector<2x128xf32>
    %1098 = arith.mulf %1097, %942 : vector<2x128xf32>
    %cst_350 = arith.constant -199.547867 : f32
    %1099 = vector.broadcast %cst_350 : f32 to vector<2x128xf32>
    %1100 = arith.addf %1098, %1099 : vector<2x128xf32>
    %1101 = arith.mulf %1100, %942 : vector<2x128xf32>
    %cst_351 = arith.constant 1.90848863 : f32
    %1102 = vector.broadcast %cst_351 : f32 to vector<2x128xf32>
    %1103 = arith.addf %1101, %1102 : vector<2x128xf32>
    %cst_352 = arith.constant 5.44025155E-4 : f32
    %1104 = vector.broadcast %cst_352 : f32 to vector<2x128xf32>
    %1105 = arith.mulf %1104, %942 : vector<2x128xf32>
    %cst_353 = arith.constant 0.128479704 : f32
    %1106 = vector.broadcast %cst_353 : f32 to vector<2x128xf32>
    %1107 = arith.addf %1105, %1106 : vector<2x128xf32>
    %1108 = arith.mulf %1107, %942 : vector<2x128xf32>
    %cst_354 = arith.constant 11.2140694 : f32
    %1109 = vector.broadcast %cst_354 : f32 to vector<2x128xf32>
    %1110 = arith.addf %1108, %1109 : vector<2x128xf32>
    %1111 = arith.mulf %1110, %942 : vector<2x128xf32>
    %cst_355 = arith.constant 372.278442 : f32
    %1112 = vector.broadcast %cst_355 : f32 to vector<2x128xf32>
    %1113 = arith.addf %1111, %1112 : vector<2x128xf32>
    %1114 = arith.mulf %1113, %942 : vector<2x128xf32>
    %cst_356 = arith.constant 4078.11157 : f32
    %1115 = vector.broadcast %cst_356 : f32 to vector<2x128xf32>
    %1116 = arith.addf %1114, %1115 : vector<2x128xf32>
    %1117 = arith.mulf %1116, %942 : vector<2x128xf32>
    %cst_357 = arith.constant 5927.20849 : f32
    %1118 = vector.broadcast %cst_357 : f32 to vector<2x128xf32>
    %1119 = arith.addf %1117, %1118 : vector<2x128xf32>
    %1120 = arith.mulf %1119, %942 : vector<2x128xf32>
    %cst_358 = arith.constant -31339.127 : f32
    %1121 = vector.broadcast %cst_358 : f32 to vector<2x128xf32>
    %1122 = arith.addf %1120, %1121 : vector<2x128xf32>
    %1123 = arith.mulf %1122, %942 : vector<2x128xf32>
    %cst_359 = arith.constant 10782.5391 : f32
    %1124 = vector.broadcast %cst_359 : f32 to vector<2x128xf32>
    %1125 = arith.addf %1123, %1124 : vector<2x128xf32>
    %1126 = arith.mulf %1125, %942 : vector<2x128xf32>
    %cst_360 = arith.constant -5306.19775 : f32
    %1127 = vector.broadcast %cst_360 : f32 to vector<2x128xf32>
    %1128 = arith.addf %1126, %1127 : vector<2x128xf32>
    %1129 = arith.mulf %1128, %942 : vector<2x128xf32>
    %cst_361 = arith.constant 707.548889 : f32
    %1130 = vector.broadcast %cst_361 : f32 to vector<2x128xf32>
    %1131 = arith.addf %1129, %1130 : vector<2x128xf32>
    %1132 = arith.mulf %1131, %942 : vector<2x128xf32>
    %cst_362 = arith.constant 29.5018311 : f32
    %1133 = vector.broadcast %cst_362 : f32 to vector<2x128xf32>
    %1134 = arith.addf %1132, %1133 : vector<2x128xf32>
    %cst_363 = arith.constant -1.16316143E-4 : f32
    %1135 = vector.broadcast %cst_363 : f32 to vector<2x128xf32>
    %1136 = arith.mulf %1135, %942 : vector<2x128xf32>
    %cst_364 = arith.constant -0.0361472704 : f32
    %1137 = vector.broadcast %cst_364 : f32 to vector<2x128xf32>
    %1138 = arith.addf %1136, %1137 : vector<2x128xf32>
    %1139 = arith.mulf %1138, %942 : vector<2x128xf32>
    %cst_365 = arith.constant -4.01120615 : f32
    %1140 = vector.broadcast %cst_365 : f32 to vector<2x128xf32>
    %1141 = arith.addf %1139, %1140 : vector<2x128xf32>
    %1142 = arith.mulf %1141, %942 : vector<2x128xf32>
    %cst_366 = arith.constant -1.704810e+02 : f32
    %1143 = vector.broadcast %cst_366 : f32 to vector<2x128xf32>
    %1144 = arith.addf %1142, %1143 : vector<2x128xf32>
    %1145 = arith.mulf %1144, %942 : vector<2x128xf32>
    %cst_367 = arith.constant -2534.6333 : f32
    %1146 = vector.broadcast %cst_367 : f32 to vector<2x128xf32>
    %1147 = arith.addf %1145, %1146 : vector<2x128xf32>
    %1148 = arith.mulf %1147, %942 : vector<2x128xf32>
    %cst_368 = arith.constant -8004.50146 : f32
    %1149 = vector.broadcast %cst_368 : f32 to vector<2x128xf32>
    %1150 = arith.addf %1148, %1149 : vector<2x128xf32>
    %1151 = arith.mulf %1150, %942 : vector<2x128xf32>
    %cst_369 = arith.constant 21560.1133 : f32
    %1152 = vector.broadcast %cst_369 : f32 to vector<2x128xf32>
    %1153 = arith.addf %1151, %1152 : vector<2x128xf32>
    %1154 = arith.mulf %1153, %942 : vector<2x128xf32>
    %cst_370 = arith.constant 7258.96972 : f32
    %1155 = vector.broadcast %cst_370 : f32 to vector<2x128xf32>
    %1156 = arith.addf %1154, %1155 : vector<2x128xf32>
    %1157 = arith.mulf %1156, %942 : vector<2x128xf32>
    %cst_371 = arith.constant -2.283070e+03 : f32
    %1158 = vector.broadcast %cst_371 : f32 to vector<2x128xf32>
    %1159 = arith.addf %1157, %1158 : vector<2x128xf32>
    %1160 = arith.mulf %1159, %942 : vector<2x128xf32>
    %cst_372 = arith.constant -628.073974 : f32
    %1161 = vector.broadcast %cst_372 : f32 to vector<2x128xf32>
    %1162 = arith.addf %1160, %1161 : vector<2x128xf32>
    %1163 = arith.mulf %1162, %942 : vector<2x128xf32>
    %cst_373 = arith.constant -113.737083 : f32
    %1164 = vector.broadcast %cst_373 : f32 to vector<2x128xf32>
    %1165 = arith.addf %1163, %1164 : vector<2x128xf32>
    %cst_374 = arith.constant 0.00954655371 : f32
    %1166 = vector.broadcast %cst_374 : f32 to vector<2x128xf32>
    %1167 = arith.mulf %1166, %942 : vector<2x128xf32>
    %cst_375 = arith.constant 1.35214984 : f32
    %1168 = vector.broadcast %cst_375 : f32 to vector<2x128xf32>
    %1169 = arith.addf %1167, %1168 : vector<2x128xf32>
    %1170 = arith.mulf %1169, %942 : vector<2x128xf32>
    %cst_376 = arith.constant 73.1981583 : f32
    %1171 = vector.broadcast %cst_376 : f32 to vector<2x128xf32>
    %1172 = arith.addf %1170, %1171 : vector<2x128xf32>
    %1173 = arith.mulf %1172, %942 : vector<2x128xf32>
    %cst_377 = arith.constant 1443.13916 : f32
    %1174 = vector.broadcast %cst_377 : f32 to vector<2x128xf32>
    %1175 = arith.addf %1173, %1174 : vector<2x128xf32>
    %1176 = arith.mulf %1175, %942 : vector<2x128xf32>
    %cst_378 = arith.constant 7555.54931 : f32
    %1177 = vector.broadcast %cst_378 : f32 to vector<2x128xf32>
    %1178 = arith.addf %1176, %1177 : vector<2x128xf32>
    %1179 = arith.mulf %1178, %942 : vector<2x128xf32>
    %cst_379 = arith.constant -9671.83789 : f32
    %1180 = vector.broadcast %cst_379 : f32 to vector<2x128xf32>
    %1181 = arith.addf %1179, %1180 : vector<2x128xf32>
    %1182 = arith.mulf %1181, %942 : vector<2x128xf32>
    %cst_380 = arith.constant -24900.6133 : f32
    %1183 = vector.broadcast %cst_380 : f32 to vector<2x128xf32>
    %1184 = arith.addf %1182, %1183 : vector<2x128xf32>
    %1185 = arith.mulf %1184, %942 : vector<2x128xf32>
    %cst_381 = arith.constant 13821.4326 : f32
    %1186 = vector.broadcast %cst_381 : f32 to vector<2x128xf32>
    %1187 = arith.addf %1185, %1186 : vector<2x128xf32>
    %1188 = arith.mulf %1187, %942 : vector<2x128xf32>
    %cst_382 = arith.constant -1695.11279 : f32
    %1189 = vector.broadcast %cst_382 : f32 to vector<2x128xf32>
    %1190 = arith.addf %1188, %1189 : vector<2x128xf32>
    %1191 = arith.mulf %1190, %942 : vector<2x128xf32>
    %cst_383 = arith.constant 109.424591 : f32
    %1192 = vector.broadcast %cst_383 : f32 to vector<2x128xf32>
    %1193 = arith.addf %1191, %1192 : vector<2x128xf32>
    %1194 = arith.mulf %937, %1134 : vector<2x128xf32>
    %1195 = arith.addf %1103, %1194 : vector<2x128xf32>
    %1196 = arith.mulf %937, %1193 : vector<2x128xf32>
    %1197 = arith.addf %1165, %1196 : vector<2x128xf32>
    %1198 = arith.mulf %941, %1197 : vector<2x128xf32>
    %1199 = arith.addf %1195, %1198 : vector<2x128xf32>
    %1200 = math.absf %1199 : vector<2x128xf32>
    %1201 = vector.extract_strided_slice %1200 {offsets = [0, 0], sizes = [2, 127], strides = [1, 1]} : vector<2x128xf32> to vector<2x127xf32>
    %1202 = vector.extract_strided_slice %1200 {offsets = [0, 1], sizes = [2, 127], strides = [1, 1]} : vector<2x128xf32> to vector<2x127xf32>
    %1203 = arith.maximumf %1201, %1202 : vector<2x127xf32>
    %1204 = vector.extract_strided_slice %1072 {offsets = [0, 0], sizes = [2, 127], strides = [1, 1]} : vector<2x128xf32> to vector<2x127xf32>
    %1205 = vector.extract_strided_slice %1072 {offsets = [0, 1], sizes = [2, 127], strides = [1, 1]} : vector<2x128xf32> to vector<2x127xf32>
    %1206 = arith.addf %1204, %1205 : vector<2x127xf32>
    %cst_384 = arith.constant 5.000000e-01 : f32
    %1207 = vector.broadcast %cst_384 : f32 to vector<2x127xf32>
    %1208 = arith.mulf %1207, %1206 : vector<2x127xf32>
    %cst_385 = arith.constant 5.000000e-01 : f32
    %1209 = vector.broadcast %cst_385 : f32 to vector<2x127xf32>
    %1210 = arith.mulf %1209, %1203 : vector<2x127xf32>
    %1211 = vector.extract_strided_slice %937 {offsets = [0, 1], sizes = [2, 127], strides = [1, 1]} : vector<2x128xf32> to vector<2x127xf32>
    %1212 = vector.extract_strided_slice %937 {offsets = [0, 0], sizes = [2, 127], strides = [1, 1]} : vector<2x128xf32> to vector<2x127xf32>
    %1213 = arith.subf %1211, %1212 : vector<2x127xf32>
    %1214 = arith.mulf %1210, %1213 : vector<2x127xf32>
    %1215 = arith.subf %1208, %1214 : vector<2x127xf32>
    %1216 = vector.shape_cast %937 : vector<2x128xf32> to vector<2x1x128xf32>
    %1217 = vector.shape_cast %3 : vector<2x63xf32> to vector<2x63x1xf32>
    %1218 = vector.broadcast %1216 : vector<2x1x128xf32> to vector<2x63x128xf32>
    %1219 = vector.broadcast %1217 : vector<2x63x1xf32> to vector<2x63x128xf32>
    %1220 = arith.subf %1218, %1219 : vector<2x63x128xf32>
    %cst_386 = arith.constant 0.000000e+00 : f32
    %1221 = vector.broadcast %cst_386 : f32 to vector<2x63x128xf32>
    %1222 = arith.maximumf %1220, %1221 : vector<2x63x128xf32>
    %1223 = vector.shape_cast %4 : vector<2x63xf32> to vector<2x63x1xf32>
    %1224 = vector.broadcast %1223 : vector<2x63x1xf32> to vector<2x63x128xf32>
    %1225 = arith.mulf %1224, %1222 : vector<2x63x128xf32>
    %cst_387 = arith.constant dense<0.000000e+00> : vector<2x128xf32>
    %1226 = vector.multi_reduction <add>, %1225, %cst_387 [1] : vector<2x63x128xf32> to vector<2x128xf32>
    %1227 = vector.broadcast %5 : vector<2x1xf32> to vector<2x128xf32>
    %1228 = arith.mulf %1227, %937 : vector<2x128xf32>
    %1229 = vector.broadcast %6 : vector<2x1xf32> to vector<2x128xf32>
    %1230 = arith.subf %1228, %1229 : vector<2x128xf32>
    %1231 = arith.addf %1230, %1226 : vector<2x128xf32>
    %1232 = vector.extract_strided_slice %1231 {offsets = [0, 1], sizes = [2, 127], strides = [1, 1]} : vector<2x128xf32> to vector<2x127xf32>
    %1233 = vector.extract_strided_slice %1231 {offsets = [0, 0], sizes = [2, 127], strides = [1, 1]} : vector<2x128xf32> to vector<2x127xf32>
    %1234 = arith.subf %1232, %1233 : vector<2x127xf32>
    %cst_388 = arith.constant 2.000000e+01 : f32
    %1235 = vector.broadcast %cst_388 : f32 to vector<2x127xf32>
    %1236 = arith.mulf %1234, %1235 : vector<2x127xf32>
    %1237 = arith.subf %1236, %1215 : vector<2x127xf32>
    %1238 = vector.extract_strided_slice %937 {offsets = [0, 1], sizes = [2, 126], strides = [1, 1]} : vector<2x128xf32> to vector<2x126xf32>
    %1239 = vector.extract_strided_slice %1237 {offsets = [0, 1], sizes = [2, 126], strides = [1, 1]} : vector<2x127xf32> to vector<2x126xf32>
    %1240 = vector.extract_strided_slice %1237 {offsets = [0, 0], sizes = [2, 126], strides = [1, 1]} : vector<2x127xf32> to vector<2x126xf32>
    %1241 = arith.subf %1239, %1240 : vector<2x126xf32>
    %cst_389 = arith.constant 2.000000e-02 : f32
    %1242 = vector.broadcast %cst_389 : f32 to vector<2x126xf32>
    %1243 = arith.mulf %1242, %1241 : vector<2x126xf32>
    %1244 = arith.addf %1238, %1243 : vector<2x126xf32>
    %1245 = vector.extract_strided_slice %1244 {offsets = [0, 0], sizes = [2, 1], strides = [1, 1]} : vector<2x126xf32> to vector<2x1xf32>
    %1246 = vector.extract_strided_slice %1244 {offsets = [0, 125], sizes = [2, 1], strides = [1, 1]} : vector<2x126xf32> to vector<2x1xf32>
    %1247 = tpu.concatenate %1245, %1244, %1246 in 1 : vector<2x1xf32>, vector<2x126xf32>, vector<2x1xf32> -> vector<2x128xf32>
    %c4 = arith.constant 4 : index
    %c0_390 = arith.constant 0 : index
    %c0_391 = arith.constant 0 : index
    %1248 = vector.load %arg5[%c4, %c0_390, %c0_391] : memref<8x2x128xf32, #tpu.memory_space<vmem>>, vector<1x2x128xf32>
    %1249 = vector.shape_cast %1248 : vector<1x2x128xf32> to vector<2x128xf32>
    %1250 = vector.shape_cast %1247 : vector<2x128xf32> to vector<1x2x128xf32>
    tpu.vector_store %arg5[%c4, %c0_390, %c0_391], %1250 {strides = array<i32>} : memref<8x2x128xf32, #tpu.memory_space<vmem>>, vector<1x2x128xf32>,
    %1251 = arith.mulf %1247, %1247 : vector<2x128xf32>
    %1252 = arith.mulf %1251, %1251 : vector<2x128xf32>
    %cst_392 = arith.constant 2.38663837E-4 : f32
    %1253 = vector.broadcast %cst_392 : f32 to vector<2x128xf32>
    %1254 = arith.mulf %1253, %1252 : vector<2x128xf32>
    %cst_393 = arith.constant 0.0375597179 : f32
    %1255 = vector.broadcast %cst_393 : f32 to vector<2x128xf32>
    %1256 = arith.addf %1254, %1255 : vector<2x128xf32>
    %1257 = arith.mulf %1256, %1252 : vector<2x128xf32>
    %cst_394 = arith.constant 2.28744245 : f32
    %1258 = vector.broadcast %cst_394 : f32 to vector<2x128xf32>
    %1259 = arith.addf %1257, %1258 : vector<2x128xf32>
    %1260 = arith.mulf %1259, %1252 : vector<2x128xf32>
    %cst_395 = arith.constant 51.5406837 : f32
    %1261 = vector.broadcast %cst_395 : f32 to vector<2x128xf32>
    %1262 = arith.addf %1260, %1261 : vector<2x128xf32>
    %1263 = arith.mulf %1262, %1252 : vector<2x128xf32>
    %cst_396 = arith.constant 314.814545 : f32
    %1264 = vector.broadcast %cst_396 : f32 to vector<2x128xf32>
    %1265 = arith.addf %1263, %1264 : vector<2x128xf32>
    %1266 = arith.mulf %1265, %1252 : vector<2x128xf32>
    %cst_397 = arith.constant -483.591919 : f32
    %1267 = vector.broadcast %cst_397 : f32 to vector<2x128xf32>
    %1268 = arith.addf %1266, %1267 : vector<2x128xf32>
    %1269 = arith.mulf %1268, %1252 : vector<2x128xf32>
    %cst_398 = arith.constant -1556.28833 : f32
    %1270 = vector.broadcast %cst_398 : f32 to vector<2x128xf32>
    %1271 = arith.addf %1269, %1270 : vector<2x128xf32>
    %1272 = arith.mulf %1271, %1252 : vector<2x128xf32>
    %cst_399 = arith.constant 1151.78601 : f32
    %1273 = vector.broadcast %cst_399 : f32 to vector<2x128xf32>
    %1274 = arith.addf %1272, %1273 : vector<2x128xf32>
    %1275 = arith.mulf %1274, %1252 : vector<2x128xf32>
    %cst_400 = arith.constant -211.889099 : f32
    %1276 = vector.broadcast %cst_400 : f32 to vector<2x128xf32>
    %1277 = arith.addf %1275, %1276 : vector<2x128xf32>
    %1278 = arith.mulf %1277, %1252 : vector<2x128xf32>
    %cst_401 = arith.constant 27.3561478 : f32
    %1279 = vector.broadcast %cst_401 : f32 to vector<2x128xf32>
    %1280 = arith.addf %1278, %1279 : vector<2x128xf32>
    %1281 = arith.mulf %1280, %1252 : vector<2x128xf32>
    %cst_402 = arith.constant -0.0258393437 : f32
    %1282 = vector.broadcast %cst_402 : f32 to vector<2x128xf32>
    %1283 = arith.addf %1281, %1282 : vector<2x128xf32>
    %cst_403 = arith.constant -5.75627419E-5 : f32
    %1284 = vector.broadcast %cst_403 : f32 to vector<2x128xf32>
    %1285 = arith.mulf %1284, %1252 : vector<2x128xf32>
    %cst_404 = arith.constant -0.0116083091 : f32
    %1286 = vector.broadcast %cst_404 : f32 to vector<2x128xf32>
    %1287 = arith.addf %1285, %1286 : vector<2x128xf32>
    %1288 = arith.mulf %1287, %1252 : vector<2x128xf32>
    %cst_405 = arith.constant -0.894940615 : f32
    %1289 = vector.broadcast %cst_405 : f32 to vector<2x128xf32>
    %1290 = arith.addf %1288, %1289 : vector<2x128xf32>
    %1291 = arith.mulf %1290, %1252 : vector<2x128xf32>
    %cst_406 = arith.constant -26.2009449 : f32
    %1292 = vector.broadcast %cst_406 : f32 to vector<2x128xf32>
    %1293 = arith.addf %1291, %1292 : vector<2x128xf32>
    %1294 = arith.mulf %1293, %1252 : vector<2x128xf32>
    %cst_407 = arith.constant -236.86026 : f32
    %1295 = vector.broadcast %cst_407 : f32 to vector<2x128xf32>
    %1296 = arith.addf %1294, %1295 : vector<2x128xf32>
    %1297 = arith.mulf %1296, %1252 : vector<2x128xf32>
    %cst_408 = arith.constant -4.83926249 : f32
    %1298 = vector.broadcast %cst_408 : f32 to vector<2x128xf32>
    %1299 = arith.addf %1297, %1298 : vector<2x128xf32>
    %1300 = arith.mulf %1299, %1252 : vector<2x128xf32>
    %cst_409 = arith.constant 1977.21265 : f32
    %1301 = vector.broadcast %cst_409 : f32 to vector<2x128xf32>
    %1302 = arith.addf %1300, %1301 : vector<2x128xf32>
    %1303 = arith.mulf %1302, %1252 : vector<2x128xf32>
    %cst_410 = arith.constant -1459.25879 : f32
    %1304 = vector.broadcast %cst_410 : f32 to vector<2x128xf32>
    %1305 = arith.addf %1303, %1304 : vector<2x128xf32>
    %1306 = arith.mulf %1305, %1252 : vector<2x128xf32>
    %cst_411 = arith.constant 587.641174 : f32
    %1307 = vector.broadcast %cst_411 : f32 to vector<2x128xf32>
    %1308 = arith.addf %1306, %1307 : vector<2x128xf32>
    %1309 = arith.mulf %1308, %1252 : vector<2x128xf32>
    %cst_412 = arith.constant -39.9095726 : f32
    %1310 = vector.broadcast %cst_412 : f32 to vector<2x128xf32>
    %1311 = arith.addf %1309, %1310 : vector<2x128xf32>
    %1312 = arith.mulf %1311, %1252 : vector<2x128xf32>
    %cst_413 = arith.constant 1.90848863 : f32
    %1313 = vector.broadcast %cst_413 : f32 to vector<2x128xf32>
    %1314 = arith.addf %1312, %1313 : vector<2x128xf32>
    %cst_414 = arith.constant 1.29529799E-5 : f32
    %1315 = vector.broadcast %cst_414 : f32 to vector<2x128xf32>
    %1316 = arith.mulf %1315, %1252 : vector<2x128xf32>
    %cst_415 = arith.constant 0.0033810446 : f32
    %1317 = vector.broadcast %cst_415 : f32 to vector<2x128xf32>
    %1318 = arith.addf %1316, %1317 : vector<2x128xf32>
    %1319 = arith.mulf %1318, %1252 : vector<2x128xf32>
    %cst_416 = arith.constant 0.32982558 : f32
    %1320 = vector.broadcast %cst_416 : f32 to vector<2x128xf32>
    %1321 = arith.addf %1319, %1320 : vector<2x128xf32>
    %1322 = arith.mulf %1321, %1252 : vector<2x128xf32>
    %cst_417 = arith.constant 12.4092817 : f32
    %1323 = vector.broadcast %cst_417 : f32 to vector<2x128xf32>
    %1324 = arith.addf %1322, %1323 : vector<2x128xf32>
    %1325 = arith.mulf %1324, %1252 : vector<2x128xf32>
    %cst_418 = arith.constant 156.850449 : f32
    %1326 = vector.broadcast %cst_418 : f32 to vector<2x128xf32>
    %1327 = arith.addf %1325, %1326 : vector<2x128xf32>
    %1328 = arith.mulf %1327, %1252 : vector<2x128xf32>
    %cst_419 = arith.constant 269.418549 : f32
    %1329 = vector.broadcast %cst_419 : f32 to vector<2x128xf32>
    %1330 = arith.addf %1328, %1329 : vector<2x128xf32>
    %1331 = arith.mulf %1330, %1252 : vector<2x128xf32>
    %cst_420 = arith.constant -1741.06262 : f32
    %1332 = vector.broadcast %cst_420 : f32 to vector<2x128xf32>
    %1333 = arith.addf %1331, %1332 : vector<2x128xf32>
    %1334 = arith.mulf %1333, %1252 : vector<2x128xf32>
    %cst_421 = arith.constant 770.181335 : f32
    %1335 = vector.broadcast %cst_421 : f32 to vector<2x128xf32>
    %1336 = arith.addf %1334, %1335 : vector<2x128xf32>
    %1337 = arith.mulf %1336, %1252 : vector<2x128xf32>
    %cst_422 = arith.constant -530.619751 : f32
    %1338 = vector.broadcast %cst_422 : f32 to vector<2x128xf32>
    %1339 = arith.addf %1337, %1338 : vector<2x128xf32>
    %1340 = arith.mulf %1339, %1252 : vector<2x128xf32>
    %cst_423 = arith.constant 117.92482 : f32
    %1341 = vector.broadcast %cst_423 : f32 to vector<2x128xf32>
    %1342 = arith.addf %1340, %1341 : vector<2x128xf32>
    %1343 = arith.mulf %1342, %1252 : vector<2x128xf32>
    %cst_424 = arith.constant 14.7509155 : f32
    %1344 = vector.broadcast %cst_424 : f32 to vector<2x128xf32>
    %1345 = arith.addf %1343, %1344 : vector<2x128xf32>
    %cst_425 = arith.constant -2.70502665E-6 : f32
    %1346 = vector.broadcast %cst_425 : f32 to vector<2x128xf32>
    %1347 = arith.mulf %1346, %1252 : vector<2x128xf32>
    %cst_426 = arith.constant -9.26853099E-4 : f32
    %1348 = vector.broadcast %cst_426 : f32 to vector<2x128xf32>
    %1349 = arith.addf %1347, %1348 : vector<2x128xf32>
    %1350 = arith.mulf %1349, %1252 : vector<2x128xf32>
    %cst_427 = arith.constant -0.114605896 : f32
    %1351 = vector.broadcast %cst_427 : f32 to vector<2x128xf32>
    %1352 = arith.addf %1350, %1351 : vector<2x128xf32>
    %1353 = arith.mulf %1352, %1252 : vector<2x128xf32>
    %cst_428 = arith.constant -5.49938726 : f32
    %1354 = vector.broadcast %cst_428 : f32 to vector<2x128xf32>
    %1355 = arith.addf %1353, %1354 : vector<2x128xf32>
    %1356 = arith.mulf %1355, %1252 : vector<2x128xf32>
    %cst_429 = arith.constant -93.8753051 : f32
    %1357 = vector.broadcast %cst_429 : f32 to vector<2x128xf32>
    %1358 = arith.addf %1356, %1357 : vector<2x128xf32>
    %1359 = arith.mulf %1358, %1252 : vector<2x128xf32>
    %cst_430 = arith.constant -348.02179 : f32
    %1360 = vector.broadcast %cst_430 : f32 to vector<2x128xf32>
    %1361 = arith.addf %1359, %1360 : vector<2x128xf32>
    %1362 = arith.mulf %1361, %1252 : vector<2x128xf32>
    %cst_431 = arith.constant 1134.7428 : f32
    %1363 = vector.broadcast %cst_431 : f32 to vector<2x128xf32>
    %1364 = arith.addf %1362, %1363 : vector<2x128xf32>
    %1365 = arith.mulf %1364, %1252 : vector<2x128xf32>
    %cst_432 = arith.constant 483.931335 : f32
    %1366 = vector.broadcast %cst_432 : f32 to vector<2x128xf32>
    %1367 = arith.addf %1365, %1366 : vector<2x128xf32>
    %1368 = arith.mulf %1367, %1252 : vector<2x128xf32>
    %cst_433 = arith.constant -207.551819 : f32
    %1369 = vector.broadcast %cst_433 : f32 to vector<2x128xf32>
    %1370 = arith.addf %1368, %1369 : vector<2x128xf32>
    %1371 = arith.mulf %1370, %1252 : vector<2x128xf32>
    %cst_434 = arith.constant -89.7248535 : f32
    %1372 = vector.broadcast %cst_434 : f32 to vector<2x128xf32>
    %1373 = arith.addf %1371, %1372 : vector<2x128xf32>
    %1374 = arith.mulf %1373, %1252 : vector<2x128xf32>
    %cst_435 = arith.constant -37.9123611 : f32
    %1375 = vector.broadcast %cst_435 : f32 to vector<2x128xf32>
    %1376 = arith.addf %1374, %1375 : vector<2x128xf32>
    %1377 = arith.mulf %1247, %1314 : vector<2x128xf32>
    %1378 = arith.addf %1283, %1377 : vector<2x128xf32>
    %1379 = arith.mulf %1247, %1376 : vector<2x128xf32>
    %1380 = arith.addf %1345, %1379 : vector<2x128xf32>
    %1381 = arith.mulf %1251, %1380 : vector<2x128xf32>
    %1382 = arith.addf %1378, %1381 : vector<2x128xf32>
    %cst_436 = arith.constant -0.00236007245 : f32
    %1383 = vector.broadcast %cst_436 : f32 to vector<2x128xf32>
    %1384 = arith.mulf %1383, %1252 : vector<2x128xf32>
    %cst_437 = arith.constant -0.429507464 : f32
    %1385 = vector.broadcast %cst_437 : f32 to vector<2x128xf32>
    %1386 = arith.addf %1384, %1385 : vector<2x128xf32>
    %1387 = arith.mulf %1386, %1252 : vector<2x128xf32>
    %cst_438 = arith.constant -29.533041 : f32
    %1388 = vector.broadcast %cst_438 : f32 to vector<2x128xf32>
    %1389 = arith.addf %1387, %1388 : vector<2x128xf32>
    %1390 = arith.mulf %1389, %1252 : vector<2x128xf32>
    %cst_439 = arith.constant -759.827392 : f32
    %1391 = vector.broadcast %cst_439 : f32 to vector<2x128xf32>
    %1392 = arith.addf %1390, %1391 : vector<2x128xf32>
    %1393 = arith.mulf %1392, %1252 : vector<2x128xf32>
    %cst_440 = arith.constant -5921.50684 : f32
    %1394 = vector.broadcast %cst_440 : f32 to vector<2x128xf32>
    %1395 = arith.addf %1393, %1394 : vector<2x128xf32>
    %1396 = arith.mulf %1395, %1252 : vector<2x128xf32>
    %cst_441 = arith.constant -101.624512 : f32
    %1397 = vector.broadcast %cst_441 : f32 to vector<2x128xf32>
    %1398 = arith.addf %1396, %1397 : vector<2x128xf32>
    %1399 = arith.mulf %1398, %1252 : vector<2x128xf32>
    %cst_442 = arith.constant 33612.6133 : f32
    %1400 = vector.broadcast %cst_442 : f32 to vector<2x128xf32>
    %1401 = arith.addf %1399, %1400 : vector<2x128xf32>
    %1402 = arith.mulf %1401, %1252 : vector<2x128xf32>
    %cst_443 = arith.constant -18970.3633 : f32
    %1403 = vector.broadcast %cst_443 : f32 to vector<2x128xf32>
    %1404 = arith.addf %1402, %1403 : vector<2x128xf32>
    %1405 = arith.mulf %1404, %1252 : vector<2x128xf32>
    %cst_444 = arith.constant 5288.77051 : f32
    %1406 = vector.broadcast %cst_444 : f32 to vector<2x128xf32>
    %1407 = arith.addf %1405, %1406 : vector<2x128xf32>
    %1408 = arith.mulf %1407, %1252 : vector<2x128xf32>
    %cst_445 = arith.constant -199.547867 : f32
    %1409 = vector.broadcast %cst_445 : f32 to vector<2x128xf32>
    %1410 = arith.addf %1408, %1409 : vector<2x128xf32>
    %1411 = arith.mulf %1410, %1252 : vector<2x128xf32>
    %cst_446 = arith.constant 1.90848863 : f32
    %1412 = vector.broadcast %cst_446 : f32 to vector<2x128xf32>
    %1413 = arith.addf %1411, %1412 : vector<2x128xf32>
    %cst_447 = arith.constant 5.44025155E-4 : f32
    %1414 = vector.broadcast %cst_447 : f32 to vector<2x128xf32>
    %1415 = arith.mulf %1414, %1252 : vector<2x128xf32>
    %cst_448 = arith.constant 0.128479704 : f32
    %1416 = vector.broadcast %cst_448 : f32 to vector<2x128xf32>
    %1417 = arith.addf %1415, %1416 : vector<2x128xf32>
    %1418 = arith.mulf %1417, %1252 : vector<2x128xf32>
    %cst_449 = arith.constant 11.2140694 : f32
    %1419 = vector.broadcast %cst_449 : f32 to vector<2x128xf32>
    %1420 = arith.addf %1418, %1419 : vector<2x128xf32>
    %1421 = arith.mulf %1420, %1252 : vector<2x128xf32>
    %cst_450 = arith.constant 372.278442 : f32
    %1422 = vector.broadcast %cst_450 : f32 to vector<2x128xf32>
    %1423 = arith.addf %1421, %1422 : vector<2x128xf32>
    %1424 = arith.mulf %1423, %1252 : vector<2x128xf32>
    %cst_451 = arith.constant 4078.11157 : f32
    %1425 = vector.broadcast %cst_451 : f32 to vector<2x128xf32>
    %1426 = arith.addf %1424, %1425 : vector<2x128xf32>
    %1427 = arith.mulf %1426, %1252 : vector<2x128xf32>
    %cst_452 = arith.constant 5927.20849 : f32
    %1428 = vector.broadcast %cst_452 : f32 to vector<2x128xf32>
    %1429 = arith.addf %1427, %1428 : vector<2x128xf32>
    %1430 = arith.mulf %1429, %1252 : vector<2x128xf32>
    %cst_453 = arith.constant -31339.127 : f32
    %1431 = vector.broadcast %cst_453 : f32 to vector<2x128xf32>
    %1432 = arith.addf %1430, %1431 : vector<2x128xf32>
    %1433 = arith.mulf %1432, %1252 : vector<2x128xf32>
    %cst_454 = arith.constant 10782.5391 : f32
    %1434 = vector.broadcast %cst_454 : f32 to vector<2x128xf32>
    %1435 = arith.addf %1433, %1434 : vector<2x128xf32>
    %1436 = arith.mulf %1435, %1252 : vector<2x128xf32>
    %cst_455 = arith.constant -5306.19775 : f32
    %1437 = vector.broadcast %cst_455 : f32 to vector<2x128xf32>
    %1438 = arith.addf %1436, %1437 : vector<2x128xf32>
    %1439 = arith.mulf %1438, %1252 : vector<2x128xf32>
    %cst_456 = arith.constant 707.548889 : f32
    %1440 = vector.broadcast %cst_456 : f32 to vector<2x128xf32>
    %1441 = arith.addf %1439, %1440 : vector<2x128xf32>
    %1442 = arith.mulf %1441, %1252 : vector<2x128xf32>
    %cst_457 = arith.constant 29.5018311 : f32
    %1443 = vector.broadcast %cst_457 : f32 to vector<2x128xf32>
    %1444 = arith.addf %1442, %1443 : vector<2x128xf32>
    %cst_458 = arith.constant -1.16316143E-4 : f32
    %1445 = vector.broadcast %cst_458 : f32 to vector<2x128xf32>
    %1446 = arith.mulf %1445, %1252 : vector<2x128xf32>
    %cst_459 = arith.constant -0.0361472704 : f32
    %1447 = vector.broadcast %cst_459 : f32 to vector<2x128xf32>
    %1448 = arith.addf %1446, %1447 : vector<2x128xf32>
    %1449 = arith.mulf %1448, %1252 : vector<2x128xf32>
    %cst_460 = arith.constant -4.01120615 : f32
    %1450 = vector.broadcast %cst_460 : f32 to vector<2x128xf32>
    %1451 = arith.addf %1449, %1450 : vector<2x128xf32>
    %1452 = arith.mulf %1451, %1252 : vector<2x128xf32>
    %cst_461 = arith.constant -1.704810e+02 : f32
    %1453 = vector.broadcast %cst_461 : f32 to vector<2x128xf32>
    %1454 = arith.addf %1452, %1453 : vector<2x128xf32>
    %1455 = arith.mulf %1454, %1252 : vector<2x128xf32>
    %cst_462 = arith.constant -2534.6333 : f32
    %1456 = vector.broadcast %cst_462 : f32 to vector<2x128xf32>
    %1457 = arith.addf %1455, %1456 : vector<2x128xf32>
    %1458 = arith.mulf %1457, %1252 : vector<2x128xf32>
    %cst_463 = arith.constant -8004.50146 : f32
    %1459 = vector.broadcast %cst_463 : f32 to vector<2x128xf32>
    %1460 = arith.addf %1458, %1459 : vector<2x128xf32>
    %1461 = arith.mulf %1460, %1252 : vector<2x128xf32>
    %cst_464 = arith.constant 21560.1133 : f32
    %1462 = vector.broadcast %cst_464 : f32 to vector<2x128xf32>
    %1463 = arith.addf %1461, %1462 : vector<2x128xf32>
    %1464 = arith.mulf %1463, %1252 : vector<2x128xf32>
    %cst_465 = arith.constant 7258.96972 : f32
    %1465 = vector.broadcast %cst_465 : f32 to vector<2x128xf32>
    %1466 = arith.addf %1464, %1465 : vector<2x128xf32>
    %1467 = arith.mulf %1466, %1252 : vector<2x128xf32>
    %cst_466 = arith.constant -2.283070e+03 : f32
    %1468 = vector.broadcast %cst_466 : f32 to vector<2x128xf32>
    %1469 = arith.addf %1467, %1468 : vector<2x128xf32>
    %1470 = arith.mulf %1469, %1252 : vector<2x128xf32>
    %cst_467 = arith.constant -628.073974 : f32
    %1471 = vector.broadcast %cst_467 : f32 to vector<2x128xf32>
    %1472 = arith.addf %1470, %1471 : vector<2x128xf32>
    %1473 = arith.mulf %1472, %1252 : vector<2x128xf32>
    %cst_468 = arith.constant -113.737083 : f32
    %1474 = vector.broadcast %cst_468 : f32 to vector<2x128xf32>
    %1475 = arith.addf %1473, %1474 : vector<2x128xf32>
    %cst_469 = arith.constant 0.00954655371 : f32
    %1476 = vector.broadcast %cst_469 : f32 to vector<2x128xf32>
    %1477 = arith.mulf %1476, %1252 : vector<2x128xf32>
    %cst_470 = arith.constant 1.35214984 : f32
    %1478 = vector.broadcast %cst_470 : f32 to vector<2x128xf32>
    %1479 = arith.addf %1477, %1478 : vector<2x128xf32>
    %1480 = arith.mulf %1479, %1252 : vector<2x128xf32>
    %cst_471 = arith.constant 73.1981583 : f32
    %1481 = vector.broadcast %cst_471 : f32 to vector<2x128xf32>
    %1482 = arith.addf %1480, %1481 : vector<2x128xf32>
    %1483 = arith.mulf %1482, %1252 : vector<2x128xf32>
    %cst_472 = arith.constant 1443.13916 : f32
    %1484 = vector.broadcast %cst_472 : f32 to vector<2x128xf32>
    %1485 = arith.addf %1483, %1484 : vector<2x128xf32>
    %1486 = arith.mulf %1485, %1252 : vector<2x128xf32>
    %cst_473 = arith.constant 7555.54931 : f32
    %1487 = vector.broadcast %cst_473 : f32 to vector<2x128xf32>
    %1488 = arith.addf %1486, %1487 : vector<2x128xf32>
    %1489 = arith.mulf %1488, %1252 : vector<2x128xf32>
    %cst_474 = arith.constant -9671.83789 : f32
    %1490 = vector.broadcast %cst_474 : f32 to vector<2x128xf32>
    %1491 = arith.addf %1489, %1490 : vector<2x128xf32>
    %1492 = arith.mulf %1491, %1252 : vector<2x128xf32>
    %cst_475 = arith.constant -24900.6133 : f32
    %1493 = vector.broadcast %cst_475 : f32 to vector<2x128xf32>
    %1494 = arith.addf %1492, %1493 : vector<2x128xf32>
    %1495 = arith.mulf %1494, %1252 : vector<2x128xf32>
    %cst_476 = arith.constant 13821.4326 : f32
    %1496 = vector.broadcast %cst_476 : f32 to vector<2x128xf32>
    %1497 = arith.addf %1495, %1496 : vector<2x128xf32>
    %1498 = arith.mulf %1497, %1252 : vector<2x128xf32>
    %cst_477 = arith.constant -1695.11279 : f32
    %1499 = vector.broadcast %cst_477 : f32 to vector<2x128xf32>
    %1500 = arith.addf %1498, %1499 : vector<2x128xf32>
    %1501 = arith.mulf %1500, %1252 : vector<2x128xf32>
    %cst_478 = arith.constant 109.424591 : f32
    %1502 = vector.broadcast %cst_478 : f32 to vector<2x128xf32>
    %1503 = arith.addf %1501, %1502 : vector<2x128xf32>
    %1504 = arith.mulf %1247, %1444 : vector<2x128xf32>
    %1505 = arith.addf %1413, %1504 : vector<2x128xf32>
    %1506 = arith.mulf %1247, %1503 : vector<2x128xf32>
    %1507 = arith.addf %1475, %1506 : vector<2x128xf32>
    %1508 = arith.mulf %1251, %1507 : vector<2x128xf32>
    %1509 = arith.addf %1505, %1508 : vector<2x128xf32>
    %1510 = math.absf %1509 : vector<2x128xf32>
    %1511 = vector.extract_strided_slice %1510 {offsets = [0, 0], sizes = [2, 127], strides = [1, 1]} : vector<2x128xf32> to vector<2x127xf32>
    %1512 = vector.extract_strided_slice %1510 {offsets = [0, 1], sizes = [2, 127], strides = [1, 1]} : vector<2x128xf32> to vector<2x127xf32>
    %1513 = arith.maximumf %1511, %1512 : vector<2x127xf32>
    %1514 = vector.extract_strided_slice %1382 {offsets = [0, 0], sizes = [2, 127], strides = [1, 1]} : vector<2x128xf32> to vector<2x127xf32>
    %1515 = vector.extract_strided_slice %1382 {offsets = [0, 1], sizes = [2, 127], strides = [1, 1]} : vector<2x128xf32> to vector<2x127xf32>
    %1516 = arith.addf %1514, %1515 : vector<2x127xf32>
    %cst_479 = arith.constant 5.000000e-01 : f32
    %1517 = vector.broadcast %cst_479 : f32 to vector<2x127xf32>
    %1518 = arith.mulf %1517, %1516 : vector<2x127xf32>
    %cst_480 = arith.constant 5.000000e-01 : f32
    %1519 = vector.broadcast %cst_480 : f32 to vector<2x127xf32>
    %1520 = arith.mulf %1519, %1513 : vector<2x127xf32>
    %1521 = vector.extract_strided_slice %1247 {offsets = [0, 1], sizes = [2, 127], strides = [1, 1]} : vector<2x128xf32> to vector<2x127xf32>
    %1522 = vector.extract_strided_slice %1247 {offsets = [0, 0], sizes = [2, 127], strides = [1, 1]} : vector<2x128xf32> to vector<2x127xf32>
    %1523 = arith.subf %1521, %1522 : vector<2x127xf32>
    %1524 = arith.mulf %1520, %1523 : vector<2x127xf32>
    %1525 = arith.subf %1518, %1524 : vector<2x127xf32>
    %1526 = vector.shape_cast %1247 : vector<2x128xf32> to vector<2x1x128xf32>
    %1527 = vector.shape_cast %3 : vector<2x63xf32> to vector<2x63x1xf32>
    %1528 = vector.broadcast %1526 : vector<2x1x128xf32> to vector<2x63x128xf32>
    %1529 = vector.broadcast %1527 : vector<2x63x1xf32> to vector<2x63x128xf32>
    %1530 = arith.subf %1528, %1529 : vector<2x63x128xf32>
    %cst_481 = arith.constant 0.000000e+00 : f32
    %1531 = vector.broadcast %cst_481 : f32 to vector<2x63x128xf32>
    %1532 = arith.maximumf %1530, %1531 : vector<2x63x128xf32>
    %1533 = vector.shape_cast %4 : vector<2x63xf32> to vector<2x63x1xf32>
    %1534 = vector.broadcast %1533 : vector<2x63x1xf32> to vector<2x63x128xf32>
    %1535 = arith.mulf %1534, %1532 : vector<2x63x128xf32>
    %cst_482 = arith.constant dense<0.000000e+00> : vector<2x128xf32>
    %1536 = vector.multi_reduction <add>, %1535, %cst_482 [1] : vector<2x63x128xf32> to vector<2x128xf32>
    %1537 = vector.broadcast %5 : vector<2x1xf32> to vector<2x128xf32>
    %1538 = arith.mulf %1537, %1247 : vector<2x128xf32>
    %1539 = vector.broadcast %6 : vector<2x1xf32> to vector<2x128xf32>
    %1540 = arith.subf %1538, %1539 : vector<2x128xf32>
    %1541 = arith.addf %1540, %1536 : vector<2x128xf32>
    %1542 = vector.extract_strided_slice %1541 {offsets = [0, 1], sizes = [2, 127], strides = [1, 1]} : vector<2x128xf32> to vector<2x127xf32>
    %1543 = vector.extract_strided_slice %1541 {offsets = [0, 0], sizes = [2, 127], strides = [1, 1]} : vector<2x128xf32> to vector<2x127xf32>
    %1544 = arith.subf %1542, %1543 : vector<2x127xf32>
    %cst_483 = arith.constant 2.000000e+01 : f32
    %1545 = vector.broadcast %cst_483 : f32 to vector<2x127xf32>
    %1546 = arith.mulf %1544, %1545 : vector<2x127xf32>
    %1547 = arith.subf %1546, %1525 : vector<2x127xf32>
    %1548 = vector.extract_strided_slice %1247 {offsets = [0, 1], sizes = [2, 126], strides = [1, 1]} : vector<2x128xf32> to vector<2x126xf32>
    %1549 = vector.extract_strided_slice %1547 {offsets = [0, 1], sizes = [2, 126], strides = [1, 1]} : vector<2x127xf32> to vector<2x126xf32>
    %1550 = vector.extract_strided_slice %1547 {offsets = [0, 0], sizes = [2, 126], strides = [1, 1]} : vector<2x127xf32> to vector<2x126xf32>
    %1551 = arith.subf %1549, %1550 : vector<2x126xf32>
    %cst_484 = arith.constant 2.000000e-02 : f32
    %1552 = vector.broadcast %cst_484 : f32 to vector<2x126xf32>
    %1553 = arith.mulf %1552, %1551 : vector<2x126xf32>
    %1554 = arith.addf %1548, %1553 : vector<2x126xf32>
    %1555 = vector.extract_strided_slice %1554 {offsets = [0, 0], sizes = [2, 1], strides = [1, 1]} : vector<2x126xf32> to vector<2x1xf32>
    %1556 = vector.extract_strided_slice %1554 {offsets = [0, 125], sizes = [2, 1], strides = [1, 1]} : vector<2x126xf32> to vector<2x1xf32>
    %1557 = tpu.concatenate %1555, %1554, %1556 in 1 : vector<2x1xf32>, vector<2x126xf32>, vector<2x1xf32> -> vector<2x128xf32>
    %c5 = arith.constant 5 : index
    %c0_485 = arith.constant 0 : index
    %c0_486 = arith.constant 0 : index
    %1558 = vector.load %arg5[%c5, %c0_485, %c0_486] : memref<8x2x128xf32, #tpu.memory_space<vmem>>, vector<1x2x128xf32>
    %1559 = vector.shape_cast %1558 : vector<1x2x128xf32> to vector<2x128xf32>
    %1560 = vector.shape_cast %1557 : vector<2x128xf32> to vector<1x2x128xf32>
    tpu.vector_store %arg5[%c5, %c0_485, %c0_486], %1560 {strides = array<i32>} : memref<8x2x128xf32, #tpu.memory_space<vmem>>, vector<1x2x128xf32>,
    %1561 = arith.mulf %1557, %1557 : vector<2x128xf32>
    %1562 = arith.mulf %1561, %1561 : vector<2x128xf32>
    %cst_487 = arith.constant 2.38663837E-4 : f32
    %1563 = vector.broadcast %cst_487 : f32 to vector<2x128xf32>
    %1564 = arith.mulf %1563, %1562 : vector<2x128xf32>
    %cst_488 = arith.constant 0.0375597179 : f32
    %1565 = vector.broadcast %cst_488 : f32 to vector<2x128xf32>
    %1566 = arith.addf %1564, %1565 : vector<2x128xf32>
    %1567 = arith.mulf %1566, %1562 : vector<2x128xf32>
    %cst_489 = arith.constant 2.28744245 : f32
    %1568 = vector.broadcast %cst_489 : f32 to vector<2x128xf32>
    %1569 = arith.addf %1567, %1568 : vector<2x128xf32>
    %1570 = arith.mulf %1569, %1562 : vector<2x128xf32>
    %cst_490 = arith.constant 51.5406837 : f32
    %1571 = vector.broadcast %cst_490 : f32 to vector<2x128xf32>
    %1572 = arith.addf %1570, %1571 : vector<2x128xf32>
    %1573 = arith.mulf %1572, %1562 : vector<2x128xf32>
    %cst_491 = arith.constant 314.814545 : f32
    %1574 = vector.broadcast %cst_491 : f32 to vector<2x128xf32>
    %1575 = arith.addf %1573, %1574 : vector<2x128xf32>
    %1576 = arith.mulf %1575, %1562 : vector<2x128xf32>
    %cst_492 = arith.constant -483.591919 : f32
    %1577 = vector.broadcast %cst_492 : f32 to vector<2x128xf32>
    %1578 = arith.addf %1576, %1577 : vector<2x128xf32>
    %1579 = arith.mulf %1578, %1562 : vector<2x128xf32>
    %cst_493 = arith.constant -1556.28833 : f32
    %1580 = vector.broadcast %cst_493 : f32 to vector<2x128xf32>
    %1581 = arith.addf %1579, %1580 : vector<2x128xf32>
    %1582 = arith.mulf %1581, %1562 : vector<2x128xf32>
    %cst_494 = arith.constant 1151.78601 : f32
    %1583 = vector.broadcast %cst_494 : f32 to vector<2x128xf32>
    %1584 = arith.addf %1582, %1583 : vector<2x128xf32>
    %1585 = arith.mulf %1584, %1562 : vector<2x128xf32>
    %cst_495 = arith.constant -211.889099 : f32
    %1586 = vector.broadcast %cst_495 : f32 to vector<2x128xf32>
    %1587 = arith.addf %1585, %1586 : vector<2x128xf32>
    %1588 = arith.mulf %1587, %1562 : vector<2x128xf32>
    %cst_496 = arith.constant 27.3561478 : f32
    %1589 = vector.broadcast %cst_496 : f32 to vector<2x128xf32>
    %1590 = arith.addf %1588, %1589 : vector<2x128xf32>
    %1591 = arith.mulf %1590, %1562 : vector<2x128xf32>
    %cst_497 = arith.constant -0.0258393437 : f32
    %1592 = vector.broadcast %cst_497 : f32 to vector<2x128xf32>
    %1593 = arith.addf %1591, %1592 : vector<2x128xf32>
    %cst_498 = arith.constant -5.75627419E-5 : f32
    %1594 = vector.broadcast %cst_498 : f32 to vector<2x128xf32>
    %1595 = arith.mulf %1594, %1562 : vector<2x128xf32>
    %cst_499 = arith.constant -0.0116083091 : f32
    %1596 = vector.broadcast %cst_499 : f32 to vector<2x128xf32>
    %1597 = arith.addf %1595, %1596 : vector<2x128xf32>
    %1598 = arith.mulf %1597, %1562 : vector<2x128xf32>
    %cst_500 = arith.constant -0.894940615 : f32
    %1599 = vector.broadcast %cst_500 : f32 to vector<2x128xf32>
    %1600 = arith.addf %1598, %1599 : vector<2x128xf32>
    %1601 = arith.mulf %1600, %1562 : vector<2x128xf32>
    %cst_501 = arith.constant -26.2009449 : f32
    %1602 = vector.broadcast %cst_501 : f32 to vector<2x128xf32>
    %1603 = arith.addf %1601, %1602 : vector<2x128xf32>
    %1604 = arith.mulf %1603, %1562 : vector<2x128xf32>
    %cst_502 = arith.constant -236.86026 : f32
    %1605 = vector.broadcast %cst_502 : f32 to vector<2x128xf32>
    %1606 = arith.addf %1604, %1605 : vector<2x128xf32>
    %1607 = arith.mulf %1606, %1562 : vector<2x128xf32>
    %cst_503 = arith.constant -4.83926249 : f32
    %1608 = vector.broadcast %cst_503 : f32 to vector<2x128xf32>
    %1609 = arith.addf %1607, %1608 : vector<2x128xf32>
    %1610 = arith.mulf %1609, %1562 : vector<2x128xf32>
    %cst_504 = arith.constant 1977.21265 : f32
    %1611 = vector.broadcast %cst_504 : f32 to vector<2x128xf32>
    %1612 = arith.addf %1610, %1611 : vector<2x128xf32>
    %1613 = arith.mulf %1612, %1562 : vector<2x128xf32>
    %cst_505 = arith.constant -1459.25879 : f32
    %1614 = vector.broadcast %cst_505 : f32 to vector<2x128xf32>
    %1615 = arith.addf %1613, %1614 : vector<2x128xf32>
    %1616 = arith.mulf %1615, %1562 : vector<2x128xf32>
    %cst_506 = arith.constant 587.641174 : f32
    %1617 = vector.broadcast %cst_506 : f32 to vector<2x128xf32>
    %1618 = arith.addf %1616, %1617 : vector<2x128xf32>
    %1619 = arith.mulf %1618, %1562 : vector<2x128xf32>
    %cst_507 = arith.constant -39.9095726 : f32
    %1620 = vector.broadcast %cst_507 : f32 to vector<2x128xf32>
    %1621 = arith.addf %1619, %1620 : vector<2x128xf32>
    %1622 = arith.mulf %1621, %1562 : vector<2x128xf32>
    %cst_508 = arith.constant 1.90848863 : f32
    %1623 = vector.broadcast %cst_508 : f32 to vector<2x128xf32>
    %1624 = arith.addf %1622, %1623 : vector<2x128xf32>
    %cst_509 = arith.constant 1.29529799E-5 : f32
    %1625 = vector.broadcast %cst_509 : f32 to vector<2x128xf32>
    %1626 = arith.mulf %1625, %1562 : vector<2x128xf32>
    %cst_510 = arith.constant 0.0033810446 : f32
    %1627 = vector.broadcast %cst_510 : f32 to vector<2x128xf32>
    %1628 = arith.addf %1626, %1627 : vector<2x128xf32>
    %1629 = arith.mulf %1628, %1562 : vector<2x128xf32>
    %cst_511 = arith.constant 0.32982558 : f32
    %1630 = vector.broadcast %cst_511 : f32 to vector<2x128xf32>
    %1631 = arith.addf %1629, %1630 : vector<2x128xf32>
    %1632 = arith.mulf %1631, %1562 : vector<2x128xf32>
    %cst_512 = arith.constant 12.4092817 : f32
    %1633 = vector.broadcast %cst_512 : f32 to vector<2x128xf32>
    %1634 = arith.addf %1632, %1633 : vector<2x128xf32>
    %1635 = arith.mulf %1634, %1562 : vector<2x128xf32>
    %cst_513 = arith.constant 156.850449 : f32
    %1636 = vector.broadcast %cst_513 : f32 to vector<2x128xf32>
    %1637 = arith.addf %1635, %1636 : vector<2x128xf32>
    %1638 = arith.mulf %1637, %1562 : vector<2x128xf32>
    %cst_514 = arith.constant 269.418549 : f32
    %1639 = vector.broadcast %cst_514 : f32 to vector<2x128xf32>
    %1640 = arith.addf %1638, %1639 : vector<2x128xf32>
    %1641 = arith.mulf %1640, %1562 : vector<2x128xf32>
    %cst_515 = arith.constant -1741.06262 : f32
    %1642 = vector.broadcast %cst_515 : f32 to vector<2x128xf32>
    %1643 = arith.addf %1641, %1642 : vector<2x128xf32>
    %1644 = arith.mulf %1643, %1562 : vector<2x128xf32>
    %cst_516 = arith.constant 770.181335 : f32
    %1645 = vector.broadcast %cst_516 : f32 to vector<2x128xf32>
    %1646 = arith.addf %1644, %1645 : vector<2x128xf32>
    %1647 = arith.mulf %1646, %1562 : vector<2x128xf32>
    %cst_517 = arith.constant -530.619751 : f32
    %1648 = vector.broadcast %cst_517 : f32 to vector<2x128xf32>
    %1649 = arith.addf %1647, %1648 : vector<2x128xf32>
    %1650 = arith.mulf %1649, %1562 : vector<2x128xf32>
    %cst_518 = arith.constant 117.92482 : f32
    %1651 = vector.broadcast %cst_518 : f32 to vector<2x128xf32>
    %1652 = arith.addf %1650, %1651 : vector<2x128xf32>
    %1653 = arith.mulf %1652, %1562 : vector<2x128xf32>
    %cst_519 = arith.constant 14.7509155 : f32
    %1654 = vector.broadcast %cst_519 : f32 to vector<2x128xf32>
    %1655 = arith.addf %1653, %1654 : vector<2x128xf32>
    %cst_520 = arith.constant -2.70502665E-6 : f32
    %1656 = vector.broadcast %cst_520 : f32 to vector<2x128xf32>
    %1657 = arith.mulf %1656, %1562 : vector<2x128xf32>
    %cst_521 = arith.constant -9.26853099E-4 : f32
    %1658 = vector.broadcast %cst_521 : f32 to vector<2x128xf32>
    %1659 = arith.addf %1657, %1658 : vector<2x128xf32>
    %1660 = arith.mulf %1659, %1562 : vector<2x128xf32>
    %cst_522 = arith.constant -0.114605896 : f32
    %1661 = vector.broadcast %cst_522 : f32 to vector<2x128xf32>
    %1662 = arith.addf %1660, %1661 : vector<2x128xf32>
    %1663 = arith.mulf %1662, %1562 : vector<2x128xf32>
    %cst_523 = arith.constant -5.49938726 : f32
    %1664 = vector.broadcast %cst_523 : f32 to vector<2x128xf32>
    %1665 = arith.addf %1663, %1664 : vector<2x128xf32>
    %1666 = arith.mulf %1665, %1562 : vector<2x128xf32>
    %cst_524 = arith.constant -93.8753051 : f32
    %1667 = vector.broadcast %cst_524 : f32 to vector<2x128xf32>
    %1668 = arith.addf %1666, %1667 : vector<2x128xf32>
    %1669 = arith.mulf %1668, %1562 : vector<2x128xf32>
    %cst_525 = arith.constant -348.02179 : f32
    %1670 = vector.broadcast %cst_525 : f32 to vector<2x128xf32>
    %1671 = arith.addf %1669, %1670 : vector<2x128xf32>
    %1672 = arith.mulf %1671, %1562 : vector<2x128xf32>
    %cst_526 = arith.constant 1134.7428 : f32
    %1673 = vector.broadcast %cst_526 : f32 to vector<2x128xf32>
    %1674 = arith.addf %1672, %1673 : vector<2x128xf32>
    %1675 = arith.mulf %1674, %1562 : vector<2x128xf32>
    %cst_527 = arith.constant 483.931335 : f32
    %1676 = vector.broadcast %cst_527 : f32 to vector<2x128xf32>
    %1677 = arith.addf %1675, %1676 : vector<2x128xf32>
    %1678 = arith.mulf %1677, %1562 : vector<2x128xf32>
    %cst_528 = arith.constant -207.551819 : f32
    %1679 = vector.broadcast %cst_528 : f32 to vector<2x128xf32>
    %1680 = arith.addf %1678, %1679 : vector<2x128xf32>
    %1681 = arith.mulf %1680, %1562 : vector<2x128xf32>
    %cst_529 = arith.constant -89.7248535 : f32
    %1682 = vector.broadcast %cst_529 : f32 to vector<2x128xf32>
    %1683 = arith.addf %1681, %1682 : vector<2x128xf32>
    %1684 = arith.mulf %1683, %1562 : vector<2x128xf32>
    %cst_530 = arith.constant -37.9123611 : f32
    %1685 = vector.broadcast %cst_530 : f32 to vector<2x128xf32>
    %1686 = arith.addf %1684, %1685 : vector<2x128xf32>
    %1687 = arith.mulf %1557, %1624 : vector<2x128xf32>
    %1688 = arith.addf %1593, %1687 : vector<2x128xf32>
    %1689 = arith.mulf %1557, %1686 : vector<2x128xf32>
    %1690 = arith.addf %1655, %1689 : vector<2x128xf32>
    %1691 = arith.mulf %1561, %1690 : vector<2x128xf32>
    %1692 = arith.addf %1688, %1691 : vector<2x128xf32>
    %cst_531 = arith.constant -0.00236007245 : f32
    %1693 = vector.broadcast %cst_531 : f32 to vector<2x128xf32>
    %1694 = arith.mulf %1693, %1562 : vector<2x128xf32>
    %cst_532 = arith.constant -0.429507464 : f32
    %1695 = vector.broadcast %cst_532 : f32 to vector<2x128xf32>
    %1696 = arith.addf %1694, %1695 : vector<2x128xf32>
    %1697 = arith.mulf %1696, %1562 : vector<2x128xf32>
    %cst_533 = arith.constant -29.533041 : f32
    %1698 = vector.broadcast %cst_533 : f32 to vector<2x128xf32>
    %1699 = arith.addf %1697, %1698 : vector<2x128xf32>
    %1700 = arith.mulf %1699, %1562 : vector<2x128xf32>
    %cst_534 = arith.constant -759.827392 : f32
    %1701 = vector.broadcast %cst_534 : f32 to vector<2x128xf32>
    %1702 = arith.addf %1700, %1701 : vector<2x128xf32>
    %1703 = arith.mulf %1702, %1562 : vector<2x128xf32>
    %cst_535 = arith.constant -5921.50684 : f32
    %1704 = vector.broadcast %cst_535 : f32 to vector<2x128xf32>
    %1705 = arith.addf %1703, %1704 : vector<2x128xf32>
    %1706 = arith.mulf %1705, %1562 : vector<2x128xf32>
    %cst_536 = arith.constant -101.624512 : f32
    %1707 = vector.broadcast %cst_536 : f32 to vector<2x128xf32>
    %1708 = arith.addf %1706, %1707 : vector<2x128xf32>
    %1709 = arith.mulf %1708, %1562 : vector<2x128xf32>
    %cst_537 = arith.constant 33612.6133 : f32
    %1710 = vector.broadcast %cst_537 : f32 to vector<2x128xf32>
    %1711 = arith.addf %1709, %1710 : vector<2x128xf32>
    %1712 = arith.mulf %1711, %1562 : vector<2x128xf32>
    %cst_538 = arith.constant -18970.3633 : f32
    %1713 = vector.broadcast %cst_538 : f32 to vector<2x128xf32>
    %1714 = arith.addf %1712, %1713 : vector<2x128xf32>
    %1715 = arith.mulf %1714, %1562 : vector<2x128xf32>
    %cst_539 = arith.constant 5288.77051 : f32
    %1716 = vector.broadcast %cst_539 : f32 to vector<2x128xf32>
    %1717 = arith.addf %1715, %1716 : vector<2x128xf32>
    %1718 = arith.mulf %1717, %1562 : vector<2x128xf32>
    %cst_540 = arith.constant -199.547867 : f32
    %1719 = vector.broadcast %cst_540 : f32 to vector<2x128xf32>
    %1720 = arith.addf %1718, %1719 : vector<2x128xf32>
    %1721 = arith.mulf %1720, %1562 : vector<2x128xf32>
    %cst_541 = arith.constant 1.90848863 : f32
    %1722 = vector.broadcast %cst_541 : f32 to vector<2x128xf32>
    %1723 = arith.addf %1721, %1722 : vector<2x128xf32>
    %cst_542 = arith.constant 5.44025155E-4 : f32
    %1724 = vector.broadcast %cst_542 : f32 to vector<2x128xf32>
    %1725 = arith.mulf %1724, %1562 : vector<2x128xf32>
    %cst_543 = arith.constant 0.128479704 : f32
    %1726 = vector.broadcast %cst_543 : f32 to vector<2x128xf32>
    %1727 = arith.addf %1725, %1726 : vector<2x128xf32>
    %1728 = arith.mulf %1727, %1562 : vector<2x128xf32>
    %cst_544 = arith.constant 11.2140694 : f32
    %1729 = vector.broadcast %cst_544 : f32 to vector<2x128xf32>
    %1730 = arith.addf %1728, %1729 : vector<2x128xf32>
    %1731 = arith.mulf %1730, %1562 : vector<2x128xf32>
    %cst_545 = arith.constant 372.278442 : f32
    %1732 = vector.broadcast %cst_545 : f32 to vector<2x128xf32>
    %1733 = arith.addf %1731, %1732 : vector<2x128xf32>
    %1734 = arith.mulf %1733, %1562 : vector<2x128xf32>
    %cst_546 = arith.constant 4078.11157 : f32
    %1735 = vector.broadcast %cst_546 : f32 to vector<2x128xf32>
    %1736 = arith.addf %1734, %1735 : vector<2x128xf32>
    %1737 = arith.mulf %1736, %1562 : vector<2x128xf32>
    %cst_547 = arith.constant 5927.20849 : f32
    %1738 = vector.broadcast %cst_547 : f32 to vector<2x128xf32>
    %1739 = arith.addf %1737, %1738 : vector<2x128xf32>
    %1740 = arith.mulf %1739, %1562 : vector<2x128xf32>
    %cst_548 = arith.constant -31339.127 : f32
    %1741 = vector.broadcast %cst_548 : f32 to vector<2x128xf32>
    %1742 = arith.addf %1740, %1741 : vector<2x128xf32>
    %1743 = arith.mulf %1742, %1562 : vector<2x128xf32>
    %cst_549 = arith.constant 10782.5391 : f32
    %1744 = vector.broadcast %cst_549 : f32 to vector<2x128xf32>
    %1745 = arith.addf %1743, %1744 : vector<2x128xf32>
    %1746 = arith.mulf %1745, %1562 : vector<2x128xf32>
    %cst_550 = arith.constant -5306.19775 : f32
    %1747 = vector.broadcast %cst_550 : f32 to vector<2x128xf32>
    %1748 = arith.addf %1746, %1747 : vector<2x128xf32>
    %1749 = arith.mulf %1748, %1562 : vector<2x128xf32>
    %cst_551 = arith.constant 707.548889 : f32
    %1750 = vector.broadcast %cst_551 : f32 to vector<2x128xf32>
    %1751 = arith.addf %1749, %1750 : vector<2x128xf32>
    %1752 = arith.mulf %1751, %1562 : vector<2x128xf32>
    %cst_552 = arith.constant 29.5018311 : f32
    %1753 = vector.broadcast %cst_552 : f32 to vector<2x128xf32>
    %1754 = arith.addf %1752, %1753 : vector<2x128xf32>
    %cst_553 = arith.constant -1.16316143E-4 : f32
    %1755 = vector.broadcast %cst_553 : f32 to vector<2x128xf32>
    %1756 = arith.mulf %1755, %1562 : vector<2x128xf32>
    %cst_554 = arith.constant -0.0361472704 : f32
    %1757 = vector.broadcast %cst_554 : f32 to vector<2x128xf32>
    %1758 = arith.addf %1756, %1757 : vector<2x128xf32>
    %1759 = arith.mulf %1758, %1562 : vector<2x128xf32>
    %cst_555 = arith.constant -4.01120615 : f32
    %1760 = vector.broadcast %cst_555 : f32 to vector<2x128xf32>
    %1761 = arith.addf %1759, %1760 : vector<2x128xf32>
    %1762 = arith.mulf %1761, %1562 : vector<2x128xf32>
    %cst_556 = arith.constant -1.704810e+02 : f32
    %1763 = vector.broadcast %cst_556 : f32 to vector<2x128xf32>
    %1764 = arith.addf %1762, %1763 : vector<2x128xf32>
    %1765 = arith.mulf %1764, %1562 : vector<2x128xf32>
    %cst_557 = arith.constant -2534.6333 : f32
    %1766 = vector.broadcast %cst_557 : f32 to vector<2x128xf32>
    %1767 = arith.addf %1765, %1766 : vector<2x128xf32>
    %1768 = arith.mulf %1767, %1562 : vector<2x128xf32>
    %cst_558 = arith.constant -8004.50146 : f32
    %1769 = vector.broadcast %cst_558 : f32 to vector<2x128xf32>
    %1770 = arith.addf %1768, %1769 : vector<2x128xf32>
    %1771 = arith.mulf %1770, %1562 : vector<2x128xf32>
    %cst_559 = arith.constant 21560.1133 : f32
    %1772 = vector.broadcast %cst_559 : f32 to vector<2x128xf32>
    %1773 = arith.addf %1771, %1772 : vector<2x128xf32>
    %1774 = arith.mulf %1773, %1562 : vector<2x128xf32>
    %cst_560 = arith.constant 7258.96972 : f32
    %1775 = vector.broadcast %cst_560 : f32 to vector<2x128xf32>
    %1776 = arith.addf %1774, %1775 : vector<2x128xf32>
    %1777 = arith.mulf %1776, %1562 : vector<2x128xf32>
    %cst_561 = arith.constant -2.283070e+03 : f32
    %1778 = vector.broadcast %cst_561 : f32 to vector<2x128xf32>
    %1779 = arith.addf %1777, %1778 : vector<2x128xf32>
    %1780 = arith.mulf %1779, %1562 : vector<2x128xf32>
    %cst_562 = arith.constant -628.073974 : f32
    %1781 = vector.broadcast %cst_562 : f32 to vector<2x128xf32>
    %1782 = arith.addf %1780, %1781 : vector<2x128xf32>
    %1783 = arith.mulf %1782, %1562 : vector<2x128xf32>
    %cst_563 = arith.constant -113.737083 : f32
    %1784 = vector.broadcast %cst_563 : f32 to vector<2x128xf32>
    %1785 = arith.addf %1783, %1784 : vector<2x128xf32>
    %cst_564 = arith.constant 0.00954655371 : f32
    %1786 = vector.broadcast %cst_564 : f32 to vector<2x128xf32>
    %1787 = arith.mulf %1786, %1562 : vector<2x128xf32>
    %cst_565 = arith.constant 1.35214984 : f32
    %1788 = vector.broadcast %cst_565 : f32 to vector<2x128xf32>
    %1789 = arith.addf %1787, %1788 : vector<2x128xf32>
    %1790 = arith.mulf %1789, %1562 : vector<2x128xf32>
    %cst_566 = arith.constant 73.1981583 : f32
    %1791 = vector.broadcast %cst_566 : f32 to vector<2x128xf32>
    %1792 = arith.addf %1790, %1791 : vector<2x128xf32>
    %1793 = arith.mulf %1792, %1562 : vector<2x128xf32>
    %cst_567 = arith.constant 1443.13916 : f32
    %1794 = vector.broadcast %cst_567 : f32 to vector<2x128xf32>
    %1795 = arith.addf %1793, %1794 : vector<2x128xf32>
    %1796 = arith.mulf %1795, %1562 : vector<2x128xf32>
    %cst_568 = arith.constant 7555.54931 : f32
    %1797 = vector.broadcast %cst_568 : f32 to vector<2x128xf32>
    %1798 = arith.addf %1796, %1797 : vector<2x128xf32>
    %1799 = arith.mulf %1798, %1562 : vector<2x128xf32>
    %cst_569 = arith.constant -9671.83789 : f32
    %1800 = vector.broadcast %cst_569 : f32 to vector<2x128xf32>
    %1801 = arith.addf %1799, %1800 : vector<2x128xf32>
    %1802 = arith.mulf %1801, %1562 : vector<2x128xf32>
    %cst_570 = arith.constant -24900.6133 : f32
    %1803 = vector.broadcast %cst_570 : f32 to vector<2x128xf32>
    %1804 = arith.addf %1802, %1803 : vector<2x128xf32>
    %1805 = arith.mulf %1804, %1562 : vector<2x128xf32>
    %cst_571 = arith.constant 13821.4326 : f32
    %1806 = vector.broadcast %cst_571 : f32 to vector<2x128xf32>
    %1807 = arith.addf %1805, %1806 : vector<2x128xf32>
    %1808 = arith.mulf %1807, %1562 : vector<2x128xf32>
    %cst_572 = arith.constant -1695.11279 : f32
    %1809 = vector.broadcast %cst_572 : f32 to vector<2x128xf32>
    %1810 = arith.addf %1808, %1809 : vector<2x128xf32>
    %1811 = arith.mulf %1810, %1562 : vector<2x128xf32>
    %cst_573 = arith.constant 109.424591 : f32
    %1812 = vector.broadcast %cst_573 : f32 to vector<2x128xf32>
    %1813 = arith.addf %1811, %1812 : vector<2x128xf32>
    %1814 = arith.mulf %1557, %1754 : vector<2x128xf32>
    %1815 = arith.addf %1723, %1814 : vector<2x128xf32>
    %1816 = arith.mulf %1557, %1813 : vector<2x128xf32>
    %1817 = arith.addf %1785, %1816 : vector<2x128xf32>
    %1818 = arith.mulf %1561, %1817 : vector<2x128xf32>
    %1819 = arith.addf %1815, %1818 : vector<2x128xf32>
    %1820 = math.absf %1819 : vector<2x128xf32>
    %1821 = vector.extract_strided_slice %1820 {offsets = [0, 0], sizes = [2, 127], strides = [1, 1]} : vector<2x128xf32> to vector<2x127xf32>
    %1822 = vector.extract_strided_slice %1820 {offsets = [0, 1], sizes = [2, 127], strides = [1, 1]} : vector<2x128xf32> to vector<2x127xf32>
    %1823 = arith.maximumf %1821, %1822 : vector<2x127xf32>
    %1824 = vector.extract_strided_slice %1692 {offsets = [0, 0], sizes = [2, 127], strides = [1, 1]} : vector<2x128xf32> to vector<2x127xf32>
    %1825 = vector.extract_strided_slice %1692 {offsets = [0, 1], sizes = [2, 127], strides = [1, 1]} : vector<2x128xf32> to vector<2x127xf32>
    %1826 = arith.addf %1824, %1825 : vector<2x127xf32>
    %cst_574 = arith.constant 5.000000e-01 : f32
    %1827 = vector.broadcast %cst_574 : f32 to vector<2x127xf32>
    %1828 = arith.mulf %1827, %1826 : vector<2x127xf32>
    %cst_575 = arith.constant 5.000000e-01 : f32
    %1829 = vector.broadcast %cst_575 : f32 to vector<2x127xf32>
    %1830 = arith.mulf %1829, %1823 : vector<2x127xf32>
    %1831 = vector.extract_strided_slice %1557 {offsets = [0, 1], sizes = [2, 127], strides = [1, 1]} : vector<2x128xf32> to vector<2x127xf32>
    %1832 = vector.extract_strided_slice %1557 {offsets = [0, 0], sizes = [2, 127], strides = [1, 1]} : vector<2x128xf32> to vector<2x127xf32>
    %1833 = arith.subf %1831, %1832 : vector<2x127xf32>
    %1834 = arith.mulf %1830, %1833 : vector<2x127xf32>
    %1835 = arith.subf %1828, %1834 : vector<2x127xf32>
    %1836 = vector.shape_cast %1557 : vector<2x128xf32> to vector<2x1x128xf32>
    %1837 = vector.shape_cast %3 : vector<2x63xf32> to vector<2x63x1xf32>
    %1838 = vector.broadcast %1836 : vector<2x1x128xf32> to vector<2x63x128xf32>
    %1839 = vector.broadcast %1837 : vector<2x63x1xf32> to vector<2x63x128xf32>
    %1840 = arith.subf %1838, %1839 : vector<2x63x128xf32>
    %cst_576 = arith.constant 0.000000e+00 : f32
    %1841 = vector.broadcast %cst_576 : f32 to vector<2x63x128xf32>
    %1842 = arith.maximumf %1840, %1841 : vector<2x63x128xf32>
    %1843 = vector.shape_cast %4 : vector<2x63xf32> to vector<2x63x1xf32>
    %1844 = vector.broadcast %1843 : vector<2x63x1xf32> to vector<2x63x128xf32>
    %1845 = arith.mulf %1844, %1842 : vector<2x63x128xf32>
    %cst_577 = arith.constant dense<0.000000e+00> : vector<2x128xf32>
    %1846 = vector.multi_reduction <add>, %1845, %cst_577 [1] : vector<2x63x128xf32> to vector<2x128xf32>
    %1847 = vector.broadcast %5 : vector<2x1xf32> to vector<2x128xf32>
    %1848 = arith.mulf %1847, %1557 : vector<2x128xf32>
    %1849 = vector.broadcast %6 : vector<2x1xf32> to vector<2x128xf32>
    %1850 = arith.subf %1848, %1849 : vector<2x128xf32>
    %1851 = arith.addf %1850, %1846 : vector<2x128xf32>
    %1852 = vector.extract_strided_slice %1851 {offsets = [0, 1], sizes = [2, 127], strides = [1, 1]} : vector<2x128xf32> to vector<2x127xf32>
    %1853 = vector.extract_strided_slice %1851 {offsets = [0, 0], sizes = [2, 127], strides = [1, 1]} : vector<2x128xf32> to vector<2x127xf32>
    %1854 = arith.subf %1852, %1853 : vector<2x127xf32>
    %cst_578 = arith.constant 2.000000e+01 : f32
    %1855 = vector.broadcast %cst_578 : f32 to vector<2x127xf32>
    %1856 = arith.mulf %1854, %1855 : vector<2x127xf32>
    %1857 = arith.subf %1856, %1835 : vector<2x127xf32>
    %1858 = vector.extract_strided_slice %1557 {offsets = [0, 1], sizes = [2, 126], strides = [1, 1]} : vector<2x128xf32> to vector<2x126xf32>
    %1859 = vector.extract_strided_slice %1857 {offsets = [0, 1], sizes = [2, 126], strides = [1, 1]} : vector<2x127xf32> to vector<2x126xf32>
    %1860 = vector.extract_strided_slice %1857 {offsets = [0, 0], sizes = [2, 126], strides = [1, 1]} : vector<2x127xf32> to vector<2x126xf32>
    %1861 = arith.subf %1859, %1860 : vector<2x126xf32>
    %cst_579 = arith.constant 2.000000e-02 : f32
    %1862 = vector.broadcast %cst_579 : f32 to vector<2x126xf32>
    %1863 = arith.mulf %1862, %1861 : vector<2x126xf32>
    %1864 = arith.addf %1858, %1863 : vector<2x126xf32>
    %1865 = vector.extract_strided_slice %1864 {offsets = [0, 0], sizes = [2, 1], strides = [1, 1]} : vector<2x126xf32> to vector<2x1xf32>
    %1866 = vector.extract_strided_slice %1864 {offsets = [0, 125], sizes = [2, 1], strides = [1, 1]} : vector<2x126xf32> to vector<2x1xf32>
    %1867 = tpu.concatenate %1865, %1864, %1866 in 1 : vector<2x1xf32>, vector<2x126xf32>, vector<2x1xf32> -> vector<2x128xf32>
    %c6 = arith.constant 6 : index
    %c0_580 = arith.constant 0 : index
    %c0_581 = arith.constant 0 : index
    %1868 = vector.load %arg5[%c6, %c0_580, %c0_581] : memref<8x2x128xf32, #tpu.memory_space<vmem>>, vector<1x2x128xf32>
    %1869 = vector.shape_cast %1868 : vector<1x2x128xf32> to vector<2x128xf32>
    %1870 = vector.shape_cast %1867 : vector<2x128xf32> to vector<1x2x128xf32>
    tpu.vector_store %arg5[%c6, %c0_580, %c0_581], %1870 {strides = array<i32>} : memref<8x2x128xf32, #tpu.memory_space<vmem>>, vector<1x2x128xf32>,
    %1871 = arith.mulf %1867, %1867 : vector<2x128xf32>
    %1872 = arith.mulf %1871, %1871 : vector<2x128xf32>
    %cst_582 = arith.constant 2.38663837E-4 : f32
    %1873 = vector.broadcast %cst_582 : f32 to vector<2x128xf32>
    %1874 = arith.mulf %1873, %1872 : vector<2x128xf32>
    %cst_583 = arith.constant 0.0375597179 : f32
    %1875 = vector.broadcast %cst_583 : f32 to vector<2x128xf32>
    %1876 = arith.addf %1874, %1875 : vector<2x128xf32>
    %1877 = arith.mulf %1876, %1872 : vector<2x128xf32>
    %cst_584 = arith.constant 2.28744245 : f32
    %1878 = vector.broadcast %cst_584 : f32 to vector<2x128xf32>
    %1879 = arith.addf %1877, %1878 : vector<2x128xf32>
    %1880 = arith.mulf %1879, %1872 : vector<2x128xf32>
    %cst_585 = arith.constant 51.5406837 : f32
    %1881 = vector.broadcast %cst_585 : f32 to vector<2x128xf32>
    %1882 = arith.addf %1880, %1881 : vector<2x128xf32>
    %1883 = arith.mulf %1882, %1872 : vector<2x128xf32>
    %cst_586 = arith.constant 314.814545 : f32
    %1884 = vector.broadcast %cst_586 : f32 to vector<2x128xf32>
    %1885 = arith.addf %1883, %1884 : vector<2x128xf32>
    %1886 = arith.mulf %1885, %1872 : vector<2x128xf32>
    %cst_587 = arith.constant -483.591919 : f32
    %1887 = vector.broadcast %cst_587 : f32 to vector<2x128xf32>
    %1888 = arith.addf %1886, %1887 : vector<2x128xf32>
    %1889 = arith.mulf %1888, %1872 : vector<2x128xf32>
    %cst_588 = arith.constant -1556.28833 : f32
    %1890 = vector.broadcast %cst_588 : f32 to vector<2x128xf32>
    %1891 = arith.addf %1889, %1890 : vector<2x128xf32>
    %1892 = arith.mulf %1891, %1872 : vector<2x128xf32>
    %cst_589 = arith.constant 1151.78601 : f32
    %1893 = vector.broadcast %cst_589 : f32 to vector<2x128xf32>
    %1894 = arith.addf %1892, %1893 : vector<2x128xf32>
    %1895 = arith.mulf %1894, %1872 : vector<2x128xf32>
    %cst_590 = arith.constant -211.889099 : f32
    %1896 = vector.broadcast %cst_590 : f32 to vector<2x128xf32>
    %1897 = arith.addf %1895, %1896 : vector<2x128xf32>
    %1898 = arith.mulf %1897, %1872 : vector<2x128xf32>
    %cst_591 = arith.constant 27.3561478 : f32
    %1899 = vector.broadcast %cst_591 : f32 to vector<2x128xf32>
    %1900 = arith.addf %1898, %1899 : vector<2x128xf32>
    %1901 = arith.mulf %1900, %1872 : vector<2x128xf32>
    %cst_592 = arith.constant -0.0258393437 : f32
    %1902 = vector.broadcast %cst_592 : f32 to vector<2x128xf32>
    %1903 = arith.addf %1901, %1902 : vector<2x128xf32>
    %cst_593 = arith.constant -5.75627419E-5 : f32
    %1904 = vector.broadcast %cst_593 : f32 to vector<2x128xf32>
    %1905 = arith.mulf %1904, %1872 : vector<2x128xf32>
    %cst_594 = arith.constant -0.0116083091 : f32
    %1906 = vector.broadcast %cst_594 : f32 to vector<2x128xf32>
    %1907 = arith.addf %1905, %1906 : vector<2x128xf32>
    %1908 = arith.mulf %1907, %1872 : vector<2x128xf32>
    %cst_595 = arith.constant -0.894940615 : f32
    %1909 = vector.broadcast %cst_595 : f32 to vector<2x128xf32>
    %1910 = arith.addf %1908, %1909 : vector<2x128xf32>
    %1911 = arith.mulf %1910, %1872 : vector<2x128xf32>
    %cst_596 = arith.constant -26.2009449 : f32
    %1912 = vector.broadcast %cst_596 : f32 to vector<2x128xf32>
    %1913 = arith.addf %1911, %1912 : vector<2x128xf32>
    %1914 = arith.mulf %1913, %1872 : vector<2x128xf32>
    %cst_597 = arith.constant -236.86026 : f32
    %1915 = vector.broadcast %cst_597 : f32 to vector<2x128xf32>
    %1916 = arith.addf %1914, %1915 : vector<2x128xf32>
    %1917 = arith.mulf %1916, %1872 : vector<2x128xf32>
    %cst_598 = arith.constant -4.83926249 : f32
    %1918 = vector.broadcast %cst_598 : f32 to vector<2x128xf32>
    %1919 = arith.addf %1917, %1918 : vector<2x128xf32>
    %1920 = arith.mulf %1919, %1872 : vector<2x128xf32>
    %cst_599 = arith.constant 1977.21265 : f32
    %1921 = vector.broadcast %cst_599 : f32 to vector<2x128xf32>
    %1922 = arith.addf %1920, %1921 : vector<2x128xf32>
    %1923 = arith.mulf %1922, %1872 : vector<2x128xf32>
    %cst_600 = arith.constant -1459.25879 : f32
    %1924 = vector.broadcast %cst_600 : f32 to vector<2x128xf32>
    %1925 = arith.addf %1923, %1924 : vector<2x128xf32>
    %1926 = arith.mulf %1925, %1872 : vector<2x128xf32>
    %cst_601 = arith.constant 587.641174 : f32
    %1927 = vector.broadcast %cst_601 : f32 to vector<2x128xf32>
    %1928 = arith.addf %1926, %1927 : vector<2x128xf32>
    %1929 = arith.mulf %1928, %1872 : vector<2x128xf32>
    %cst_602 = arith.constant -39.9095726 : f32
    %1930 = vector.broadcast %cst_602 : f32 to vector<2x128xf32>
    %1931 = arith.addf %1929, %1930 : vector<2x128xf32>
    %1932 = arith.mulf %1931, %1872 : vector<2x128xf32>
    %cst_603 = arith.constant 1.90848863 : f32
    %1933 = vector.broadcast %cst_603 : f32 to vector<2x128xf32>
    %1934 = arith.addf %1932, %1933 : vector<2x128xf32>
    %cst_604 = arith.constant 1.29529799E-5 : f32
    %1935 = vector.broadcast %cst_604 : f32 to vector<2x128xf32>
    %1936 = arith.mulf %1935, %1872 : vector<2x128xf32>
    %cst_605 = arith.constant 0.0033810446 : f32
    %1937 = vector.broadcast %cst_605 : f32 to vector<2x128xf32>
    %1938 = arith.addf %1936, %1937 : vector<2x128xf32>
    %1939 = arith.mulf %1938, %1872 : vector<2x128xf32>
    %cst_606 = arith.constant 0.32982558 : f32
    %1940 = vector.broadcast %cst_606 : f32 to vector<2x128xf32>
    %1941 = arith.addf %1939, %1940 : vector<2x128xf32>
    %1942 = arith.mulf %1941, %1872 : vector<2x128xf32>
    %cst_607 = arith.constant 12.4092817 : f32
    %1943 = vector.broadcast %cst_607 : f32 to vector<2x128xf32>
    %1944 = arith.addf %1942, %1943 : vector<2x128xf32>
    %1945 = arith.mulf %1944, %1872 : vector<2x128xf32>
    %cst_608 = arith.constant 156.850449 : f32
    %1946 = vector.broadcast %cst_608 : f32 to vector<2x128xf32>
    %1947 = arith.addf %1945, %1946 : vector<2x128xf32>
    %1948 = arith.mulf %1947, %1872 : vector<2x128xf32>
    %cst_609 = arith.constant 269.418549 : f32
    %1949 = vector.broadcast %cst_609 : f32 to vector<2x128xf32>
    %1950 = arith.addf %1948, %1949 : vector<2x128xf32>
    %1951 = arith.mulf %1950, %1872 : vector<2x128xf32>
    %cst_610 = arith.constant -1741.06262 : f32
    %1952 = vector.broadcast %cst_610 : f32 to vector<2x128xf32>
    %1953 = arith.addf %1951, %1952 : vector<2x128xf32>
    %1954 = arith.mulf %1953, %1872 : vector<2x128xf32>
    %cst_611 = arith.constant 770.181335 : f32
    %1955 = vector.broadcast %cst_611 : f32 to vector<2x128xf32>
    %1956 = arith.addf %1954, %1955 : vector<2x128xf32>
    %1957 = arith.mulf %1956, %1872 : vector<2x128xf32>
    %cst_612 = arith.constant -530.619751 : f32
    %1958 = vector.broadcast %cst_612 : f32 to vector<2x128xf32>
    %1959 = arith.addf %1957, %1958 : vector<2x128xf32>
    %1960 = arith.mulf %1959, %1872 : vector<2x128xf32>
    %cst_613 = arith.constant 117.92482 : f32
    %1961 = vector.broadcast %cst_613 : f32 to vector<2x128xf32>
    %1962 = arith.addf %1960, %1961 : vector<2x128xf32>
    %1963 = arith.mulf %1962, %1872 : vector<2x128xf32>
    %cst_614 = arith.constant 14.7509155 : f32
    %1964 = vector.broadcast %cst_614 : f32 to vector<2x128xf32>
    %1965 = arith.addf %1963, %1964 : vector<2x128xf32>
    %cst_615 = arith.constant -2.70502665E-6 : f32
    %1966 = vector.broadcast %cst_615 : f32 to vector<2x128xf32>
    %1967 = arith.mulf %1966, %1872 : vector<2x128xf32>
    %cst_616 = arith.constant -9.26853099E-4 : f32
    %1968 = vector.broadcast %cst_616 : f32 to vector<2x128xf32>
    %1969 = arith.addf %1967, %1968 : vector<2x128xf32>
    %1970 = arith.mulf %1969, %1872 : vector<2x128xf32>
    %cst_617 = arith.constant -0.114605896 : f32
    %1971 = vector.broadcast %cst_617 : f32 to vector<2x128xf32>
    %1972 = arith.addf %1970, %1971 : vector<2x128xf32>
    %1973 = arith.mulf %1972, %1872 : vector<2x128xf32>
    %cst_618 = arith.constant -5.49938726 : f32
    %1974 = vector.broadcast %cst_618 : f32 to vector<2x128xf32>
    %1975 = arith.addf %1973, %1974 : vector<2x128xf32>
    %1976 = arith.mulf %1975, %1872 : vector<2x128xf32>
    %cst_619 = arith.constant -93.8753051 : f32
    %1977 = vector.broadcast %cst_619 : f32 to vector<2x128xf32>
    %1978 = arith.addf %1976, %1977 : vector<2x128xf32>
    %1979 = arith.mulf %1978, %1872 : vector<2x128xf32>
    %cst_620 = arith.constant -348.02179 : f32
    %1980 = vector.broadcast %cst_620 : f32 to vector<2x128xf32>
    %1981 = arith.addf %1979, %1980 : vector<2x128xf32>
    %1982 = arith.mulf %1981, %1872 : vector<2x128xf32>
    %cst_621 = arith.constant 1134.7428 : f32
    %1983 = vector.broadcast %cst_621 : f32 to vector<2x128xf32>
    %1984 = arith.addf %1982, %1983 : vector<2x128xf32>
    %1985 = arith.mulf %1984, %1872 : vector<2x128xf32>
    %cst_622 = arith.constant 483.931335 : f32
    %1986 = vector.broadcast %cst_622 : f32 to vector<2x128xf32>
    %1987 = arith.addf %1985, %1986 : vector<2x128xf32>
    %1988 = arith.mulf %1987, %1872 : vector<2x128xf32>
    %cst_623 = arith.constant -207.551819 : f32
    %1989 = vector.broadcast %cst_623 : f32 to vector<2x128xf32>
    %1990 = arith.addf %1988, %1989 : vector<2x128xf32>
    %1991 = arith.mulf %1990, %1872 : vector<2x128xf32>
    %cst_624 = arith.constant -89.7248535 : f32
    %1992 = vector.broadcast %cst_624 : f32 to vector<2x128xf32>
    %1993 = arith.addf %1991, %1992 : vector<2x128xf32>
    %1994 = arith.mulf %1993, %1872 : vector<2x128xf32>
    %cst_625 = arith.constant -37.9123611 : f32
    %1995 = vector.broadcast %cst_625 : f32 to vector<2x128xf32>
    %1996 = arith.addf %1994, %1995 : vector<2x128xf32>
    %1997 = arith.mulf %1867, %1934 : vector<2x128xf32>
    %1998 = arith.addf %1903, %1997 : vector<2x128xf32>
    %1999 = arith.mulf %1867, %1996 : vector<2x128xf32>
    %2000 = arith.addf %1965, %1999 : vector<2x128xf32>
    %2001 = arith.mulf %1871, %2000 : vector<2x128xf32>
    %2002 = arith.addf %1998, %2001 : vector<2x128xf32>
    %cst_626 = arith.constant -0.00236007245 : f32
    %2003 = vector.broadcast %cst_626 : f32 to vector<2x128xf32>
    %2004 = arith.mulf %2003, %1872 : vector<2x128xf32>
    %cst_627 = arith.constant -0.429507464 : f32
    %2005 = vector.broadcast %cst_627 : f32 to vector<2x128xf32>
    %2006 = arith.addf %2004, %2005 : vector<2x128xf32>
    %2007 = arith.mulf %2006, %1872 : vector<2x128xf32>
    %cst_628 = arith.constant -29.533041 : f32
    %2008 = vector.broadcast %cst_628 : f32 to vector<2x128xf32>
    %2009 = arith.addf %2007, %2008 : vector<2x128xf32>
    %2010 = arith.mulf %2009, %1872 : vector<2x128xf32>
    %cst_629 = arith.constant -759.827392 : f32
    %2011 = vector.broadcast %cst_629 : f32 to vector<2x128xf32>
    %2012 = arith.addf %2010, %2011 : vector<2x128xf32>
    %2013 = arith.mulf %2012, %1872 : vector<2x128xf32>
    %cst_630 = arith.constant -5921.50684 : f32
    %2014 = vector.broadcast %cst_630 : f32 to vector<2x128xf32>
    %2015 = arith.addf %2013, %2014 : vector<2x128xf32>
    %2016 = arith.mulf %2015, %1872 : vector<2x128xf32>
    %cst_631 = arith.constant -101.624512 : f32
    %2017 = vector.broadcast %cst_631 : f32 to vector<2x128xf32>
    %2018 = arith.addf %2016, %2017 : vector<2x128xf32>
    %2019 = arith.mulf %2018, %1872 : vector<2x128xf32>
    %cst_632 = arith.constant 33612.6133 : f32
    %2020 = vector.broadcast %cst_632 : f32 to vector<2x128xf32>
    %2021 = arith.addf %2019, %2020 : vector<2x128xf32>
    %2022 = arith.mulf %2021, %1872 : vector<2x128xf32>
    %cst_633 = arith.constant -18970.3633 : f32
    %2023 = vector.broadcast %cst_633 : f32 to vector<2x128xf32>
    %2024 = arith.addf %2022, %2023 : vector<2x128xf32>
    %2025 = arith.mulf %2024, %1872 : vector<2x128xf32>
    %cst_634 = arith.constant 5288.77051 : f32
    %2026 = vector.broadcast %cst_634 : f32 to vector<2x128xf32>
    %2027 = arith.addf %2025, %2026 : vector<2x128xf32>
    %2028 = arith.mulf %2027, %1872 : vector<2x128xf32>
    %cst_635 = arith.constant -199.547867 : f32
    %2029 = vector.broadcast %cst_635 : f32 to vector<2x128xf32>
    %2030 = arith.addf %2028, %2029 : vector<2x128xf32>
    %2031 = arith.mulf %2030, %1872 : vector<2x128xf32>
    %cst_636 = arith.constant 1.90848863 : f32
    %2032 = vector.broadcast %cst_636 : f32 to vector<2x128xf32>
    %2033 = arith.addf %2031, %2032 : vector<2x128xf32>
    %cst_637 = arith.constant 5.44025155E-4 : f32
    %2034 = vector.broadcast %cst_637 : f32 to vector<2x128xf32>
    %2035 = arith.mulf %2034, %1872 : vector<2x128xf32>
    %cst_638 = arith.constant 0.128479704 : f32
    %2036 = vector.broadcast %cst_638 : f32 to vector<2x128xf32>
    %2037 = arith.addf %2035, %2036 : vector<2x128xf32>
    %2038 = arith.mulf %2037, %1872 : vector<2x128xf32>
    %cst_639 = arith.constant 11.2140694 : f32
    %2039 = vector.broadcast %cst_639 : f32 to vector<2x128xf32>
    %2040 = arith.addf %2038, %2039 : vector<2x128xf32>
    %2041 = arith.mulf %2040, %1872 : vector<2x128xf32>
    %cst_640 = arith.constant 372.278442 : f32
    %2042 = vector.broadcast %cst_640 : f32 to vector<2x128xf32>
    %2043 = arith.addf %2041, %2042 : vector<2x128xf32>
    %2044 = arith.mulf %2043, %1872 : vector<2x128xf32>
    %cst_641 = arith.constant 4078.11157 : f32
    %2045 = vector.broadcast %cst_641 : f32 to vector<2x128xf32>
    %2046 = arith.addf %2044, %2045 : vector<2x128xf32>
    %2047 = arith.mulf %2046, %1872 : vector<2x128xf32>
    %cst_642 = arith.constant 5927.20849 : f32
    %2048 = vector.broadcast %cst_642 : f32 to vector<2x128xf32>
    %2049 = arith.addf %2047, %2048 : vector<2x128xf32>
    %2050 = arith.mulf %2049, %1872 : vector<2x128xf32>
    %cst_643 = arith.constant -31339.127 : f32
    %2051 = vector.broadcast %cst_643 : f32 to vector<2x128xf32>
    %2052 = arith.addf %2050, %2051 : vector<2x128xf32>
    %2053 = arith.mulf %2052, %1872 : vector<2x128xf32>
    %cst_644 = arith.constant 10782.5391 : f32
    %2054 = vector.broadcast %cst_644 : f32 to vector<2x128xf32>
    %2055 = arith.addf %2053, %2054 : vector<2x128xf32>
    %2056 = arith.mulf %2055, %1872 : vector<2x128xf32>
    %cst_645 = arith.constant -5306.19775 : f32
    %2057 = vector.broadcast %cst_645 : f32 to vector<2x128xf32>
    %2058 = arith.addf %2056, %2057 : vector<2x128xf32>
    %2059 = arith.mulf %2058, %1872 : vector<2x128xf32>
    %cst_646 = arith.constant 707.548889 : f32
    %2060 = vector.broadcast %cst_646 : f32 to vector<2x128xf32>
    %2061 = arith.addf %2059, %2060 : vector<2x128xf32>
    %2062 = arith.mulf %2061, %1872 : vector<2x128xf32>
    %cst_647 = arith.constant 29.5018311 : f32
    %2063 = vector.broadcast %cst_647 : f32 to vector<2x128xf32>
    %2064 = arith.addf %2062, %2063 : vector<2x128xf32>
    %cst_648 = arith.constant -1.16316143E-4 : f32
    %2065 = vector.broadcast %cst_648 : f32 to vector<2x128xf32>
    %2066 = arith.mulf %2065, %1872 : vector<2x128xf32>
    %cst_649 = arith.constant -0.0361472704 : f32
    %2067 = vector.broadcast %cst_649 : f32 to vector<2x128xf32>
    %2068 = arith.addf %2066, %2067 : vector<2x128xf32>
    %2069 = arith.mulf %2068, %1872 : vector<2x128xf32>
    %cst_650 = arith.constant -4.01120615 : f32
    %2070 = vector.broadcast %cst_650 : f32 to vector<2x128xf32>
    %2071 = arith.addf %2069, %2070 : vector<2x128xf32>
    %2072 = arith.mulf %2071, %1872 : vector<2x128xf32>
    %cst_651 = arith.constant -1.704810e+02 : f32
    %2073 = vector.broadcast %cst_651 : f32 to vector<2x128xf32>
    %2074 = arith.addf %2072, %2073 : vector<2x128xf32>
    %2075 = arith.mulf %2074, %1872 : vector<2x128xf32>
    %cst_652 = arith.constant -2534.6333 : f32
    %2076 = vector.broadcast %cst_652 : f32 to vector<2x128xf32>
    %2077 = arith.addf %2075, %2076 : vector<2x128xf32>
    %2078 = arith.mulf %2077, %1872 : vector<2x128xf32>
    %cst_653 = arith.constant -8004.50146 : f32
    %2079 = vector.broadcast %cst_653 : f32 to vector<2x128xf32>
    %2080 = arith.addf %2078, %2079 : vector<2x128xf32>
    %2081 = arith.mulf %2080, %1872 : vector<2x128xf32>
    %cst_654 = arith.constant 21560.1133 : f32
    %2082 = vector.broadcast %cst_654 : f32 to vector<2x128xf32>
    %2083 = arith.addf %2081, %2082 : vector<2x128xf32>
    %2084 = arith.mulf %2083, %1872 : vector<2x128xf32>
    %cst_655 = arith.constant 7258.96972 : f32
    %2085 = vector.broadcast %cst_655 : f32 to vector<2x128xf32>
    %2086 = arith.addf %2084, %2085 : vector<2x128xf32>
    %2087 = arith.mulf %2086, %1872 : vector<2x128xf32>
    %cst_656 = arith.constant -2.283070e+03 : f32
    %2088 = vector.broadcast %cst_656 : f32 to vector<2x128xf32>
    %2089 = arith.addf %2087, %2088 : vector<2x128xf32>
    %2090 = arith.mulf %2089, %1872 : vector<2x128xf32>
    %cst_657 = arith.constant -628.073974 : f32
    %2091 = vector.broadcast %cst_657 : f32 to vector<2x128xf32>
    %2092 = arith.addf %2090, %2091 : vector<2x128xf32>
    %2093 = arith.mulf %2092, %1872 : vector<2x128xf32>
    %cst_658 = arith.constant -113.737083 : f32
    %2094 = vector.broadcast %cst_658 : f32 to vector<2x128xf32>
    %2095 = arith.addf %2093, %2094 : vector<2x128xf32>
    %cst_659 = arith.constant 0.00954655371 : f32
    %2096 = vector.broadcast %cst_659 : f32 to vector<2x128xf32>
    %2097 = arith.mulf %2096, %1872 : vector<2x128xf32>
    %cst_660 = arith.constant 1.35214984 : f32
    %2098 = vector.broadcast %cst_660 : f32 to vector<2x128xf32>
    %2099 = arith.addf %2097, %2098 : vector<2x128xf32>
    %2100 = arith.mulf %2099, %1872 : vector<2x128xf32>
    %cst_661 = arith.constant 73.1981583 : f32
    %2101 = vector.broadcast %cst_661 : f32 to vector<2x128xf32>
    %2102 = arith.addf %2100, %2101 : vector<2x128xf32>
    %2103 = arith.mulf %2102, %1872 : vector<2x128xf32>
    %cst_662 = arith.constant 1443.13916 : f32
    %2104 = vector.broadcast %cst_662 : f32 to vector<2x128xf32>
    %2105 = arith.addf %2103, %2104 : vector<2x128xf32>
    %2106 = arith.mulf %2105, %1872 : vector<2x128xf32>
    %cst_663 = arith.constant 7555.54931 : f32
    %2107 = vector.broadcast %cst_663 : f32 to vector<2x128xf32>
    %2108 = arith.addf %2106, %2107 : vector<2x128xf32>
    %2109 = arith.mulf %2108, %1872 : vector<2x128xf32>
    %cst_664 = arith.constant -9671.83789 : f32
    %2110 = vector.broadcast %cst_664 : f32 to vector<2x128xf32>
    %2111 = arith.addf %2109, %2110 : vector<2x128xf32>
    %2112 = arith.mulf %2111, %1872 : vector<2x128xf32>
    %cst_665 = arith.constant -24900.6133 : f32
    %2113 = vector.broadcast %cst_665 : f32 to vector<2x128xf32>
    %2114 = arith.addf %2112, %2113 : vector<2x128xf32>
    %2115 = arith.mulf %2114, %1872 : vector<2x128xf32>
    %cst_666 = arith.constant 13821.4326 : f32
    %2116 = vector.broadcast %cst_666 : f32 to vector<2x128xf32>
    %2117 = arith.addf %2115, %2116 : vector<2x128xf32>
    %2118 = arith.mulf %2117, %1872 : vector<2x128xf32>
    %cst_667 = arith.constant -1695.11279 : f32
    %2119 = vector.broadcast %cst_667 : f32 to vector<2x128xf32>
    %2120 = arith.addf %2118, %2119 : vector<2x128xf32>
    %2121 = arith.mulf %2120, %1872 : vector<2x128xf32>
    %cst_668 = arith.constant 109.424591 : f32
    %2122 = vector.broadcast %cst_668 : f32 to vector<2x128xf32>
    %2123 = arith.addf %2121, %2122 : vector<2x128xf32>
    %2124 = arith.mulf %1867, %2064 : vector<2x128xf32>
    %2125 = arith.addf %2033, %2124 : vector<2x128xf32>
    %2126 = arith.mulf %1867, %2123 : vector<2x128xf32>
    %2127 = arith.addf %2095, %2126 : vector<2x128xf32>
    %2128 = arith.mulf %1871, %2127 : vector<2x128xf32>
    %2129 = arith.addf %2125, %2128 : vector<2x128xf32>
    %2130 = math.absf %2129 : vector<2x128xf32>
    %2131 = vector.extract_strided_slice %2130 {offsets = [0, 0], sizes = [2, 127], strides = [1, 1]} : vector<2x128xf32> to vector<2x127xf32>
    %2132 = vector.extract_strided_slice %2130 {offsets = [0, 1], sizes = [2, 127], strides = [1, 1]} : vector<2x128xf32> to vector<2x127xf32>
    %2133 = arith.maximumf %2131, %2132 : vector<2x127xf32>
    %2134 = vector.extract_strided_slice %2002 {offsets = [0, 0], sizes = [2, 127], strides = [1, 1]} : vector<2x128xf32> to vector<2x127xf32>
    %2135 = vector.extract_strided_slice %2002 {offsets = [0, 1], sizes = [2, 127], strides = [1, 1]} : vector<2x128xf32> to vector<2x127xf32>
    %2136 = arith.addf %2134, %2135 : vector<2x127xf32>
    %cst_669 = arith.constant 5.000000e-01 : f32
    %2137 = vector.broadcast %cst_669 : f32 to vector<2x127xf32>
    %2138 = arith.mulf %2137, %2136 : vector<2x127xf32>
    %cst_670 = arith.constant 5.000000e-01 : f32
    %2139 = vector.broadcast %cst_670 : f32 to vector<2x127xf32>
    %2140 = arith.mulf %2139, %2133 : vector<2x127xf32>
    %2141 = vector.extract_strided_slice %1867 {offsets = [0, 1], sizes = [2, 127], strides = [1, 1]} : vector<2x128xf32> to vector<2x127xf32>
    %2142 = vector.extract_strided_slice %1867 {offsets = [0, 0], sizes = [2, 127], strides = [1, 1]} : vector<2x128xf32> to vector<2x127xf32>
    %2143 = arith.subf %2141, %2142 : vector<2x127xf32>
    %2144 = arith.mulf %2140, %2143 : vector<2x127xf32>
    %2145 = arith.subf %2138, %2144 : vector<2x127xf32>
    %2146 = vector.shape_cast %1867 : vector<2x128xf32> to vector<2x1x128xf32>
    %2147 = vector.shape_cast %3 : vector<2x63xf32> to vector<2x63x1xf32>
    %2148 = vector.broadcast %2146 : vector<2x1x128xf32> to vector<2x63x128xf32>
    %2149 = vector.broadcast %2147 : vector<2x63x1xf32> to vector<2x63x128xf32>
    %2150 = arith.subf %2148, %2149 : vector<2x63x128xf32>
    %cst_671 = arith.constant 0.000000e+00 : f32
    %2151 = vector.broadcast %cst_671 : f32 to vector<2x63x128xf32>
    %2152 = arith.maximumf %2150, %2151 : vector<2x63x128xf32>
    %2153 = vector.shape_cast %4 : vector<2x63xf32> to vector<2x63x1xf32>
    %2154 = vector.broadcast %2153 : vector<2x63x1xf32> to vector<2x63x128xf32>
    %2155 = arith.mulf %2154, %2152 : vector<2x63x128xf32>
    %cst_672 = arith.constant dense<0.000000e+00> : vector<2x128xf32>
    %2156 = vector.multi_reduction <add>, %2155, %cst_672 [1] : vector<2x63x128xf32> to vector<2x128xf32>
    %2157 = vector.broadcast %5 : vector<2x1xf32> to vector<2x128xf32>
    %2158 = arith.mulf %2157, %1867 : vector<2x128xf32>
    %2159 = vector.broadcast %6 : vector<2x1xf32> to vector<2x128xf32>
    %2160 = arith.subf %2158, %2159 : vector<2x128xf32>
    %2161 = arith.addf %2160, %2156 : vector<2x128xf32>
    %2162 = vector.extract_strided_slice %2161 {offsets = [0, 1], sizes = [2, 127], strides = [1, 1]} : vector<2x128xf32> to vector<2x127xf32>
    %2163 = vector.extract_strided_slice %2161 {offsets = [0, 0], sizes = [2, 127], strides = [1, 1]} : vector<2x128xf32> to vector<2x127xf32>
    %2164 = arith.subf %2162, %2163 : vector<2x127xf32>
    %cst_673 = arith.constant 2.000000e+01 : f32
    %2165 = vector.broadcast %cst_673 : f32 to vector<2x127xf32>
    %2166 = arith.mulf %2164, %2165 : vector<2x127xf32>
    %2167 = arith.subf %2166, %2145 : vector<2x127xf32>
    %2168 = vector.extract_strided_slice %1867 {offsets = [0, 1], sizes = [2, 126], strides = [1, 1]} : vector<2x128xf32> to vector<2x126xf32>
    %2169 = vector.extract_strided_slice %2167 {offsets = [0, 1], sizes = [2, 126], strides = [1, 1]} : vector<2x127xf32> to vector<2x126xf32>
    %2170 = vector.extract_strided_slice %2167 {offsets = [0, 0], sizes = [2, 126], strides = [1, 1]} : vector<2x127xf32> to vector<2x126xf32>
    %2171 = arith.subf %2169, %2170 : vector<2x126xf32>
    %cst_674 = arith.constant 2.000000e-02 : f32
    %2172 = vector.broadcast %cst_674 : f32 to vector<2x126xf32>
    %2173 = arith.mulf %2172, %2171 : vector<2x126xf32>
    %2174 = arith.addf %2168, %2173 : vector<2x126xf32>
    %2175 = vector.extract_strided_slice %2174 {offsets = [0, 0], sizes = [2, 1], strides = [1, 1]} : vector<2x126xf32> to vector<2x1xf32>
    %2176 = vector.extract_strided_slice %2174 {offsets = [0, 125], sizes = [2, 1], strides = [1, 1]} : vector<2x126xf32> to vector<2x1xf32>
    %2177 = tpu.concatenate %2175, %2174, %2176 in 1 : vector<2x1xf32>, vector<2x126xf32>, vector<2x1xf32> -> vector<2x128xf32>
    %c7 = arith.constant 7 : index
    %c0_675 = arith.constant 0 : index
    %c0_676 = arith.constant 0 : index
    %2178 = vector.load %arg5[%c7, %c0_675, %c0_676] : memref<8x2x128xf32, #tpu.memory_space<vmem>>, vector<1x2x128xf32>
    %2179 = vector.shape_cast %2178 : vector<1x2x128xf32> to vector<2x128xf32>
    %2180 = vector.shape_cast %2177 : vector<2x128xf32> to vector<1x2x128xf32>
    tpu.vector_store %arg5[%c7, %c0_675, %c0_676], %2180 {strides = array<i32>} : memref<8x2x128xf32, #tpu.memory_space<vmem>>, vector<1x2x128xf32>,
    %c1_i32 = arith.constant 1 : i32
    %2181 = arith.addi %arg0, %c1_i32 : i32
    %c2_i32 = arith.constant 2 : i32
    %2182 = arith.cmpi slt, %2181, %c2_i32 : i32
    %2183 = arith.extui %2182 : i1 to i32
    %c0_i32_677 = arith.constant 0 : i32
    %2184 = arith.cmpi ne, %2183, %c0_i32_677 : i32
    scf.if %2184 {
      %2185 = arith.mulf %2177, %2177 : vector<2x128xf32>
      %2186 = arith.mulf %2185, %2185 : vector<2x128xf32>
      %cst_678 = arith.constant 2.38663837E-4 : f32
      %2187 = vector.broadcast %cst_678 : f32 to vector<2x128xf32>
      %2188 = arith.mulf %2187, %2186 : vector<2x128xf32>
      %cst_679 = arith.constant 0.0375597179 : f32
      %2189 = vector.broadcast %cst_679 : f32 to vector<2x128xf32>
      %2190 = arith.addf %2188, %2189 : vector<2x128xf32>
      %2191 = arith.mulf %2190, %2186 : vector<2x128xf32>
      %cst_680 = arith.constant 2.28744245 : f32
      %2192 = vector.broadcast %cst_680 : f32 to vector<2x128xf32>
      %2193 = arith.addf %2191, %2192 : vector<2x128xf32>
      %2194 = arith.mulf %2193, %2186 : vector<2x128xf32>
      %cst_681 = arith.constant 51.5406837 : f32
      %2195 = vector.broadcast %cst_681 : f32 to vector<2x128xf32>
      %2196 = arith.addf %2194, %2195 : vector<2x128xf32>
      %2197 = arith.mulf %2196, %2186 : vector<2x128xf32>
      %cst_682 = arith.constant 314.814545 : f32
      %2198 = vector.broadcast %cst_682 : f32 to vector<2x128xf32>
      %2199 = arith.addf %2197, %2198 : vector<2x128xf32>
      %2200 = arith.mulf %2199, %2186 : vector<2x128xf32>
      %cst_683 = arith.constant -483.591919 : f32
      %2201 = vector.broadcast %cst_683 : f32 to vector<2x128xf32>
      %2202 = arith.addf %2200, %2201 : vector<2x128xf32>
      %2203 = arith.mulf %2202, %2186 : vector<2x128xf32>
      %cst_684 = arith.constant -1556.28833 : f32
      %2204 = vector.broadcast %cst_684 : f32 to vector<2x128xf32>
      %2205 = arith.addf %2203, %2204 : vector<2x128xf32>
      %2206 = arith.mulf %2205, %2186 : vector<2x128xf32>
      %cst_685 = arith.constant 1151.78601 : f32
      %2207 = vector.broadcast %cst_685 : f32 to vector<2x128xf32>
      %2208 = arith.addf %2206, %2207 : vector<2x128xf32>
      %2209 = arith.mulf %2208, %2186 : vector<2x128xf32>
      %cst_686 = arith.constant -211.889099 : f32
      %2210 = vector.broadcast %cst_686 : f32 to vector<2x128xf32>
      %2211 = arith.addf %2209, %2210 : vector<2x128xf32>
      %2212 = arith.mulf %2211, %2186 : vector<2x128xf32>
      %cst_687 = arith.constant 27.3561478 : f32
      %2213 = vector.broadcast %cst_687 : f32 to vector<2x128xf32>
      %2214 = arith.addf %2212, %2213 : vector<2x128xf32>
      %2215 = arith.mulf %2214, %2186 : vector<2x128xf32>
      %cst_688 = arith.constant -0.0258393437 : f32
      %2216 = vector.broadcast %cst_688 : f32 to vector<2x128xf32>
      %2217 = arith.addf %2215, %2216 : vector<2x128xf32>
      %cst_689 = arith.constant -5.75627419E-5 : f32
      %2218 = vector.broadcast %cst_689 : f32 to vector<2x128xf32>
      %2219 = arith.mulf %2218, %2186 : vector<2x128xf32>
      %cst_690 = arith.constant -0.0116083091 : f32
      %2220 = vector.broadcast %cst_690 : f32 to vector<2x128xf32>
      %2221 = arith.addf %2219, %2220 : vector<2x128xf32>
      %2222 = arith.mulf %2221, %2186 : vector<2x128xf32>
      %cst_691 = arith.constant -0.894940615 : f32
      %2223 = vector.broadcast %cst_691 : f32 to vector<2x128xf32>
      %2224 = arith.addf %2222, %2223 : vector<2x128xf32>
      %2225 = arith.mulf %2224, %2186 : vector<2x128xf32>
      %cst_692 = arith.constant -26.2009449 : f32
      %2226 = vector.broadcast %cst_692 : f32 to vector<2x128xf32>
      %2227 = arith.addf %2225, %2226 : vector<2x128xf32>
      %2228 = arith.mulf %2227, %2186 : vector<2x128xf32>
      %cst_693 = arith.constant -236.86026 : f32
      %2229 = vector.broadcast %cst_693 : f32 to vector<2x128xf32>
      %2230 = arith.addf %2228, %2229 : vector<2x128xf32>
      %2231 = arith.mulf %2230, %2186 : vector<2x128xf32>
      %cst_694 = arith.constant -4.83926249 : f32
      %2232 = vector.broadcast %cst_694 : f32 to vector<2x128xf32>
      %2233 = arith.addf %2231, %2232 : vector<2x128xf32>
      %2234 = arith.mulf %2233, %2186 : vector<2x128xf32>
      %cst_695 = arith.constant 1977.21265 : f32
      %2235 = vector.broadcast %cst_695 : f32 to vector<2x128xf32>
      %2236 = arith.addf %2234, %2235 : vector<2x128xf32>
      %2237 = arith.mulf %2236, %2186 : vector<2x128xf32>
      %cst_696 = arith.constant -1459.25879 : f32
      %2238 = vector.broadcast %cst_696 : f32 to vector<2x128xf32>
      %2239 = arith.addf %2237, %2238 : vector<2x128xf32>
      %2240 = arith.mulf %2239, %2186 : vector<2x128xf32>
      %cst_697 = arith.constant 587.641174 : f32
      %2241 = vector.broadcast %cst_697 : f32 to vector<2x128xf32>
      %2242 = arith.addf %2240, %2241 : vector<2x128xf32>
      %2243 = arith.mulf %2242, %2186 : vector<2x128xf32>
      %cst_698 = arith.constant -39.9095726 : f32
      %2244 = vector.broadcast %cst_698 : f32 to vector<2x128xf32>
      %2245 = arith.addf %2243, %2244 : vector<2x128xf32>
      %2246 = arith.mulf %2245, %2186 : vector<2x128xf32>
      %cst_699 = arith.constant 1.90848863 : f32
      %2247 = vector.broadcast %cst_699 : f32 to vector<2x128xf32>
      %2248 = arith.addf %2246, %2247 : vector<2x128xf32>
      %cst_700 = arith.constant 1.29529799E-5 : f32
      %2249 = vector.broadcast %cst_700 : f32 to vector<2x128xf32>
      %2250 = arith.mulf %2249, %2186 : vector<2x128xf32>
      %cst_701 = arith.constant 0.0033810446 : f32
      %2251 = vector.broadcast %cst_701 : f32 to vector<2x128xf32>
      %2252 = arith.addf %2250, %2251 : vector<2x128xf32>
      %2253 = arith.mulf %2252, %2186 : vector<2x128xf32>
      %cst_702 = arith.constant 0.32982558 : f32
      %2254 = vector.broadcast %cst_702 : f32 to vector<2x128xf32>
      %2255 = arith.addf %2253, %2254 : vector<2x128xf32>
      %2256 = arith.mulf %2255, %2186 : vector<2x128xf32>
      %cst_703 = arith.constant 12.4092817 : f32
      %2257 = vector.broadcast %cst_703 : f32 to vector<2x128xf32>
      %2258 = arith.addf %2256, %2257 : vector<2x128xf32>
      %2259 = arith.mulf %2258, %2186 : vector<2x128xf32>
      %cst_704 = arith.constant 156.850449 : f32
      %2260 = vector.broadcast %cst_704 : f32 to vector<2x128xf32>
      %2261 = arith.addf %2259, %2260 : vector<2x128xf32>
      %2262 = arith.mulf %2261, %2186 : vector<2x128xf32>
      %cst_705 = arith.constant 269.418549 : f32
      %2263 = vector.broadcast %cst_705 : f32 to vector<2x128xf32>
      %2264 = arith.addf %2262, %2263 : vector<2x128xf32>
      %2265 = arith.mulf %2264, %2186 : vector<2x128xf32>
      %cst_706 = arith.constant -1741.06262 : f32
      %2266 = vector.broadcast %cst_706 : f32 to vector<2x128xf32>
      %2267 = arith.addf %2265, %2266 : vector<2x128xf32>
      %2268 = arith.mulf %2267, %2186 : vector<2x128xf32>
      %cst_707 = arith.constant 770.181335 : f32
      %2269 = vector.broadcast %cst_707 : f32 to vector<2x128xf32>
      %2270 = arith.addf %2268, %2269 : vector<2x128xf32>
      %2271 = arith.mulf %2270, %2186 : vector<2x128xf32>
      %cst_708 = arith.constant -530.619751 : f32
      %2272 = vector.broadcast %cst_708 : f32 to vector<2x128xf32>
      %2273 = arith.addf %2271, %2272 : vector<2x128xf32>
      %2274 = arith.mulf %2273, %2186 : vector<2x128xf32>
      %cst_709 = arith.constant 117.92482 : f32
      %2275 = vector.broadcast %cst_709 : f32 to vector<2x128xf32>
      %2276 = arith.addf %2274, %2275 : vector<2x128xf32>
      %2277 = arith.mulf %2276, %2186 : vector<2x128xf32>
      %cst_710 = arith.constant 14.7509155 : f32
      %2278 = vector.broadcast %cst_710 : f32 to vector<2x128xf32>
      %2279 = arith.addf %2277, %2278 : vector<2x128xf32>
      %cst_711 = arith.constant -2.70502665E-6 : f32
      %2280 = vector.broadcast %cst_711 : f32 to vector<2x128xf32>
      %2281 = arith.mulf %2280, %2186 : vector<2x128xf32>
      %cst_712 = arith.constant -9.26853099E-4 : f32
      %2282 = vector.broadcast %cst_712 : f32 to vector<2x128xf32>
      %2283 = arith.addf %2281, %2282 : vector<2x128xf32>
      %2284 = arith.mulf %2283, %2186 : vector<2x128xf32>
      %cst_713 = arith.constant -0.114605896 : f32
      %2285 = vector.broadcast %cst_713 : f32 to vector<2x128xf32>
      %2286 = arith.addf %2284, %2285 : vector<2x128xf32>
      %2287 = arith.mulf %2286, %2186 : vector<2x128xf32>
      %cst_714 = arith.constant -5.49938726 : f32
      %2288 = vector.broadcast %cst_714 : f32 to vector<2x128xf32>
      %2289 = arith.addf %2287, %2288 : vector<2x128xf32>
      %2290 = arith.mulf %2289, %2186 : vector<2x128xf32>
      %cst_715 = arith.constant -93.8753051 : f32
      %2291 = vector.broadcast %cst_715 : f32 to vector<2x128xf32>
      %2292 = arith.addf %2290, %2291 : vector<2x128xf32>
      %2293 = arith.mulf %2292, %2186 : vector<2x128xf32>
      %cst_716 = arith.constant -348.02179 : f32
      %2294 = vector.broadcast %cst_716 : f32 to vector<2x128xf32>
      %2295 = arith.addf %2293, %2294 : vector<2x128xf32>
      %2296 = arith.mulf %2295, %2186 : vector<2x128xf32>
      %cst_717 = arith.constant 1134.7428 : f32
      %2297 = vector.broadcast %cst_717 : f32 to vector<2x128xf32>
      %2298 = arith.addf %2296, %2297 : vector<2x128xf32>
      %2299 = arith.mulf %2298, %2186 : vector<2x128xf32>
      %cst_718 = arith.constant 483.931335 : f32
      %2300 = vector.broadcast %cst_718 : f32 to vector<2x128xf32>
      %2301 = arith.addf %2299, %2300 : vector<2x128xf32>
      %2302 = arith.mulf %2301, %2186 : vector<2x128xf32>
      %cst_719 = arith.constant -207.551819 : f32
      %2303 = vector.broadcast %cst_719 : f32 to vector<2x128xf32>
      %2304 = arith.addf %2302, %2303 : vector<2x128xf32>
      %2305 = arith.mulf %2304, %2186 : vector<2x128xf32>
      %cst_720 = arith.constant -89.7248535 : f32
      %2306 = vector.broadcast %cst_720 : f32 to vector<2x128xf32>
      %2307 = arith.addf %2305, %2306 : vector<2x128xf32>
      %2308 = arith.mulf %2307, %2186 : vector<2x128xf32>
      %cst_721 = arith.constant -37.9123611 : f32
      %2309 = vector.broadcast %cst_721 : f32 to vector<2x128xf32>
      %2310 = arith.addf %2308, %2309 : vector<2x128xf32>
      %2311 = arith.mulf %2177, %2248 : vector<2x128xf32>
      %2312 = arith.addf %2217, %2311 : vector<2x128xf32>
      %2313 = arith.mulf %2177, %2310 : vector<2x128xf32>
      %2314 = arith.addf %2279, %2313 : vector<2x128xf32>
      %2315 = arith.mulf %2185, %2314 : vector<2x128xf32>
      %2316 = arith.addf %2312, %2315 : vector<2x128xf32>
      %cst_722 = arith.constant -0.00236007245 : f32
      %2317 = vector.broadcast %cst_722 : f32 to vector<2x128xf32>
      %2318 = arith.mulf %2317, %2186 : vector<2x128xf32>
      %cst_723 = arith.constant -0.429507464 : f32
      %2319 = vector.broadcast %cst_723 : f32 to vector<2x128xf32>
      %2320 = arith.addf %2318, %2319 : vector<2x128xf32>
      %2321 = arith.mulf %2320, %2186 : vector<2x128xf32>
      %cst_724 = arith.constant -29.533041 : f32
      %2322 = vector.broadcast %cst_724 : f32 to vector<2x128xf32>
      %2323 = arith.addf %2321, %2322 : vector<2x128xf32>
      %2324 = arith.mulf %2323, %2186 : vector<2x128xf32>
      %cst_725 = arith.constant -759.827392 : f32
      %2325 = vector.broadcast %cst_725 : f32 to vector<2x128xf32>
      %2326 = arith.addf %2324, %2325 : vector<2x128xf32>
      %2327 = arith.mulf %2326, %2186 : vector<2x128xf32>
      %cst_726 = arith.constant -5921.50684 : f32
      %2328 = vector.broadcast %cst_726 : f32 to vector<2x128xf32>
      %2329 = arith.addf %2327, %2328 : vector<2x128xf32>
      %2330 = arith.mulf %2329, %2186 : vector<2x128xf32>
      %cst_727 = arith.constant -101.624512 : f32
      %2331 = vector.broadcast %cst_727 : f32 to vector<2x128xf32>
      %2332 = arith.addf %2330, %2331 : vector<2x128xf32>
      %2333 = arith.mulf %2332, %2186 : vector<2x128xf32>
      %cst_728 = arith.constant 33612.6133 : f32
      %2334 = vector.broadcast %cst_728 : f32 to vector<2x128xf32>
      %2335 = arith.addf %2333, %2334 : vector<2x128xf32>
      %2336 = arith.mulf %2335, %2186 : vector<2x128xf32>
      %cst_729 = arith.constant -18970.3633 : f32
      %2337 = vector.broadcast %cst_729 : f32 to vector<2x128xf32>
      %2338 = arith.addf %2336, %2337 : vector<2x128xf32>
      %2339 = arith.mulf %2338, %2186 : vector<2x128xf32>
      %cst_730 = arith.constant 5288.77051 : f32
      %2340 = vector.broadcast %cst_730 : f32 to vector<2x128xf32>
      %2341 = arith.addf %2339, %2340 : vector<2x128xf32>
      %2342 = arith.mulf %2341, %2186 : vector<2x128xf32>
      %cst_731 = arith.constant -199.547867 : f32
      %2343 = vector.broadcast %cst_731 : f32 to vector<2x128xf32>
      %2344 = arith.addf %2342, %2343 : vector<2x128xf32>
      %2345 = arith.mulf %2344, %2186 : vector<2x128xf32>
      %cst_732 = arith.constant 1.90848863 : f32
      %2346 = vector.broadcast %cst_732 : f32 to vector<2x128xf32>
      %2347 = arith.addf %2345, %2346 : vector<2x128xf32>
      %cst_733 = arith.constant 5.44025155E-4 : f32
      %2348 = vector.broadcast %cst_733 : f32 to vector<2x128xf32>
      %2349 = arith.mulf %2348, %2186 : vector<2x128xf32>
      %cst_734 = arith.constant 0.128479704 : f32
      %2350 = vector.broadcast %cst_734 : f32 to vector<2x128xf32>
      %2351 = arith.addf %2349, %2350 : vector<2x128xf32>
      %2352 = arith.mulf %2351, %2186 : vector<2x128xf32>
      %cst_735 = arith.constant 11.2140694 : f32
      %2353 = vector.broadcast %cst_735 : f32 to vector<2x128xf32>
      %2354 = arith.addf %2352, %2353 : vector<2x128xf32>
      %2355 = arith.mulf %2354, %2186 : vector<2x128xf32>
      %cst_736 = arith.constant 372.278442 : f32
      %2356 = vector.broadcast %cst_736 : f32 to vector<2x128xf32>
      %2357 = arith.addf %2355, %2356 : vector<2x128xf32>
      %2358 = arith.mulf %2357, %2186 : vector<2x128xf32>
      %cst_737 = arith.constant 4078.11157 : f32
      %2359 = vector.broadcast %cst_737 : f32 to vector<2x128xf32>
      %2360 = arith.addf %2358, %2359 : vector<2x128xf32>
      %2361 = arith.mulf %2360, %2186 : vector<2x128xf32>
      %cst_738 = arith.constant 5927.20849 : f32
      %2362 = vector.broadcast %cst_738 : f32 to vector<2x128xf32>
      %2363 = arith.addf %2361, %2362 : vector<2x128xf32>
      %2364 = arith.mulf %2363, %2186 : vector<2x128xf32>
      %cst_739 = arith.constant -31339.127 : f32
      %2365 = vector.broadcast %cst_739 : f32 to vector<2x128xf32>
      %2366 = arith.addf %2364, %2365 : vector<2x128xf32>
      %2367 = arith.mulf %2366, %2186 : vector<2x128xf32>
      %cst_740 = arith.constant 10782.5391 : f32
      %2368 = vector.broadcast %cst_740 : f32 to vector<2x128xf32>
      %2369 = arith.addf %2367, %2368 : vector<2x128xf32>
      %2370 = arith.mulf %2369, %2186 : vector<2x128xf32>
      %cst_741 = arith.constant -5306.19775 : f32
      %2371 = vector.broadcast %cst_741 : f32 to vector<2x128xf32>
      %2372 = arith.addf %2370, %2371 : vector<2x128xf32>
      %2373 = arith.mulf %2372, %2186 : vector<2x128xf32>
      %cst_742 = arith.constant 707.548889 : f32
      %2374 = vector.broadcast %cst_742 : f32 to vector<2x128xf32>
      %2375 = arith.addf %2373, %2374 : vector<2x128xf32>
      %2376 = arith.mulf %2375, %2186 : vector<2x128xf32>
      %cst_743 = arith.constant 29.5018311 : f32
      %2377 = vector.broadcast %cst_743 : f32 to vector<2x128xf32>
      %2378 = arith.addf %2376, %2377 : vector<2x128xf32>
      %cst_744 = arith.constant -1.16316143E-4 : f32
      %2379 = vector.broadcast %cst_744 : f32 to vector<2x128xf32>
      %2380 = arith.mulf %2379, %2186 : vector<2x128xf32>
      %cst_745 = arith.constant -0.0361472704 : f32
      %2381 = vector.broadcast %cst_745 : f32 to vector<2x128xf32>
      %2382 = arith.addf %2380, %2381 : vector<2x128xf32>
      %2383 = arith.mulf %2382, %2186 : vector<2x128xf32>
      %cst_746 = arith.constant -4.01120615 : f32
      %2384 = vector.broadcast %cst_746 : f32 to vector<2x128xf32>
      %2385 = arith.addf %2383, %2384 : vector<2x128xf32>
      %2386 = arith.mulf %2385, %2186 : vector<2x128xf32>
      %cst_747 = arith.constant -1.704810e+02 : f32
      %2387 = vector.broadcast %cst_747 : f32 to vector<2x128xf32>
      %2388 = arith.addf %2386, %2387 : vector<2x128xf32>
      %2389 = arith.mulf %2388, %2186 : vector<2x128xf32>
      %cst_748 = arith.constant -2534.6333 : f32
      %2390 = vector.broadcast %cst_748 : f32 to vector<2x128xf32>
      %2391 = arith.addf %2389, %2390 : vector<2x128xf32>
      %2392 = arith.mulf %2391, %2186 : vector<2x128xf32>
      %cst_749 = arith.constant -8004.50146 : f32
      %2393 = vector.broadcast %cst_749 : f32 to vector<2x128xf32>
      %2394 = arith.addf %2392, %2393 : vector<2x128xf32>
      %2395 = arith.mulf %2394, %2186 : vector<2x128xf32>
      %cst_750 = arith.constant 21560.1133 : f32
      %2396 = vector.broadcast %cst_750 : f32 to vector<2x128xf32>
      %2397 = arith.addf %2395, %2396 : vector<2x128xf32>
      %2398 = arith.mulf %2397, %2186 : vector<2x128xf32>
      %cst_751 = arith.constant 7258.96972 : f32
      %2399 = vector.broadcast %cst_751 : f32 to vector<2x128xf32>
      %2400 = arith.addf %2398, %2399 : vector<2x128xf32>
      %2401 = arith.mulf %2400, %2186 : vector<2x128xf32>
      %cst_752 = arith.constant -2.283070e+03 : f32
      %2402 = vector.broadcast %cst_752 : f32 to vector<2x128xf32>
      %2403 = arith.addf %2401, %2402 : vector<2x128xf32>
      %2404 = arith.mulf %2403, %2186 : vector<2x128xf32>
      %cst_753 = arith.constant -628.073974 : f32
      %2405 = vector.broadcast %cst_753 : f32 to vector<2x128xf32>
      %2406 = arith.addf %2404, %2405 : vector<2x128xf32>
      %2407 = arith.mulf %2406, %2186 : vector<2x128xf32>
      %cst_754 = arith.constant -113.737083 : f32
      %2408 = vector.broadcast %cst_754 : f32 to vector<2x128xf32>
      %2409 = arith.addf %2407, %2408 : vector<2x128xf32>
      %cst_755 = arith.constant 0.00954655371 : f32
      %2410 = vector.broadcast %cst_755 : f32 to vector<2x128xf32>
      %2411 = arith.mulf %2410, %2186 : vector<2x128xf32>
      %cst_756 = arith.constant 1.35214984 : f32
      %2412 = vector.broadcast %cst_756 : f32 to vector<2x128xf32>
      %2413 = arith.addf %2411, %2412 : vector<2x128xf32>
      %2414 = arith.mulf %2413, %2186 : vector<2x128xf32>
      %cst_757 = arith.constant 73.1981583 : f32
      %2415 = vector.broadcast %cst_757 : f32 to vector<2x128xf32>
      %2416 = arith.addf %2414, %2415 : vector<2x128xf32>
      %2417 = arith.mulf %2416, %2186 : vector<2x128xf32>
      %cst_758 = arith.constant 1443.13916 : f32
      %2418 = vector.broadcast %cst_758 : f32 to vector<2x128xf32>
      %2419 = arith.addf %2417, %2418 : vector<2x128xf32>
      %2420 = arith.mulf %2419, %2186 : vector<2x128xf32>
      %cst_759 = arith.constant 7555.54931 : f32
      %2421 = vector.broadcast %cst_759 : f32 to vector<2x128xf32>
      %2422 = arith.addf %2420, %2421 : vector<2x128xf32>
      %2423 = arith.mulf %2422, %2186 : vector<2x128xf32>
      %cst_760 = arith.constant -9671.83789 : f32
      %2424 = vector.broadcast %cst_760 : f32 to vector<2x128xf32>
      %2425 = arith.addf %2423, %2424 : vector<2x128xf32>
      %2426 = arith.mulf %2425, %2186 : vector<2x128xf32>
      %cst_761 = arith.constant -24900.6133 : f32
      %2427 = vector.broadcast %cst_761 : f32 to vector<2x128xf32>
      %2428 = arith.addf %2426, %2427 : vector<2x128xf32>
      %2429 = arith.mulf %2428, %2186 : vector<2x128xf32>
      %cst_762 = arith.constant 13821.4326 : f32
      %2430 = vector.broadcast %cst_762 : f32 to vector<2x128xf32>
      %2431 = arith.addf %2429, %2430 : vector<2x128xf32>
      %2432 = arith.mulf %2431, %2186 : vector<2x128xf32>
      %cst_763 = arith.constant -1695.11279 : f32
      %2433 = vector.broadcast %cst_763 : f32 to vector<2x128xf32>
      %2434 = arith.addf %2432, %2433 : vector<2x128xf32>
      %2435 = arith.mulf %2434, %2186 : vector<2x128xf32>
      %cst_764 = arith.constant 109.424591 : f32
      %2436 = vector.broadcast %cst_764 : f32 to vector<2x128xf32>
      %2437 = arith.addf %2435, %2436 : vector<2x128xf32>
      %2438 = arith.mulf %2177, %2378 : vector<2x128xf32>
      %2439 = arith.addf %2347, %2438 : vector<2x128xf32>
      %2440 = arith.mulf %2177, %2437 : vector<2x128xf32>
      %2441 = arith.addf %2409, %2440 : vector<2x128xf32>
      %2442 = arith.mulf %2185, %2441 : vector<2x128xf32>
      %2443 = arith.addf %2439, %2442 : vector<2x128xf32>
      %2444 = math.absf %2443 : vector<2x128xf32>
      %2445 = vector.extract_strided_slice %2444 {offsets = [0, 0], sizes = [2, 127], strides = [1, 1]} : vector<2x128xf32> to vector<2x127xf32>
      %2446 = vector.extract_strided_slice %2444 {offsets = [0, 1], sizes = [2, 127], strides = [1, 1]} : vector<2x128xf32> to vector<2x127xf32>
      %2447 = arith.maximumf %2445, %2446 : vector<2x127xf32>
      %2448 = vector.extract_strided_slice %2316 {offsets = [0, 0], sizes = [2, 127], strides = [1, 1]} : vector<2x128xf32> to vector<2x127xf32>
      %2449 = vector.extract_strided_slice %2316 {offsets = [0, 1], sizes = [2, 127], strides = [1, 1]} : vector<2x128xf32> to vector<2x127xf32>
      %2450 = arith.addf %2448, %2449 : vector<2x127xf32>
      %cst_765 = arith.constant 5.000000e-01 : f32
      %2451 = vector.broadcast %cst_765 : f32 to vector<2x127xf32>
      %2452 = arith.mulf %2451, %2450 : vector<2x127xf32>
      %cst_766 = arith.constant 5.000000e-01 : f32
      %2453 = vector.broadcast %cst_766 : f32 to vector<2x127xf32>
      %2454 = arith.mulf %2453, %2447 : vector<2x127xf32>
      %2455 = vector.extract_strided_slice %2177 {offsets = [0, 1], sizes = [2, 127], strides = [1, 1]} : vector<2x128xf32> to vector<2x127xf32>
      %2456 = vector.extract_strided_slice %2177 {offsets = [0, 0], sizes = [2, 127], strides = [1, 1]} : vector<2x128xf32> to vector<2x127xf32>
      %2457 = arith.subf %2455, %2456 : vector<2x127xf32>
      %2458 = arith.mulf %2454, %2457 : vector<2x127xf32>
      %2459 = arith.subf %2452, %2458 : vector<2x127xf32>
      %2460 = vector.shape_cast %2177 : vector<2x128xf32> to vector<2x1x128xf32>
      %2461 = vector.shape_cast %3 : vector<2x63xf32> to vector<2x63x1xf32>
      %2462 = vector.broadcast %2460 : vector<2x1x128xf32> to vector<2x63x128xf32>
      %2463 = vector.broadcast %2461 : vector<2x63x1xf32> to vector<2x63x128xf32>
      %2464 = arith.subf %2462, %2463 : vector<2x63x128xf32>
      %cst_767 = arith.constant 0.000000e+00 : f32
      %2465 = vector.broadcast %cst_767 : f32 to vector<2x63x128xf32>
      %2466 = arith.maximumf %2464, %2465 : vector<2x63x128xf32>
      %2467 = vector.shape_cast %4 : vector<2x63xf32> to vector<2x63x1xf32>
      %2468 = vector.broadcast %2467 : vector<2x63x1xf32> to vector<2x63x128xf32>
      %2469 = arith.mulf %2468, %2466 : vector<2x63x128xf32>
      %cst_768 = arith.constant dense<0.000000e+00> : vector<2x128xf32>
      %2470 = vector.multi_reduction <add>, %2469, %cst_768 [1] : vector<2x63x128xf32> to vector<2x128xf32>
      %2471 = vector.broadcast %5 : vector<2x1xf32> to vector<2x128xf32>
      %2472 = arith.mulf %2471, %2177 : vector<2x128xf32>
      %2473 = vector.broadcast %6 : vector<2x1xf32> to vector<2x128xf32>
      %2474 = arith.subf %2472, %2473 : vector<2x128xf32>
      %2475 = arith.addf %2474, %2470 : vector<2x128xf32>
      %2476 = vector.extract_strided_slice %2475 {offsets = [0, 1], sizes = [2, 127], strides = [1, 1]} : vector<2x128xf32> to vector<2x127xf32>
      %2477 = vector.extract_strided_slice %2475 {offsets = [0, 0], sizes = [2, 127], strides = [1, 1]} : vector<2x128xf32> to vector<2x127xf32>
      %2478 = arith.subf %2476, %2477 : vector<2x127xf32>
      %cst_769 = arith.constant 2.000000e+01 : f32
      %2479 = vector.broadcast %cst_769 : f32 to vector<2x127xf32>
      %2480 = arith.mulf %2478, %2479 : vector<2x127xf32>
      %2481 = arith.subf %2480, %2459 : vector<2x127xf32>
      %2482 = vector.extract_strided_slice %2177 {offsets = [0, 1], sizes = [2, 126], strides = [1, 1]} : vector<2x128xf32> to vector<2x126xf32>
      %2483 = vector.extract_strided_slice %2481 {offsets = [0, 1], sizes = [2, 126], strides = [1, 1]} : vector<2x127xf32> to vector<2x126xf32>
      %2484 = vector.extract_strided_slice %2481 {offsets = [0, 0], sizes = [2, 126], strides = [1, 1]} : vector<2x127xf32> to vector<2x126xf32>
      %2485 = arith.subf %2483, %2484 : vector<2x126xf32>
      %cst_770 = arith.constant 2.000000e-02 : f32
      %2486 = vector.broadcast %cst_770 : f32 to vector<2x126xf32>
      %2487 = arith.mulf %2486, %2485 : vector<2x126xf32>
      %2488 = arith.addf %2482, %2487 : vector<2x126xf32>
      %2489 = vector.extract_strided_slice %2488 {offsets = [0, 0], sizes = [2, 1], strides = [1, 1]} : vector<2x126xf32> to vector<2x1xf32>
      %2490 = vector.extract_strided_slice %2488 {offsets = [0, 125], sizes = [2, 1], strides = [1, 1]} : vector<2x126xf32> to vector<2x1xf32>
      %2491 = tpu.concatenate %2489, %2488, %2490 in 1 : vector<2x1xf32>, vector<2x126xf32>, vector<2x1xf32> -> vector<2x128xf32>
      %c0_771 = arith.constant 0 : index
      %c0_772 = arith.constant 0 : index
      %2492 = vector.load %arg6[%c0_771, %c0_772] : memref<2x128xf32, #tpu.memory_space<vmem>>, vector<2x128xf32>
      tpu.vector_store %arg6[%c0_771, %c0_772], %2491 {strides = array<i32>} : memref<2x128xf32, #tpu.memory_space<vmem>>, vector<2x128xf32>,
    } else {
    }
    return
  }
  func.func @transform_0(%arg0: i32) -> (i32, i32) {
    %c0_i32 = arith.constant 0 : i32
    %c0_i32_0 = arith.constant 0 : i32
    %c0_i32_1 = arith.constant 0 : i32
    return %c0_i32, %c0_i32_0 : i32, i32
  }
  func.func @transform_1(%arg0: i32) -> (i32, i32) {
    %c0_i32 = arith.constant 0 : i32
    %c0_i32_0 = arith.constant 0 : i32
    %c0_i32_1 = arith.constant 0 : i32
    return %c0_i32, %c0_i32_0 : i32, i32
  }
  func.func @transform_2(%arg0: i32) -> (i32, i32) {
    %c0_i32 = arith.constant 0 : i32
    %c0_i32_0 = arith.constant 0 : i32
    %c0_i32_1 = arith.constant 0 : i32
    return %c0_i32, %c0_i32_0 : i32, i32
  }
  func.func @transform_3(%arg0: i32) -> (i32, i32) {
    %c0_i32 = arith.constant 0 : i32
    %c0_i32_0 = arith.constant 0 : i32
    %c0_i32_1 = arith.constant 0 : i32
    return %c0_i32, %c0_i32_0 : i32, i32
  }
  func.func @transform_4(%arg0: i32) -> (i32, i32, i32) {
    %c0_i32 = arith.constant 0 : i32
    %c0_i32_0 = arith.constant 0 : i32
    %c0_i32_1 = arith.constant 0 : i32
    return %arg0, %c0_i32, %c0_i32_0 : i32, i32, i32
  }
}

</mosaic_0001>

<bundles_post_ra>
// kernel: tpu_custom_call.1
= control target key start
LH: loop header
LB: loop body
LE: loop exit
PB: predicated region body
PF: predicated region fallthrough
CT: control target
= control target key end

     0   :  { %9 = vsyncpa [#allocation4], 0  ;;  %s5078_s0 = inlined_call_operand.hbm [shape: f32[2,128], index: 0, kind: input, shape index: {}]   ;;  %s5079_s1 = inlined_call_operand.hbm [shape: f32[2,63], index: 1, kind: input, shape index: {}]   ;;  %s5080_s2 = inlined_call_operand.hbm [shape: f32[2,63], index: 2, kind: input, shape index: {}]   ;;  %s5081_s3 = inlined_call_operand.vmem [shape: f32[2,2], index: 3, kind: input, shape index: {}]   ;;  %s5082_s4 = inlined_call_operand.hbm [shape: f32[16,2,128], index: 4, kind: output, shape index: {}]  }
   0x1   :  { %10 = vsyncpa [#allocation7], 0 }
   0x2   :  { %11 = vsyncpa [#allocation5], 0 }
   0x3   :  { %13 = vsyncpa [#allocation5 + $0x1], 0  ;;  %s3410_s15 = smov 0   ;;  %s3412_s16 = smov 0  }
   0x4   :  { %s3414_s17 = smov 0   ;;  %s3416_s18 = smov 0  }
   0x5 LB: > { %s3431_s19 = sadd.s32 4294967295, %s3372_s18   ;;  %s3078_s20 = sadd.s32 4294967294, %s3372_s18   ;;  %s3372_s18 = sphi %s3416_s18, %s5201_s18   ;;  %s3368_s17 = sphi %s3414_s17, %s5200_s17   ;;  %s3364_s16 = sphi %s3412_s16, %s5199_s16   ;;  %s3360_s15 = sphi %s3410_s15, %s5198_s15  }
   0x6   : > { %s3435_s21 = sadd.s32 1, %s3372_s18   ;;  %s110_s22 = sadd.s32 1, %s3368_s17 }
   0x7   : > { %s107_s23 = ssub.s32 %s3372_s18, %s3435_s21  ;;  %p120_p0 = scmp.ne.s32.totalorder %s3368_s17, %s3364_s16 }
   0x8   : > { %p108_p1 = scmp.eq.s32.totalorder %s107_s23, 0  ;;  %p121_p2 = scmp.eq.s32.totalorder %s3431_s19, 1 }
   0x9   : > { %p126_p3 = scmp.ne.s32.totalorder %s3364_s16, %s3360_s15  ;;  %p127_p4 = scmp.eq.s32.totalorder %s3078_s20, 1 }
   0xa   : > { %s3446_s24 = scalar_select %p108_p1, %s3368_s17, %s110_s22  }
   0xb   : > { %p3448_p5 = por %p121_p2, %p120_p0  ;;  %p3452_p6 = por %p127_p4, %p126_p3 }
   0xc   : > { %p3079_p7 = scmp.ge.s32.totalorder %s3372_s18, 1  ;;  %p134_p8 = scmp.lt.s32.totalorder %s3372_s18, 3 }
   0xd   : > { %p3080_p9 = scmp.ne.s32.totalorder %s3431_s19, 0  ;;  %p3131_p10 = scmp.eq.s32.totalorder %s3431_s19, 0 }
   0xe   : > { %p3460_p11 = pnand %p3079_p7, %p134_p8  ;;  %s158_s30 = sshll.u32 %s5079_s1, 4  ;;  %s159_s30 = int_to_ptr.hbm [resolvable:$true] %s158_s30 }
   0xf   : > { %s3374_s5 = smov [#allocation6]   ;;  %s146_s9 = sshll.u32 %s5078_s0, 4  ;;  %s147_s9 = int_to_ptr.hbm [resolvable:$true] %s146_s9 }
  0x10   : > { %p3117_p12 = pneg %p3460_p11  ;;  %s160_s6 = sshll.u32 %s3374_s5, 4  ;;  %s161_s6 = int_to_ptr.vmem [resolvable:$true] %s160_s6 }
  0x11   : > { %s170_s12 = sshll.u32 %s5080_s2, 4  ;;  %s3375_s13 = smov [#allocation3]   ;;  %s171_s12 = int_to_ptr.hbm [resolvable:$true] %s170_s12 }
  0x12   : > { %p3118_p13 = pnand %p3131_p10, %p3117_p12  ;;  %s148_s14 = sshll.u32 %s3375_s13, 4  ;;  %s149_s14 = int_to_ptr.vmem [resolvable:$true] %s148_s14 }
  0x13   : > { %s3376_s20 = smov [#allocation8]   ;;  %188 = sbr.rel (%p3460_p11) target bundleno = 5534 (0x159e), region = 36 }
  0x14   : > { %3123 = dma.hbm_to_vmem [thread:$0]  (!%p3118_p13), %s159_s30, 32, %s161_s6, [#allocation7]  }
  0x15   : > { %3120 = dma.hbm_to_vmem [thread:$0]  (!%p3118_p13), %s147_s9, 32, %s149_s14, [#allocation4]  }
  0x16   : > { %s172_s22 = sshll.u32 %s3376_s20, 4  ;;  %s173_s22 = int_to_ptr.vmem [resolvable:$true] %s172_s22 }
  0x17   : > { %3126 = dma.hbm_to_vmem [thread:$0]  (!%p3118_p13), %s171_s12, 32, %s173_s22, [#allocation7]  }
  0x18   : > { %3347 = dma.done.wait (%p3131_p10), [#allocation4], 32  }
  0x19   : > { %3349 = vsyncadd (%p3131_p10), [#allocation4], 4294967264 }
  0x1a   : > { %3351 = dma.done.wait (%p3131_p10), [#allocation7], 64  }
  0x1b   : > { %3353 = vsyncadd (%p3131_p10), [#allocation7], 4294967232  ;;  %s217_s23 = sand.u32 1, %s3364_s16   ;;  %224 = sbr.rel (%p3080_p9) target bundleno = 34 (0x22), region = 52 }
  0x1c   : > { %s3087_s28 = sshll.u32 %s217_s23, 4 }
  0x1d   : > { %s3490_s29 = scalar_lea.vmem [#allocation9], %s3087_s28 }
  0x20   : > { %v225_v0 = vld [vmem:[#allocation3] sm:$0x3] }
  0x21   : > { %226 = vst [vmem:[#allocation2] sm:$0x3] %v225_v0 }
  0x22 PF: > { %v430_v1 = vlaneseq  ;;  %v227_v4 = vld [vmem:[#allocation6] sm:$0x3]  ;;  %s3377_s27 = smov 1   ;;  %v228_v11 = vld [vmem:[#allocation8] sm:$0x3]  ;;  %s3380_s6 = smov 127  }
  0x23   : > { %v3499_v5 = vperm.slane %v227_v4, 1  ;;  %v3510_v8 = vperm.slane %v227_v4, 0  ;;  %v3525_v12 = vperm.slane %v228_v11, 0  ;;  %v3530_v13 = vperm.slane %v228_v11, 1  ;;  %s2660_s7 = sadd.s32 1, %s3431_s19 }
  0x24   : > { %v3494_v2 = vshrl.u32 %v430_v1, 7  ;;  %vm683_vm0 = vcmask 1046528   ;;  %vm719_vm1 = vcmask 1041409   ;;  %vm752_vm2 = vcmask 7168   ;;  %p3096_p0 = scmp.ge.s32.totalorder %s2660_s7, 2 }
  0x25   : > { %vm754_vm3 = vcmask 1039360   ;;  %s3381_s8 = smov (!%p3096_p0), 1   ;;  %s3382_s9 = smov (!%p3096_p0), 127  }
  0x26   : > { %3182 = vset.pattern.permute.xlu1 %v3494_v2  ;;  %v438_v3 = vadd.s32 8, %v3494_v2  ;;  %3181 = vset.pattern.permute.xlu0 %v3494_v2  ;;  %v444_v7 = vadd.s32 16, %v3494_v2  ;;  %v450_v9 = vadd.s32 24, %v3494_v2  ;;  %v3519_v10 = vadd.s32 32, %v3494_v2 }
  0x27   : > { %v3534_v14 = vadd.s32 40, %v3494_v2  ;;  %v3549_v15 = vadd.s32 48, %v3494_v2  ;;  %v3582_v50 = vadd.s32 56, %v3494_v2 }
  0x28   : > { %3184 = vset.pattern.permute.xlu2 %v438_v3  ;;  %v3503_v6 = vld [vmem:[#allocation2] sm:$0x3] }
  0x29   : > { %418 = vrot.lane.b32.xlu0 %v3503_v6, %s3377_s27  ;;  %231 = vst [vmem:[%s3490_s29] sm:$0x3] %v3503_v6  ;;  %v3553_v16 = vmul.f32 %v3503_v6, %v3503_v6 }
  0x2b   : > { %v3557_v17 = vmul.f32 %v3553_v16, %v3553_v16 }
  0x2d   : > { %v340_v18 = vmul.f32 0.00054402516, %v3557_v17  ;;  %v360_v19 = vmul.f32 -0.00011631614, %v3557_v17  ;;  %v320_v20 = vmul.f32 -0.0023600725, %v3557_v17 }
  0x2e   : > { %483 = vperm.xlu1 %3182, %v3499_v5   ;;  %v380_v23 = vmul.f32 0.009546554, %v3557_v17  ;;  %v254_v39 = vmul.f32 -5.7562742e-05, %v3557_v17  ;;  %v274_v41 = vmul.f32 1.295298e-05, %v3557_v17 }
  0x2f   : > { %v341_v21 = vadd.f32 0.1284797, %v340_v18  ;;  %v361_v22 = vadd.f32 -0.03614727, %v360_v19  ;;  %v321_v24 = vadd.f32 -0.42950746, %v320_v20 }
  0x30   : > { %489 = vperm.xlu2 %3184, %v3499_v5   ;;  %v381_v27 = vadd.f32 1.3521498, %v380_v23  ;;  %v294_v42 = vmul.f32 -2.7050266e-06, %v3557_v17  ;;  %v234_v46 = vmul.f32 0.00023866384, %v3557_v17 }
  0x31   : > { %434 = vperm.xlu0 %3181, %v3510_v8   ;;  %v342_v25 = vmul.f32 %v341_v21, %v3557_v17  ;;  %v362_v26 = vmul.f32 %v361_v22, %v3557_v17  ;;  %v322_v28 = vmul.f32 %v321_v24, %v3557_v17  ;;  %v255_v48 = vadd.f32 -0.011608309, %v254_v39 }
  0x32   : > { %v382_v31 = vmul.f32 %v381_v27, %v3557_v17  ;;  %v275_v49 = vadd.f32 0.0033810446, %v274_v41  ;;  %v235_v55 = vadd.f32 0.037559718, %v234_v46  ;;  %v295_v57 = vadd.f32 -0.0009268531, %v294_v42 }
  0x33   : > { %v343_v29 = vadd.f32 11.214069, %v342_v25  ;;  %v363_v30 = vadd.f32 -4.011206, %v362_v26  ;;  %v323_v32 = vadd.f32 -29.533041, %v322_v28  ;;  %v256_v56 = vmul.f32 %v255_v48, %v3557_v17 }
  0x34   : > { %v383_v35 = vadd.f32 73.19816, %v382_v31  ;;  %v236_v62 = vmul.f32 %v235_v55, %v3557_v17  ;;  %v276_v0 = vmul.f32 %v275_v49, %v3557_v17 }
  0x35   : > { %v344_v33 = vmul.f32 %v343_v29, %v3557_v17  ;;  %v364_v34 = vmul.f32 %v363_v30, %v3557_v17  ;;  %v324_v36 = vmul.f32 %v323_v32, %v3557_v17  ;;  %v257_v63 = vadd.f32 -0.8949406, %v256_v56 }
  0x36   : > { %3183 = vset.pattern.permute.xlu1 %v438_v3  ;;  %v384_v40 = vmul.f32 %v383_v35, %v3557_v17  ;;  %v277_v11 = vadd.f32 0.32982558, %v276_v0 }
  0x37   : > { %v345_v37 = vadd.f32 372.27844, %v344_v33  ;;  %v365_v38 = vadd.f32 -170.481, %v364_v34  ;;  %v325_v43 = vadd.f32 -759.8274, %v324_v36 }
  0x38   : > { %3185 = vset.pattern.permute.xlu2 %v444_v7  ;;  %v385_v47 = vadd.f32 1443.1392, %v384_v40  ;;  %v278_v23 = vmul.f32 %v277_v11, %v3557_v17 }
  0x39   : > { %3188 = vset.pattern.permute.xlu0 %v450_v9  ;;  %v346_v44 = vmul.f32 %v345_v37, %v3557_v17  ;;  %v366_v45 = vmul.f32 %v365_v38, %v3557_v17  ;;  %v326_v51 = vmul.f32 %v325_v43, %v3557_v17 }
  0x3a   : > { %v386_v54 = vmul.f32 %v385_v47, %v3557_v17  ;;  %v279_v28 = vadd.f32 12.409282, %v278_v23 }
  0x3b   : > { %v347_v52 = vadd.f32 4078.1116, %v346_v44  ;;  %v367_v53 = vadd.f32 -2534.6333, %v366_v45  ;;  %v327_v58 = vadd.f32 -5921.507, %v326_v51 }
  0x3c   : > { %v387_v61 = vadd.f32 7555.5493, %v386_v54  ;;  %v280_v34 = vmul.f32 %v279_v28, %v3557_v17  ;;  %v3378_v28 = vmov 0  }
  0x3d   : > { %v348_v59 = vmul.f32 %v347_v52, %v3557_v17  ;;  %v368_v60 = vmul.f32 %v367_v53, %v3557_v17  ;;  %v328_v1 = vmul.f32 %v327_v58, %v3557_v17 }
  0x3e   : > { %440 = vperm.xlu1 %3183, %v3510_v8   ;;  %v388_v4 = vmul.f32 %v387_v61, %v3557_v17  ;;  %v281_v40 = vadd.f32 156.85045, %v280_v34 }
  0x3f   : > { %v329_v20 = vadd.f32 -101.62451, %v328_v1 }
  0x40   : > { %446 = vperm.xlu2 %3185, %v3510_v8   ;;  %v389_v24 = vadd.f32 -9671.838, %v388_v4  ;;  %v282_v43 = vmul.f32 %v281_v40, %v3557_v17 }
  0x41   : > { %501 = vperm.xlu0 %3188, %v3499_v5   ;;  %v330_v32 = vmul.f32 %v329_v20, %v3557_v17 }
  0x42   : > { %v390_v36 = vmul.f32 %v389_v24, %v3557_v17  ;;  %v283_v48 = vadd.f32 269.41855, %v282_v43 }
  0x43   : > { %v331_v41 = vadd.f32 33612.613, %v330_v32 }
  0x44   : > { %v391_v44 = vadd.f32 -24900.613, %v390_v36 }
  0x45   : > { %v332_v49 = vmul.f32 %v331_v41, %v3557_v17 }
  0x46   : > { %3186 = vset.pattern.permute.xlu1 %v444_v7  ;;  %v392_v53 = vmul.f32 %v391_v44, %v3557_v17 }
  0x47   : > { %v333_v58 = vadd.f32 -18970.363, %v332_v49 }
  0x48   : > { %3187 = vset.pattern.permute.xlu2 %v450_v9  ;;  %v393_v61 = vadd.f32 13821.433, %v392_v53 }
  0x49   : > { %3191 = vset.pattern.permute.xlu0 %v3519_v10 }
  0x4e   : > { %495 = vperm.xlu1 %3186, %v3499_v5  }
  0x50   : > { %452 = vperm.xlu2 %3187, %v3510_v8  }
  0x51   : > { %458 = vperm.xlu0 %3191, %v3510_v8  }
  0x56   : > { %3189 = vset.pattern.permute.xlu1 %v3494_v2  ;;  %v349_v2 = vadd.f32 5927.2085, %v348_v59 }
  0x58   : > { %3190 = vset.pattern.permute.xlu2 %v438_v3  ;;  %v369_v3 = vadd.f32 -8004.5015, %v368_v60  ;;  %v350_v21 = vmul.f32 %v349_v2, %v3557_v17  ;;  %v334_v2 = vmul.f32 %v333_v58, %v3557_v17 }
  0x59   : > { %592 = vperm.xlu0 %3191, %v3525_v12  }
  0x5a   : > { %v370_v22 = vmul.f32 %v369_v3, %v3557_v17  ;;  %v351_v33 = vadd.f32 -31339.127, %v350_v21 }
  0x5c   : > { %v371_v35 = vadd.f32 21560.113, %v370_v22  ;;  %v352_v42 = vmul.f32 %v351_v33, %v3557_v17 }
  0x5e   : > { %568 = vperm.xlu1 %3189, %v3525_v12   ;;  %v353_v51 = vadd.f32 10782.539, %v352_v42 }
  0x60   : > { %574 = vperm.xlu2 %3190, %v3525_v12   ;;  %v354_v59 = vmul.f32 %v353_v51, %v3557_v17 }
  0x61   : > { %3200 = vset.pattern.permute.xlu0 %v3534_v14 }
  0x62   : > { %v355_v3 = vadd.f32 -5306.1978, %v354_v59 }
  0x64   : > { %v356_v20 = vmul.f32 %v355_v3, %v3557_v17 }
  0x66   : > { %617 = vperm.xlu1 %3189, %v3530_v13  }
  0x68   : > { %623 = vperm.xlu2 %3190, %v3530_v13  }
  0x69   : > { %513 = vperm.xlu0 %3200, %v3499_v5  }
  0x6e   : > { %3192 = vset.pattern.permute.xlu1 %v3519_v10 }
  0x70   : > { %3193 = vset.pattern.permute.xlu2 %v444_v7 }
  0x71   : > { %647 = vperm.xlu0 %3200, %v3530_v13  }
  0x76   : > { %507 = vperm.xlu1 %3192, %v3499_v5  }
  0x78   : > { %580 = vperm.xlu2 %3193, %v3525_v12  }
  0x79   : > { %3209 = vset.pattern.permute.xlu0 %v3378_v28 }
  0x7e   : > { %3194 = vset.pattern.permute.xlu1 %v444_v7  ;;  %v237_v7 = vadd.f32 2.2874424, %v236_v62 }
  0x80   : > { %3195 = vset.pattern.permute.xlu2 %v3534_v14  ;;  %v238_v18 = vmul.f32 %v237_v7, %v3557_v17  ;;  %v394_v7 = vmul.f32 %v393_v61, %v3557_v17 }
  0x82   : > { %v239_v25 = vadd.f32 51.540684, %v238_v18  ;;  %v395_v22 = vadd.f32 -1695.1128, %v394_v7 }
  0x84   : > { %v240_v29 = vmul.f32 %v239_v25, %v3557_v17  ;;  %v3639_v25 = vld [vmem:[%s5081_s3] sm:$0x3]  ;;  %v396_v33 = vmul.f32 %v395_v22, %v3557_v17 }
  0x85   : > { %708 = vperm.xlu0 %3209, %v3639_v25  }
  0x86   : > { %629 = vperm.xlu1 %3194, %v3530_v13   ;;  %v241_v39 = vadd.f32 314.81454, %v240_v29  ;;  %v397_v41 = vadd.f32 109.42459, %v396_v33 }
  0x88   : > { %464 = vperm.xlu2 %3195, %v3510_v8   ;;  %v242_v47 = vmul.f32 %v241_v39, %v3557_v17 }
  0x8a   : > { %v243_v56 = vadd.f32 -483.59192, %v242_v47  ;;  %v3657_v49 = vpop.permute.xlu2 %489 }
  0x8b   : > { %5123 = vst [vmem:[#allocation13_spill] sm:$0xff] %v3657_v49 }
  0x8e   : > { %3196 = vset.pattern.permute.xlu1 %v450_v9 }
  0x90   : > { %3197 = vset.pattern.permute.xlu2 %v450_v9  ;;  %v258_v9 = vmul.f32 %v257_v63, %v3557_v17  ;;  %v244_v63 = vmul.f32 %v243_v56, %v3557_v17 }
  0x92   : > { %v259_v19 = vadd.f32 -26.200945, %v258_v9  ;;  %v245_v11 = vadd.f32 -1556.2883, %v244_v63 }
  0x94   : > { %v260_v26 = vmul.f32 %v259_v19, %v3557_v17  ;;  %v335_v19 = vadd.f32 5288.7705, %v334_v2 }
  0x96   : > { %586 = vperm.xlu1 %3196, %v3525_v12   ;;  %v261_v30 = vadd.f32 -236.86026, %v260_v26  ;;  %v246_v26 = vmul.f32 %v245_v11, %v3557_v17 }
  0x98   : > { %635 = vperm.xlu2 %3197, %v3530_v13   ;;  %v262_v37 = vmul.f32 %v261_v30, %v3557_v17  ;;  %v336_v30 = vmul.f32 %v335_v19, %v3557_v17 }
  0x9a   : > { %v263_v45 = vadd.f32 -4.8392625, %v262_v37  ;;  %v337_v39 = vadd.f32 -199.54787, %v336_v30 }
  0x9c   : > { %v264_v54 = vmul.f32 %v263_v45, %v3557_v17  ;;  %v338_v45 = vmul.f32 %v337_v39, %v3557_v17 }
  0x9e   : > { %3198 = vset.pattern.permute.xlu1 %v3549_v15  ;;  %v265_v62 = vadd.f32 1977.2126, %v264_v54 }
  0xa0   : > { %3199 = vset.pattern.permute.xlu2 %v3549_v15  ;;  %v266_v9 = vmul.f32 %v265_v62, %v3557_v17  ;;  %v3379_v62 = vmov 1   ;;  %v3681_v22 = vpop.permute.xlu1 %483 }
  0xa1   : > { %3211 = vset.pattern.permute.xlu0 %v3379_v62  ;;  %5124 = vst [vmem:[#allocation14_spill] sm:$0xff] %v3681_v22 }
  0xa2   : > { %v267_v23 = vadd.f32 -1459.2588, %v266_v9 }
  0xa4   : > { %v268_v36 = vmul.f32 %v267_v23, %v3557_v17  ;;  %v419_v23 = vpop.permute.xlu0 %418 }
  0xa6   : > { %470 = vperm.xlu1 %3198, %v3510_v8   ;;  %v269_v43 = vadd.f32 587.6412, %v268_v36 }
  0xa8   : > { %519 = vperm.xlu2 %3199, %v3499_v5  }
  0xac   : > { %v3712_v33 = vpop.permute.xlu0 %434 }
  0xae   : > { %3201 = vset.pattern.permute.xlu1 %v3519_v10  ;;  %v296_v10 = vmul.f32 %v295_v57, %v3557_v17  ;;  %v284_v57 = vmul.f32 %v283_v48, %v3557_v17  ;;  %v400_v48 = vmul.f32 %v397_v41, %v3503_v6 }
  0xb0   : > { %3202 = vset.pattern.permute.xlu2 %v3582_v50  ;;  %v297_v27 = vadd.f32 -0.114605896, %v296_v10  ;;  %v285_v0 = vadd.f32 -1741.0626, %v284_v57 }
  0xb2   : > { %v298_v31 = vmul.f32 %v297_v27, %v3557_v17  ;;  %v286_v18 = vmul.f32 %v285_v0, %v3557_v17  ;;  %v3667_v0 = vpop.permute.xlu2 %446 }
  0xb4   : > { %v299_v38 = vadd.f32 -5.4993873, %v298_v31  ;;  %v287_v27 = vadd.f32 770.18134, %v286_v18  ;;  %v357_v31 = vadd.f32 707.5489, %v356_v20  ;;  %v3718_v36 = vpop.permute.xlu0 %501 }
  0xb5   : > { %5131 = vst [vmem:[#allocation21_spill] sm:$0xff] %v3718_v36 }
  0xb6   : > { %641 = vperm.xlu1 %3201, %v3530_v13   ;;  %v300_v46 = vmul.f32 %v299_v38, %v3557_v17  ;;  %v288_v37 = vmul.f32 %v287_v27, %v3557_v17  ;;  %v358_v40 = vmul.f32 %v357_v31, %v3557_v17 }
  0xb8   : > { %476 = vperm.xlu2 %3202, %v3510_v8   ;;  %v372_v8 = vmul.f32 %v371_v35, %v3557_v17  ;;  %v301_v55 = vadd.f32 -93.875305, %v300_v46  ;;  %v247_v35 = vadd.f32 1151.786, %v246_v26  ;;  %v359_v46 = vadd.f32 29.501831, %v358_v40  ;;  %v3691_v26 = vpop.permute.xlu1 %440 }
  0xba   : > { %v373_v52 = vadd.f32 7258.9697, %v372_v8  ;;  %v248_v42 = vmul.f32 %v247_v35, %v3557_v17  ;;  %v289_v8 = vadd.f32 -530.61975, %v288_v37  ;;  %v398_v56 = vmul.f32 %v359_v46, %v3503_v6 }
  0xbc   : > { %v374_v60 = vmul.f32 %v373_v52, %v3557_v17  ;;  %v249_v51 = vadd.f32 -211.8891, %v248_v42  ;;  %v270_v52 = vmul.f32 %v269_v43, %v3557_v17  ;;  %v290_v53 = vmul.f32 %v289_v8, %v3557_v17 }
  0xbe   : > { %3203 = vset.pattern.permute.xlu1 %v3582_v50  ;;  %v375_v4 = vadd.f32 -2283.07, %v374_v60  ;;  %v250_v58 = vmul.f32 %v249_v51, %v3557_v17  ;;  %v271_v59 = vadd.f32 -39.909573, %v270_v52  ;;  %v291_v60 = vadd.f32 117.92482, %v290_v53 }
  0xc0   : > { %3204 = vset.pattern.permute.xlu2 %v3534_v14  ;;  %v302_v14 = vmul.f32 %v301_v55, %v3557_v17  ;;  %v376_v21 = vmul.f32 %v375_v4, %v3557_v17  ;;  %v339_v55 = vadd.f32 1.9084886, %v338_v45  ;;  %v272_v2 = vmul.f32 %v271_v59, %v3557_v17  ;;  %v3698_v28 = vpop.permute.xlu1 %495 }
  0xc1   : > { %v292_v3 = vmul.f32 %v291_v60, %v3557_v17  ;;  %5126 = vst [vmem:[#allocation16_spill] sm:$0xff] %v3698_v28 }
  0xc2   : > { %v303_v1 = vadd.f32 -348.0218, %v302_v14  ;;  %v377_v32 = vadd.f32 -628.074, %v376_v21  ;;  %v399_v14 = vadd.f32 %v398_v56, %v339_v55  ;;  %v3679_v21 = vpop.permute.xlu2 %452  ;;  %v527_v56 = vperm.slane %v3503_v6, 0 }
  0xc3   : > { %v293_v11 = vadd.f32 14.750916, %v292_v3  ;;  %v3724_v39 = vpop.permute.xlu0 %458 }
  0xc4   : > { %v304_v10 = vmul.f32 %v303_v1, %v3557_v17  ;;  %v251_v1 = vadd.f32 27.356148, %v250_v58 }
  0xc6   : > { %525 = vperm.xlu1 %3203, %v3499_v5   ;;  %v305_v5 = vadd.f32 1134.7428, %v304_v10  ;;  %v252_v9 = vmul.f32 %v251_v1, %v3557_v17  ;;  %v273_v10 = vadd.f32 1.9084886, %v272_v2 }
  0xc8   : > { %598 = vperm.xlu2 %3204, %v3525_v12   ;;  %v306_v24 = vmul.f32 %v305_v5, %v3557_v17  ;;  %v253_v5 = vadd.f32 -0.025839344, %v252_v9  ;;  %v314_v19 = vmul.f32 %v273_v10, %v3503_v6  ;;  %v532_v9 = vsub.f32 %v527_v56, %v3691_v26 }
  0xca   : > { %v307_v29 = vadd.f32 483.93134, %v306_v24  ;;  %v421_v24 = vsub.f32 %v3503_v6, %v419_v23  ;;  %v3693_v27 = vpop.permute.xlu2 %574 }
  0xcb   : > { %5125 = vst [vmem:[#allocation15_spill] sm:$0xff] %v3693_v27  ;;  %v3731_v43 = vpop.permute.xlu0 %592 }
  0xcc   : > { %v308_v34 = vmul.f32 %v307_v29, %v3557_v17 }
  0xce   : > { %3205 = vset.pattern.permute.xlu1 %v3549_v15  ;;  %v309_v38 = vadd.f32 -207.55182, %v308_v34 }
  0xd0   : > { %3206 = vset.pattern.permute.xlu2 %v3549_v15  ;;  %v378_v15 = vmul.f32 %v377_v32, %v3557_v17  ;;  %v310_v44 = vmul.f32 %v309_v38, %v3557_v17  ;;  %v3702_v29 = vpop.permute.xlu1 %568 }
  0xd1   : > { %5128 = vst [vmem:[#allocation18_spill] sm:$0xff] %v3702_v29 }
  0xd2   : > { %v379_v47 = vadd.f32 -113.73708, %v378_v15  ;;  %v311_v54 = vadd.f32 -89.72485, %v310_v44  ;;  %v428_v15 = vrot.slane %v3503_v6, 1 }
  0xd4   : > { %v401_v57 = vadd.f32 %v400_v48, %v379_v47  ;;  %v312_v61 = vmul.f32 %v311_v54, %v3557_v17  ;;  %v528_v42 = vperm.slane %v428_v15, 0  ;;  %v534_v15 = vsub.f32 %v527_v56, %v3679_v21 }
  0xd6   : > { %604 = vperm.xlu1 %3205, %v3525_v12   ;;  %v402_v63 = vmul.f32 %v401_v57, %v3553_v16  ;;  %v313_v4 = vadd.f32 -37.91236, %v312_v61  ;;  %v539_v8 = vsub.f32 %v528_v42, %v3681_v22  ;;  %v540_v45 = vsub.f32 %v528_v42, %v3657_v49 }
  0xd7   : > { %v541_v46 = vsub.f32 %v528_v42, %v3698_v28  ;;  %v542_v51 = vsub.f32 %v528_v42, %v3718_v36 }
  0xd8   : > { %653 = vperm.xlu2 %3206, %v3530_v13   ;;  %v3671_v7 = vadd.f32 %v402_v63, %v399_v14  ;;  %v3706_v30 = vpop.permute.xlu1 %617  ;;  %v555_v48 = vmax.f32 %v539_v8, 0.0  ;;  %v556_v53 = vmax.f32 %v540_v45, 0.0 }
  0xd9   : > { %v557_v54 = vmax.f32 %v541_v46, 0.0  ;;  %v558_v59 = vmax.f32 %v542_v51, 0.0 }
  0xda   : > { %v404_v18 = vand.u32 2147483647, %v3671_v7  ;;  %v669_v55 = vmul.f32 %v3706_v30, %v555_v48 }
  0xdb   : > { %v3741_v52 = vpop.permute.xlu0 %513 }
  0xdc   : > { %5135 = vst [vmem:[#allocation25_spill] sm:$0xff] %v3741_v52  ;;  %v544_v63 = vsub.f32 %v528_v42, %v3741_v52 }
  0xde   : > { %3207 = vset.pattern.permute.xlu1 %v3582_v50 }
  0xe0   : > { %3208 = vset.pattern.permute.xlu2 %v3582_v50  ;;  %v316_v50 = vmul.f32 %v313_v4, %v3503_v6 }
  0xe2   : > { %v317_v20 = vadd.f32 %v316_v50, %v293_v11 }
  0xe4   : > { %v318_v17 = vmul.f32 %v317_v20, %v3553_v16  ;;  %v3700_v16 = vpop.permute.xlu2 %623  ;;  %v533_v20 = vsub.f32 %v527_v56, %v3667_v0 }
  0xe5   : > { %5127 = vst [vmem:[#allocation17_spill] sm:$0xff] %v3700_v16  ;;  %v670_v57 = vmul.f32 %v3700_v16, %v556_v53 }
  0xe6   : > { %610 = vperm.xlu1 %3207, %v3525_v12   ;;  %v315_v12 = vadd.f32 %v314_v19, %v253_v5  ;;  %v560_v5 = vmax.f32 %v544_v63, 0.0  ;;  %v549_v51 = vmax.f32 %v533_v20, 0.0 }
  0xe7   : > { %v692_v14 = vadd.f32 %v670_v57, %v669_v55  ;;  %v535_v55 = vsub.f32 %v527_v56, %v3724_v39 }
  0xe8   : > { %659 = vperm.xlu2 %3208, %v3530_v13   ;;  %v3688_v13 = vadd.f32 %v318_v17, %v315_v12  ;;  %v3710_v32 = vpop.permute.xlu1 %507  ;;  %v3760_v12 = vpop.permute.xlu0 %647 }
  0xe9   : > { %5130 = vst [vmem:[#allocation20_spill] sm:$0xff] %v3710_v32  ;;  %v543_v58 = vsub.f32 %v528_v42, %v3710_v32 }
  0xeb   : > { %v559_v2 = vmax.f32 %v543_v58, 0.0  ;;  %v550_v58 = vmax.f32 %v534_v15, 0.0 }
  0xee   : > { %406 = vrot.lane.b32.xlu1 %v404_v18, %s3380_s6 }
  0xf0   : > { %3210 = vset.pattern.permute.xlu2 %v3379_v62  ;;  %v531_v62 = vsub.f32 %v527_v56, %v3712_v33 }
  0xf1   : > { %713 = vperm.xlu2 %3210, %v3639_v25   ;;  %v3704_v25 = vpop.permute.xlu2 %580 }
  0xf2   : > { %v547_v11 = vmax.f32 %v531_v62, 0.0 }
  0xf4   : > { %v661_v45 = vmul.f32 %v3702_v29, %v547_v11 }
  0xf6   : > { %411 = vrot.lane.b32.xlu1 %v3688_v13, %s3380_s6 }
  0xf8   : > { %v3716_v35 = vpop.permute.xlu1 %629 }
  0xf9   : > { %423 = vrot.lane.b32.xlu2 %v421_v24, %s3380_s6  ;;  %v3708_v31 = vpop.permute.xlu2 %464  ;;  %v671_v60 = vmul.f32 %v3716_v35, %v557_v54  ;;  %v548_v24 = vmax.f32 %v532_v9, 0.0 }
  0xfa   : > { %5129 = vst [vmem:[#allocation19_spill] sm:$0xff] %v3708_v31  ;;  %v536_v63 = vsub.f32 %v527_v56, %v3708_v31 }
  0xfb   : > { %v693_v3 = vadd.f32 %v692_v14, %v671_v60  ;;  %v662_v54 = vmul.f32 %v3693_v27, %v548_v24  ;;  %v663_v60 = vmul.f32 %v3704_v25, %v549_v51 }
 0x101   : > { %v3714_v34 = vpop.permute.xlu2 %635 }
 0x102   : > { %v672_v4 = vmul.f32 %v3714_v34, %v558_v59  ;;  %v677_v59 = vadd.f32 %v662_v54, %v661_v45 }
 0x104   : > { %v694_v17 = vadd.f32 %v693_v3, %v672_v4  ;;  %v678_v9 = vadd.f32 %v677_v59, %v663_v60 }
 0x108   : > { %v3722_v38 = vpop.permute.xlu1 %586 }
 0x109   : > { %v3720_v37 = vpop.permute.xlu2 %519  ;;  %v664_v3 = vmul.f32 %v3722_v38, %v550_v58 }
 0x10a   : > { %5132 = vst [vmem:[#allocation22_spill] sm:$0xff] %v3720_v37  ;;  %v545_v50 = vsub.f32 %v528_v42, %v3720_v37 }
 0x10c   : > { %v561_v46 = vmax.f32 %v545_v50, 0.0 }
 0x112   : > { %v3726_v40 = vpop.permute.xlu2 %476 }
 0x113   : > { %5133 = vst [vmem:[#allocation23_spill] sm:$0xff] %v3726_v40 }
 0x118   : > { %v3729_v41 = vpop.permute.xlu1 %470 }
 0x119   : > { %5134 = vst [vmem:[#allocation24_spill] sm:$0xff] %v3729_v41 }
 0x122   : > { %v3734_v44 = vpop.permute.xlu2 %598 }
 0x128   : > { %v3738_v47 = vpop.permute.xlu1 %641 }
 0x129   : > { %v673_v19 = vmul.f32 %v3738_v47, %v559_v2  ;;  %v551_v2 = vmax.f32 %v535_v55, 0.0 }
 0x12b   : > { %v695_v48 = vadd.f32 %v694_v17, %v673_v19  ;;  %v679_v19 = vadd.f32 %v678_v9, %v664_v3  ;;  %v665_v20 = vmul.f32 %v3731_v43, %v551_v2  ;;  %v538_v17 = vsub.f32 %v527_v56, %v3726_v40  ;;  %v3788_v2 = vpop.permute.xlu0 %708 }
 0x12d   : > { %v680_v45 = vadd.f32 %v679_v19, %v665_v20 }
 0x132   : > { %v3748_v61 = vpop.permute.xlu2 %653 }
 0x133   : > { %v675_v57 = vmul.f32 %v3748_v61, %v561_v46 }
 0x138   : > { %v3752_v1 = vpop.permute.xlu1 %525 }
 0x139   : > { %5136 = vst [vmem:[#allocation26_spill] sm:$0xff] %v3752_v1  ;;  %v546_v10 = vsub.f32 %v528_v42, %v3752_v1  ;;  %v674_v42 = vmul.f32 %v3760_v12, %v560_v5  ;;  %v552_v5 = vmax.f32 %v536_v63, 0.0 }
 0x13b   : > { %v562_v8 = vmax.f32 %v546_v10, 0.0  ;;  %v696_v62 = vadd.f32 %v695_v48, %v674_v42  ;;  %v537_v10 = vsub.f32 %v527_v56, %v3729_v41  ;;  %v666_v15 = vmul.f32 %v3734_v44, %v552_v5 }
 0x13c   : > { %v554_v48 = vmax.f32 %v538_v17, 0.0 }
 0x13d   : > { %v697_v4 = vadd.f32 %v696_v62, %v675_v57  ;;  %v553_v24 = vmax.f32 %v537_v10, 0.0  ;;  %v681_v42 = vadd.f32 %v680_v45, %v666_v15 }
 0x142   : > { %v3762_v23 = vpop.permute.xlu2 %659 }
 0x143   : > { %v676_v53 = vmul.f32 %v3762_v23, %v562_v8 }
 0x145   : > { %v698_v14 = vsel %vm683_vm0, %v676_v53, 0.0 }
 0x146   : > { %v699_v50 = vadd.f32 %v698_v14, %v697_v4 }
 0x148   : > { %v3776_v11 = vpop.permute.xlu1 %604  ;;  %v700_v8 = vrot.slane %v699_v50, 4 }
 0x149   : > { %v667_v46 = vmul.f32 %v3776_v11, %v553_v24 }
 0x14a   : > { %v701_v53 = vadd.f32 %v700_v8, %v699_v50  ;;  %v711_v50 = vmul.f32 %v3788_v2, %v3503_v6 }
 0x14b   : > { %v682_v55 = vadd.f32 %v681_v42, %v667_v46  ;;  %v3786_v56 = vpop.permute.xlu2 %713 }
 0x14c   : > { %v702_v59 = vrot.slane %v701_v53, 2  ;;  %v716_v45 = vsub.f32 %v711_v50, %v3786_v56 }
 0x14e   : > { %v703_v63 = vadd.f32 %v702_v59, %v701_v53 }
 0x150   : > { %v704_v10 = vrot.slane %v703_v63, 1 }
 0x152   : > { %v705_v15 = vadd.f32 %v704_v10, %v703_v63 }
 0x153   : > { %v424_v20 = vpop.permute.xlu2 %423 }
 0x158   : > { %v3782_v51 = vpop.permute.xlu1 %610 }
 0x159   : > { %v668_v54 = vmul.f32 %v3782_v51, %v554_v48 }
 0x15b   : > { %v684_v57 = vsel %vm683_vm0, %v668_v54, 0.0 }
 0x15c   : > { %v685_v58 = vadd.f32 %v684_v57, %v682_v55 }
 0x15e   : > { %v686_v60 = vrot.slane %v685_v58, 4 }
 0x160   : > { %v407_v62 = vpop.permute.xlu1 %406  ;;  %v687_v14 = vadd.f32 %v686_v60, %v685_v58 }
 0x161   : > { %v409_v4 = vmax.f32 %v404_v18, %v407_v62 }
 0x162   : > { %v688_v3 = vrot.slane %v687_v14, 2 }
 0x163   : > { %v416_v19 = vmul.f32 0.5, %v409_v4 }
 0x164   : > { %v689_v9 = vadd.f32 %v688_v3, %v687_v14 }
 0x165   : > { %v426_v7 = vmul.f32 %v424_v20, %v416_v19 }
 0x166   : > { %v690_v5 = vrot.slane %v689_v9, 1 }
 0x168   : > { %v412_v17 = vpop.permute.xlu1 %411  ;;  %v691_v24 = vadd.f32 %v690_v5, %v689_v9 }
 0x169   : > { %v414_v8 = vadd.f32 %v412_v17, %v3688_v13 }
 0x16a   : > { %v720_v46 = vsel %vm719_vm1, %v705_v15, %v691_v24 }
 0x16b   : > { %v415_v18 = vmul.f32 0.5, %v414_v8  ;;  %v722_v48 = vadd.f32 %v720_v46, %v716_v45 }
 0x16d   : > { %v427_v42 = vsub.f32 %v415_v18, %v426_v7  ;;  %724 = vrot.lane.b32.xlu0 %v722_v48, %s3377_s27 }
 0x16f   : > { %730 = vrot.lane.b32.xlu1 %v427_v42, %s3377_s27 }
 0x1df   : > { %v725_v53 = vpop.permute.xlu0 %724 }
 0x1e0   : > { %v727_v54 = vsub.f32 %v722_v48, %v725_v53 }
 0x1e1   : > { %v731_v57 = vpop.permute.xlu1 %730 }
 0x1e2   : > { %v728_v55 = vmul.f32 20.0, %v727_v54 }
 0x1e4   : > { %v733_v58 = vsub.f32 %v728_v55, %v731_v57 }
 0x1e6   : > { %735 = vrot.lane.b32.xlu2 %v733_v58, %s3377_s27 }
 0x240   : > { %v736_v13 = vpop.permute.xlu2 %735 }
 0x241   : > { %v738_v59 = vsub.f32 %v733_v58, %v736_v13 }
 0x243   : > { %v739_v60 = vmul.f32 0.02, %v738_v59 }
 0x245   : > { %741 = vrot.lane.b32.xlu0 %v739_v60, %s3380_s6 }
 0x2b7   : > { %v742_v62 = vpop.permute.xlu0 %741 }
 0x2b8   : > { %v744_v14 = vadd.f32 %v742_v62, %v3503_v6 }
 0x2ba   : > { %749 = vrot.lane.b32.xlu2 %v744_v14, %s3377_s27  ;;  %746 = vrot.lane.b32.xlu1 %v744_v14, %s3380_s6 }
 0x314   : > { %v750_v3 = vpop.permute.xlu2 %749 }
 0x32c   : > { %v747_v63 = vpop.permute.xlu1 %746 }
 0x32d   : > { %v753_v4 = vsel %vm752_vm2, %v747_v63, %v744_v14 }
 0x32e   : > { %v3806_v9 = vsel %vm754_vm3, %v753_v4, %v750_v3 }
 0x32f   : > { %3089 = vst [vmem:[%s3490_s29 + $0x2] sm:$0x3] %v3806_v9  ;;  %944 = vrot.lane.b32.xlu0 %v3806_v9, %s3377_s27  ;;  %v3814_v6 = vmul.f32 %v3806_v9, %v3806_v9 }
 0x331   : > { %v3818_v10 = vmul.f32 %v3814_v6, %v3814_v6 }
 0x333   : > { %v846_v50 = vmul.f32 -0.0023600725, %v3818_v10  ;;  %v866_v5 = vmul.f32 0.00054402516, %v3818_v10  ;;  %v886_v19 = vmul.f32 -0.00011631614, %v3818_v10 }
 0x334   : > { %v906_v20 = vmul.f32 0.009546554, %v3818_v10  ;;  %v760_v17 = vmul.f32 0.00023866384, %v3818_v10  ;;  %v780_v24 = vmul.f32 -5.7562742e-05, %v3818_v10 }
 0x335   : > { %v847_v15 = vadd.f32 -0.42950746, %v846_v50  ;;  %v867_v8 = vadd.f32 0.1284797, %v866_v5  ;;  %v887_v45 = vadd.f32 -0.03614727, %v886_v19 }
 0x336   : > { %v907_v46 = vadd.f32 1.3521498, %v906_v20  ;;  %v761_v7 = vadd.f32 0.037559718, %v760_v17  ;;  %v781_v18 = vadd.f32 -0.011608309, %v780_v24 }
 0x337   : > { %v848_v48 = vmul.f32 %v847_v15, %v3818_v10  ;;  %v868_v42 = vmul.f32 %v867_v8, %v3818_v10  ;;  %v888_v53 = vmul.f32 %v887_v45, %v3818_v10  ;;  %v800_v54 = vmul.f32 1.295298e-05, %v3818_v10 }
 0x338   : > { %v908_v55 = vmul.f32 %v907_v46, %v3818_v10  ;;  %v762_v57 = vmul.f32 %v761_v7, %v3818_v10  ;;  %v782_v58 = vmul.f32 %v781_v18, %v3818_v10  ;;  %v820_v13 = vmul.f32 -2.7050266e-06, %v3818_v10 }
 0x339   : > { %v849_v59 = vadd.f32 -29.533041, %v848_v48  ;;  %v869_v60 = vadd.f32 11.214069, %v868_v42  ;;  %v889_v62 = vadd.f32 -4.011206, %v888_v53 }
 0x33a   : > { %v909_v14 = vadd.f32 73.19816, %v908_v55  ;;  %v763_v63 = vadd.f32 2.2874424, %v762_v57  ;;  %v783_v3 = vadd.f32 -0.8949406, %v782_v58 }
 0x33b   : > { %v850_v4 = vmul.f32 %v849_v59, %v3818_v10  ;;  %v870_v50 = vmul.f32 %v869_v60, %v3818_v10  ;;  %v890_v5 = vmul.f32 %v889_v62, %v3818_v10  ;;  %v801_v19 = vadd.f32 0.0033810446, %v800_v54 }
 0x33c   : > { %v910_v20 = vmul.f32 %v909_v14, %v3818_v10  ;;  %v764_v17 = vmul.f32 %v763_v63, %v3818_v10  ;;  %v784_v24 = vmul.f32 %v783_v3, %v3818_v10  ;;  %v821_v15 = vadd.f32 -0.0009268531, %v820_v13 }
 0x33d   : > { %v851_v8 = vadd.f32 -759.8274, %v850_v4  ;;  %v871_v45 = vadd.f32 372.27844, %v870_v50  ;;  %v891_v46 = vadd.f32 -170.481, %v890_v5  ;;  %v802_v7 = vmul.f32 %v801_v19, %v3818_v10 }
 0x33e   : > { %v911_v18 = vadd.f32 1443.1392, %v910_v20  ;;  %v765_v48 = vadd.f32 51.540684, %v764_v17  ;;  %v785_v42 = vadd.f32 -26.200945, %v784_v24  ;;  %v822_v53 = vmul.f32 %v821_v15, %v3818_v10 }
 0x33f   : > { %v852_v55 = vmul.f32 %v851_v8, %v3818_v10  ;;  %v872_v54 = vmul.f32 %v871_v45, %v3818_v10  ;;  %v892_v57 = vmul.f32 %v891_v46, %v3818_v10  ;;  %v803_v58 = vadd.f32 0.32982558, %v802_v7 }
 0x340   : > { %v912_v59 = vmul.f32 %v911_v18, %v3818_v10  ;;  %v766_v13 = vmul.f32 %v765_v48, %v3818_v10  ;;  %v786_v60 = vmul.f32 %v785_v42, %v3818_v10  ;;  %v823_v62 = vadd.f32 -0.114605896, %v822_v53 }
 0x341   : > { %v853_v14 = vadd.f32 -5921.507, %v852_v55  ;;  %v873_v63 = vadd.f32 4078.1116, %v872_v54  ;;  %v893_v3 = vadd.f32 -2534.6333, %v892_v57  ;;  %v804_v4 = vmul.f32 %v803_v58, %v3818_v10 }
 0x342   : > { %v913_v50 = vadd.f32 7555.5493, %v912_v59  ;;  %v767_v5 = vadd.f32 314.81454, %v766_v13  ;;  %v787_v19 = vadd.f32 -236.86026, %v786_v60  ;;  %v824_v20 = vmul.f32 %v823_v62, %v3818_v10 }
 0x343   : > { %v854_v17 = vmul.f32 %v853_v14, %v3818_v10  ;;  %v874_v24 = vmul.f32 %v873_v63, %v3818_v10  ;;  %v894_v15 = vmul.f32 %v893_v3, %v3818_v10  ;;  %v805_v8 = vadd.f32 12.409282, %v804_v4 }
 0x344   : > { %v914_v45 = vmul.f32 %v913_v50, %v3818_v10  ;;  %v768_v46 = vmul.f32 %v767_v5, %v3818_v10  ;;  %v788_v7 = vmul.f32 %v787_v19, %v3818_v10  ;;  %v825_v18 = vadd.f32 -5.4993873, %v824_v20 }
 0x345   : > { %v855_v48 = vadd.f32 -101.62451, %v854_v17  ;;  %v875_v42 = vadd.f32 5927.2085, %v874_v24  ;;  %v895_v53 = vadd.f32 -8004.5015, %v894_v15  ;;  %v806_v55 = vmul.f32 %v805_v8, %v3818_v10 }
 0x346   : > { %v915_v54 = vadd.f32 -9671.838, %v914_v45  ;;  %v769_v57 = vadd.f32 -483.59192, %v768_v46  ;;  %v789_v58 = vadd.f32 -4.8392625, %v788_v7  ;;  %v826_v59 = vmul.f32 %v825_v18, %v3818_v10 }
 0x347   : > { %v856_v13 = vmul.f32 %v855_v48, %v3818_v10  ;;  %v876_v60 = vmul.f32 %v875_v42, %v3818_v10  ;;  %v896_v62 = vmul.f32 %v895_v53, %v3818_v10  ;;  %v807_v14 = vadd.f32 156.85045, %v806_v55 }
 0x348   : > { %v916_v63 = vmul.f32 %v915_v54, %v3818_v10  ;;  %v770_v3 = vmul.f32 %v769_v57, %v3818_v10  ;;  %v790_v4 = vmul.f32 %v789_v58, %v3818_v10  ;;  %v827_v50 = vadd.f32 -93.875305, %v826_v59 }
 0x349   : > { %v857_v5 = vadd.f32 33612.613, %v856_v13  ;;  %v877_v19 = vadd.f32 -31339.127, %v876_v60  ;;  %v897_v20 = vadd.f32 21560.113, %v896_v62  ;;  %v808_v17 = vmul.f32 %v807_v14, %v3818_v10 }
 0x34a   : > { %v917_v24 = vadd.f32 -24900.613, %v916_v63  ;;  %v771_v15 = vadd.f32 -1556.2883, %v770_v3  ;;  %v791_v8 = vadd.f32 1977.2126, %v790_v4  ;;  %v828_v45 = vmul.f32 %v827_v50, %v3818_v10 }
 0x34b   : > { %v858_v46 = vmul.f32 %v857_v5, %v3818_v10  ;;  %v878_v7 = vmul.f32 %v877_v19, %v3818_v10  ;;  %v898_v18 = vmul.f32 %v897_v20, %v3818_v10  ;;  %v809_v48 = vadd.f32 269.41855, %v808_v17 }
 0x34c   : > { %v918_v42 = vmul.f32 %v917_v24, %v3818_v10  ;;  %v772_v53 = vmul.f32 %v771_v15, %v3818_v10  ;;  %v792_v55 = vmul.f32 %v791_v8, %v3818_v10  ;;  %v829_v54 = vadd.f32 -348.0218, %v828_v45 }
 0x34d   : > { %v859_v57 = vadd.f32 -18970.363, %v858_v46  ;;  %v879_v58 = vadd.f32 10782.539, %v878_v7  ;;  %v899_v59 = vadd.f32 7258.9697, %v898_v18  ;;  %v810_v13 = vmul.f32 %v809_v48, %v3818_v10 }
 0x34e   : > { %v919_v60 = vadd.f32 13821.433, %v918_v42  ;;  %v773_v62 = vadd.f32 1151.786, %v772_v53  ;;  %v793_v14 = vadd.f32 -1459.2588, %v792_v55  ;;  %v830_v63 = vmul.f32 %v829_v54, %v3818_v10 }
 0x34f   : > { %v860_v3 = vmul.f32 %v859_v57, %v3818_v10  ;;  %v880_v4 = vmul.f32 %v879_v58, %v3818_v10  ;;  %v900_v50 = vmul.f32 %v899_v59, %v3818_v10  ;;  %v811_v5 = vadd.f32 -1741.0626, %v810_v13 }
 0x350   : > { %v920_v19 = vmul.f32 %v919_v60, %v3818_v10  ;;  %v774_v20 = vmul.f32 %v773_v62, %v3818_v10  ;;  %v794_v17 = vmul.f32 %v793_v14, %v3818_v10  ;;  %v831_v24 = vadd.f32 1134.7428, %v830_v63 }
 0x351   : > { %v861_v15 = vadd.f32 5288.7705, %v860_v3  ;;  %v881_v8 = vadd.f32 -5306.1978, %v880_v4  ;;  %v901_v45 = vadd.f32 -2283.07, %v900_v50  ;;  %v812_v46 = vmul.f32 %v811_v5, %v3818_v10 }
 0x352   : > { %v921_v7 = vadd.f32 -1695.1128, %v920_v19  ;;  %v775_v18 = vadd.f32 -211.8891, %v774_v20  ;;  %v795_v48 = vadd.f32 587.6412, %v794_v17  ;;  %v832_v42 = vmul.f32 %v831_v24, %v3818_v10 }
 0x353   : > { %v862_v53 = vmul.f32 %v861_v15, %v3818_v10  ;;  %v882_v55 = vmul.f32 %v881_v8, %v3818_v10  ;;  %v902_v54 = vmul.f32 %v901_v45, %v3818_v10  ;;  %v813_v57 = vadd.f32 770.18134, %v812_v46 }
 0x354   : > { %v954_v58 = vrot.slane %v3806_v9, 1  ;;  %v922_v59 = vmul.f32 %v921_v7, %v3818_v10  ;;  %v796_v13 = vmul.f32 %v795_v48, %v3818_v10  ;;  %v833_v60 = vadd.f32 483.93134, %v832_v42 }
 0x355   : > { %v863_v62 = vadd.f32 -199.54787, %v862_v53  ;;  %v883_v14 = vadd.f32 707.5489, %v882_v55  ;;  %v903_v63 = vadd.f32 -628.074, %v902_v54  ;;  %v814_v3 = vmul.f32 %v813_v57, %v3818_v10 }
 0x356   : > { %v923_v4 = vadd.f32 109.42459, %v922_v59  ;;  %v776_v50 = vmul.f32 %v775_v18, %v3818_v10  ;;  %v797_v5 = vadd.f32 -39.909573, %v796_v13  ;;  %v834_v19 = vmul.f32 %v833_v60, %v3818_v10 }
 0x357   : > { %v864_v20 = vmul.f32 %v863_v62, %v3818_v10  ;;  %v884_v17 = vmul.f32 %v883_v14, %v3818_v10  ;;  %v904_v24 = vmul.f32 %v903_v63, %v3818_v10  ;;  %v815_v15 = vadd.f32 -530.61975, %v814_v3 }
 0x358   : > { %v3895_v8 = vperm.slane %v3806_v9, 0  ;;  %v3897_v45 = vperm.slane %v954_v58, 0  ;;  %v926_v46 = vmul.f32 %v923_v4, %v3806_v9  ;;  %v835_v7 = vadd.f32 -207.55182, %v834_v19 }
 0x359   : > { %v885_v48 = vadd.f32 29.501831, %v884_v17  ;;  %v905_v18 = vadd.f32 -113.73708, %v904_v24  ;;  %v798_v42 = vmul.f32 %v797_v5, %v3818_v10  ;;  %v816_v53 = vmul.f32 %v815_v15, %v3818_v10 }
 0x35a   : > { %v777_v55 = vadd.f32 27.356148, %v776_v50  ;;  %v836_v54 = vmul.f32 %v835_v7, %v3818_v10  ;;  %v865_v57 = vadd.f32 1.9084886, %v864_v20  ;;  %v959_v58 = vsub.f32 %v3895_v8, %v3712_v33 }
 0x35b   : > { %v924_v59 = vmul.f32 %v885_v48, %v3806_v9  ;;  %v927_v13 = vadd.f32 %v926_v46, %v905_v18  ;;  %v817_v60 = vadd.f32 117.92482, %v816_v53  ;;  %v960_v14 = vsub.f32 %v3895_v8, %v3691_v26 }
 0x35c   : > { %v837_v62 = vadd.f32 -89.72485, %v836_v54  ;;  %v961_v63 = vsub.f32 %v3895_v8, %v3667_v0  ;;  %v799_v50 = vadd.f32 1.9084886, %v798_v42  ;;  %v967_v5 = vsub.f32 %v3897_v45, %v3681_v22 }
 0x35d   : > { %v925_v3 = vadd.f32 %v924_v59, %v865_v57  ;;  %v928_v4 = vmul.f32 %v927_v13, %v3814_v6  ;;  %v818_v19 = vmul.f32 %v817_v60, %v3818_v10  ;;  %v962_v17 = vsub.f32 %v3895_v8, %v3679_v21 }
 0x35e   : > { %v838_v20 = vmul.f32 %v837_v62, %v3818_v10  ;;  %v968_v24 = vsub.f32 %v3897_v45, %v3657_v49  ;;  %v778_v46 = vmul.f32 %v777_v55, %v3818_v10  ;;  %v963_v7 = vsub.f32 %v3895_v8, %v3724_v39 }
 0x35f   : > { %v3919_v15 = vadd.f32 %v928_v4, %v925_v3  ;;  %v964_v48 = vsub.f32 %v3895_v8, %v3708_v31  ;;  %v969_v42 = vsub.f32 %v3897_v45, %v3698_v28  ;;  %v975_v53 = vmax.f32 %v959_v58, 0.0 }
 0x360   : > { %v839_v18 = vadd.f32 -37.91236, %v838_v20  ;;  %v976_v54 = vmax.f32 %v960_v14, 0.0  ;;  %v840_v59 = vmul.f32 %v799_v50, %v3806_v9  ;;  %v965_v13 = vsub.f32 %v3895_v8, %v3729_v41 }
 0x361   : > { %v5085_v57 = vand.u32 2147483647, %v3919_v15  ;;  %v983_v10 = vmax.f32 %v967_v5, 0.0  ;;  %v819_v55 = vadd.f32 14.750916, %v818_v19  ;;  %v970_v62 = vsub.f32 %v3897_v45, %v3718_v36 }
 0x362   : > { %v842_v60 = vmul.f32 %v839_v18, %v3806_v9  ;;  %v984_v3 = vmax.f32 %v968_v24, 0.0  ;;  %v779_v58 = vadd.f32 -0.025839344, %v778_v46  ;;  %v966_v14 = vsub.f32 %v3895_v8, %v3726_v40 }
 0x363   : > { %932 = vrot.lane.b32.xlu1 %v5085_v57, %s3380_s6  ;;  %v971_v4 = vsub.f32 %v3897_v45, %v3710_v32  ;;  %v977_v50 = vmax.f32 %v961_v63, 0.0  ;;  %v985_v19 = vmax.f32 %v969_v42, 0.0  ;;  %v991_v20 = vmul.f32 %v975_v53, %v3702_v29 }
 0x364   : > { %v843_v5 = vadd.f32 %v842_v60, %v819_v55  ;;  %v992_v18 = vmul.f32 %v976_v54, %v3693_v27  ;;  %v841_v36 = vadd.f32 %v840_v59, %v779_v58  ;;  %v972_v24 = vsub.f32 %v3897_v45, %v3741_v52 }
 0x365   : > { %v973_v46 = vsub.f32 %v3897_v45, %v3720_v37  ;;  %v999_v57 = vmul.f32 %v983_v10, %v3706_v30  ;;  %v978_v28 = vmax.f32 %v962_v17, 0.0  ;;  %v986_v32 = vmax.f32 %v970_v62, 0.0 }
 0x366   : > { %v844_v8 = vmul.f32 %v843_v5, %v3814_v6  ;;  %v1000_v63 = vmul.f32 %v984_v3, %v3700_v16  ;;  %v974_v42 = vsub.f32 %v3897_v45, %v3752_v1  ;;  %v979_v53 = vmax.f32 %v963_v7, 0.0 }
 0x367   : > { %v987_v54 = vmax.f32 %v971_v4, 0.0  ;;  %v993_v59 = vmul.f32 %v977_v50, %v3704_v25  ;;  %v1001_v60 = vmul.f32 %v985_v19, %v3716_v35  ;;  %v1007_v58 = vadd.f32 %v992_v18, %v991_v20 }
 0x368   : > { %v845_v55 = vadd.f32 %v844_v8, %v841_v36  ;;  %v1021_v27 = vadd.f32 %v1000_v63, %v999_v57  ;;  %v980_v29 = vmax.f32 %v964_v48, 0.0  ;;  %v988_v10 = vmax.f32 %v972_v24, 0.0 }
 0x369   : > { %v994_v6 = vmul.f32 %v978_v28, %v3722_v38  ;;  %v1002_v17 = vmul.f32 %v986_v32, %v3714_v34  ;;  %v1008_v62 = vadd.f32 %v1007_v58, %v993_v59  ;;  %v981_v45 = vmax.f32 %v965_v13, 0.0 }
 0x36a   : > { %937 = vrot.lane.b32.xlu2 %v845_v55, %s3380_s6  ;;  %v1022_v3 = vadd.f32 %v1021_v27, %v1001_v60  ;;  %v982_v7 = vmax.f32 %v966_v14, 0.0  ;;  %v989_v4 = vmax.f32 %v973_v46, 0.0  ;;  %v990_v5 = vmax.f32 %v974_v42, 0.0 }
 0x36b   : > { %v995_v36 = vmul.f32 %v979_v53, %v3731_v43  ;;  %v1003_v50 = vmul.f32 %v987_v54, %v3738_v47  ;;  %v1009_v19 = vadd.f32 %v1008_v62, %v994_v6  ;;  %v996_v48 = vmul.f32 %v980_v29, %v3734_v44 }
 0x36c   : > { %v1023_v57 = vadd.f32 %v1022_v3, %v1002_v17  ;;  %v1004_v20 = vmul.f32 %v988_v10, %v3760_v12  ;;  %v998_v32 = vmul.f32 %v982_v7, %v3782_v51  ;;  %v1006_v27 = vmul.f32 %v990_v5, %v3762_v23 }
 0x36d   : > { %v1010_v18 = vadd.f32 %v1009_v19, %v995_v36  ;;  %v997_v13 = vmul.f32 %v981_v45, %v3776_v11  ;;  %v1005_v14 = vmul.f32 %v989_v4, %v3748_v61  ;;  %v1035_v45 = vmul.f32 %v3806_v9, %v3788_v2 }
 0x36e   : > { %v1024_v28 = vadd.f32 %v1023_v57, %v1003_v50  ;;  %v1013_v42 = vsel %vm683_vm0, %v998_v32, 0.0  ;;  %v1027_v29 = vsel %vm683_vm0, %v1006_v27, 0.0  ;;  %v5137_v32 = vand.u32 2147483647, %v3919_v15 }
 0x36f   : > { %v1011_v24 = vadd.f32 %v1010_v18, %v996_v48  ;;  %v1036_v50 = vsub.f32 %v1035_v45, %v3786_v56 }
 0x370   : > { %v1025_v46 = vadd.f32 %v1024_v28, %v1004_v20 }
 0x371   : > { %v1012_v8 = vadd.f32 %v1011_v24, %v997_v13 }
 0x372   : > { %v1026_v63 = vadd.f32 %v1025_v46, %v1005_v14 }
 0x373   : > { %v1014_v53 = vadd.f32 %v1013_v42, %v1012_v8 }
 0x374   : > { %v1028_v54 = vadd.f32 %v1027_v29, %v1026_v63 }
 0x375   : > { %v1015_v59 = vrot.slane %v1014_v53, 4 }
 0x376   : > { %v1029_v60 = vrot.slane %v1028_v54, 4 }
 0x377   : > { %v1016_v58 = vadd.f32 %v1015_v59, %v1014_v53 }
 0x378   : > { %v1030_v10 = vadd.f32 %v1029_v60, %v1028_v54 }
 0x379   : > { %v1017_v6 = vrot.slane %v1016_v58, 2 }
 0x37a   : > { %v1031_v17 = vrot.slane %v1030_v10, 2 }
 0x37b   : > { %v1018_v62 = vadd.f32 %v1017_v6, %v1016_v58 }
 0x37c   : > { %v1032_v3 = vadd.f32 %v1031_v17, %v1030_v10 }
 0x37d   : > { %v1019_v7 = vrot.slane %v1018_v62, 1 }
 0x37e   : > { %v1033_v4 = vrot.slane %v1032_v3, 1 }
 0x37f   : > { %v1020_v5 = vadd.f32 %v1019_v7, %v1018_v62 }
 0x380   : > { %v1034_v36 = vadd.f32 %v1033_v4, %v1032_v3 }
 0x382   : > { %v1039_v19 = vsel %vm719_vm1, %v1034_v36, %v1020_v5 }
 0x383   : > { %v1041_v57 = vadd.f32 %v1039_v19, %v1036_v50 }
 0x385   : > { %1043 = vrot.lane.b32.xlu1 %v1041_v57, %s3377_s27 }
 0x3a1   : > { %v945_v48 = vpop.permute.xlu0 %944 }
 0x3a2   : > { %v947_v20 = vsub.f32 %v3806_v9, %v945_v48 }
 0x3a4   : > { %949 = vrot.lane.b32.xlu0 %v947_v20, %s3380_s6 }
 0x3c4   : > { %v938_v28 = vpop.permute.xlu2 %937 }
 0x3c5   : > { %v940_v13 = vadd.f32 %v938_v28, %v845_v55 }
 0x3c7   : > { %v941_v46 = vmul.f32 0.5, %v940_v13 }
 0x3d5   : > { %v933_v18 = vpop.permute.xlu1 %932 }
 0x3d6   : > { %v935_v27 = vmax.f32 %v5137_v32, %v933_v18 }
 0x3d8   : > { %v942_v14 = vmul.f32 0.5, %v935_v27 }
 0x3f7   : > { %v1044_v42 = vpop.permute.xlu1 %1043 }
 0x3f8   : > { %v1046_v29 = vsub.f32 %v1041_v57, %v1044_v42 }
 0x3fa   : > { %v1047_v53 = vmul.f32 20.0, %v1046_v29 }
 0x416   : > { %v950_v24 = vpop.permute.xlu0 %949 }
 0x417   : > { %v952_v8 = vmul.f32 %v950_v24, %v942_v14 }
 0x419   : > { %v953_v63 = vsub.f32 %v941_v46, %v952_v8 }
 0x41b   : > { %1049 = vrot.lane.b32.xlu2 %v953_v63, %s3377_s27 }
 0x475   : > { %v1050_v54 = vpop.permute.xlu2 %1049 }
 0x476   : > { %v1052_v59 = vsub.f32 %v1047_v53, %v1050_v54 }
 0x478   : > { %1054 = vrot.lane.b32.xlu0 %v1052_v59, %s3377_s27 }
 0x4ea   : > { %v1055_v60 = vpop.permute.xlu0 %1054 }
 0x4eb   : > { %v1057_v58 = vsub.f32 %v1052_v59, %v1055_v60 }
 0x4ed   : > { %v1058_v15 = vmul.f32 0.02, %v1057_v58 }
 0x4ef   : > { %1060 = vrot.lane.b32.xlu1 %v1058_v15, %s3380_s6 }
 0x561   : > { %v1061_v55 = vpop.permute.xlu1 %1060 }
 0x562   : > { %v1063_v10 = vadd.f32 %v1061_v55, %v3806_v9 }
 0x564   : > { %1068 = vrot.lane.b32.xlu0 %v1063_v10, %s3377_s27  ;;  %1065 = vrot.lane.b32.xlu2 %v1063_v10, %s3380_s6 }
 0x5be   : > { %v1066_v6 = vpop.permute.xlu2 %1065 }
 0x5bf   : > { %v1071_v17 = vsel %vm752_vm2, %v1066_v6, %v1063_v10 }
 0x5d6   : > { %v1069_v62 = vpop.permute.xlu0 %1068 }
 0x5d7   : > { %v3985_v3 = vsel %vm754_vm3, %v1071_v17, %v1069_v62 }
 0x5d8   : > { %3090 = vst [vmem:[%s3490_s29 + $0x4] sm:$0x3] %v3985_v3  ;;  %1261 = vrot.lane.b32.xlu1 %v3985_v3, %s3377_s27  ;;  %v3993_v45 = vmul.f32 %v3985_v3, %v3985_v3 }
 0x5da   : > { %v3997_v9 = vmul.f32 %v3993_v45, %v3993_v45 }
 0x5dc   : > { %v1163_v7 = vmul.f32 -0.0023600725, %v3997_v9  ;;  %v1183_v50 = vmul.f32 0.00054402516, %v3997_v9  ;;  %v1203_v32 = vmul.f32 -0.00011631614, %v3997_v9 }
 0x5dd   : > { %v1223_v53 = vmul.f32 0.009546554, %v3997_v9 }
 0x5de   : > { %v1164_v4 = vadd.f32 -0.42950746, %v1163_v7  ;;  %v1184_v57 = vadd.f32 0.1284797, %v1183_v50  ;;  %v1204_v14 = vadd.f32 -0.03614727, %v1203_v32 }
 0x5df   : > { %v1224_v58 = vadd.f32 1.3521498, %v1223_v53  ;;  %v1137_v53 = vmul.f32 -2.7050266e-06, %v3997_v9 }
 0x5e0   : > { %v1165_v5 = vmul.f32 %v1164_v4, %v3997_v9  ;;  %v1185_v20 = vmul.f32 %v1184_v57, %v3997_v9  ;;  %v1205_v8 = vmul.f32 %v1204_v14, %v3997_v9  ;;  %v1097_v57 = vmul.f32 -5.7562742e-05, %v3997_v9 }
 0x5e1   : > { %v1225_v6 = vmul.f32 %v1224_v58, %v3997_v9 }
 0x5e2   : > { %v1166_v36 = vadd.f32 -29.533041, %v1165_v5  ;;  %v1186_v28 = vadd.f32 11.214069, %v1185_v20  ;;  %v1206_v29 = vadd.f32 -4.011206, %v1205_v8 }
 0x5e3   : > { %v1226_v7 = vadd.f32 73.19816, %v1225_v6 }
 0x5e4   : > { %v1167_v19 = vmul.f32 %v1166_v36, %v3997_v9  ;;  %v1187_v13 = vmul.f32 %v1186_v28, %v3997_v9  ;;  %v1207_v60 = vmul.f32 %v1206_v29, %v3997_v9 }
 0x5e5   : > { %v1227_v50 = vmul.f32 %v1226_v7, %v3997_v9 }
 0x5e6   : > { %v1168_v48 = vadd.f32 -759.8274, %v1167_v19  ;;  %v1188_v46 = vadd.f32 372.27844, %v1187_v13  ;;  %v1208_v10 = vadd.f32 -170.481, %v1207_v60 }
 0x5e7   : > { %v1077_v19 = vmul.f32 0.00023866384, %v3997_v9  ;;  %v1228_v28 = vadd.f32 1443.1392, %v1227_v50 }
 0x5e8   : > { %v1169_v18 = vmul.f32 %v1168_v48, %v3997_v9  ;;  %v1189_v42 = vmul.f32 %v1188_v46, %v3997_v9  ;;  %v1209_v62 = vmul.f32 %v1208_v10, %v3997_v9  ;;  %v1117_v48 = vmul.f32 1.295298e-05, %v3997_v9 }
 0x5e9   : > { %v1078_v32 = vadd.f32 0.037559718, %v1077_v19  ;;  %v1229_v8 = vmul.f32 %v1228_v28, %v3997_v9 }
 0x5ea   : > { %v1170_v27 = vadd.f32 -5921.507, %v1169_v18  ;;  %v1190_v59 = vadd.f32 4078.1116, %v1189_v42  ;;  %v1210_v36 = vadd.f32 -2534.6333, %v1209_v62 }
 0x5eb   : > { %v1118_v13 = vadd.f32 0.0033810446, %v1117_v48  ;;  %v1230_v60 = vadd.f32 7555.5493, %v1229_v8 }
 0x5ec   : > { %v1171_v24 = vmul.f32 %v1170_v27, %v3997_v9  ;;  %v1191_v55 = vmul.f32 %v1190_v59, %v3997_v9  ;;  %v1211_v18 = vmul.f32 %v1210_v36, %v3997_v9  ;;  %v1098_v27 = vadd.f32 -0.011608309, %v1097_v57 }
 0x5ed   : > { %v1119_v29 = vmul.f32 %v1118_v13, %v3997_v9  ;;  %v1231_v62 = vmul.f32 %v1230_v60, %v3997_v9  ;;  %v1138_v36 = vadd.f32 -0.0009268531, %v1137_v53 }
 0x5ee   : > { %v1172_v63 = vadd.f32 -101.62451, %v1171_v24  ;;  %v1192_v17 = vadd.f32 5927.2085, %v1191_v55  ;;  %v1212_v46 = vadd.f32 -8004.5015, %v1211_v18  ;;  %v1099_v42 = vmul.f32 %v1098_v27, %v3997_v9 }
 0x5ef   : > { %v1120_v55 = vadd.f32 0.32982558, %v1119_v29  ;;  %v1232_v57 = vadd.f32 -9671.838, %v1231_v62  ;;  %v1139_v28 = vmul.f32 %v1138_v36, %v3997_v9 }
 0x5f0   : > { %v1173_v54 = vmul.f32 %v1172_v63, %v3997_v9  ;;  %v1193_v5 = vmul.f32 %v1192_v17, %v3997_v9  ;;  %v1079_v63 = vmul.f32 %v1078_v32, %v3997_v9  ;;  %v1213_v59 = vmul.f32 %v1212_v46, %v3997_v9 }
 0x5f2   : > { %v1174_v15 = vadd.f32 33612.613, %v1173_v54  ;;  %v1194_v20 = vadd.f32 -31339.127, %v1193_v5  ;;  %v1080_v58 = vadd.f32 2.2874424, %v1079_v63  ;;  %v1121_v5 = vmul.f32 %v1120_v55, %v3997_v9 }
 0x5f3   : > { %v1214_v17 = vadd.f32 21560.113, %v1213_v59  ;;  %v1140_v63 = vadd.f32 -0.114605896, %v1139_v28 }
 0x5f4   : > { %v1175_v4 = vmul.f32 %v1174_v15, %v3997_v9  ;;  %v1195_v24 = vmul.f32 %v1194_v20, %v3997_v9  ;;  %v1100_v15 = vadd.f32 -0.8949406, %v1099_v42  ;;  %v1081_v7 = vmul.f32 %v1080_v58, %v3997_v9 }
 0x5f5   : > { %v1215_v19 = vmul.f32 %v1214_v17, %v3997_v9  ;;  %v1122_v18 = vadd.f32 12.409282, %v1121_v5  ;;  %v1141_v58 = vmul.f32 %v1140_v63, %v3997_v9 }
 0x5f6   : > { %v1176_v14 = vadd.f32 -18970.363, %v1175_v4  ;;  %v1196_v54 = vadd.f32 10782.539, %v1195_v24  ;;  %v1101_v4 = vmul.f32 %v1100_v15, %v3997_v9  ;;  %v1082_v48 = vadd.f32 51.540684, %v1081_v7 }
 0x5f7   : > { %v1216_v13 = vadd.f32 7258.9697, %v1215_v19  ;;  %v1123_v8 = vmul.f32 %v1122_v18, %v3997_v9  ;;  %v1142_v7 = vadd.f32 -5.4993873, %v1141_v58 }
 0x5f8   : > { %v1177_v10 = vmul.f32 %v1176_v14, %v3997_v9  ;;  %v1197_v6 = vmul.f32 %v1196_v54, %v3997_v9  ;;  %v1102_v20 = vadd.f32 -26.200945, %v1101_v4  ;;  %v1233_v14 = vmul.f32 %v1232_v57, %v3997_v9 }
 0x5f9   : > { %v1083_v24 = vmul.f32 %v1082_v48, %v3997_v9  ;;  %v1217_v29 = vmul.f32 %v1216_v13, %v3997_v9  ;;  %v1124_v60 = vadd.f32 156.85045, %v1123_v8  ;;  %v1143_v48 = vmul.f32 %v1142_v7, %v3997_v9 }
 0x5fa   : > { %v1198_v50 = vadd.f32 -5306.1978, %v1197_v6  ;;  %v1178_v32 = vadd.f32 5288.7705, %v1177_v10  ;;  %v1103_v46 = vmul.f32 %v1102_v20, %v3997_v9  ;;  %v1234_v53 = vadd.f32 -24900.613, %v1233_v14 }
 0x5fb   : > { %v1084_v54 = vadd.f32 314.81454, %v1083_v24  ;;  %v1218_v55 = vadd.f32 -2283.07, %v1217_v29  ;;  %v1125_v62 = vmul.f32 %v1124_v60, %v3997_v9  ;;  %v1144_v14 = vadd.f32 -93.875305, %v1143_v48 }
 0x5fc   : > { %v1199_v27 = vmul.f32 %v1198_v50, %v3997_v9  ;;  %v1104_v59 = vadd.f32 -236.86026, %v1103_v46  ;;  %v1179_v15 = vmul.f32 %v1178_v32, %v3997_v9  ;;  %v1235_v10 = vmul.f32 %v1234_v53, %v3997_v9 }
 0x5fd   : > { %v1085_v6 = vmul.f32 %v1084_v54, %v3997_v9  ;;  %v1219_v5 = vmul.f32 %v1218_v55, %v3997_v9  ;;  %v1126_v57 = vadd.f32 269.41855, %v1125_v62  ;;  %v1145_v53 = vmul.f32 %v1144_v14, %v3997_v9 }
 0x5fe   : > { %v1200_v42 = vadd.f32 707.5489, %v1199_v27  ;;  %v1105_v17 = vmul.f32 %v1104_v59, %v3997_v9  ;;  %v1236_v36 = vadd.f32 13821.433, %v1235_v10  ;;  %v1180_v20 = vadd.f32 -199.54787, %v1179_v15 }
 0x5ff   : > { %v1086_v50 = vadd.f32 -483.59192, %v1085_v6  ;;  %v1220_v18 = vadd.f32 -628.074, %v1219_v5  ;;  %v1127_v13 = vmul.f32 %v1126_v57, %v3997_v9  ;;  %v1271_v54 = vrot.slane %v3985_v3, 1 }
 0x600   : > { %v1201_v4 = vmul.f32 %v1200_v42, %v3997_v9  ;;  %v1106_v19 = vadd.f32 -4.8392625, %v1105_v17  ;;  %v1237_v28 = vmul.f32 %v1236_v36, %v3997_v9  ;;  %v4061_v59 = vperm.slane %v3985_v3, 0 }
 0x601   : > { %v1087_v32 = vmul.f32 %v1086_v50, %v3997_v9  ;;  %v1221_v46 = vmul.f32 %v1220_v18, %v3997_v9  ;;  %v1128_v29 = vadd.f32 -1741.0626, %v1127_v13  ;;  %v1181_v60 = vmul.f32 %v1180_v20, %v3997_v9 }
 0x602   : > { %v1107_v27 = vmul.f32 %v1106_v19, %v3997_v9  ;;  %v1202_v24 = vadd.f32 29.501831, %v1201_v4  ;;  %v1238_v8 = vadd.f32 -1695.1128, %v1237_v28  ;;  %v1146_v6 = vadd.f32 -348.0218, %v1145_v53 }
 0x603   : > { %v1088_v63 = vadd.f32 -1556.2883, %v1087_v32  ;;  %v1129_v10 = vmul.f32 %v1128_v29, %v3997_v9  ;;  %v1222_v17 = vadd.f32 -113.73708, %v1221_v46  ;;  %v4070_v19 = vperm.slane %v1271_v54, 0 }
 0x604   : > { %v1108_v42 = vadd.f32 1977.2126, %v1107_v27  ;;  %v1239_v58 = vmul.f32 %v1238_v8, %v3997_v9  ;;  %v1241_v7 = vmul.f32 %v1202_v24, %v3985_v3  ;;  %v1147_v50 = vmul.f32 %v1146_v6, %v3997_v9 }
 0x605   : > { %v1089_v15 = vmul.f32 %v1088_v63, %v3997_v9  ;;  %v1130_v36 = vadd.f32 770.18134, %v1129_v10  ;;  %v1182_v57 = vadd.f32 1.9084886, %v1181_v60  ;;  %v1276_v20 = vsub.f32 %v4061_v59, %v3712_v33 }
 0x606   : > { %v1109_v55 = vmul.f32 %v1108_v42, %v3997_v9  ;;  %v1240_v62 = vadd.f32 109.42459, %v1239_v58  ;;  %v1148_v27 = vadd.f32 1134.7428, %v1147_v50  ;;  %v1277_v24 = vsub.f32 %v4061_v59, %v3691_v26 }
 0x607   : > { %v1090_v4 = vadd.f32 1151.786, %v1089_v15  ;;  %v1131_v32 = vmul.f32 %v1130_v36, %v3997_v9  ;;  %v1242_v13 = vadd.f32 %v1241_v7, %v1182_v57  ;;  %v1278_v46 = vsub.f32 %v4061_v59, %v3667_v0 }
 0x608   : > { %v1110_v5 = vadd.f32 -1459.2588, %v1109_v55  ;;  %v1243_v48 = vmul.f32 %v1240_v62, %v3985_v3  ;;  %v1149_v42 = vmul.f32 %v1148_v27, %v3997_v9  ;;  %v1279_v29 = vsub.f32 %v4061_v59, %v3679_v21 }
 0x609   : > { %v1091_v18 = vmul.f32 %v1090_v4, %v3997_v9  ;;  %v1132_v63 = vadd.f32 -530.61975, %v1131_v32  ;;  %v1280_v54 = vsub.f32 %v4061_v59, %v3724_v39  ;;  %v1281_v60 = vsub.f32 %v4061_v59, %v3708_v31  ;;  %v5138_v4 = vld [vmem:[#allocation16_spill] sm:$0xff] }
 0x60a   : > { %v1111_v28 = vmul.f32 %v1110_v5, %v3997_v9  ;;  %v1244_v14 = vadd.f32 %v1243_v48, %v1222_v17  ;;  %v1284_v58 = vsub.f32 %v4070_v19, %v3681_v22  ;;  %v1150_v10 = vadd.f32 483.93134, %v1149_v42  ;;  %v5139_v48 = vld [vmem:[#allocation21_spill] sm:$0xff]  ;;  %v5140_v32 = vld [vmem:[#allocation20_spill] sm:$0xff] }
 0x60b   : > { %v1092_v15 = vadd.f32 -211.8891, %v1091_v18  ;;  %v1285_v6 = vsub.f32 %v4070_v19, %v3657_v49  ;;  %v1282_v62 = vsub.f32 %v4061_v59, %v3729_v41  ;;  %v1283_v7 = vsub.f32 %v4061_v59, %v3726_v40 }
 0x60c   : > { %v1112_v8 = vadd.f32 587.6412, %v1111_v28  ;;  %v1245_v53 = vmul.f32 %v1244_v14, %v3993_v45  ;;  %v1286_v5 = vsub.f32 %v4070_v19, %v5138_v4  ;;  %v1133_v50 = vmul.f32 %v1132_v63, %v3997_v9  ;;  %v5142_v4 = vld [vmem:[#allocation15_spill] sm:$0xff] }
 0x60d   : > { %v1151_v57 = vmul.f32 %v1150_v10, %v3997_v9  ;;  %v1287_v18 = vsub.f32 %v4070_v19, %v5139_v48  ;;  %v1288_v27 = vsub.f32 %v4070_v19, %v5140_v32  ;;  %v1293_v14 = vmax.f32 %v1277_v24, 0.0  ;;  %v5141_v48 = vld [vmem:[#allocation18_spill] sm:$0xff] }
 0x60e   : > { %v1113_v55 = vmul.f32 %v1112_v8, %v3997_v9  ;;  %v4095_v17 = vadd.f32 %v1245_v53, %v1242_v13  ;;  %v1292_v13 = vmax.f32 %v1276_v20, 0.0  ;;  %v1093_v59 = vmul.f32 %v1092_v15, %v3997_v9 }
 0x60f   : > { %v1152_v8 = vadd.f32 -207.55182, %v1151_v57  ;;  %v1300_v42 = vmax.f32 %v1284_v58, 0.0  ;;  %v1301_v53 = vmax.f32 %v1285_v6, 0.0  ;;  %v1289_v63 = vsub.f32 %v4070_v19, %v3741_v52 }
 0x610   : > { %v1114_v36 = vadd.f32 -39.909573, %v1113_v55  ;;  %v5094_v28 = vand.u32 2147483647, %v4095_v17  ;;  %v1290_v55 = vsub.f32 %v4070_v19, %v3720_v37  ;;  %v1291_v10 = vsub.f32 %v4070_v19, %v3752_v1 }
 0x611   : > { %v1294_v20 = vmax.f32 %v1278_v46, 0.0  ;;  %v1134_v15 = vadd.f32 117.92482, %v1133_v50  ;;  %v1153_v58 = vmul.f32 %v1152_v8, %v3997_v9  ;;  %v1295_v6 = vmax.f32 %v1279_v29, 0.0 }
 0x612   : > { %1249 = vrot.lane.b32.xlu2 %v5094_v28, %s3380_s6  ;;  %v1115_v24 = vmul.f32 %v1114_v36, %v3997_v9  ;;  %v1296_v57 = vmax.f32 %v1280_v54, 0.0  ;;  %v1302_v32 = vmax.f32 %v1286_v5, 0.0  ;;  %v1308_v28 = vmul.f32 %v1292_v13, %v5141_v48 }
 0x613   : > { %v1309_v49 = vmul.f32 %v1293_v14, %v5142_v4  ;;  %v1094_v52 = vadd.f32 27.356148, %v1093_v59  ;;  %v1154_v22 = vadd.f32 -89.72485, %v1153_v58  ;;  %v1316_v37 = vmul.f32 %v1300_v42, %v3706_v30 }
 0x614   : > { %v1317_v40 = vmul.f32 %v1301_v53, %v3700_v16  ;;  %v1297_v19 = vmax.f32 %v1281_v60, 0.0  ;;  %v1298_v46 = vmax.f32 %v1282_v62, 0.0  ;;  %v1299_v1 = vmax.f32 %v1283_v7, 0.0 }
 0x615   : > { %v1303_v36 = vmax.f32 %v1287_v18, 0.0  ;;  %v1116_v50 = vadd.f32 1.9084886, %v1115_v24  ;;  %v1135_v8 = vmul.f32 %v1134_v15, %v3997_v9  ;;  %v1155_v29 = vmul.f32 %v1154_v22, %v3997_v9 }
 0x616   : > { %v1304_v54 = vmax.f32 %v1288_v27, 0.0  ;;  %v1310_v5 = vmul.f32 %v1294_v20, %v3704_v25  ;;  %v1318_v13 = vmul.f32 %v1302_v32, %v3716_v35  ;;  %v1324_v14 = vadd.f32 %v1309_v49, %v1308_v28 }
 0x617   : > { %v1338_v59 = vadd.f32 %v1317_v40, %v1316_v37  ;;  %v1095_v42 = vmul.f32 %v1094_v52, %v3997_v9  ;;  %v1156_v58 = vadd.f32 -37.91236, %v1155_v29  ;;  %v1305_v53 = vmax.f32 %v1289_v63, 0.0 }
 0x618   : > { %v1306_v60 = vmax.f32 %v1290_v55, 0.0  ;;  %v1311_v62 = vmul.f32 %v1295_v6, %v3722_v38  ;;  %v1319_v7 = vmul.f32 %v1303_v36, %v3714_v34  ;;  %v1325_v18 = vadd.f32 %v1324_v14, %v1310_v5 }
 0x619   : > { %v1339_v24 = vadd.f32 %v1338_v59, %v1318_v13  ;;  %v1136_v15 = vadd.f32 14.750916, %v1135_v8  ;;  %v1157_v22 = vmul.f32 %v1116_v50, %v3985_v3  ;;  %v1159_v27 = vmul.f32 %v1156_v58, %v3985_v3 }
 0x61a   : > { %v1307_v20 = vmax.f32 %v1291_v10, 0.0  ;;  %v1312_v49 = vmul.f32 %v1296_v57, %v3731_v43  ;;  %v1320_v37 = vmul.f32 %v1304_v54, %v3738_v47  ;;  %v1326_v40 = vadd.f32 %v1325_v18, %v1311_v62 }
 0x61b   : > { %v1340_v52 = vadd.f32 %v1339_v24, %v1319_v7  ;;  %v1096_v9 = vadd.f32 -0.025839344, %v1095_v42  ;;  %v1160_v28 = vadd.f32 %v1159_v27, %v1136_v15  ;;  %v1313_v32 = vmul.f32 %v1297_v19, %v3734_v44 }
 0x61c   : > { %v1321_v63 = vmul.f32 %v1305_v53, %v3760_v12  ;;  %v1327_v55 = vadd.f32 %v1326_v40, %v1312_v49  ;;  %v1315_v8 = vmul.f32 %v1299_v1, %v3782_v51  ;;  %v1323_v10 = vmul.f32 %v1307_v20, %v3762_v23 }
 0x61d   : > { %v1341_v6 = vadd.f32 %v1340_v52, %v1320_v37  ;;  %v1158_v36 = vadd.f32 %v1157_v22, %v1096_v9  ;;  %v1161_v50 = vmul.f32 %v1160_v28, %v3993_v45  ;;  %v1314_v57 = vmul.f32 %v1298_v46, %v3776_v11 }
 0x61e   : > { %v1322_v29 = vmul.f32 %v1306_v60, %v3748_v61  ;;  %v1328_v54 = vadd.f32 %v1327_v55, %v1313_v32  ;;  %v1330_v59 = vsel %vm683_vm0, %v1315_v8, 0.0  ;;  %v1344_v42 = vsel %vm683_vm0, %v1323_v10, 0.0 }
 0x61f   : > { %v1342_v5 = vadd.f32 %v1341_v6, %v1321_v63  ;;  %v1162_v13 = vadd.f32 %v1161_v50, %v1158_v36  ;;  %v1352_v15 = vmul.f32 %v3985_v3, %v3788_v2  ;;  %v5143_v55 = vand.u32 2147483647, %v4095_v17 }
 0x620   : > { %v1329_v14 = vadd.f32 %v1328_v54, %v1314_v57 }
 0x621   : > { %v1343_v19 = vadd.f32 %v1342_v5, %v1322_v29  ;;  %1254 = vrot.lane.b32.xlu0 %v1162_v13, %s3380_s6  ;;  %v1353_v37 = vsub.f32 %v1352_v15, %v3786_v56 }
 0x622   : > { %v1331_v45 = vadd.f32 %v1330_v59, %v1329_v14 }
 0x623   : > { %v1345_v58 = vadd.f32 %v1344_v42, %v1343_v19 }
 0x624   : > { %v1332_v1 = vrot.slane %v1331_v45, 4 }
 0x625   : > { %v1346_v53 = vrot.slane %v1345_v58, 4 }
 0x626   : > { %v1333_v62 = vadd.f32 %v1332_v1, %v1331_v45 }
 0x627   : > { %v1347_v7 = vadd.f32 %v1346_v53, %v1345_v58 }
 0x628   : > { %v1334_v46 = vrot.slane %v1333_v62, 2 }
 0x629   : > { %v1348_v18 = vrot.slane %v1347_v7, 2 }
 0x62a   : > { %v1335_v60 = vadd.f32 %v1334_v46, %v1333_v62 }
 0x62b   : > { %v1349_v24 = vadd.f32 %v1348_v18, %v1347_v7 }
 0x62c   : > { %v1336_v22 = vrot.slane %v1335_v60, 1 }
 0x62d   : > { %v1350_v27 = vrot.slane %v1349_v24, 1 }
 0x62e   : > { %v1337_v20 = vadd.f32 %v1336_v22, %v1335_v60 }
 0x62f   : > { %v1351_v49 = vadd.f32 %v1350_v27, %v1349_v24 }
 0x631   : > { %v1356_v40 = vsel %vm719_vm1, %v1351_v49, %v1337_v20 }
 0x632   : > { %v1358_v52 = vadd.f32 %v1356_v40, %v1353_v37 }
 0x634   : > { %1360 = vrot.lane.b32.xlu2 %v1358_v52, %s3377_s27 }
 0x64a   : > { %v1262_v9 = vpop.permute.xlu1 %1261 }
 0x64b   : > { %v1264_v28 = vsub.f32 %v3985_v3, %v1262_v9 }
 0x64d   : > { %1266 = vrot.lane.b32.xlu1 %v1264_v28, %s3380_s6 }
 0x66c   : > { %v1250_v32 = vpop.permute.xlu2 %1249 }
 0x66d   : > { %v1252_v6 = vmax.f32 %v5143_v55, %v1250_v32 }
 0x66f   : > { %v1259_v50 = vmul.f32 0.5, %v1252_v6 }
 0x68e   : > { %v1361_v54 = vpop.permute.xlu2 %1360 }
 0x68f   : > { %v1363_v5 = vsub.f32 %v1358_v52, %v1361_v54 }
 0x691   : > { %v1364_v14 = vmul.f32 20.0, %v1363_v5 }
 0x693   : > { %v1255_v63 = vpop.permute.xlu0 %1254 }
 0x694   : > { %v1257_v36 = vadd.f32 %v1255_v63, %v1162_v13 }
 0x696   : > { %v1258_v10 = vmul.f32 0.5, %v1257_v36 }
 0x6bf   : > { %v1267_v8 = vpop.permute.xlu1 %1266 }
 0x6c0   : > { %v1269_v57 = vmul.f32 %v1267_v8, %v1259_v50 }
 0x6c2   : > { %v1270_v29 = vsub.f32 %v1258_v10, %v1269_v57 }
 0x6c4   : > { %1366 = vrot.lane.b32.xlu0 %v1270_v29, %s3377_s27 }
 0x736   : > { %v1367_v19 = vpop.permute.xlu0 %1366 }
 0x737   : > { %v1369_v59 = vsub.f32 %v1364_v14, %v1367_v19 }
 0x739   : > { %1371 = vrot.lane.b32.xlu1 %v1369_v59, %s3377_s27 }
 0x7ab   : > { %v1372_v42 = vpop.permute.xlu1 %1371 }
 0x7ac   : > { %v1374_v45 = vsub.f32 %v1369_v59, %v1372_v42 }
 0x7ae   : > { %v1375_v17 = vmul.f32 0.02, %v1374_v45 }
 0x7b0   : > { %1377 = vrot.lane.b32.xlu2 %v1375_v17, %s3380_s6 }
 0x80a   : > { %v1378_v13 = vpop.permute.xlu2 %1377 }
 0x80b   : > { %v1380_v58 = vadd.f32 %v1378_v13, %v3985_v3 }
 0x80d   : > { %1385 = vrot.lane.b32.xlu1 %v1380_v58, %s3377_s27  ;;  %1382 = vrot.lane.b32.xlu0 %v1380_v58, %s3380_s6 }
 0x87f   : > { %v1386_v1 = vpop.permute.xlu1 %1385  ;;  %v1383_v53 = vpop.permute.xlu0 %1382 }
 0x880   : > { %v1388_v62 = vsel %vm752_vm2, %v1383_v53, %v1380_v58 }
 0x881   : > { %v4164_v7 = vsel %vm754_vm3, %v1388_v62, %v1386_v1 }
 0x882   : > { %3091 = vst [vmem:[%s3490_s29 + $0x6] sm:$0x3] %v4164_v7  ;;  %1578 = vrot.lane.b32.xlu2 %v4164_v7, %s3377_s27  ;;  %v4172_v46 = vmul.f32 %v4164_v7, %v4164_v7 }
 0x884   : > { %v4176_v3 = vmul.f32 %v4172_v46, %v4172_v46 }
 0x886   : > { %v1480_v18 = vmul.f32 -0.0023600725, %v4176_v3  ;;  %v1500_v22 = vmul.f32 0.00054402516, %v4176_v3  ;;  %v1520_v9 = vmul.f32 -0.00011631614, %v4176_v3 }
 0x887   : > { %v1540_v57 = vmul.f32 0.009546554, %v4176_v3 }
 0x888   : > { %v1481_v60 = vadd.f32 -0.42950746, %v1480_v18  ;;  %v1501_v20 = vadd.f32 0.1284797, %v1500_v22  ;;  %v1521_v63 = vadd.f32 -0.03614727, %v1520_v9 }
 0x889   : > { %v1541_v14 = vadd.f32 1.3521498, %v1540_v57  ;;  %v1394_v9 = vmul.f32 0.00023866384, %v4176_v3 }
 0x88a   : > { %v1482_v24 = vmul.f32 %v1481_v60, %v4176_v3  ;;  %v1502_v37 = vmul.f32 %v1501_v20, %v4176_v3  ;;  %v1522_v36 = vmul.f32 %v1521_v63, %v4176_v3 }
 0x88b   : > { %v1542_v45 = vmul.f32 %v1541_v14, %v4176_v3 }
 0x88c   : > { %v1483_v15 = vadd.f32 -29.533041, %v1482_v24  ;;  %v1503_v52 = vadd.f32 11.214069, %v1502_v37  ;;  %v1523_v10 = vadd.f32 -4.011206, %v1522_v36 }
 0x88d   : > { %v1543_v58 = vadd.f32 73.19816, %v1542_v45 }
 0x88e   : > { %v1484_v27 = vmul.f32 %v1483_v15, %v4176_v3  ;;  %v1504_v32 = vmul.f32 %v1503_v52, %v4176_v3  ;;  %v1524_v5 = vmul.f32 %v1523_v10, %v4176_v3 }
 0x88f   : > { %v1544_v18 = vmul.f32 %v1543_v58, %v4176_v3 }
 0x890   : > { %v1485_v49 = vadd.f32 -759.8274, %v1484_v27  ;;  %v1505_v6 = vadd.f32 372.27844, %v1504_v32  ;;  %v1525_v42 = vadd.f32 -170.481, %v1524_v5 }
 0x891   : > { %v1545_v15 = vadd.f32 1443.1392, %v1544_v18 }
 0x892   : > { %v1486_v40 = vmul.f32 %v1485_v49, %v4176_v3  ;;  %v1506_v8 = vmul.f32 %v1505_v6, %v4176_v3  ;;  %v1526_v13 = vmul.f32 %v1525_v42, %v4176_v3  ;;  %v1395_v6 = vadd.f32 0.037559718, %v1394_v9 }
 0x893   : > { %v1546_v49 = vmul.f32 %v1545_v15, %v4176_v3 }
 0x894   : > { %v1487_v28 = vadd.f32 -5921.507, %v1486_v40  ;;  %v1507_v54 = vadd.f32 4078.1116, %v1506_v8  ;;  %v1527_v62 = vadd.f32 -2534.6333, %v1526_v13  ;;  %v1396_v10 = vmul.f32 %v1395_v6, %v4176_v3 }
 0x895   : > { %v1547_v52 = vadd.f32 7555.5493, %v1546_v49 }
 0x896   : > { %v1488_v55 = vmul.f32 %v1487_v28, %v4176_v3  ;;  %v1508_v59 = vmul.f32 %v1507_v54, %v4176_v3  ;;  %v1528_v24 = vmul.f32 %v1527_v62, %v4176_v3  ;;  %v1397_v14 = vadd.f32 2.2874424, %v1396_v10 }
 0x897   : > { %v1434_v62 = vmul.f32 1.295298e-05, %v4176_v3 }
 0x898   : > { %v1489_v50 = vadd.f32 -101.62451, %v1488_v55  ;;  %v1509_v17 = vadd.f32 5927.2085, %v1508_v59  ;;  %v1529_v20 = vadd.f32 -8004.5015, %v1528_v24  ;;  %v1548_v55 = vmul.f32 %v1547_v52, %v4176_v3 }
 0x899   : > { %v1454_v24 = vmul.f32 -2.7050266e-06, %v4176_v3 }
 0x89a   : > { %v1490_v29 = vmul.f32 %v1489_v50, %v4176_v3  ;;  %v1510_v53 = vmul.f32 %v1509_v17, %v4176_v3  ;;  %v1530_v40 = vmul.f32 %v1529_v20, %v4176_v3  ;;  %v1549_v8 = vadd.f32 -9671.838, %v1548_v55 }
 0x89b   : > { %v1398_v17 = vmul.f32 %v1397_v14, %v4176_v3  ;;  %v1435_v20 = vadd.f32 0.0033810446, %v1434_v62  ;;  %v4235_v62 = vperm.slane %v4164_v7, 0 }
 0x89c   : > { %v1491_v19 = vadd.f32 33612.613, %v1490_v29  ;;  %v1511_v60 = vadd.f32 -31339.127, %v1510_v53  ;;  %v1531_v63 = vadd.f32 21560.113, %v1530_v40  ;;  %v1550_v5 = vmul.f32 %v1549_v8, %v4176_v3 }
 0x89d   : > { %v1399_v18 = vadd.f32 51.540684, %v1398_v17  ;;  %v1455_v40 = vadd.f32 -0.0009268531, %v1454_v24 }
 0x89e   : > { %v1492_v1 = vmul.f32 %v1491_v19, %v4176_v3  ;;  %v1512_v27 = vmul.f32 %v1511_v60, %v4176_v3  ;;  %v1532_v50 = vmul.f32 %v1531_v63, %v4176_v3  ;;  %v1414_v19 = vmul.f32 -5.7562742e-05, %v4176_v3 }
 0x89f   : > { %v1551_v45 = vadd.f32 -24900.613, %v1550_v5  ;;  %v1400_v49 = vmul.f32 %v1399_v18, %v4176_v3  ;;  %v1456_v6 = vmul.f32 %v1455_v40, %v4176_v3 }
 0x8a0   : > { %v1493_v22 = vadd.f32 -18970.363, %v1492_v1  ;;  %v1513_v37 = vadd.f32 10782.539, %v1512_v27  ;;  %v1533_v54 = vadd.f32 7258.9697, %v1532_v50 }
 0x8a1   : > { %v1415_v13 = vadd.f32 -0.011608309, %v1414_v19  ;;  %v1552_v53 = vmul.f32 %v1551_v45, %v4176_v3  ;;  %v1401_v63 = vadd.f32 314.81454, %v1400_v49 }
 0x8a2   : > { %v1494_v28 = vmul.f32 %v1493_v22, %v4176_v3  ;;  %v1514_v32 = vmul.f32 %v1513_v37, %v4176_v3  ;;  %v1534_v42 = vmul.f32 %v1533_v54, %v4176_v3  ;;  %v1457_v54 = vadd.f32 -0.114605896, %v1456_v6 }
 0x8a3   : > { %v1416_v60 = vmul.f32 %v1415_v13, %v4176_v3  ;;  %v1553_v27 = vadd.f32 13821.433, %v1552_v53  ;;  %v1593_v6 = vsub.f32 %v4235_v62, %v3712_v33 }
 0x8a4   : > { %v1515_v36 = vadd.f32 -5306.1978, %v1514_v32  ;;  %v1495_v57 = vadd.f32 5288.7705, %v1494_v28  ;;  %v1535_v1 = vadd.f32 -2283.07, %v1534_v42  ;;  %v1436_v32 = vmul.f32 %v1435_v20, %v4176_v3 }
 0x8a5   : > { %v1417_v37 = vadd.f32 -0.8949406, %v1416_v60  ;;  %v1554_v28 = vmul.f32 %v1553_v27, %v4176_v3  ;;  %v1458_v17 = vmul.f32 %v1457_v54, %v4176_v3  ;;  %v1596_v54 = vsub.f32 %v4235_v62, %v3679_v21 }
 0x8a6   : > { %v1516_v29 = vmul.f32 %v1515_v36, %v4176_v3  ;;  %v1496_v58 = vmul.f32 %v1495_v57, %v4176_v3  ;;  %v1536_v22 = vmul.f32 %v1535_v1, %v4176_v3  ;;  %v1437_v10 = vadd.f32 0.32982558, %v1436_v32 }
 0x8a7   : > { %v1418_v55 = vmul.f32 %v1417_v37, %v4176_v3  ;;  %v1555_v8 = vadd.f32 -1695.1128, %v1554_v28  ;;  %v1402_v57 = vmul.f32 %v1401_v63, %v4176_v3  ;;  %v1459_v24 = vadd.f32 -5.4993873, %v1458_v17 }
 0x8a8   : > { %v1517_v59 = vadd.f32 707.5489, %v1516_v29  ;;  %v1497_v52 = vadd.f32 -199.54787, %v1496_v58  ;;  %v1537_v9 = vadd.f32 -628.074, %v1536_v22  ;;  %v1438_v19 = vmul.f32 %v1437_v10, %v4176_v3 }
 0x8a9   : > { %v1419_v29 = vadd.f32 -26.200945, %v1418_v55  ;;  %v1556_v14 = vmul.f32 %v1555_v8, %v4176_v3  ;;  %v1403_v42 = vadd.f32 -483.59192, %v1402_v57  ;;  %v1460_v37 = vmul.f32 %v1459_v24, %v4176_v3 }
 0x8aa   : > { %v1518_v15 = vmul.f32 %v1517_v59, %v4176_v3  ;;  %v1538_v50 = vmul.f32 %v1537_v9, %v4176_v3  ;;  %v1498_v5 = vmul.f32 %v1497_v52, %v4176_v3  ;;  %v1588_v59 = vrot.slane %v4164_v7, 1 }
 0x8ab   : > { %v1420_v45 = vmul.f32 %v1419_v29, %v4176_v3  ;;  %v1557_v58 = vadd.f32 109.42459, %v1556_v14  ;;  %v1439_v53 = vadd.f32 12.409282, %v1438_v19  ;;  %v1404_v18 = vmul.f32 %v1403_v42, %v4176_v3 }
 0x8ac   : > { %v1519_v36 = vadd.f32 29.501831, %v1518_v15  ;;  %v1539_v13 = vadd.f32 -113.73708, %v1538_v50  ;;  %v1499_v15 = vadd.f32 1.9084886, %v1498_v5  ;;  %v1594_v8 = vsub.f32 %v4235_v62, %v3691_v26 }
 0x8ad   : > { %v1421_v60 = vadd.f32 -236.86026, %v1420_v45  ;;  %v1560_v22 = vmul.f32 %v1557_v58, %v4164_v7  ;;  %v1440_v27 = vmul.f32 %v1439_v53, %v4176_v3  ;;  %v1405_v20 = vadd.f32 -1556.2883, %v1404_v18  ;;  %v5144_v58 = vld [vmem:[#allocation23_spill] sm:$0xff] }
 0x8ae   : > { %v1558_v1 = vmul.f32 %v1519_v36, %v4164_v7  ;;  %v4242_v40 = vperm.slane %v1588_v59, 0  ;;  %v1461_v55 = vadd.f32 -93.875305, %v1460_v37  ;;  %v1595_v10 = vsub.f32 %v4235_v62, %v3667_v0 }
 0x8af   : > { %v1422_v49 = vmul.f32 %v1421_v60, %v4176_v3  ;;  %v1561_v9 = vadd.f32 %v1560_v22, %v1539_v13  ;;  %v1441_v28 = vadd.f32 156.85045, %v1440_v27  ;;  %v1406_v32 = vmul.f32 %v1405_v20, %v4176_v3  ;;  %v5145_v60 = vld [vmem:[#allocation14_spill] sm:$0xff] }
 0x8b0   : > { %v1559_v52 = vadd.f32 %v1558_v1, %v1499_v15  ;;  %v1462_v29 = vmul.f32 %v1461_v55, %v4176_v3  ;;  %v1597_v5 = vsub.f32 %v4235_v62, %v3724_v39  ;;  %v1598_v42 = vsub.f32 %v4235_v62, %v3708_v31  ;;  %v5146_v15 = vld [vmem:[#allocation13_spill] sm:$0xff] }
 0x8b1   : > { %v1423_v63 = vadd.f32 -4.8392625, %v1422_v49  ;;  %v1562_v36 = vmul.f32 %v1561_v9, %v4172_v46  ;;  %v1442_v50 = vmul.f32 %v1441_v28, %v4176_v3  ;;  %v1407_v19 = vadd.f32 1151.786, %v1406_v32  ;;  %v5147_v49 = vld [vmem:[#allocation16_spill] sm:$0xff]  ;;  %v5150_v55 = vld [vmem:[#allocation25_spill] sm:$0xff] }
 0x8b2   : > { %v1463_v17 = vadd.f32 -348.0218, %v1462_v29  ;;  %v1599_v13 = vsub.f32 %v4235_v62, %v3729_v41  ;;  %v1600_v1 = vsub.f32 %v4235_v62, %v5144_v58  ;;  %v1601_v24 = vsub.f32 %v4242_v40, %v5145_v60  ;;  %v5149_v32 = vld [vmem:[#allocation20_spill] sm:$0xff]  ;;  %v5151_v29 = vld [vmem:[#allocation22_spill] sm:$0xff] }
 0x8b3   : > { %v1424_v57 = vmul.f32 %v1423_v63, %v4176_v3  ;;  %v4259_v14 = vadd.f32 %v1562_v36, %v1559_v52  ;;  %v1443_v59 = vadd.f32 269.41855, %v1442_v50  ;;  %v1602_v22 = vsub.f32 %v4242_v40, %v5146_v15  ;;  %v5148_v52 = vld [vmem:[#allocation21_spill] sm:$0xff]  ;;  %v5152_v58 = vld [vmem:[#allocation26_spill] sm:$0xff] }
 0x8b4   : > { %v1464_v20 = vmul.f32 %v1463_v17, %v4176_v3  ;;  %v1603_v37 = vsub.f32 %v4242_v40, %v5147_v49  ;;  %v1604_v62 = vsub.f32 %v4242_v40, %v5148_v52  ;;  %v1408_v9 = vmul.f32 %v1407_v19, %v4176_v3 }
 0x8b5   : > { %v1425_v45 = vadd.f32 1977.2126, %v1424_v57  ;;  %v5107_v53 = vand.u32 2147483647, %v4259_v14  ;;  %v1444_v18 = vmul.f32 %v1443_v59, %v4176_v3  ;;  %v1605_v63 = vsub.f32 %v4242_v40, %v5149_v32 }
 0x8b6   : > { %v1606_v36 = vsub.f32 %v4242_v40, %v5150_v55  ;;  %v1465_v57 = vadd.f32 1134.7428, %v1464_v20  ;;  %v1607_v59 = vsub.f32 %v4242_v40, %v5151_v29  ;;  %v1610_v52 = vmax.f32 %v1594_v8, 0.0 }
 0x8b7   : > { %v1426_v27 = vmul.f32 %v1425_v45, %v4176_v3  ;;  %1566 = vrot.lane.b32.xlu0 %v5107_v53, %s3380_s6  ;;  %v1445_v28 = vadd.f32 -1741.0626, %v1444_v18  ;;  %v1609_v45 = vmax.f32 %v1593_v6, 0.0  ;;  %v1617_v49 = vmax.f32 %v1601_v24, 0.0 }
 0x8b8   : > { %v1618_v53 = vmax.f32 %v1602_v22, 0.0  ;;  %v1466_v18 = vmul.f32 %v1465_v57, %v4176_v3  ;;  %v1608_v32 = vsub.f32 %v4242_v40, %v5152_v58  ;;  %v1611_v41 = vmax.f32 %v1595_v10, 0.0 }
 0x8b9   : > { %v1427_v50 = vadd.f32 -1459.2588, %v1426_v27  ;;  %v1446_v17 = vmul.f32 %v1445_v28, %v4176_v3  ;;  %v1409_v55 = vadd.f32 -211.8891, %v1408_v9  ;;  %v1612_v20 = vmax.f32 %v1596_v54, 0.0 }
 0x8ba   : > { %v1613_v31 = vmax.f32 %v1597_v5, 0.0  ;;  %v1467_v29 = vadd.f32 483.93134, %v1466_v18  ;;  %v1619_v6 = vmax.f32 %v1603_v37, 0.0  ;;  %v1625_v28 = vmul.f32 %v1609_v45, %v5141_v48 }
 0x8bb   : > { %v1428_v19 = vmul.f32 %v1427_v50, %v4176_v3  ;;  %v1447_v27 = vadd.f32 770.18134, %v1446_v17  ;;  %v1626_v24 = vmul.f32 %v1610_v52, %v5142_v4  ;;  %v1633_v22 = vmul.f32 %v1617_v49, %v3706_v30 }
 0x8bc   : > { %v1634_v50 = vmul.f32 %v1618_v53, %v3700_v16  ;;  %v1468_v10 = vmul.f32 %v1467_v29, %v4176_v3  ;;  %v1614_v9 = vmax.f32 %v1598_v42, 0.0  ;;  %v1615_v54 = vmax.f32 %v1599_v13, 0.0 }
 0x8bd   : > { %v1429_v15 = vadd.f32 587.6412, %v1428_v19  ;;  %v1448_v8 = vmul.f32 %v1447_v27, %v4176_v3  ;;  %v1616_v57 = vmax.f32 %v1600_v1, 0.0  ;;  %v1620_v17 = vmax.f32 %v1604_v62, 0.0 }
 0x8be   : > { %v1621_v37 = vmax.f32 %v1605_v63, 0.0  ;;  %v1410_v45 = vmul.f32 %v1409_v55, %v4176_v3  ;;  %v1469_v18 = vadd.f32 -207.55182, %v1468_v10  ;;  %v1627_v52 = vmul.f32 %v1611_v41, %v3704_v25 }
 0x8bf   : > { %v1430_v40 = vmul.f32 %v1429_v15, %v4176_v3  ;;  %v1449_v5 = vadd.f32 -530.61975, %v1448_v8  ;;  %v1635_v53 = vmul.f32 %v1619_v6, %v3716_v35  ;;  %v1641_v27 = vadd.f32 %v1626_v24, %v1625_v28 }
 0x8c0   : > { %v1655_v15 = vadd.f32 %v1634_v50, %v1633_v22  ;;  %v1470_v42 = vmul.f32 %v1469_v18, %v4176_v3  ;;  %v1622_v13 = vmax.f32 %v1606_v36, 0.0  ;;  %v1628_v1 = vmul.f32 %v1612_v20, %v3722_v38 }
 0x8c1   : > { %v1431_v19 = vadd.f32 -39.909573, %v1430_v40  ;;  %v1450_v49 = vmul.f32 %v1449_v5, %v4176_v3  ;;  %v1636_v63 = vmul.f32 %v1620_v17, %v3714_v34  ;;  %v1642_v55 = vadd.f32 %v1641_v27, %v1627_v52 }
 0x8c2   : > { %v1656_v8 = vadd.f32 %v1655_v15, %v1635_v53  ;;  %v1411_v40 = vadd.f32 27.356148, %v1410_v45  ;;  %v1471_v41 = vadd.f32 -89.72485, %v1470_v42  ;;  %v1623_v10 = vmax.f32 %v1607_v59, 0.0 }
 0x8c3   : > { %v1432_v29 = vmul.f32 %v1431_v19, %v4176_v3  ;;  %v1451_v62 = vadd.f32 117.92482, %v1450_v49  ;;  %v1624_v5 = vmax.f32 %v1608_v32, 0.0  ;;  %v1629_v6 = vmul.f32 %v1613_v31, %v3731_v43 }
 0x8c4   : > { %v1637_v28 = vmul.f32 %v1621_v37, %v3738_v47  ;;  %v1643_v24 = vadd.f32 %v1642_v55, %v1628_v1  ;;  %v1657_v22 = vadd.f32 %v1656_v8, %v1636_v63  ;;  %v1472_v20 = vmul.f32 %v1471_v41, %v4176_v3 }
 0x8c5   : > { %v1433_v50 = vadd.f32 1.9084886, %v1432_v29  ;;  %v1452_v36 = vmul.f32 %v1451_v62, %v4176_v3  ;;  %v1630_v19 = vmul.f32 %v1614_v9, %v3734_v44  ;;  %v1638_v17 = vmul.f32 %v1622_v13, %v3760_v12 }
 0x8c6   : > { %v1644_v18 = vadd.f32 %v1643_v24, %v1629_v6  ;;  %v1658_v45 = vadd.f32 %v1657_v22, %v1637_v28  ;;  %v1412_v59 = vmul.f32 %v1411_v40, %v4176_v3  ;;  %v1473_v32 = vadd.f32 -37.91236, %v1472_v20 }
 0x8c7   : > { %v1632_v31 = vmul.f32 %v1616_v57, %v3782_v51  ;;  %v1640_v37 = vmul.f32 %v1624_v5, %v3762_v23  ;;  %v1631_v52 = vmul.f32 %v1615_v54, %v3776_v11  ;;  %v1639_v49 = vmul.f32 %v1623_v10, %v3748_v61 }
 0x8c8   : > { %v1645_v53 = vadd.f32 %v1644_v18, %v1630_v19  ;;  %v1659_v27 = vadd.f32 %v1658_v45, %v1638_v17  ;;  %v1453_v15 = vadd.f32 14.750916, %v1452_v36  ;;  %v1474_v9 = vmul.f32 %v1433_v50, %v4164_v7 }
 0x8c9   : > { %v1476_v29 = vmul.f32 %v1473_v32, %v4164_v7  ;;  %v1413_v1 = vadd.f32 -0.025839344, %v1412_v59  ;;  %v1647_v62 = vsel %vm683_vm0, %v1632_v31, 0.0  ;;  %v1661_v57 = vsel %vm683_vm0, %v1640_v37, 0.0 }
 0x8ca   : > { %v1646_v42 = vadd.f32 %v1645_v53, %v1631_v52  ;;  %v1660_v13 = vadd.f32 %v1659_v27, %v1639_v49  ;;  %v1669_v19 = vmul.f32 %v4164_v7, %v3788_v2  ;;  %v5153_v52 = vand.u32 2147483647, %v4259_v14 }
 0x8cb   : > { %v1477_v3 = vadd.f32 %v1476_v29, %v1453_v15  ;;  %v1475_v8 = vadd.f32 %v1474_v9, %v1413_v1 }
 0x8cc   : > { %v1648_v63 = vadd.f32 %v1647_v62, %v1646_v42  ;;  %v1662_v55 = vadd.f32 %v1661_v57, %v1660_v13  ;;  %v1670_v59 = vsub.f32 %v1669_v19, %v3786_v56 }
 0x8cd   : > { %v1478_v40 = vmul.f32 %v1477_v3, %v4172_v46 }
 0x8ce   : > { %v1649_v10 = vrot.slane %v1648_v63, 4  ;;  %v1663_v5 = vrot.slane %v1662_v55, 4 }
 0x8cf   : > { %v1479_v6 = vadd.f32 %v1478_v40, %v1475_v8 }
 0x8d0   : > { %v1650_v28 = vadd.f32 %v1649_v10, %v1648_v63  ;;  %v1664_v24 = vadd.f32 %v1663_v5, %v1662_v55 }
 0x8d1   : > { %1571 = vrot.lane.b32.xlu1 %v1479_v6, %s3380_s6 }
 0x8d2   : > { %v1651_v22 = vrot.slane %v1650_v28, 2  ;;  %v1665_v50 = vrot.slane %v1664_v24, 2 }
 0x8d4   : > { %v1652_v36 = vadd.f32 %v1651_v22, %v1650_v28  ;;  %v1666_v20 = vadd.f32 %v1665_v50, %v1664_v24 }
 0x8d6   : > { %v1653_v17 = vrot.slane %v1652_v36, 1  ;;  %v1667_v46 = vrot.slane %v1666_v20, 1 }
 0x8d8   : > { %v1654_v18 = vadd.f32 %v1653_v17, %v1652_v36  ;;  %v1668_v45 = vadd.f32 %v1667_v46, %v1666_v20 }
 0x8da   : > { %v1673_v32 = vsel %vm719_vm1, %v1668_v45, %v1654_v18 }
 0x8db   : > { %v1675_v31 = vadd.f32 %v1673_v32, %v1670_v59 }
 0x8dc   : > { %v1579_v54 = vpop.permute.xlu2 %1578 }
 0x8dd   : > { %v1581_v41 = vsub.f32 %v4164_v7, %v1579_v54  ;;  %1677 = vrot.lane.b32.xlu0 %v1675_v31, %s3377_s27 }
 0x8df   : > { %1583 = vrot.lane.b32.xlu2 %v1581_v41, %s3380_s6 }
 0x929   : > { %v1567_v37 = vpop.permute.xlu0 %1566 }
 0x92a   : > { %v1569_v49 = vmax.f32 %v5153_v52, %v1567_v37 }
 0x92c   : > { %v1576_v27 = vmul.f32 0.5, %v1569_v49 }
 0x939   : > { %v1584_v53 = vpop.permute.xlu2 %1583 }
 0x93a   : > { %v1586_v29 = vmul.f32 %v1584_v53, %v1576_v27 }
 0x943   : > { %v1572_v15 = vpop.permute.xlu1 %1571 }
 0x944   : > { %v1574_v9 = vadd.f32 %v1572_v15, %v1479_v6 }
 0x946   : > { %v1575_v42 = vmul.f32 0.5, %v1574_v9 }
 0x948   : > { %v1587_v13 = vsub.f32 %v1575_v42, %v1586_v29 }
 0x94a   : > { %1683 = vrot.lane.b32.xlu1 %v1587_v13, %s3377_s27 }
 0x94f   : > { %v1678_v1 = vpop.permute.xlu0 %1677 }
 0x950   : > { %v1680_v3 = vsub.f32 %v1675_v31, %v1678_v1 }
 0x952   : > { %v1681_v62 = vmul.f32 20.0, %v1680_v3 }
 0x9bc   : > { %v1684_v57 = vpop.permute.xlu1 %1683 }
 0x9bd   : > { %v1686_v63 = vsub.f32 %v1681_v62, %v1684_v57 }
 0x9bf   : > { %1688 = vrot.lane.b32.xlu2 %v1686_v63, %s3377_s27 }
 0xa19   : > { %v1689_v55 = vpop.permute.xlu2 %1688 }
 0xa1a   : > { %v1691_v14 = vsub.f32 %v1686_v63, %v1689_v55 }
 0xa1c   : > { %v1692_v54 = vmul.f32 0.02, %v1691_v14 }
 0xa1e   : > { %1694 = vrot.lane.b32.xlu0 %v1692_v54, %s3380_s6 }
 0xa90   : > { %v1695_v8 = vpop.permute.xlu0 %1694 }
 0xa91   : > { %v1697_v40 = vadd.f32 %v1695_v8, %v4164_v7 }
 0xa93   : > { %1702 = vrot.lane.b32.xlu2 %v1697_v40, %s3377_s27  ;;  %1699 = vrot.lane.b32.xlu1 %v1697_v40, %s3380_s6 }
 0xaed   : > { %v1703_v10 = vpop.permute.xlu2 %1702 }
 0xb05   : > { %v1700_v41 = vpop.permute.xlu1 %1699 }
 0xb06   : > { %v1705_v5 = vsel %vm752_vm2, %v1700_v41, %v1697_v40 }
 0xb07   : > { %v4343_v6 = vsel %vm754_vm3, %v1705_v5, %v1703_v10 }
 0xb08   : > { %3092 = vst [vmem:[%s3490_s29 + $0x8] sm:$0x3] %v4343_v6  ;;  %1895 = vrot.lane.b32.xlu0 %v4343_v6, %s3377_s27  ;;  %v4351_v28 = vmul.f32 %v4343_v6, %v4343_v6 }
 0xb0a   : > { %v4355_v7 = vmul.f32 %v4351_v28, %v4351_v28 }
 0xb0c   : > { %v1797_v24 = vmul.f32 -0.0023600725, %v4355_v7  ;;  %v1817_v20 = vmul.f32 0.00054402516, %v4355_v7  ;;  %v1837_v32 = vmul.f32 -0.00011631614, %v4355_v7 }
 0xb0d   : > { %v1857_v15 = vmul.f32 0.009546554, %v4355_v7  ;;  %v1711_v9 = vmul.f32 0.00023866384, %v4355_v7  ;;  %v1731_v29 = vmul.f32 -5.7562742e-05, %v4355_v7 }
 0xb0e   : > { %v1798_v22 = vadd.f32 -0.42950746, %v1797_v24  ;;  %v1818_v17 = vadd.f32 0.1284797, %v1817_v20  ;;  %v1838_v52 = vadd.f32 -0.03614727, %v1837_v32 }
 0xb0f   : > { %v1751_v3 = vmul.f32 1.295298e-05, %v4355_v7  ;;  %v1858_v62 = vadd.f32 1.3521498, %v1857_v15  ;;  %v1712_v57 = vadd.f32 0.037559718, %v1711_v9 }
 0xb10   : > { %v1799_v50 = vmul.f32 %v1798_v22, %v4355_v7  ;;  %v1819_v18 = vmul.f32 %v1818_v17, %v4355_v7  ;;  %v1839_v27 = vmul.f32 %v1838_v52, %v4355_v7  ;;  %v1732_v63 = vadd.f32 -0.011608309, %v1731_v29 }
 0xb11   : > { %v1752_v8 = vadd.f32 0.0033810446, %v1751_v3  ;;  %v1859_v40 = vmul.f32 %v1858_v62, %v4355_v7  ;;  %v1713_v41 = vmul.f32 %v1712_v57, %v4355_v7  ;;  %v1771_v5 = vmul.f32 -2.7050266e-06, %v4355_v7 }
 0xb12   : > { %v1800_v36 = vadd.f32 -29.533041, %v1799_v50  ;;  %v1820_v59 = vadd.f32 11.214069, %v1819_v18  ;;  %v1840_v1 = vadd.f32 -4.011206, %v1839_v27  ;;  %v1733_v10 = vmul.f32 %v1732_v63, %v4355_v7 }
 0xb13   : > { %v1860_v20 = vadd.f32 73.19816, %v1859_v40  ;;  %v1772_v52 = vadd.f32 -0.0009268531, %v1771_v5 }
 0xb14   : > { %v1801_v19 = vmul.f32 %v1800_v36, %v4355_v7  ;;  %v1821_v37 = vmul.f32 %v1820_v59, %v4355_v7  ;;  %v1841_v54 = vmul.f32 %v1840_v1, %v4355_v7  ;;  %v1753_v36 = vmul.f32 %v1752_v8, %v4355_v7 }
 0xb15   : > { %v1734_v17 = vadd.f32 -0.8949406, %v1733_v10  ;;  %v1861_v32 = vmul.f32 %v1860_v20, %v4355_v7 }
 0xb16   : > { %v1802_v46 = vadd.f32 -759.8274, %v1801_v19  ;;  %v1822_v53 = vadd.f32 372.27844, %v1821_v37  ;;  %v1842_v50 = vadd.f32 -170.481, %v1841_v54 }
 0xb17   : > { %v1714_v19 = vadd.f32 2.2874424, %v1713_v41  ;;  %v1754_v59 = vadd.f32 0.32982558, %v1753_v36  ;;  %v1735_v37 = vmul.f32 %v1734_v17, %v4355_v7  ;;  %v1862_v15 = vadd.f32 1443.1392, %v1861_v32 }
 0xb18   : > { %v1803_v45 = vmul.f32 %v1802_v46, %v4355_v7  ;;  %v1823_v13 = vmul.f32 %v1822_v53, %v4355_v7 }
 0xb19   : > { %v1755_v27 = vmul.f32 %v1754_v59, %v4355_v7  ;;  %v1736_v29 = vadd.f32 -26.200945, %v1735_v37  ;;  %v1863_v57 = vmul.f32 %v1862_v15, %v4355_v7 }
 0xb1a   : > { %v1804_v31 = vadd.f32 -5921.507, %v1803_v45  ;;  %v1824_v14 = vadd.f32 4078.1116, %v1823_v13  ;;  %v1843_v45 = vmul.f32 %v1842_v50, %v4355_v7 }
 0xb1b   : > { %v1756_v62 = vadd.f32 12.409282, %v1755_v27  ;;  %v1864_v41 = vadd.f32 7555.5493, %v1863_v57 }
 0xb1c   : > { %v1805_v49 = vmul.f32 %v1804_v31, %v4355_v7  ;;  %v1825_v22 = vmul.f32 %v1824_v14, %v4355_v7  ;;  %v1715_v31 = vmul.f32 %v1714_v19, %v4355_v7  ;;  %v1844_v53 = vadd.f32 -2534.6333, %v1843_v45 }
 0xb1d   : > { %v1757_v40 = vmul.f32 %v1756_v62, %v4355_v7  ;;  %v1865_v19 = vmul.f32 %v1864_v41, %v4355_v7 }
 0xb1e   : > { %v1806_v42 = vadd.f32 -101.62451, %v1805_v49  ;;  %v1826_v18 = vadd.f32 5927.2085, %v1825_v22  ;;  %v1716_v9 = vadd.f32 51.540684, %v1715_v31  ;;  %v1845_v3 = vmul.f32 %v1844_v53, %v4355_v7 }
 0xb1f   : > { %v1758_v20 = vadd.f32 156.85045, %v1757_v40  ;;  %v1866_v31 = vadd.f32 -9671.838, %v1865_v19 }
 0xb20   : > { %v1807_v55 = vmul.f32 %v1806_v42, %v4355_v7  ;;  %v1827_v49 = vmul.f32 %v1826_v18, %v4355_v7  ;;  %v1773_v42 = vmul.f32 %v1772_v52, %v4355_v7  ;;  %v1717_v63 = vmul.f32 %v1716_v9, %v4355_v7 }
 0xb21   : > { %v1846_v8 = vadd.f32 -8004.5015, %v1845_v3  ;;  %v1759_v32 = vmul.f32 %v1758_v20, %v4355_v7 }
 0xb22   : > { %v1808_v24 = vadd.f32 33612.613, %v1807_v55  ;;  %v1828_v1 = vadd.f32 -31339.127, %v1827_v49  ;;  %v1737_v55 = vmul.f32 %v1736_v29, %v4355_v7  ;;  %v1774_v14 = vadd.f32 -0.114605896, %v1773_v42 }
 0xb23   : > { %v1718_v10 = vadd.f32 314.81454, %v1717_v63  ;;  %v1847_v36 = vmul.f32 %v1846_v8, %v4355_v7  ;;  %v1760_v9 = vadd.f32 269.41855, %v1759_v32  ;;  %v1867_v29 = vmul.f32 %v1866_v31, %v4355_v7 }
 0xb24   : > { %v1809_v46 = vmul.f32 %v1808_v24, %v4355_v7  ;;  %v1829_v54 = vmul.f32 %v1828_v1, %v4355_v7  ;;  %v1738_v5 = vadd.f32 -236.86026, %v1737_v55  ;;  %v1775_v24 = vmul.f32 %v1774_v14, %v4355_v7 }
 0xb25   : > { %v1719_v17 = vmul.f32 %v1718_v10, %v4355_v7  ;;  %v1848_v59 = vadd.f32 21560.113, %v1847_v36  ;;  %v1761_v57 = vmul.f32 %v1760_v9, %v4355_v7  ;;  %v1868_v63 = vadd.f32 -24900.613, %v1867_v29 }
 0xb26   : > { %v1810_v13 = vadd.f32 -18970.363, %v1809_v46  ;;  %v1830_v50 = vadd.f32 10782.539, %v1829_v54  ;;  %v1739_v46 = vmul.f32 %v1738_v5, %v4355_v7  ;;  %v1776_v18 = vadd.f32 -5.4993873, %v1775_v24 }
 0xb27   : > { %v1720_v37 = vadd.f32 -483.59192, %v1719_v17  ;;  %v1849_v15 = vmul.f32 %v1848_v59, %v4355_v7  ;;  %v1762_v10 = vadd.f32 -1741.0626, %v1761_v57  ;;  %v1869_v5 = vmul.f32 %v1868_v63, %v4355_v7 }
 0xb28   : > { %v1811_v22 = vmul.f32 %v1810_v13, %v4355_v7  ;;  %v1831_v45 = vmul.f32 %v1830_v50, %v4355_v7  ;;  %v1740_v52 = vadd.f32 -4.8392625, %v1739_v46  ;;  %v1777_v49 = vmul.f32 %v1776_v18, %v4355_v7 }
 0xb29   : > { %v1721_v42 = vmul.f32 %v1720_v37, %v4355_v7  ;;  %v1850_v62 = vadd.f32 7258.9697, %v1849_v15  ;;  %v1763_v19 = vmul.f32 %v1762_v10, %v4355_v7  ;;  %v1870_v17 = vadd.f32 13821.433, %v1869_v5 }
 0xb2a   : > { %v1812_v53 = vadd.f32 5288.7705, %v1811_v22  ;;  %v1832_v27 = vadd.f32 -5306.1978, %v1831_v45  ;;  %v1741_v13 = vmul.f32 %v1740_v52, %v4355_v7  ;;  %v1778_v1 = vadd.f32 -93.875305, %v1777_v49 }
 0xb2b   : > { %v1722_v55 = vadd.f32 -1556.2883, %v1721_v42  ;;  %v1851_v41 = vmul.f32 %v1850_v62, %v4355_v7  ;;  %v1764_v31 = vadd.f32 770.18134, %v1763_v19  ;;  %v1871_v37 = vmul.f32 %v1870_v17, %v4355_v7 }
 0xb2c   : > { %v1833_v3 = vmul.f32 %v1832_v27, %v4355_v7  ;;  %v1742_v14 = vadd.f32 1977.2126, %v1741_v13  ;;  %v1779_v54 = vmul.f32 %v1778_v1, %v4355_v7  ;;  %v1813_v8 = vmul.f32 %v1812_v53, %v4355_v7 }
 0xb2d   : > { %v1723_v24 = vmul.f32 %v1722_v55, %v4355_v7  ;;  %v1852_v20 = vadd.f32 -2283.07, %v1851_v41  ;;  %v1905_v27 = vrot.slane %v4343_v6, 1  ;;  %v1765_v29 = vmul.f32 %v1764_v31, %v4355_v7 }
 0xb2e   : > { %v1834_v40 = vadd.f32 707.5489, %v1833_v3  ;;  %v1743_v22 = vmul.f32 %v1742_v14, %v4355_v7  ;;  %v1780_v50 = vadd.f32 -348.0218, %v1779_v54  ;;  %v1814_v59 = vadd.f32 -199.54787, %v1813_v8 }
 0xb2f   : > { %v1724_v46 = vadd.f32 1151.786, %v1723_v24  ;;  %v1853_v32 = vmul.f32 %v1852_v20, %v4355_v7  ;;  %v1872_v42 = vadd.f32 -1695.1128, %v1871_v37  ;;  %v4426_v3 = vperm.slane %v4343_v6, 0 }
 0xb30   : > { %v1835_v36 = vmul.f32 %v1834_v40, %v4355_v7  ;;  %v1744_v18 = vadd.f32 -1459.2588, %v1743_v22  ;;  %v1781_v45 = vmul.f32 %v1780_v50, %v4355_v7  ;;  %v1766_v63 = vadd.f32 -530.61975, %v1765_v29 }
 0xb31   : > { %v1725_v52 = vmul.f32 %v1724_v46, %v4355_v7  ;;  %v1854_v9 = vadd.f32 -628.074, %v1853_v32  ;;  %v1815_v55 = vmul.f32 %v1814_v59, %v4355_v7  ;;  %v1873_v14 = vmul.f32 %v1872_v42, %v4355_v7  ;;  %v5155_v42 = vld [vmem:[#allocation19_spill] sm:$0xff] }
 0xb32   : > { %v1745_v49 = vmul.f32 %v1744_v18, %v4355_v7  ;;  %v1782_v53 = vadd.f32 1134.7428, %v1781_v45  ;;  %v1836_v15 = vadd.f32 29.501831, %v1835_v36  ;;  %v4432_v40 = vperm.slane %v1905_v27, 0 }
 0xb33   : > { %v1855_v62 = vmul.f32 %v1854_v9, %v4355_v7  ;;  %v1726_v57 = vadd.f32 -211.8891, %v1725_v52  ;;  %v1767_v10 = vmul.f32 %v1766_v63, %v4355_v7  ;;  %v1874_v24 = vadd.f32 109.42459, %v1873_v14 }
 0xb34   : > { %v1746_v13 = vadd.f32 587.6412, %v1745_v49  ;;  %v1783_v1 = vmul.f32 %v1782_v53, %v4355_v7  ;;  %v1875_v41 = vmul.f32 %v1836_v15, %v4343_v6  ;;  %v1910_v20 = vsub.f32 %v4426_v3, %v3712_v33  ;;  %v5154_v15 = vld [vmem:[#allocation13_spill] sm:$0xff] }
 0xb35   : > { %v1856_v5 = vadd.f32 -113.73708, %v1855_v62  ;;  %v1727_v36 = vmul.f32 %v1726_v57, %v4355_v7  ;;  %v1911_v19 = vsub.f32 %v4426_v3, %v3691_v26  ;;  %v1912_v17 = vsub.f32 %v4426_v3, %v3667_v0  ;;  %v5157_v57 = vld [vmem:[#allocation23_spill] sm:$0xff] }
 0xb36   : > { %v1747_v54 = vmul.f32 %v1746_v13, %v4355_v7  ;;  %v1784_v8 = vadd.f32 483.93134, %v1783_v1  ;;  %v1816_v46 = vadd.f32 1.9084886, %v1815_v55  ;;  %v1877_v18 = vmul.f32 %v1874_v24, %v4343_v6  ;;  %v5156_v1 = vld [vmem:[#allocation24_spill] sm:$0xff] }
 0xb37   : > { %v1913_v59 = vsub.f32 %v4426_v3, %v3679_v21  ;;  %v1768_v31 = vadd.f32 117.92482, %v1767_v10  ;;  %v1914_v37 = vsub.f32 %v4426_v3, %v3724_v39  ;;  %v1918_v52 = vsub.f32 %v4432_v40, %v5145_v60 }
 0xb38   : > { %v1748_v22 = vadd.f32 -39.909573, %v1747_v54  ;;  %v1785_v50 = vmul.f32 %v1784_v8, %v4355_v7  ;;  %v1876_v49 = vadd.f32 %v1875_v41, %v1816_v46  ;;  %v1878_v53 = vadd.f32 %v1877_v18, %v1856_v5  ;;  %v5158_v5 = vld [vmem:[#allocation16_spill] sm:$0xff] }
 0xb39   : > { %v1919_v9 = vsub.f32 %v4432_v40, %v5154_v15  ;;  %v1728_v29 = vadd.f32 27.356148, %v1727_v36  ;;  %v1915_v13 = vsub.f32 %v4426_v3, %v5155_v42  ;;  %v1916_v62 = vsub.f32 %v4426_v3, %v5156_v1 }
 0xb3a   : > { %v1786_v45 = vadd.f32 -207.55182, %v1785_v50  ;;  %v1749_v32 = vmul.f32 %v1748_v22, %v4355_v7  ;;  %v1917_v63 = vsub.f32 %v4426_v3, %v5157_v57  ;;  %v1879_v55 = vmul.f32 %v1878_v53, %v4351_v28  ;;  %v5159_v22 = vld [vmem:[#allocation21_spill] sm:$0xff]  ;;  %v5160_v53 = vld [vmem:[#allocation20_spill] sm:$0xff] }
 0xb3b   : > { %v1926_v54 = vmax.f32 %v1910_v20, 0.0  ;;  %v1927_v8 = vmax.f32 %v1911_v19, 0.0  ;;  %v1769_v10 = vmul.f32 %v1768_v31, %v4355_v7  ;;  %v1920_v24 = vsub.f32 %v4432_v40, %v5158_v5  ;;  %v5161_v19 = vld [vmem:[#allocation25_spill] sm:$0xff] }
 0xb3c   : > { %v1787_v27 = vmul.f32 %v1786_v45, %v4355_v7  ;;  %v1750_v41 = vadd.f32 1.9084886, %v1749_v32  ;;  %v1921_v50 = vsub.f32 %v4432_v40, %v5159_v22  ;;  %v4467_v36 = vadd.f32 %v1879_v55, %v1876_v49 }
 0xb3d   : > { %v1934_v18 = vmax.f32 %v1918_v52, 0.0  ;;  %v1935_v3 = vmax.f32 %v1919_v9, 0.0  ;;  %v1729_v45 = vmul.f32 %v1728_v29, %v4355_v7  ;;  %v1922_v20 = vsub.f32 %v4432_v40, %v5160_v53 }
 0xb3e   : > { %v1788_v14 = vadd.f32 -89.72485, %v1787_v27  ;;  %v1923_v32 = vsub.f32 %v4432_v40, %v5161_v19  ;;  %v1928_v31 = vmax.f32 %v1912_v17, 0.0  ;;  %v5114_v27 = vand.u32 2147483647, %v4467_v36 }
 0xb3f   : > { %v1942_v22 = vmul.f32 %v1926_v54, %v5141_v48  ;;  %v1943_v49 = vmul.f32 %v1927_v8, %v5142_v4  ;;  %v1770_v55 = vadd.f32 14.750916, %v1769_v10  ;;  %v1929_v9 = vmax.f32 %v1913_v59, 0.0 }
 0xb40   : > { %v1789_v46 = vmul.f32 %v1788_v14, %v4355_v7  ;;  %v5162_v14 = vld [vmem:[#allocation22_spill] sm:$0xff]  ;;  %v1936_v7 = vmax.f32 %v1920_v24, 0.0  ;;  %1883 = vrot.lane.b32.xlu1 %v5114_v27, %s3380_s6  ;;  %v1791_v29 = vmul.f32 %v1750_v41, %v4343_v6  ;;  %v1951_v54 = vmul.f32 %v1935_v3, %v3700_v16 }
 0xb41   : > { %v1924_v52 = vsub.f32 %v4432_v40, %v5162_v14  ;;  %v1730_v48 = vadd.f32 -0.025839344, %v1729_v45  ;;  %v1925_v8 = vsub.f32 %v4432_v40, %v5152_v58  ;;  %v1930_v10 = vmax.f32 %v1914_v37, 0.0 }
 0xb42   : > { %v1790_v5 = vadd.f32 -37.91236, %v1789_v46  ;;  %v1950_v46 = vmul.f32 %v1934_v18, %v3706_v30  ;;  %v1937_v4 = vmax.f32 %v1921_v50, 0.0  ;;  %v1931_v24 = vmax.f32 %v1915_v13, 0.0 }
 0xb43   : > { %v1944_v14 = vmul.f32 %v1928_v31, %v3704_v25  ;;  %v1958_v19 = vadd.f32 %v1943_v49, %v1942_v22  ;;  %v1932_v27 = vmax.f32 %v1916_v62, 0.0  ;;  %v1938_v53 = vmax.f32 %v1922_v20, 0.0 }
 0xb44   : > { %v1793_v17 = vmul.f32 %v1790_v5, %v4343_v6  ;;  %v1952_v41 = vmul.f32 %v1936_v7, %v3716_v35  ;;  %v1972_v5 = vadd.f32 %v1951_v54, %v1950_v46  ;;  %v1792_v15 = vadd.f32 %v1791_v29, %v1730_v48 }
 0xb45   : > { %v1945_v3 = vmul.f32 %v1929_v9, %v3722_v38  ;;  %v1959_v45 = vadd.f32 %v1958_v19, %v1944_v14  ;;  %v1933_v16 = vmax.f32 %v1917_v63, 0.0  ;;  %v1939_v40 = vmax.f32 %v1923_v32, 0.0 }
 0xb46   : > { %v1794_v59 = vadd.f32 %v1793_v17, %v1770_v55  ;;  %v1953_v37 = vmul.f32 %v1937_v4, %v3714_v34  ;;  %v1973_v50 = vadd.f32 %v1972_v5, %v1952_v41  ;;  %v1941_v55 = vmax.f32 %v1925_v8, 0.0 }
 0xb47   : > { %v1946_v22 = vmul.f32 %v1930_v10, %v3731_v43  ;;  %v1960_v62 = vadd.f32 %v1959_v45, %v1945_v3  ;;  %v1940_v20 = vmax.f32 %v1924_v52, 0.0  ;;  %v1954_v31 = vmul.f32 %v1938_v53, %v3738_v47 }
 0xb48   : > { %v1795_v18 = vmul.f32 %v1794_v59, %v4351_v28  ;;  %v1974_v49 = vadd.f32 %v1973_v50, %v1953_v37  ;;  %v1947_v48 = vmul.f32 %v1931_v24, %v3734_v44  ;;  %v1949_v63 = vmul.f32 %v1933_v16, %v3782_v51 }
 0xb49   : > { %v1961_v28 = vadd.f32 %v1960_v62, %v1946_v22  ;;  %v1955_v19 = vmul.f32 %v1939_v40, %v3760_v12  ;;  %v1957_v32 = vmul.f32 %v1941_v55, %v3762_v23  ;;  %v1956_v52 = vmul.f32 %v1940_v20, %v3748_v61 }
 0xb4a   : > { %v1796_v13 = vadd.f32 %v1795_v18, %v1792_v15  ;;  %v1975_v4 = vadd.f32 %v1974_v49, %v1954_v31  ;;  %v1948_v15 = vmul.f32 %v1932_v27, %v3776_v11  ;;  %v1964_v7 = vsel %vm683_vm0, %v1949_v63, 0.0 }
 0xb4b   : > { %v1962_v14 = vadd.f32 %v1961_v28, %v1947_v48  ;;  %v1978_v46 = vsel %vm683_vm0, %v1957_v32, 0.0  ;;  %v1986_v3 = vmul.f32 %v4343_v6, %v3788_v2  ;;  %v5163_v48 = vand.u32 2147483647, %v4467_v36 }
 0xb4c   : > { %1888 = vrot.lane.b32.xlu2 %v1796_v13, %s3380_s6  ;;  %v1976_v9 = vadd.f32 %v1975_v4, %v1955_v19 }
 0xb4d   : > { %v1963_v53 = vadd.f32 %v1962_v14, %v1948_v15  ;;  %v1987_v50 = vsub.f32 %v1986_v3, %v3786_v56 }
 0xb4e   : > { %v1977_v29 = vadd.f32 %v1976_v9, %v1956_v52 }
 0xb4f   : > { %v1965_v17 = vadd.f32 %v1964_v7, %v1963_v53 }
 0xb50   : > { %v1979_v54 = vadd.f32 %v1978_v46, %v1977_v29 }
 0xb51   : > { %v1966_v16 = vrot.slane %v1965_v17, 4 }
 0xb52   : > { %v1980_v8 = vrot.slane %v1979_v54, 4 }
 0xb53   : > { %v1967_v10 = vadd.f32 %v1966_v16, %v1965_v17 }
 0xb54   : > { %v1981_v59 = vadd.f32 %v1980_v8, %v1979_v54 }
 0xb55   : > { %v1968_v24 = vrot.slane %v1967_v10, 2 }
 0xb56   : > { %v1982_v27 = vrot.slane %v1981_v59, 2 }
 0xb57   : > { %v1969_v41 = vadd.f32 %v1968_v24, %v1967_v10 }
 0xb58   : > { %v1983_v5 = vadd.f32 %v1982_v27, %v1981_v59 }
 0xb59   : > { %v1970_v18 = vrot.slane %v1969_v41, 1 }
 0xb5a   : > { %v1984_v45 = vrot.slane %v1983_v5, 1 }
 0xb5b   : > { %v1971_v40 = vadd.f32 %v1970_v18, %v1969_v41 }
 0xb5c   : > { %v1985_v37 = vadd.f32 %v1984_v45, %v1983_v5 }
 0xb5e   : > { %v1990_v55 = vsel %vm719_vm1, %v1985_v37, %v1971_v40 }
 0xb5f   : > { %v1992_v22 = vadd.f32 %v1990_v55, %v1987_v50 }
 0xb61   : > { %1994 = vrot.lane.b32.xlu1 %v1992_v22, %s3377_s27 }
 0xb7a   : > { %v1896_v62 = vpop.permute.xlu0 %1895 }
 0xb7b   : > { %v1898_v20 = vsub.f32 %v4343_v6, %v1896_v62 }
 0xb7d   : > { %1900 = vrot.lane.b32.xlu0 %v1898_v20, %s3380_s6 }
 0xba6   : > { %v1889_v49 = vpop.permute.xlu2 %1888 }
 0xba7   : > { %v1891_v63 = vadd.f32 %v1889_v49, %v1796_v13 }
 0xba9   : > { %v1892_v15 = vmul.f32 0.5, %v1891_v63 }
 0xbb2   : > { %v1884_v31 = vpop.permute.xlu1 %1883 }
 0xbb3   : > { %v1886_v28 = vmax.f32 %v5163_v48, %v1884_v31 }
 0xbb5   : > { %v1893_v19 = vmul.f32 0.5, %v1886_v28 }
 0xbd3   : > { %v1995_v52 = vpop.permute.xlu1 %1994 }
 0xbd4   : > { %v1997_v9 = vsub.f32 %v1992_v22, %v1995_v52 }
 0xbd6   : > { %v1998_v53 = vmul.f32 20.0, %v1997_v9 }
 0xbef   : > { %v1901_v4 = vpop.permute.xlu0 %1900 }
 0xbf0   : > { %v1903_v32 = vmul.f32 %v1901_v4, %v1893_v19 }
 0xbf2   : > { %v1904_v14 = vsub.f32 %v1892_v15, %v1903_v32 }
 0xbf4   : > { %2000 = vrot.lane.b32.xlu2 %v1904_v14, %s3377_s27 }
 0xc4e   : > { %v2001_v7 = vpop.permute.xlu2 %2000 }
 0xc4f   : > { %v2003_v29 = vsub.f32 %v1998_v53, %v2001_v7 }
 0xc51   : > { %2005 = vrot.lane.b32.xlu0 %v2003_v29, %s3377_s27 }
 0xcc3   : > { %v2006_v17 = vpop.permute.xlu0 %2005 }
 0xcc4   : > { %v2008_v46 = vsub.f32 %v2003_v29, %v2006_v17 }
 0xcc6   : > { %v2009_v36 = vmul.f32 0.02, %v2008_v46 }
 0xcc8   : > { %2011 = vrot.lane.b32.xlu1 %v2009_v36, %s3380_s6 }
 0xd3a   : > { %v2012_v13 = vpop.permute.xlu1 %2011 }
 0xd3b   : > { %v2014_v54 = vadd.f32 %v2012_v13, %v4343_v6 }
 0xd3d   : > { %2019 = vrot.lane.b32.xlu0 %v2014_v54, %s3377_s27  ;;  %2016 = vrot.lane.b32.xlu2 %v2014_v54, %s3380_s6 }
 0xd97   : > { %v2017_v16 = vpop.permute.xlu2 %2016 }
 0xd98   : > { %v2022_v8 = vsel %vm752_vm2, %v2017_v16, %v2014_v54 }
 0xdaf   : > { %v2020_v10 = vpop.permute.xlu0 %2019 }
 0xdb0   : > { %v4522_v59 = vsel %vm754_vm3, %v2022_v8, %v2020_v10 }
 0xdb1   : > { %3093 = vst [vmem:[%s3490_s29 + $0xa] sm:$0x3] %v4522_v59  ;;  %2212 = vrot.lane.b32.xlu1 %v4522_v59, %s3377_s27  ;;  %v4530_v24 = vmul.f32 %v4522_v59, %v4522_v59 }
 0xdb3   : > { %v4534_v6 = vmul.f32 %v4530_v24, %v4530_v24 }
 0xdb5   : > { %v2114_v27 = vmul.f32 -0.0023600725, %v4534_v6  ;;  %v2134_v3 = vmul.f32 0.00054402516, %v4534_v6  ;;  %v2154_v62 = vmul.f32 -0.00011631614, %v4534_v6 }
 0xdb6   : > { %v2174_v32 = vmul.f32 0.009546554, %v4534_v6 }
 0xdb7   : > { %v2115_v41 = vadd.f32 -0.42950746, %v2114_v27  ;;  %v2135_v40 = vadd.f32 0.1284797, %v2134_v3  ;;  %v2155_v49 = vadd.f32 -0.03614727, %v2154_v62 }
 0xdb8   : > { %v2175_v53 = vadd.f32 1.3521498, %v2174_v32  ;;  %v2028_v62 = vmul.f32 0.00023866384, %v4534_v6 }
 0xdb9   : > { %v2116_v5 = vmul.f32 %v2115_v41, %v4534_v6  ;;  %v2136_v50 = vmul.f32 %v2135_v40, %v4534_v6  ;;  %v2156_v63 = vmul.f32 %v2155_v49, %v4534_v6 }
 0xdba   : > { %v2176_v46 = vmul.f32 %v2175_v53, %v4534_v6 }
 0xdbb   : > { %v2117_v18 = vadd.f32 -29.533041, %v2116_v5  ;;  %v2137_v22 = vadd.f32 11.214069, %v2136_v50  ;;  %v2157_v15 = vadd.f32 -4.011206, %v2156_v63 }
 0xdbc   : > { %v2177_v54 = vadd.f32 73.19816, %v2176_v46 }
 0xdbd   : > { %v2118_v45 = vmul.f32 %v2117_v18, %v4534_v6  ;;  %v2138_v31 = vmul.f32 %v2137_v22, %v4534_v6  ;;  %v2158_v9 = vmul.f32 %v2157_v15, %v4534_v6 }
 0xdbe   : > { %v2178_v27 = vmul.f32 %v2177_v54, %v4534_v6 }
 0xdbf   : > { %v2119_v37 = vadd.f32 -759.8274, %v2118_v45  ;;  %v2139_v28 = vadd.f32 372.27844, %v2138_v31  ;;  %v2159_v17 = vadd.f32 -170.481, %v2158_v9 }
 0xdc0   : > { %v2179_v18 = vadd.f32 1443.1392, %v2178_v27 }
 0xdc1   : > { %v2120_v55 = vmul.f32 %v2119_v37, %v4534_v6  ;;  %v2140_v4 = vmul.f32 %v2139_v28, %v4534_v6  ;;  %v2160_v13 = vmul.f32 %v2159_v17, %v4534_v6  ;;  %v2029_v28 = vadd.f32 0.037559718, %v2028_v62 }
 0xdc2   : > { %v2180_v37 = vmul.f32 %v2179_v18, %v4534_v6 }
 0xdc3   : > { %v2121_v20 = vadd.f32 -5921.507, %v2120_v55  ;;  %v2141_v52 = vadd.f32 4078.1116, %v2140_v4  ;;  %v2161_v10 = vadd.f32 -2534.6333, %v2160_v13  ;;  %v2030_v15 = vmul.f32 %v2029_v28, %v4534_v6 }
 0xdc4   : > { %v2181_v22 = vadd.f32 7555.5493, %v2180_v37  ;;  %v2088_v13 = vmul.f32 -2.7050266e-06, %v4534_v6 }
 0xdc5   : > { %v2122_v48 = vmul.f32 %v2121_v20, %v4534_v6  ;;  %v2142_v29 = vmul.f32 %v2141_v52, %v4534_v6  ;;  %v2162_v5 = vmul.f32 %v2161_v10, %v4534_v6  ;;  %v2031_v53 = vadd.f32 2.2874424, %v2030_v15 }
 0xdc7   : > { %v2123_v19 = vadd.f32 -101.62451, %v2122_v48  ;;  %v2143_v36 = vadd.f32 5927.2085, %v2142_v29  ;;  %v2163_v40 = vadd.f32 -8004.5015, %v2162_v5  ;;  %v2182_v48 = vmul.f32 %v2181_v22, %v4534_v6 }
 0xdc8   : > { %v2068_v29 = vmul.f32 1.295298e-05, %v4534_v6  ;;  %v2032_v54 = vmul.f32 %v2031_v53, %v4534_v6  ;;  %v2089_v5 = vadd.f32 -0.0009268531, %v2088_v13  ;;  %v4591_v13 = vperm.slane %v4522_v59, 0 }
 0xdc9   : > { %v2124_v14 = vmul.f32 %v2123_v19, %v4534_v6  ;;  %v2144_v8 = vmul.f32 %v2143_v36, %v4534_v6  ;;  %v2164_v55 = vmul.f32 %v2163_v40, %v4534_v6  ;;  %v2183_v4 = vadd.f32 -9671.838, %v2182_v48 }
 0xdca   : > { %v2033_v18 = vadd.f32 51.540684, %v2032_v54 }
 0xdcb   : > { %v2125_v7 = vadd.f32 33612.613, %v2124_v14  ;;  %v2145_v41 = vadd.f32 -31339.127, %v2144_v8  ;;  %v2165_v49 = vadd.f32 21560.113, %v2164_v55  ;;  %v2184_v9 = vmul.f32 %v2183_v4, %v4534_v6 }
 0xdcc   : > { %v2069_v8 = vadd.f32 0.0033810446, %v2068_v29  ;;  %v2090_v55 = vmul.f32 %v2089_v5, %v4534_v6  ;;  %v2034_v22 = vmul.f32 %v2033_v18, %v4534_v6  ;;  %v2222_v29 = vrot.slane %v4522_v59, 1 }
 0xdcd   : > { %v2126_v16 = vmul.f32 %v2125_v7, %v4534_v6  ;;  %v2146_v45 = vmul.f32 %v2145_v41, %v4534_v6  ;;  %v2166_v19 = vmul.f32 %v2165_v49, %v4534_v6  ;;  %v2048_v7 = vmul.f32 -5.7562742e-05, %v4534_v6 }
 0xdce   : > { %v2185_v36 = vadd.f32 -24900.613, %v2184_v9  ;;  %v2091_v28 = vadd.f32 -0.114605896, %v2090_v55 }
 0xdcf   : > { %v2127_v3 = vadd.f32 -18970.363, %v2126_v16  ;;  %v2147_v50 = vadd.f32 10782.539, %v2146_v45  ;;  %v2167_v52 = vadd.f32 7258.9697, %v2166_v19  ;;  %v2070_v45 = vmul.f32 %v2069_v8, %v4534_v6 }
 0xdd0   : > { %v2049_v16 = vadd.f32 -0.011608309, %v2048_v7  ;;  %v2186_v41 = vmul.f32 %v2185_v36, %v4534_v6 }
 0xdd1   : > { %v2128_v20 = vmul.f32 %v2127_v3, %v4534_v6  ;;  %v2148_v31 = vmul.f32 %v2147_v50, %v4534_v6  ;;  %v2168_v46 = vmul.f32 %v2167_v52, %v4534_v6  ;;  %v2092_v52 = vmul.f32 %v2091_v28, %v4534_v6 }
 0xdd2   : > { %v2050_v3 = vmul.f32 %v2049_v16, %v4534_v6  ;;  %v2187_v50 = vadd.f32 13821.433, %v2186_v41 }
 0xdd3   : > { %v2149_v63 = vadd.f32 -5306.1978, %v2148_v31  ;;  %v2129_v32 = vadd.f32 5288.7705, %v2128_v20  ;;  %v2169_v27 = vadd.f32 -2283.07, %v2168_v46 }
 0xdd4   : > { %v2051_v62 = vadd.f32 -0.8949406, %v2050_v3  ;;  %v2071_v20 = vadd.f32 0.32982558, %v2070_v45  ;;  %v2188_v48 = vmul.f32 %v2187_v50, %v4534_v6  ;;  %v2093_v36 = vadd.f32 -5.4993873, %v2092_v52 }
 0xdd5   : > { %v2150_v14 = vmul.f32 %v2149_v63, %v4534_v6  ;;  %v2130_v10 = vmul.f32 %v2129_v32, %v4534_v6  ;;  %v2170_v37 = vmul.f32 %v2169_v27, %v4534_v6  ;;  %v2035_v63 = vadd.f32 314.81454, %v2034_v22 }
 0xdd6   : > { %v2052_v19 = vmul.f32 %v2051_v62, %v4534_v6  ;;  %v2072_v4 = vmul.f32 %v2071_v20, %v4534_v6  ;;  %v2094_v5 = vmul.f32 %v2093_v36, %v4534_v6 }
 0xdd7   : > { %v2151_v17 = vadd.f32 707.5489, %v2150_v14  ;;  %v2131_v31 = vadd.f32 -199.54787, %v2130_v10  ;;  %v2171_v49 = vadd.f32 -628.074, %v2170_v37  ;;  %v2036_v9 = vmul.f32 %v2035_v63, %v4534_v6 }
 0xdd8   : > { %v2189_v14 = vadd.f32 -1695.1128, %v2188_v48  ;;  %v2053_v53 = vadd.f32 -26.200945, %v2052_v19  ;;  %v2073_v7 = vadd.f32 12.409282, %v2072_v4  ;;  %v2228_v63 = vsub.f32 %v4591_v13, %v3691_v26 }
 0xdd9   : > { %v2152_v40 = vmul.f32 %v2151_v17, %v4534_v6  ;;  %v2172_v32 = vmul.f32 %v2171_v49, %v4534_v6  ;;  %v2132_v17 = vmul.f32 %v2131_v31, %v4534_v6  ;;  %v2037_v54 = vadd.f32 -483.59192, %v2036_v9 }
 0xdda   : > { %v2190_v46 = vmul.f32 %v2189_v14, %v4534_v6  ;;  %v2054_v16 = vmul.f32 %v2053_v53, %v4534_v6  ;;  %v2074_v8 = vmul.f32 %v2073_v7, %v4534_v6  ;;  %v2095_v55 = vadd.f32 -93.875305, %v2094_v5  ;;  %v5164_v5 = vld [vmem:[#allocation13_spill] sm:$0xff] }
 0xddb   : > { %v2153_v15 = vadd.f32 29.501831, %v2152_v40  ;;  %v2173_v10 = vadd.f32 -113.73708, %v2172_v32  ;;  %v2038_v18 = vmul.f32 %v2037_v54, %v4534_v6  ;;  %v4598_v40 = vperm.slane %v2222_v29, 0 }
 0xddc   : > { %v2191_v27 = vadd.f32 109.42459, %v2190_v46  ;;  %v2055_v3 = vadd.f32 -236.86026, %v2054_v16  ;;  %v2075_v45 = vadd.f32 156.85045, %v2074_v8  ;;  %v2227_v31 = vsub.f32 %v4591_v13, %v3712_v33 }
 0xddd   : > { %v2192_v41 = vmul.f32 %v2153_v15, %v4522_v59  ;;  %v2133_v37 = vadd.f32 1.9084886, %v2132_v17  ;;  %v2039_v22 = vadd.f32 -1556.2883, %v2038_v18  ;;  %v2096_v28 = vmul.f32 %v2095_v55, %v4534_v6 }
 0xdde   : > { %v2194_v50 = vmul.f32 %v2191_v27, %v4522_v59  ;;  %v2056_v62 = vmul.f32 %v2055_v3, %v4534_v6  ;;  %v2076_v20 = vmul.f32 %v2075_v45, %v4534_v6  ;;  %v2229_v32 = vsub.f32 %v4591_v13, %v3667_v0 }
 0xddf   : > { %v2193_v49 = vadd.f32 %v2192_v41, %v2133_v37  ;;  %v2040_v19 = vmul.f32 %v2039_v22, %v4534_v6  ;;  %v2097_v52 = vadd.f32 -348.0218, %v2096_v28  ;;  %v2230_v9 = vsub.f32 %v4591_v13, %v3679_v21 }
 0xde0   : > { %v2195_v48 = vadd.f32 %v2194_v50, %v2173_v10  ;;  %v2057_v4 = vadd.f32 -4.8392625, %v2056_v62  ;;  %v2077_v15 = vadd.f32 269.41855, %v2076_v20  ;;  %v2231_v53 = vsub.f32 %v4591_v13, %v3724_v39  ;;  %v5165_v50 = vld [vmem:[#allocation16_spill] sm:$0xff]  ;;  %v5166_v62 = vld [vmem:[#allocation21_spill] sm:$0xff] }
 0xde1   : > { %v2041_v7 = vadd.f32 1151.786, %v2040_v19  ;;  %v2232_v46 = vsub.f32 %v4591_v13, %v5155_v42  ;;  %v2098_v54 = vmul.f32 %v2097_v52, %v4534_v6  ;;  %v2233_v16 = vsub.f32 %v4591_v13, %v5156_v1  ;;  %v5168_v19 = vld [vmem:[#allocation25_spill] sm:$0xff] }
 0xde2   : > { %v2196_v14 = vmul.f32 %v2195_v48, %v4530_v24  ;;  %v2058_v29 = vmul.f32 %v2057_v4, %v4534_v6  ;;  %v2078_v17 = vmul.f32 %v2077_v15, %v4534_v6  ;;  %v2234_v8 = vsub.f32 %v4591_v13, %v5157_v57  ;;  %v5169_v15 = vld [vmem:[#allocation22_spill] sm:$0xff] }
 0xde3   : > { %v2235_v41 = vsub.f32 %v4598_v40, %v5145_v60  ;;  %v2236_v18 = vsub.f32 %v4598_v40, %v5164_v5  ;;  %v2042_v45 = vmul.f32 %v2041_v7, %v4534_v6  ;;  %v2099_v37 = vadd.f32 1134.7428, %v2098_v54 }
 0xde4   : > { %v4620_v36 = vadd.f32 %v2196_v14, %v2193_v49  ;;  %v2059_v10 = vadd.f32 1977.2126, %v2058_v29  ;;  %v2079_v27 = vadd.f32 -1741.0626, %v2078_v17  ;;  %v2237_v55 = vsub.f32 %v4598_v40, %v5165_v50  ;;  %v5167_v49 = vld [vmem:[#allocation20_spill] sm:$0xff] }
 0xde5   : > { %v2238_v20 = vsub.f32 %v4598_v40, %v5166_v62  ;;  %v2239_v48 = vsub.f32 %v4598_v40, %v5167_v49  ;;  %v2100_v28 = vmul.f32 %v2099_v37, %v4534_v6  ;;  %v2240_v4 = vsub.f32 %v4598_v40, %v5168_v19 }
 0xde6   : > { %v5117_v3 = vand.u32 2147483647, %v4620_v36  ;;  %v2060_v22 = vmul.f32 %v2059_v10, %v4534_v6  ;;  %v2080_v13 = vmul.f32 %v2079_v27, %v4534_v6  ;;  %v2241_v14 = vsub.f32 %v4598_v40, %v5169_v15 }
 0xde7   : > { %v2242_v52 = vsub.f32 %v4598_v40, %v5152_v58  ;;  %v2243_v17 = vmax.f32 %v2227_v31, 0.0  ;;  %v2244_v54 = vmax.f32 %v2228_v63, 0.0  ;;  %v2043_v10 = vadd.f32 -211.8891, %v2042_v45  ;;  %v5171_v63 = vld [vmem:[#allocation15_spill] sm:$0xff] }
 0xde8   : > { %2200 = vrot.lane.b32.xlu2 %v5117_v3, %s3380_s6  ;;  %v2061_v7 = vadd.f32 -1459.2588, %v2060_v22  ;;  %v2081_v29 = vadd.f32 770.18134, %v2080_v13  ;;  %v2101_v27 = vadd.f32 483.93134, %v2100_v28 }
 0xde9   : > { %v2251_v49 = vmax.f32 %v2235_v41, 0.0  ;;  %v2252_v62 = vmax.f32 %v2236_v18, 0.0  ;;  %v2245_v50 = vmax.f32 %v2229_v32, 0.0  ;;  %v2246_v19 = vmax.f32 %v2230_v9, 0.0  ;;  %v5170_v13 = vld [vmem:[#allocation18_spill] sm:$0xff] }
 0xdea   : > { %v2062_v3 = vmul.f32 %v2061_v7, %v4534_v6  ;;  %v2082_v37 = vmul.f32 %v2081_v29, %v4534_v6  ;;  %v2102_v5 = vmul.f32 %v2101_v27, %v4534_v6  ;;  %v2247_v15 = vmax.f32 %v2231_v53, 0.0  ;;  %v5172_v7 = vld [vmem:[#allocation17_spill] sm:$0xff] }
 0xdeb   : > { %v2248_v60 = vmax.f32 %v2232_v46, 0.0  ;;  %v2253_v57 = vmax.f32 %v2237_v55, 0.0  ;;  %v2259_v31 = vmul.f32 %v2243_v17, %v5170_v13  ;;  %v2260_v45 = vmul.f32 %v2244_v54, %v5171_v63 }
 0xdec   : > { %v2063_v40 = vadd.f32 587.6412, %v2062_v3  ;;  %v2083_v22 = vadd.f32 -530.61975, %v2082_v37  ;;  %v2044_v41 = vmul.f32 %v2043_v10, %v4534_v6  ;;  %v2103_v18 = vadd.f32 -207.55182, %v2102_v5 }
 0xded   : > { %v2267_v28 = vmul.f32 %v2251_v49, %v3706_v30  ;;  %v2268_v29 = vmul.f32 %v2252_v62, %v5172_v7  ;;  %v2249_v53 = vmax.f32 %v2233_v16, 0.0  ;;  %v2250_v46 = vmax.f32 %v2234_v8, 0.0 }
 0xdee   : > { %v2064_v32 = vmul.f32 %v2063_v40, %v4534_v6  ;;  %v2084_v9 = vmul.f32 %v2083_v22, %v4534_v6  ;;  %v2104_v3 = vmul.f32 %v2103_v18, %v4534_v6  ;;  %v2254_v55 = vmax.f32 %v2238_v20, 0.0 }
 0xdef   : > { %v2255_v27 = vmax.f32 %v2239_v48, 0.0  ;;  %v2256_v17 = vmax.f32 %v2240_v4, 0.0  ;;  %v2261_v10 = vmul.f32 %v2245_v50, %v3704_v25  ;;  %v2275_v5 = vadd.f32 %v2260_v45, %v2259_v31 }
 0xdf0   : > { %v2065_v37 = vadd.f32 -39.909573, %v2064_v32  ;;  %v2085_v54 = vadd.f32 117.92482, %v2084_v9  ;;  %v2045_v63 = vadd.f32 27.356148, %v2044_v41  ;;  %v2269_v62 = vmul.f32 %v2253_v57, %v3716_v35 }
 0xdf1   : > { %v2105_v49 = vadd.f32 -89.72485, %v2104_v3  ;;  %v2289_v7 = vadd.f32 %v2268_v29, %v2267_v28  ;;  %v2257_v22 = vmax.f32 %v2241_v14, 0.0  ;;  %v2262_v16 = vmul.f32 %v2246_v19, %v3722_v38 }
 0xdf2   : > { %v2066_v40 = vmul.f32 %v2065_v37, %v4534_v6  ;;  %v2276_v8 = vadd.f32 %v2275_v5, %v2261_v10  ;;  %v2086_v20 = vmul.f32 %v2085_v54, %v4534_v6  ;;  %v2270_v4 = vmul.f32 %v2254_v55, %v3714_v34 }
 0xdf3   : > { %v2106_v48 = vmul.f32 %v2105_v49, %v4534_v6  ;;  %v2290_v18 = vadd.f32 %v2289_v7, %v2269_v62  ;;  %v2258_v31 = vmax.f32 %v2242_v52, 0.0  ;;  %v2263_v45 = vmul.f32 %v2247_v15, %v3731_v43 }
 0xdf4   : > { %v2067_v50 = vadd.f32 1.9084886, %v2066_v40  ;;  %v2277_v41 = vadd.f32 %v2276_v8, %v2262_v16  ;;  %v2046_v57 = vmul.f32 %v2045_v63, %v4534_v6  ;;  %v2271_v14 = vmul.f32 %v2255_v27, %v3738_v47 }
 0xdf5   : > { %v2107_v28 = vadd.f32 -37.91236, %v2106_v48  ;;  %v2291_v29 = vadd.f32 %v2290_v18, %v2270_v4  ;;  %v2264_v19 = vmul.f32 %v2248_v60, %v3734_v44  ;;  %v2266_v32 = vmul.f32 %v2250_v46, %v3782_v51 }
 0xdf6   : > { %v2272_v9 = vmul.f32 %v2256_v17, %v3760_v12  ;;  %v2278_v3 = vadd.f32 %v2277_v41, %v2263_v45  ;;  %v2087_v55 = vadd.f32 14.750916, %v2086_v20  ;;  %v2108_v7 = vmul.f32 %v2067_v50, %v4522_v59 }
 0xdf7   : > { %v2110_v52 = vmul.f32 %v2107_v28, %v4522_v59  ;;  %v2292_v15 = vadd.f32 %v2291_v29, %v2271_v14  ;;  %v2265_v37 = vmul.f32 %v2249_v53, %v3776_v11  ;;  %v2274_v6 = vmul.f32 %v2258_v31, %v3762_v23 }
 0xdf8   : > { %v2279_v63 = vadd.f32 %v2278_v3, %v2264_v19  ;;  %v2047_v27 = vadd.f32 -0.025839344, %v2046_v57  ;;  %v2273_v60 = vmul.f32 %v2257_v22, %v3748_v61  ;;  %v2281_v49 = vsel %vm683_vm0, %v2266_v32, 0.0 }
 0xdf9   : > { %v2111_v54 = vadd.f32 %v2110_v52, %v2087_v55  ;;  %v2293_v10 = vadd.f32 %v2292_v15, %v2272_v9  ;;  %v2295_v16 = vsel %vm683_vm0, %v2274_v6, 0.0  ;;  %v5173_v52 = vand.u32 2147483647, %v4620_v36 }
 0xdfa   : > { %v2280_v46 = vadd.f32 %v2279_v63, %v2265_v37  ;;  %v2109_v5 = vadd.f32 %v2108_v7, %v2047_v27 }
 0xdfb   : > { %v2112_v17 = vmul.f32 %v2111_v54, %v4530_v24  ;;  %v2294_v62 = vadd.f32 %v2293_v10, %v2273_v60  ;;  %v2303_v24 = vmul.f32 %v4522_v59, %v3788_v2 }
 0xdfc   : > { %v2282_v40 = vadd.f32 %v2281_v49, %v2280_v46 }
 0xdfd   : > { %v2113_v8 = vadd.f32 %v2112_v17, %v2109_v5  ;;  %v2296_v53 = vadd.f32 %v2295_v16, %v2294_v62  ;;  %v2304_v29 = vsub.f32 %v2303_v24, %v3786_v56 }
 0xdfe   : > { %v2283_v20 = vrot.slane %v2282_v40, 4 }
 0xdff   : > { %2205 = vrot.lane.b32.xlu0 %v2113_v8, %s3380_s6  ;;  %v2297_v48 = vrot.slane %v2296_v53, 4 }
 0xe00   : > { %v2284_v4 = vadd.f32 %v2283_v20, %v2282_v40 }
 0xe01   : > { %v2298_v18 = vadd.f32 %v2297_v48, %v2296_v53 }
 0xe02   : > { %v2285_v22 = vrot.slane %v2284_v4, 2 }
 0xe03   : > { %v2299_v50 = vrot.slane %v2298_v18, 2 }
 0xe04   : > { %v2286_v31 = vadd.f32 %v2285_v22, %v2284_v4 }
 0xe05   : > { %v2300_v45 = vadd.f32 %v2299_v50, %v2298_v18 }
 0xe06   : > { %v2287_v41 = vrot.slane %v2286_v31, 1 }
 0xe07   : > { %v2301_v57 = vrot.slane %v2300_v45, 1 }
 0xe08   : > { %v2288_v28 = vadd.f32 %v2287_v41, %v2286_v31 }
 0xe09   : > { %v2302_v14 = vadd.f32 %v2301_v57, %v2300_v45 }
 0xe0b   : > { %v2307_v19 = vsel %vm719_vm1, %v2302_v14, %v2288_v28 }
 0xe0c   : > { %v2309_v32 = vadd.f32 %v2307_v19, %v2304_v29 }
 0xe0e   : > { %2311 = vrot.lane.b32.xlu2 %v2309_v32, %s3377_s27 }
 0xe23   : > { %v2213_v9 = vpop.permute.xlu1 %2212 }
 0xe24   : > { %v2215_v3 = vsub.f32 %v4522_v59, %v2213_v9 }
 0xe26   : > { %2217 = vrot.lane.b32.xlu1 %v2215_v3, %s3380_s6 }
 0xe42   : > { %v2201_v55 = vpop.permute.xlu2 %2200 }
 0xe43   : > { %v2203_v15 = vmax.f32 %v5173_v52, %v2201_v55 }
 0xe45   : > { %v2210_v6 = vmul.f32 0.5, %v2203_v15 }
 0xe68   : > { %v2312_v10 = vpop.permute.xlu2 %2311 }
 0xe69   : > { %v2314_v46 = vsub.f32 %v2309_v32, %v2312_v10 }
 0xe6b   : > { %v2315_v5 = vmul.f32 20.0, %v2314_v46 }
 0xe71   : > { %v2206_v7 = vpop.permute.xlu0 %2205 }
 0xe72   : > { %v2208_v37 = vadd.f32 %v2206_v7, %v2113_v8 }
 0xe74   : > { %v2209_v27 = vmul.f32 0.5, %v2208_v37 }
 0xe98   : > { %v2218_v63 = vpop.permute.xlu1 %2217 }
 0xe99   : > { %v2220_v54 = vmul.f32 %v2218_v63, %v2210_v6 }
 0xe9b   : > { %v2221_v60 = vsub.f32 %v2209_v27, %v2220_v54 }
 0xe9d   : > { %2317 = vrot.lane.b32.xlu0 %v2221_v60, %s3377_s27 }
 0xf0f   : > { %v2318_v17 = vpop.permute.xlu0 %2317 }
 0xf10   : > { %v2320_v49 = vsub.f32 %v2315_v5, %v2318_v17 }
 0xf12   : > { %2322 = vrot.lane.b32.xlu1 %v2320_v49, %s3377_s27 }
 0xf84   : > { %v2323_v62 = vpop.permute.xlu1 %2322 }
 0xf85   : > { %v2325_v40 = vsub.f32 %v2320_v49, %v2323_v62 }
 0xf87   : > { %v2326_v36 = vmul.f32 0.02, %v2325_v40 }
 0xf89   : > { %2328 = vrot.lane.b32.xlu2 %v2326_v36, %s3380_s6 }
 0xfe3   : > { %v2329_v16 = vpop.permute.xlu2 %2328 }
 0xfe4   : > { %v2331_v8 = vadd.f32 %v2329_v16, %v4522_v59 }
 0xfe6   : > { %2336 = vrot.lane.b32.xlu1 %v2331_v8, %s3377_s27  ;;  %2333 = vrot.lane.b32.xlu0 %v2331_v8, %s3380_s6 }
0x1058   : > { %v2337_v53 = vpop.permute.xlu1 %2336  ;;  %v2334_v20 = vpop.permute.xlu0 %2333 }
0x1059   : > { %v2339_v48 = vsel %vm752_vm2, %v2334_v20, %v2331_v8 }
0x105a   : > { %v4701_v4 = vsel %vm754_vm3, %v2339_v48, %v2337_v53 }
0x105b   : > { %3094 = vst [vmem:[%s3490_s29 + $0xc] sm:$0x3] %v4701_v4  ;;  %2529 = vrot.lane.b32.xlu2 %v4701_v4, %s3377_s27  ;;  %v4709_v18 = vmul.f32 %v4701_v4, %v4701_v4 }
0x105d   : > { %v4713_v59 = vmul.f32 %v4709_v18, %v4709_v18 }
0x105f   : > { %v2431_v22 = vmul.f32 -0.0023600725, %v4713_v59  ;;  %v2451_v41 = vmul.f32 0.00054402516, %v4713_v59  ;;  %v2471_v32 = vmul.f32 -0.00011631614, %v4713_v59 }
0x1060   : > { %v2491_v27 = vmul.f32 0.009546554, %v4713_v59 }
0x1061   : > { %v2432_v50 = vadd.f32 -0.42950746, %v2431_v22  ;;  %v2452_v57 = vadd.f32 0.1284797, %v2451_v41  ;;  %v2472_v55 = vadd.f32 -0.03614727, %v2471_v32 }
0x1062   : > { %v2492_v46 = vadd.f32 1.3521498, %v2491_v27 }
0x1063   : > { %v2433_v31 = vmul.f32 %v2432_v50, %v4713_v59  ;;  %v2453_v14 = vmul.f32 %v2452_v57, %v4713_v59  ;;  %v2473_v15 = vmul.f32 %v2472_v55, %v4713_v59 }
0x1064   : > { %v2493_v62 = vmul.f32 %v2492_v46, %v4713_v59  ;;  %v2365_v46 = vmul.f32 -5.7562742e-05, %v4713_v59 }
0x1065   : > { %v2434_v45 = vadd.f32 -29.533041, %v2433_v31  ;;  %v2454_v19 = vadd.f32 11.214069, %v2453_v14  ;;  %v2474_v63 = vadd.f32 -4.011206, %v2473_v15 }
0x1066   : > { %v2494_v16 = vadd.f32 73.19816, %v2493_v62 }
0x1067   : > { %v2435_v24 = vmul.f32 %v2434_v45, %v4713_v59  ;;  %v2455_v3 = vmul.f32 %v2454_v19, %v4713_v59  ;;  %v2475_v10 = vmul.f32 %v2474_v63, %v4713_v59  ;;  %v2345_v19 = vmul.f32 0.00023866384, %v4713_v59 }
0x1068   : > { %v2495_v48 = vmul.f32 %v2494_v16, %v4713_v59 }
0x1069   : > { %v2436_v28 = vadd.f32 -759.8274, %v2435_v24  ;;  %v2456_v52 = vadd.f32 372.27844, %v2455_v3  ;;  %v2476_v49 = vadd.f32 -170.481, %v2475_v10 }
0x106a   : > { %v2496_v31 = vadd.f32 1443.1392, %v2495_v48 }
0x106b   : > { %v2437_v29 = vmul.f32 %v2436_v28, %v4713_v59  ;;  %v2457_v6 = vmul.f32 %v2456_v52, %v4713_v59  ;;  %v2477_v36 = vmul.f32 %v2476_v49, %v4713_v59 }
0x106c   : > { %v2497_v57 = vmul.f32 %v2496_v31, %v4713_v59  ;;  %v2385_v31 = vmul.f32 1.295298e-05, %v4713_v59 }
0x106d   : > { %v2438_v9 = vadd.f32 -5921.507, %v2437_v29  ;;  %v2458_v60 = vadd.f32 4078.1116, %v2457_v6  ;;  %v2478_v20 = vadd.f32 -2534.6333, %v2477_v36 }
0x106e   : > { %v2498_v29 = vadd.f32 7555.5493, %v2497_v57 }
0x106f   : > { %v2439_v7 = vmul.f32 %v2438_v9, %v4713_v59  ;;  %v2459_v17 = vmul.f32 %v2458_v60, %v4713_v59  ;;  %v2479_v50 = vmul.f32 %v2478_v20, %v4713_v59 }
0x1070   : > { %v2499_v55 = vmul.f32 %v2498_v29, %v4713_v59  ;;  %v2386_v29 = vadd.f32 0.0033810446, %v2385_v31 }
0x1071   : > { %v2440_v37 = vadd.f32 -101.62451, %v2439_v7  ;;  %v2460_v40 = vadd.f32 5927.2085, %v2459_v17  ;;  %v2480_v24 = vadd.f32 -8004.5015, %v2479_v50 }
0x1072   : > { %v2346_v7 = vadd.f32 0.037559718, %v2345_v19 }
0x1073   : > { %v2441_v54 = vmul.f32 %v2440_v37, %v4713_v59  ;;  %v2461_v53 = vmul.f32 %v2460_v40, %v4713_v59  ;;  %v2481_v14 = vmul.f32 %v2480_v24, %v4713_v59  ;;  %v2500_v37 = vadd.f32 -9671.838, %v2499_v55 }
0x1074   : > { %v2347_v6 = vmul.f32 %v2346_v7, %v4713_v59  ;;  %v2366_v40 = vadd.f32 -0.011608309, %v2365_v46  ;;  %v2405_v24 = vmul.f32 -2.7050266e-06, %v4713_v59 }
0x1075   : > { %v2442_v5 = vadd.f32 33612.613, %v2441_v54  ;;  %v2462_v22 = vadd.f32 -31339.127, %v2461_v53  ;;  %v2482_v3 = vadd.f32 21560.113, %v2481_v14  ;;  %v2501_v60 = vmul.f32 %v2500_v37, %v4713_v59 }
0x1076   : > { %v2348_v10 = vadd.f32 2.2874424, %v2347_v6  ;;  %v2367_v20 = vmul.f32 %v2366_v40, %v4713_v59  ;;  %v2539_v40 = vrot.slane %v4701_v4, 1 }
0x1077   : > { %v2443_v8 = vmul.f32 %v2442_v5, %v4713_v59  ;;  %v2463_v41 = vmul.f32 %v2462_v22, %v4713_v59  ;;  %v2483_v15 = vmul.f32 %v2482_v3, %v4713_v59  ;;  %v2502_v49 = vadd.f32 -24900.613, %v2501_v60 }
0x1078   : > { %v2349_v62 = vmul.f32 %v2348_v10, %v4713_v59 }
0x1079   : > { %v2444_v45 = vadd.f32 -18970.363, %v2443_v8  ;;  %v2464_v28 = vadd.f32 10782.539, %v2463_v41  ;;  %v2484_v54 = vadd.f32 7258.9697, %v2483_v15  ;;  %v2503_v8 = vmul.f32 %v2502_v49, %v4713_v59 }
0x107a   : > { %v2350_v53 = vadd.f32 51.540684, %v2349_v62  ;;  %v2368_v41 = vadd.f32 -0.8949406, %v2367_v20 }
0x107b   : > { %v2445_v32 = vmul.f32 %v2444_v45, %v4713_v59  ;;  %v2465_v9 = vmul.f32 %v2464_v28, %v4713_v59  ;;  %v2485_v17 = vmul.f32 %v2484_v54, %v4713_v59  ;;  %v2504_v50 = vadd.f32 13821.433, %v2503_v8 }
0x107c   : > { %v2351_v45 = vmul.f32 %v2350_v53, %v4713_v59  ;;  %v4773_v53 = vperm.slane %v4701_v4, 0 }
0x107d   : > { %v2466_v52 = vadd.f32 -5306.1978, %v2465_v9  ;;  %v2446_v63 = vadd.f32 5288.7705, %v2445_v32  ;;  %v2486_v16 = vadd.f32 -2283.07, %v2485_v17  ;;  %v2505_v14 = vmul.f32 %v2504_v50, %v4713_v59 }
0x107e   : > { %v2352_v19 = vadd.f32 314.81454, %v2351_v45  ;;  %v2369_v32 = vmul.f32 %v2368_v41, %v4713_v59  ;;  %v2406_v9 = vadd.f32 -0.0009268531, %v2405_v24 }
0x107f   : > { %v2467_v27 = vmul.f32 %v2466_v52, %v4713_v59  ;;  %v2447_v36 = vmul.f32 %v2446_v63, %v4713_v59  ;;  %v2487_v22 = vmul.f32 %v2486_v16, %v4713_v59  ;;  %v2506_v7 = vadd.f32 -1695.1128, %v2505_v14 }
0x1080   : > { %v2387_v52 = vmul.f32 %v2386_v29, %v4713_v59  ;;  %v2353_v15 = vmul.f32 %v2352_v19, %v4713_v59  ;;  %v2370_v37 = vadd.f32 -26.200945, %v2369_v32  ;;  %v2407_v6 = vmul.f32 %v2406_v9, %v4713_v59 }
0x1081   : > { %v2468_v5 = vadd.f32 707.5489, %v2467_v27  ;;  %v2448_v57 = vadd.f32 -199.54787, %v2447_v36  ;;  %v2488_v28 = vadd.f32 -628.074, %v2487_v22  ;;  %v2507_v27 = vmul.f32 %v2506_v7, %v4713_v59 }
0x1082   : > { %v2388_v54 = vadd.f32 0.32982558, %v2387_v52  ;;  %v2354_v60 = vadd.f32 -483.59192, %v2353_v15  ;;  %v2371_v10 = vmul.f32 %v2370_v37, %v4713_v59  ;;  %v2408_v46 = vadd.f32 -0.114605896, %v2407_v6 }
0x1083   : > { %v2469_v48 = vmul.f32 %v2468_v5, %v4713_v59  ;;  %v2489_v55 = vmul.f32 %v2488_v28, %v4713_v59  ;;  %v2449_v63 = vmul.f32 %v2448_v57, %v4713_v59  ;;  %v2508_v17 = vadd.f32 109.42459, %v2507_v27 }
0x1084   : > { %v2389_v62 = vmul.f32 %v2388_v54, %v4713_v59  ;;  %v2355_v36 = vmul.f32 %v2354_v60, %v4713_v59  ;;  %v2372_v16 = vadd.f32 -236.86026, %v2371_v10  ;;  %v2409_v8 = vmul.f32 %v2408_v46, %v4713_v59 }
0x1085   : > { %v2470_v3 = vadd.f32 29.501831, %v2469_v48  ;;  %v2490_v5 = vadd.f32 -113.73708, %v2489_v55  ;;  %v2450_v20 = vadd.f32 1.9084886, %v2449_v63  ;;  %v2511_v48 = vmul.f32 %v2508_v17, %v4701_v4 }
0x1086   : > { %v2390_v22 = vadd.f32 12.409282, %v2389_v62  ;;  %v2356_v50 = vadd.f32 -1556.2883, %v2355_v36  ;;  %v2373_v31 = vmul.f32 %v2372_v16, %v4713_v59  ;;  %v2410_v45 = vadd.f32 -5.4993873, %v2409_v8 }
0x1087   : > { %v2509_v49 = vmul.f32 %v2470_v3, %v4701_v4  ;;  %v2512_v24 = vadd.f32 %v2511_v48, %v2490_v5  ;;  %v4780_v19 = vperm.slane %v2539_v40, 0  ;;  %v2544_v3 = vsub.f32 %v4773_v53, %v3712_v33  ;;  %v5174_v62 = vld [vmem:[#allocation23_spill] sm:$0xff]  ;;  %v5175_v8 = vld [vmem:[#allocation14_spill] sm:$0xff]  ;;  %v5176_v48 = vld [vmem:[#allocation13_spill] sm:$0xff] }
0x1088   : > { %v2391_v57 = vmul.f32 %v2390_v22, %v4713_v59  ;;  %v2357_v28 = vmul.f32 %v2356_v50, %v4713_v59  ;;  %v2374_v14 = vadd.f32 -4.8392625, %v2373_v31  ;;  %v2411_v29 = vmul.f32 %v2410_v45, %v4713_v59  ;;  %v5177_v50 = vld [vmem:[#allocation16_spill] sm:$0xff]  ;;  %v5178_v31 = vld [vmem:[#allocation21_spill] sm:$0xff] }
0x1089   : > { %v2510_v41 = vadd.f32 %v2509_v49, %v2450_v20  ;;  %v2513_v32 = vmul.f32 %v2512_v24, %v4709_v18  ;;  %v2545_v52 = vsub.f32 %v4773_v53, %v3691_v26  ;;  %v2546_v15 = vsub.f32 %v4773_v53, %v3667_v0  ;;  %v5179_v45 = vld [vmem:[#allocation20_spill] sm:$0xff] }
0x108a   : > { %v2392_v9 = vadd.f32 156.85045, %v2391_v57  ;;  %v2375_v55 = vmul.f32 %v2374_v14, %v4713_v59  ;;  %v2412_v7 = vadd.f32 -93.875305, %v2411_v29  ;;  %v2547_v63 = vsub.f32 %v4773_v53, %v3679_v21  ;;  %v5180_v14 = vld [vmem:[#allocation25_spill] sm:$0xff] }
0x108b   : > { %v4790_v37 = vadd.f32 %v2513_v32, %v2510_v41  ;;  %v2548_v27 = vsub.f32 %v4773_v53, %v3724_v39  ;;  %v2358_v54 = vadd.f32 1151.786, %v2357_v28  ;;  %v2549_v46 = vsub.f32 %v4773_v53, %v5155_v42 }
0x108c   : > { %v2393_v6 = vmul.f32 %v2392_v9, %v4713_v59  ;;  %v2376_v60 = vadd.f32 1977.2126, %v2375_v55  ;;  %v2413_v10 = vmul.f32 %v2412_v7, %v4713_v59  ;;  %v2550_v49 = vsub.f32 %v4773_v53, %v5156_v1  ;;  %v5181_v9 = vld [vmem:[#allocation22_spill] sm:$0xff] }
0x108d   : > { %v2515_v5 = vand.u32 2147483647, %v4790_v37  ;;  %v2551_v40 = vsub.f32 %v4773_v53, %v5174_v62  ;;  %v2552_v20 = vsub.f32 %v4780_v19, %v5175_v8  ;;  %v2553_v22 = vsub.f32 %v4780_v19, %v5176_v48 }
0x108e   : > { %v2394_v17 = vadd.f32 269.41855, %v2393_v6  ;;  %v2377_v36 = vmul.f32 %v2376_v60, %v4713_v59  ;;  %v2414_v16 = vadd.f32 -348.0218, %v2413_v10  ;;  %v2554_v1 = vsub.f32 %v4780_v19, %v5177_v50 }
0x108f   : > { %2517 = vrot.lane.b32.xlu0 %v2515_v5, %s3380_s6  ;;  %v2555_v53 = vsub.f32 %v4780_v19, %v5178_v31  ;;  %v2556_v41 = vsub.f32 %v4780_v19, %v5179_v45  ;;  %v2359_v24 = vmul.f32 %v2358_v54, %v4713_v59  ;;  %v2557_v29 = vsub.f32 %v4780_v19, %v5180_v14 }
0x1090   : > { %v2395_v42 = vmul.f32 %v2394_v17, %v4713_v59  ;;  %v2378_v57 = vadd.f32 -1459.2588, %v2377_v36  ;;  %v2415_v28 = vmul.f32 %v2414_v16, %v4713_v59  ;;  %v2558_v55 = vsub.f32 %v4780_v19, %v5181_v9 }
0x1091   : > { %v2560_v7 = vmax.f32 %v2544_v3, 0.0  ;;  %v2561_v6 = vmax.f32 %v2545_v52, 0.0  ;;  %v2568_v17 = vmax.f32 %v2552_v20, 0.0  ;;  %v2569_v62 = vmax.f32 %v2553_v22, 0.0 }
0x1092   : > { %v2396_v32 = vadd.f32 -1741.0626, %v2395_v42  ;;  %v2379_v60 = vmul.f32 %v2378_v57, %v4713_v59  ;;  %v2416_v10 = vadd.f32 1134.7428, %v2415_v28  ;;  %v2559_v54 = vsub.f32 %v4780_v19, %v5152_v58  ;;  %v5182_v57 = vld [vmem:[#allocation15_spill] sm:$0xff] }
0x1093   : > { %v2562_v36 = vmax.f32 %v2546_v15, 0.0  ;;  %v2563_v16 = vmax.f32 %v2547_v63, 0.0  ;;  %v2360_v48 = vadd.f32 -211.8891, %v2359_v24  ;;  %v2564_v31 = vmax.f32 %v2548_v27, 0.0 }
0x1094   : > { %v2397_v8 = vmul.f32 %v2396_v32, %v4713_v59  ;;  %v2380_v50 = vadd.f32 587.6412, %v2379_v60  ;;  %v2417_v42 = vmul.f32 %v2416_v10, %v4713_v59  ;;  %v2570_v3 = vmax.f32 %v2554_v1, 0.0  ;;  %v5183_v32 = vld [vmem:[#allocation17_spill] sm:$0xff] }
0x1095   : > { %v2576_v52 = vmul.f32 %v2560_v7, %v5170_v13  ;;  %v2577_v28 = vmul.f32 %v2561_v6, %v5182_v57  ;;  %v2584_v14 = vmul.f32 %v2568_v17, %v3706_v30  ;;  %v2585_v58 = vmul.f32 %v2569_v62, %v5183_v32 }
0x1096   : > { %v2398_v45 = vadd.f32 770.18134, %v2397_v8  ;;  %v2381_v20 = vmul.f32 %v2380_v50, %v4713_v59  ;;  %v2418_v22 = vadd.f32 483.93134, %v2417_v42  ;;  %v2565_v15 = vmax.f32 %v2549_v46, 0.0 }
0x1097   : > { %v2566_v63 = vmax.f32 %v2550_v49, 0.0  ;;  %v2567_v24 = vmax.f32 %v2551_v40, 0.0  ;;  %v2571_v1 = vmax.f32 %v2555_v53, 0.0  ;;  %v2572_v60 = vmax.f32 %v2556_v41, 0.0 }
0x1098   : > { %v2399_v19 = vmul.f32 %v2398_v45, %v4713_v59  ;;  %v2382_v9 = vadd.f32 -39.909573, %v2381_v20  ;;  %v2419_v27 = vmul.f32 %v2418_v22, %v4713_v59  ;;  %v2361_v13 = vmul.f32 %v2360_v48, %v4713_v59 }
0x1099   : > { %v2578_v6 = vmul.f32 %v2562_v36, %v3704_v25  ;;  %v2592_v10 = vadd.f32 %v2577_v28, %v2576_v52  ;;  %v2573_v17 = vmax.f32 %v2557_v29, 0.0  ;;  %v2586_v62 = vmul.f32 %v2570_v3, %v3716_v35 }
0x109a   : > { %v2400_v7 = vadd.f32 -530.61975, %v2399_v19  ;;  %v2420_v8 = vadd.f32 -207.55182, %v2419_v27  ;;  %v2606_v50 = vadd.f32 %v2585_v58, %v2584_v14  ;;  %v2574_v49 = vmax.f32 %v2558_v55, 0.0 }
0x109b   : > { %v2579_v40 = vmul.f32 %v2563_v16, %v3722_v38  ;;  %v2593_v42 = vadd.f32 %v2592_v10, %v2578_v6  ;;  %v2383_v53 = vmul.f32 %v2382_v9, %v4713_v59  ;;  %v2587_v48 = vmul.f32 %v2571_v1, %v3714_v34 }
0x109c   : > { %v2401_v46 = vmul.f32 %v2400_v7, %v4713_v59  ;;  %v2421_v41 = vmul.f32 %v2420_v8, %v4713_v59  ;;  %v2607_v45 = vadd.f32 %v2606_v50, %v2586_v62  ;;  %v2575_v52 = vmax.f32 %v2559_v54, 0.0 }
0x109d   : > { %v2580_v29 = vmul.f32 %v2564_v31, %v3731_v43  ;;  %v2594_v57 = vadd.f32 %v2593_v42, %v2579_v40  ;;  %v2362_v3 = vadd.f32 27.356148, %v2361_v13  ;;  %v2588_v20 = vmul.f32 %v2572_v60, %v3738_v47 }
0x109e   : > { %v2402_v36 = vadd.f32 117.92482, %v2401_v46  ;;  %v2422_v28 = vadd.f32 -89.72485, %v2421_v41  ;;  %v2608_v55 = vadd.f32 %v2607_v45, %v2587_v48  ;;  %v2581_v16 = vmul.f32 %v2565_v15, %v3734_v44 }
0x109f   : > { %v2583_v22 = vmul.f32 %v2567_v24, %v3782_v51  ;;  %v2589_v14 = vmul.f32 %v2573_v17, %v3760_v12  ;;  %v2595_v32 = vadd.f32 %v2594_v57, %v2580_v29  ;;  %v2384_v58 = vadd.f32 1.9084886, %v2383_v53 }
0x10a0   : > { %v2403_v19 = vmul.f32 %v2402_v36, %v4713_v59  ;;  %v2423_v54 = vmul.f32 %v2422_v28, %v4713_v59  ;;  %v2609_v9 = vadd.f32 %v2608_v55, %v2588_v20  ;;  %v2582_v31 = vmul.f32 %v2566_v63, %v3776_v11 }
0x10a1   : > { %v2591_v27 = vmul.f32 %v2575_v52, %v3762_v23  ;;  %v2596_v1 = vadd.f32 %v2595_v32, %v2581_v16  ;;  %v2363_v60 = vmul.f32 %v2362_v3, %v4713_v59  ;;  %v2590_v15 = vmul.f32 %v2574_v49, %v3748_v61 }
0x10a2   : > { %v2424_v13 = vadd.f32 -37.91236, %v2423_v54  ;;  %v2610_v24 = vadd.f32 %v2609_v9, %v2589_v14  ;;  %v2598_v6 = vsel %vm683_vm0, %v2583_v22, 0.0  ;;  %v2404_v10 = vadd.f32 14.750916, %v2403_v19 }
0x10a3   : > { %v2597_v7 = vadd.f32 %v2596_v1, %v2582_v31  ;;  %v2425_v8 = vmul.f32 %v2384_v58, %v4701_v4  ;;  %v2612_v63 = vsel %vm683_vm0, %v2591_v27, 0.0  ;;  %v2364_v40 = vadd.f32 -0.025839344, %v2363_v60 }
0x10a4   : > { %v2427_v17 = vmul.f32 %v2424_v13, %v4701_v4  ;;  %v2611_v62 = vadd.f32 %v2610_v24, %v2590_v15  ;;  %v2620_v16 = vmul.f32 %v4701_v4, %v3788_v2 }
0x10a5   : > { %v2599_v50 = vadd.f32 %v2598_v6, %v2597_v7  ;;  %v2426_v41 = vadd.f32 %v2425_v8, %v2364_v40 }
0x10a6   : > { %v2428_v42 = vadd.f32 %v2427_v17, %v2404_v10  ;;  %v2613_v59 = vadd.f32 %v2612_v63, %v2611_v62 }
0x10a7   : > { %v2600_v49 = vrot.slane %v2599_v50, 4 }
0x10a8   : > { %v2429_v48 = vmul.f32 %v2428_v42, %v4709_v18  ;;  %v2614_v45 = vrot.slane %v2613_v59, 4  ;;  %v2621_v18 = vsub.f32 %v2620_v16, %v3786_v56 }
0x10a9   : > { %v2601_v36 = vadd.f32 %v2600_v49, %v2599_v50 }
0x10aa   : > { %v2430_v52 = vadd.f32 %v2429_v48, %v2426_v41  ;;  %v2615_v29 = vadd.f32 %v2614_v45, %v2613_v59 }
0x10ab   : > { %v2602_v57 = vrot.slane %v2601_v36, 2 }
0x10ac   : > { %2522 = vrot.lane.b32.xlu1 %v2430_v52, %s3380_s6  ;;  %v2616_v3 = vrot.slane %v2615_v29, 2 }
0x10ad   : > { %v2603_v28 = vadd.f32 %v2602_v57, %v2601_v36 }
0x10ae   : > { %v2617_v20 = vadd.f32 %v2616_v3, %v2615_v29 }
0x10af   : > { %v2604_v55 = vrot.slane %v2603_v28, 1 }
0x10b0   : > { %v2618_v22 = vrot.slane %v2617_v20, 1 }
0x10b1   : > { %v2605_v14 = vadd.f32 %v2604_v55, %v2603_v28 }
0x10b2   : > { %v2619_v32 = vadd.f32 %v2618_v22, %v2617_v20 }
0x10b4   : > { %v2624_v58 = vsel %vm719_vm1, %v2619_v32, %v2605_v14 }
0x10b5   : > { %v2530_v46 = vpop.permute.xlu2 %2529  ;;  %v2626_v19 = vadd.f32 %v2624_v58, %v2621_v18 }
0x10b6   : > { %v2532_v53 = vsub.f32 %v4701_v4, %v2530_v46 }
0x10b7   : > { %2628 = vrot.lane.b32.xlu0 %v2626_v19, %s3377_s27 }
0x10b8   : > { %2534 = vrot.lane.b32.xlu2 %v2532_v53, %s3380_s6 }
0x1101   : > { %v2518_v54 = vpop.permute.xlu0 %2517 }
0x1102   : > { %v2520_v9 = vmax.f32 %v2515_v5, %v2518_v54 }
0x1104   : > { %v2527_v27 = vmul.f32 0.5, %v2520_v9 }
0x1112   : > { %v2535_v31 = vpop.permute.xlu2 %2534 }
0x1113   : > { %v2537_v13 = vmul.f32 %v2535_v31, %v2527_v27 }
0x111e   : > { %v2523_v1 = vpop.permute.xlu1 %2522 }
0x111f   : > { %v2525_v60 = vadd.f32 %v2523_v1, %v2430_v52 }
0x1121   : > { %v2526_v15 = vmul.f32 0.5, %v2525_v60 }
0x1123   : > { %v2538_v24 = vsub.f32 %v2526_v15, %v2537_v13 }
0x1125   : > { %2634 = vrot.lane.b32.xlu1 %v2538_v24, %s3377_s27 }
0x1129   : > { %v2629_v7 = vpop.permute.xlu0 %2628 }
0x112a   : > { %v2631_v6 = vsub.f32 %v2626_v19, %v2629_v7 }
0x112c   : > { %v2632_v10 = vmul.f32 20.0, %v2631_v6 }
0x1197   : > { %v2635_v8 = vpop.permute.xlu1 %2634 }
0x1198   : > { %v2637_v17 = vsub.f32 %v2632_v10, %v2635_v8 }
0x119a   : > { %2639 = vrot.lane.b32.xlu2 %v2637_v17, %s3377_s27 }
0x11f4   : > { %v2640_v37 = vpop.permute.xlu2 %2639 }
0x11f5   : > { %v2642_v5 = vsub.f32 %v2637_v17, %v2640_v37 }
0x11f7   : > { %v2643_v62 = vmul.f32 0.02, %v2642_v5 }
0x11f9   : > { %2645 = vrot.lane.b32.xlu0 %v2643_v62, %s3380_s6 }
0x126b   : > { %v2646_v50 = vpop.permute.xlu0 %2645 }
0x126c   : > { %v2648_v63 = vadd.f32 %v2646_v50, %v4701_v4 }
0x126e   : > { %2653 = vrot.lane.b32.xlu2 %v2648_v63, %s3377_s27  ;;  %2650 = vrot.lane.b32.xlu1 %v2648_v63, %s3380_s6 }
0x12c8   : > { %v2654_v40 = vpop.permute.xlu2 %2653 }
0x12df   : > { %2664 = sbr.rel (%p3096_p0) target bundleno = 5518 (0x158e), region = 56 }
0x12e0   : > { %v2651_v46 = vpop.permute.xlu1 %2650 }
0x12e1   : > { %v2656_v42 = vsel %vm752_vm2, %v2651_v46, %v2648_v63 }
0x12e2   : > { %v4881_v59 = vsel %vm754_vm3, %v2656_v42, %v2654_v40 }
0x12e3   : > { %3095 = vst [vmem:[%s3490_s29 + $0xe] sm:$0x3] %v4881_v59 }
0x12e4   : > { %v4887_v53 = vmul.f32 %v4881_v59, %v4881_v59  ;;  %2851 = vrot.lane.b32.xlu0 %v4881_v59, %s3381_s8 }
0x12e6   : > { %v4893_v4 = vmul.f32 %v4887_v53, %v4887_v53 }
0x12e8   : > { %v2667_v49 = vmul.f32 0.00023866384, %v4893_v4  ;;  %v2687_v36 = vmul.f32 -5.7562742e-05, %v4893_v4  ;;  %v2707_v55 = vmul.f32 1.295298e-05, %v4893_v4 }
0x12e9   : > { %v2727_v31 = vmul.f32 -2.7050266e-06, %v4893_v4 }
0x12ea   : > { %v2668_v41 = vadd.f32 0.037559718, %v2667_v49  ;;  %v2688_v29 = vadd.f32 -0.011608309, %v2687_v36  ;;  %v2708_v14 = vadd.f32 0.0033810446, %v2707_v55 }
0x12eb   : > { %v2728_v13 = vadd.f32 -0.0009268531, %v2727_v31 }
0x12ec   : > { %v2669_v48 = vmul.f32 %v2668_v41, %v4893_v4  ;;  %v2689_v3 = vmul.f32 %v2688_v29, %v4893_v4  ;;  %v2709_v58 = vmul.f32 %v2708_v14, %v4893_v4 }
0x12ed   : > { %v2729_v7 = vmul.f32 %v2728_v13, %v4893_v4 }
0x12ee   : > { %v2670_v45 = vadd.f32 2.2874424, %v2669_v48  ;;  %v2690_v20 = vadd.f32 -0.8949406, %v2689_v3  ;;  %v2710_v9 = vadd.f32 0.32982558, %v2709_v58 }
0x12ef   : > { %v2730_v17 = vadd.f32 -0.114605896, %v2729_v7  ;;  %v2773_v48 = vmul.f32 0.00054402516, %v4893_v4  ;;  %v2753_v3 = vmul.f32 -0.0023600725, %v4893_v4 }
0x12f0   : > { %v2671_v52 = vmul.f32 %v2670_v45, %v4893_v4  ;;  %v2691_v22 = vmul.f32 %v2690_v20, %v4893_v4  ;;  %v2711_v60 = vmul.f32 %v2710_v9, %v4893_v4  ;;  %v2793_v45 = vmul.f32 -0.00011631614, %v4893_v4 }
0x12f1   : > { %v2731_v62 = vmul.f32 %v2730_v17, %v4893_v4  ;;  %v2754_v14 = vadd.f32 -0.42950746, %v2753_v3  ;;  %v2813_v58 = vmul.f32 0.009546554, %v4893_v4 }
0x12f2   : > { %v2672_v57 = vadd.f32 51.540684, %v2671_v52  ;;  %v2692_v18 = vadd.f32 -26.200945, %v2691_v22  ;;  %v2712_v24 = vadd.f32 12.409282, %v2711_v60 }
0x12f3   : > { %v2732_v40 = vadd.f32 -5.4993873, %v2731_v62  ;;  %v2794_v20 = vadd.f32 -0.03614727, %v2793_v45  ;;  %v2814_v13 = vadd.f32 1.3521498, %v2813_v58 }
0x12f4   : > { %v2673_v28 = vmul.f32 %v2672_v57, %v4893_v4  ;;  %v2693_v54 = vmul.f32 %v2692_v18, %v4893_v4  ;;  %v2713_v8 = vmul.f32 %v2712_v24, %v4893_v4 }
0x12f5   : > { %v2733_v41 = vmul.f32 %v2732_v40, %v4893_v4  ;;  %v2795_v18 = vmul.f32 %v2794_v20, %v4893_v4 }
0x12f6   : > { %v2674_v16 = vadd.f32 314.81454, %v2673_v28  ;;  %v2694_v1 = vadd.f32 -236.86026, %v2693_v54  ;;  %v2714_v5 = vadd.f32 156.85045, %v2713_v8  ;;  %v2815_v8 = vmul.f32 %v2814_v13, %v4893_v4 }
0x12f7   : > { %v2734_v57 = vadd.f32 -93.875305, %v2733_v41  ;;  %v2774_v28 = vadd.f32 0.1284797, %v2773_v48  ;;  %v2796_v60 = vadd.f32 -4.011206, %v2795_v18 }
0x12f8   : > { %v2675_v32 = vmul.f32 %v2674_v16, %v4893_v4  ;;  %v2695_v15 = vmul.f32 %v2694_v1, %v4893_v4  ;;  %v2715_v46 = vmul.f32 %v2714_v5, %v4893_v4  ;;  %v2816_v40 = vadd.f32 73.19816, %v2815_v8 }
0x12f9   : > { %v2735_v22 = vmul.f32 %v2734_v57, %v4893_v4 }
0x12fa   : > { %v2676_v19 = vadd.f32 -483.59192, %v2675_v32  ;;  %v2696_v10 = vadd.f32 -4.8392625, %v2695_v15  ;;  %v2716_v49 = vadd.f32 269.41855, %v2715_v46  ;;  %v2775_v32 = vmul.f32 %v2774_v28, %v4893_v4 }
0x12fb   : > { %v2736_v31 = vadd.f32 -348.0218, %v2735_v22 }
0x12fc   : > { %v2677_v27 = vmul.f32 %v2676_v19, %v4893_v4  ;;  %v2697_v37 = vmul.f32 %v2696_v10, %v4893_v4  ;;  %v2717_v29 = vmul.f32 %v2716_v49, %v4893_v4  ;;  %v2776_v1 = vadd.f32 11.214069, %v2775_v32 }
0x12fd   : > { %v2737_v24 = vmul.f32 %v2736_v31, %v4893_v4  ;;  %v2797_v10 = vmul.f32 %v2796_v60, %v4893_v4 }
0x12fe   : > { %v2678_v6 = vadd.f32 -1556.2883, %v2677_v27  ;;  %v2698_v63 = vadd.f32 1977.2126, %v2697_v37  ;;  %v2718_v16 = vadd.f32 -1741.0626, %v2717_v29  ;;  %v2755_v27 = vmul.f32 %v2754_v14, %v4893_v4 }
0x12ff   : > { %v2738_v62 = vadd.f32 1134.7428, %v2737_v24  ;;  %v2798_v46 = vadd.f32 -170.481, %v2797_v10 }
0x1300   : > { %v2679_v50 = vmul.f32 %v2678_v6, %v4893_v4  ;;  %v2699_v42 = vmul.f32 %v2698_v63, %v4893_v4  ;;  %v2719_v9 = vmul.f32 %v2718_v16, %v4893_v4  ;;  %v2756_v7 = vadd.f32 -29.533041, %v2755_v27 }
0x1301   : > { %v2777_v6 = vmul.f32 %v2776_v1, %v4893_v4  ;;  %v2739_v49 = vmul.f32 %v2738_v62, %v4893_v4  ;;  %v2799_v45 = vmul.f32 %v2798_v46, %v4893_v4 }
0x1302   : > { %v2680_v36 = vadd.f32 1151.786, %v2679_v50  ;;  %v2700_v52 = vadd.f32 -1459.2588, %v2699_v42  ;;  %v2720_v15 = vadd.f32 770.18134, %v2719_v9  ;;  %v2757_v50 = vmul.f32 %v2756_v7, %v4893_v4 }
0x1303   : > { %v2778_v63 = vadd.f32 372.27844, %v2777_v6  ;;  %v2740_v3 = vadd.f32 483.93134, %v2739_v49 }
0x1304   : > { %v2701_v55 = vmul.f32 %v2700_v52, %v4893_v4  ;;  %v2681_v19 = vmul.f32 %v2680_v36, %v4893_v4  ;;  %v2721_v5 = vmul.f32 %v2720_v15, %v4893_v4  ;;  %v2758_v41 = vadd.f32 -759.8274, %v2757_v50 }
0x1305   : > { %v2779_v48 = vmul.f32 %v2778_v63, %v4893_v4  ;;  %v2817_v36 = vmul.f32 %v2816_v40, %v4893_v4  ;;  %v2741_v22 = vmul.f32 %v2740_v3, %v4893_v4 }
0x1306   : > { %v2702_v54 = vadd.f32 587.6412, %v2701_v55  ;;  %v2682_v17 = vadd.f32 -211.8891, %v2681_v19  ;;  %v2722_v42 = vadd.f32 -530.61975, %v2721_v5  ;;  %v2759_v28 = vmul.f32 %v2758_v41, %v4893_v4 }
0x1307   : > { %v2780_v20 = vadd.f32 4078.1116, %v2779_v48  ;;  %v2800_v55 = vadd.f32 -2534.6333, %v2799_v45  ;;  %v2818_v16 = vadd.f32 1443.1392, %v2817_v36 }
0x1308   : > { %v2703_v37 = vmul.f32 %v2702_v54, %v4893_v4  ;;  %v2683_v52 = vmul.f32 %v2682_v17, %v4893_v4  ;;  %v2723_v57 = vmul.f32 %v2722_v42, %v4893_v4  ;;  %v2760_v14 = vadd.f32 -5921.507, %v2759_v28 }
0x1309   : > { %v2781_v32 = vmul.f32 %v2780_v20, %v4893_v4  ;;  %v2801_v18 = vmul.f32 %v2800_v55, %v4893_v4  ;;  %v2819_v58 = vmul.f32 %v2818_v16, %v4893_v4  ;;  %v2742_v31 = vadd.f32 -207.55182, %v2741_v22 }
0x130a   : > { %v2704_v29 = vadd.f32 -39.909573, %v2703_v37  ;;  %v2684_v19 = vadd.f32 27.356148, %v2683_v52  ;;  %v2724_v9 = vadd.f32 117.92482, %v2723_v57  ;;  %v2761_v27 = vmul.f32 %v2760_v14, %v4893_v4 }
0x130b   : > { %v2782_v1 = vadd.f32 5927.2085, %v2781_v32  ;;  %v2802_v60 = vadd.f32 -8004.5015, %v2801_v18  ;;  %v2820_v13 = vadd.f32 7555.5493, %v2819_v58  ;;  %v2743_v15 = vmul.f32 %v2742_v31, %v4893_v4 }
0x130c   : > { %v2705_v54 = vmul.f32 %v2704_v29, %v4893_v4  ;;  %v2762_v24 = vadd.f32 -101.62451, %v2761_v27  ;;  %v2685_v8 = vmul.f32 %v2684_v19, %v4893_v4  ;;  %v2725_v37 = vmul.f32 %v2724_v9, %v4893_v4 }
0x130d   : > { %v2783_v7 = vmul.f32 %v2782_v1, %v4893_v4  ;;  %v2803_v6 = vmul.f32 %v2802_v60, %v4893_v4  ;;  %v2821_v10 = vmul.f32 %v2820_v13, %v4893_v4  ;;  %v2744_v5 = vadd.f32 -89.72485, %v2743_v15 }
0x130e   : > { %v2706_v17 = vadd.f32 1.9084886, %v2705_v54  ;;  %v2763_v62 = vmul.f32 %v2762_v24, %v4893_v4  ;;  %v2686_v45 = vadd.f32 -0.025839344, %v2685_v8  ;;  %v2726_v36 = vadd.f32 14.750916, %v2725_v37 }
0x130f   : > { %v2784_v50 = vadd.f32 -31339.127, %v2783_v7  ;;  %v2804_v63 = vadd.f32 21560.113, %v2803_v6  ;;  %v2822_v46 = vadd.f32 -9671.838, %v2821_v10  ;;  %v2745_v40 = vmul.f32 %v2744_v5, %v4893_v4 }
0x1310   : > { %v2764_v42 = vadd.f32 33612.613, %v2763_v62  ;;  %v2747_v29 = vmul.f32 %v2706_v17, %v4881_v59 }
0x1311   : > { %v2785_v49 = vmul.f32 %v2784_v50, %v4893_v4  ;;  %v2805_v41 = vmul.f32 %v2804_v63, %v4893_v4  ;;  %v2823_v48 = vmul.f32 %v2822_v46, %v4893_v4  ;;  %v2746_v52 = vadd.f32 -37.91236, %v2745_v40 }
0x1312   : > { %v2765_v57 = vmul.f32 %v2764_v42, %v4893_v4  ;;  %v2748_v18 = vadd.f32 %v2747_v29, %v2686_v45 }
0x1313   : > { %v2786_v3 = vadd.f32 10782.539, %v2785_v49  ;;  %v2806_v28 = vadd.f32 7258.9697, %v2805_v41  ;;  %v2824_v20 = vadd.f32 -24900.613, %v2823_v48  ;;  %v2749_v55 = vmul.f32 %v2746_v52, %v4881_v59 }
0x1314   : > { %v2766_v16 = vadd.f32 -18970.363, %v2765_v57 }
0x1315   : > { %v2787_v22 = vmul.f32 %v2786_v3, %v4893_v4  ;;  %v2807_v14 = vmul.f32 %v2806_v28, %v4893_v4  ;;  %v2825_v32 = vmul.f32 %v2824_v20, %v4893_v4  ;;  %v2750_v58 = vadd.f32 %v2749_v55, %v2726_v36 }
0x1316   : > { %v2767_v19 = vmul.f32 %v2766_v16, %v4893_v4  ;;  %v2861_v3 = vrot.slane %v4881_v59, 1  ;;  %v2862_v28 = vperm.slane %v4881_v59, 0  ;;  %v5184_v16 = vld [vmem:[#allocation14_spill] sm:$0xff] }
0x1317   : > { %v2788_v54 = vadd.f32 -5306.1978, %v2787_v22  ;;  %v2808_v9 = vadd.f32 -2283.07, %v2807_v14  ;;  %v2826_v31 = vadd.f32 13821.433, %v2825_v32  ;;  %v2751_v27 = vmul.f32 %v2750_v58, %v4887_v53 }
0x1318   : > { %v2768_v1 = vadd.f32 5288.7705, %v2767_v19  ;;  %v2863_v20 = vperm.slane %v2861_v3, 0  ;;  %v2867_v55 = vsub.f32 %v2862_v28, %v3691_v26  ;;  %v5185_v14 = vld [vmem:[#allocation13_spill] sm:$0xff]  ;;  %v5186_v58 = vld [vmem:[#allocation16_spill] sm:$0xff]  ;;  %v5197_v3 = vld [vmem:[#allocation26_spill] sm:$0xff] }
0x1319   : > { %v2789_v60 = vmul.f32 %v2788_v54, %v4893_v4  ;;  %v2809_v13 = vmul.f32 %v2808_v9, %v4893_v4  ;;  %v2827_v15 = vmul.f32 %v2826_v31, %v4893_v4  ;;  %v4972_v24 = vadd.f32 %v2751_v27, %v2748_v18 }
0x131a   : > { %v2769_v7 = vmul.f32 %v2768_v1, %v4893_v4  ;;  %v2874_v22 = vsub.f32 %v2863_v20, %v5184_v16  ;;  %v2875_v32 = vsub.f32 %v2863_v20, %v5185_v14  ;;  %v2868_v18 = vsub.f32 %v2862_v28, %v3667_v0 }
0x131b   : > { %v2790_v6 = vadd.f32 707.5489, %v2789_v60  ;;  %v2810_v10 = vadd.f32 -628.074, %v2809_v13  ;;  %v2828_v8 = vadd.f32 -1695.1128, %v2827_v15  ;;  %2844 = vrot.lane.b32.xlu1 %v4972_v24, %s3382_s9  ;;  %v2876_v19 = vsub.f32 %v2863_v20, %v5186_v58 }
0x131c   : > { %v2770_v17 = vadd.f32 -199.54787, %v2769_v7  ;;  %v2883_v9 = vmax.f32 %v2867_v55, 0.0  ;;  %v2890_v31 = vmax.f32 %v2874_v22, 0.0  ;;  %v2891_v27 = vmax.f32 %v2875_v32, 0.0  ;;  %v5187_v60 = vld [vmem:[#allocation21_spill] sm:$0xff] }
0x131d   : > { %v2791_v37 = vmul.f32 %v2790_v6, %v4893_v4  ;;  %v2811_v5 = vmul.f32 %v2810_v10, %v4893_v4  ;;  %v2829_v62 = vmul.f32 %v2828_v8, %v4893_v4  ;;  %v2869_v1 = vsub.f32 %v2862_v28, %v3679_v21  ;;  %v5188_v7 = vld [vmem:[#allocation18_spill] sm:$0xff]  ;;  %v5189_v6 = vld [vmem:[#allocation15_spill] sm:$0xff] }
0x131e   : > { %v2771_v50 = vmul.f32 %v2770_v17, %v4893_v4  ;;  %v2877_v13 = vsub.f32 %v2863_v20, %v5187_v60  ;;  %v2884_v15 = vmax.f32 %v2868_v18, 0.0  ;;  %v2899_v10 = vmul.f32 %v2883_v9, %v5189_v6  ;;  %v5190_v17 = vld [vmem:[#allocation20_spill] sm:$0xff] }
0x131f   : > { %v2792_v63 = vadd.f32 29.501831, %v2791_v37  ;;  %v2812_v46 = vadd.f32 -113.73708, %v2811_v5  ;;  %v2830_v40 = vadd.f32 109.42459, %v2829_v62  ;;  %v2870_v8 = vsub.f32 %v2862_v28, %v3724_v39 }
0x1320   : > { %v2772_v42 = vadd.f32 1.9084886, %v2771_v50  ;;  %v2878_v0 = vsub.f32 %v2863_v20, %v5190_v17  ;;  %v2906_v37 = vmul.f32 %v2890_v31, %v3706_v30  ;;  %v5191_v5 = vld [vmem:[#allocation17_spill] sm:$0xff]  ;;  %v2885_v50 = vmax.f32 %v2869_v1, 0.0 }
0x1321   : > { %v2831_v49 = vmul.f32 %v2792_v63, %v4881_v59  ;;  %v2833_v41 = vmul.f32 %v2830_v40, %v4881_v59  ;;  %v2907_v62 = vmul.f32 %v2891_v27, %v5191_v5  ;;  %v2893_v63 = vmax.f32 %v2877_v13, 0.0  ;;  %v5193_v40 = vld [vmem:[#allocation25_spill] sm:$0xff] }
0x1322   : > { %v2881_v30 = vsub.f32 %v2863_v20, %v5197_v3  ;;  %v2894_v55 = vmax.f32 %v2878_v0, 0.0  ;;  %v2901_v18 = vmul.f32 %v2885_v50, %v3722_v38 }
0x1323   : > { %v2832_v48 = vadd.f32 %v2831_v49, %v2772_v42  ;;  %v2834_v45 = vadd.f32 %v2833_v41, %v2812_v46  ;;  %v5192_v46 = vld [vmem:[#allocation19_spill] sm:$0xff]  ;;  %v2879_v42 = vsub.f32 %v2863_v20, %v5193_v40  ;;  %v2900_v49 = vmul.f32 %v2884_v15, %v3704_v25 }
0x1324   : > { %v2871_v21 = vsub.f32 %v2862_v28, %v5192_v46  ;;  %v2928_v22 = vadd.f32 %v2907_v62, %v2906_v37  ;;  %v2909_v25 = vmul.f32 %v2893_v63, %v3714_v34  ;;  %v2910_v9 = vmul.f32 %v2894_v55, %v3738_v47 }
0x1325   : > { %v2835_v36 = vmul.f32 %v2834_v45, %v4887_v53  ;;  %v2866_v53 = vsub.f32 %v2862_v28, %v3712_v33  ;;  %v2892_v33 = vmax.f32 %v2876_v19, 0.0  ;;  %v2895_v32 = vmax.f32 %v2879_v42, 0.0 }
0x1326   : > { %v2887_v14 = vmax.f32 %v2871_v21, 0.0 }
0x1327   : > { %v4984_v52 = vadd.f32 %v2835_v36, %v2832_v48  ;;  %v2882_v54 = vmax.f32 %v2866_v53, 0.0  ;;  %v2908_v41 = vmul.f32 %v2892_v33, %v3716_v35  ;;  %v5194_v48 = vld [vmem:[#allocation24_spill] sm:$0xff]  ;;  %v5195_v36 = vld [vmem:[#allocation23_spill] sm:$0xff]  ;;  %v2886_v53 = vmax.f32 %v2870_v8, 0.0 }
0x1328   : > { %v2872_v45 = vsub.f32 %v2862_v28, %v5194_v48  ;;  %v2873_v39 = vsub.f32 %v2862_v28, %v5195_v36  ;;  %v2903_v27 = vmul.f32 %v2887_v14, %v3734_v44  ;;  %v2911_v1 = vmul.f32 %v2895_v32, %v3760_v12 }
0x1329   : > { %v2837_v29 = vand.u32 2147483647, %v4984_v52  ;;  %v2898_v26 = vmul.f32 %v2882_v54, %v5188_v7  ;;  %v2897_v54 = vmax.f32 %v2881_v30, 0.0  ;;  %v2902_v28 = vmul.f32 %v2886_v53, %v3731_v43 }
0x132a   : > { %v2888_v58 = vmax.f32 %v2872_v45, 0.0  ;;  %v2889_v35 = vmax.f32 %v2873_v39, 0.0 }
0x132b   : > { %2839 = vrot.lane.b32.xlu0 %v2837_v29, %s3382_s9  ;;  %v2914_v16 = vadd.f32 %v2899_v10, %v2898_v26  ;;  %v2913_v34 = vmul.f32 %v2897_v54, %v3762_v23 }
0x132c   : > { %v2905_v38 = vmul.f32 %v2889_v35, %v3782_v51  ;;  %v2904_v15 = vmul.f32 %v2888_v58, %v3776_v11 }
0x132d   : > { %v2915_v31 = vadd.f32 %v2914_v16, %v2900_v49  ;;  %v2934_v44 = vsel %vm683_vm0, %v2913_v34, 0.0 }
0x132e   : > { %v2920_v6 = vsel %vm683_vm0, %v2905_v38, 0.0 }
0x132f   : > { %v2916_v60 = vadd.f32 %v2915_v31, %v2901_v18 }
0x1331   : > { %v2917_v7 = vadd.f32 %v2916_v60, %v2902_v28 }
0x1333   : > { %v2918_v26 = vadd.f32 %v2917_v7, %v2903_v27 }
0x1335   : > { %v2919_v10 = vadd.f32 %v2918_v26, %v2904_v15 }
0x1337   : > { %v2921_v8 = vadd.f32 %v2920_v6, %v2919_v10 }
0x1339   : > { %v2922_v0 = vrot.slane %v2921_v8, 4 }
0x133b   : > { %v2923_v37 = vadd.f32 %v2922_v0, %v2921_v8 }
0x133d   : > { %v2924_v5 = vrot.slane %v2923_v37, 2 }
0x133f   : > { %v2925_v62 = vadd.f32 %v2924_v5, %v2923_v37 }
0x1341   : > { %v2926_v63 = vrot.slane %v2925_v62, 1 }
0x1343   : > { %v2927_v40 = vadd.f32 %v2926_v63, %v2925_v62 }
0x1356   : > { %v2852_v4 = vpop.permute.xlu0 %2851 }
0x1357   : > { %v2854_v57 = vsub.f32 %v4881_v59, %v2852_v4  ;;  %v5196_v4 = vld [vmem:[#allocation22_spill] sm:$0xff] }
0x1359   : > { %2856 = vrot.lane.b32.xlu1 %v2854_v57, %s3382_s9  ;;  %v2880_v57 = vsub.f32 %v2863_v20, %v5196_v4  ;;  %v2929_v20 = vadd.f32 %v2928_v22, %v2908_v41 }
0x135b   : > { %v2896_v19 = vmax.f32 %v2880_v57, 0.0  ;;  %v2930_v13 = vadd.f32 %v2929_v20, %v2909_v25 }
0x135d   : > { %v2912_v33 = vmul.f32 %v2896_v19, %v3748_v61  ;;  %v2931_v43 = vadd.f32 %v2930_v13, %v2910_v9  ;;  %v2942_v61 = vmul.f32 %v4881_v59, %v3788_v2 }
0x135f   : > { %v2932_v47 = vadd.f32 %v2931_v43, %v2911_v1  ;;  %v2943_v21 = vsub.f32 %v2942_v61, %v3786_v56 }
0x1361   : > { %v2933_v12 = vadd.f32 %v2932_v47, %v2912_v33 }
0x1363   : > { %v2935_v17 = vadd.f32 %v2934_v44, %v2933_v12 }
0x1365   : > { %v2936_v51 = vrot.slane %v2935_v17, 4 }
0x1367   : > { %v2937_v23 = vadd.f32 %v2936_v51, %v2935_v17 }
0x1369   : > { %v2938_v11 = vrot.slane %v2937_v23, 2 }
0x136b   : > { %v2939_v50 = vadd.f32 %v2938_v11, %v2937_v23 }
0x136d   : > { %v2940_v46 = vrot.slane %v2939_v50, 1 }
0x136f   : > { %v2941_v42 = vadd.f32 %v2940_v46, %v2939_v50 }
0x1371   : > { %v2946_v49 = vsel %vm719_vm1, %v2941_v42, %v2927_v40 }
0x1372   : > { %v2948_v41 = vadd.f32 %v2946_v49, %v2943_v21 }
0x1374   : > { %2950 = vrot.lane.b32.xlu2 %v2948_v41, %s3381_s8 }
0x138d   : > { %v2845_v48 = vpop.permute.xlu1 %2844 }
0x138e   : > { %v2847_v2 = vadd.f32 %v2845_v48, %v4972_v24 }
0x1390   : > { %v2848_v57 = vmul.f32 0.5, %v2847_v2 }
0x139d   : > { %v2840_v45 = vpop.permute.xlu0 %2839 }
0x139e   : > { %v2842_v36 = vmax.f32 %v2837_v29, %v2840_v45 }
0x13a0   : > { %v2849_v39 = vmul.f32 0.5, %v2842_v36 }
0x13cb   : > { %v2857_v4 = vpop.permute.xlu1 %2856 }
0x13cc   : > { %v2859_v3 = vmul.f32 %v2857_v4, %v2849_v39 }
0x13ce   : > { %v2860_v30 = vsub.f32 %v2848_v57, %v2859_v3  ;;  %v2951_v56 = vpop.permute.xlu2 %2950 }
0x13cf   : > { %v2953_v53 = vsub.f32 %v2948_v41, %v2951_v56 }
0x13d0   : > { %2956 = vrot.lane.b32.xlu2 %v2860_v30, %s3381_s8 }
0x13d1   : > { %v2954_v55 = vmul.f32 20.0, %v2953_v53 }
0x142a   : > { %v2957_v16 = vpop.permute.xlu2 %2956 }
0x142b   : > { %v2959_v22 = vsub.f32 %v2954_v55, %v2957_v16 }
0x142d   : > { %2961 = vrot.lane.b32.xlu0 %v2959_v22, %s3381_s8 }
0x149f   : > { %v2962_v14 = vpop.permute.xlu0 %2961 }
0x14a0   : > { %v2964_v32 = vsub.f32 %v2959_v22, %v2962_v14 }
0x14a2   : > { %v2965_v52 = vmul.f32 0.02, %v2964_v32 }
0x14a4   : > { %2967 = vrot.lane.b32.xlu1 %v2965_v52, %s3382_s9 }
0x1516   : > { %v2968_v24 = vpop.permute.xlu1 %2967 }
0x1517   : > { %v2970_v29 = vadd.f32 %v2968_v24, %v4881_v59 }
0x1519   : > { %2975 = vrot.lane.b32.xlu0 %v2970_v29, %s3381_s8  ;;  %2972 = vrot.lane.b32.xlu2 %v2970_v29, %s3382_s9 }
0x1573   : > { %v2973_v18 = vpop.permute.xlu2 %2972 }
0x1574   : > { %v2978_v25 = vsel %vm752_vm2, %v2973_v18, %v2970_v29 }
0x158b   : > { %v2976_v58 = vpop.permute.xlu0 %2975 }
0x158c   : > { %v2979_v35 = vsel %vm754_vm3, %v2978_v25, %v2976_v58 }
0x158d   : > { %2980 = vst [vmem:[#allocation2] sm:$0x3] %v2979_v35 }
0x158e PF: > { %s3102_s10 = sshll.u32 %s3431_s19, 4  ;;  %s2994_s14 = sshll.u32 %s3490_s29, 4  ;;  %s2995_s14 = int_to_ptr.vmem [resolvable:$true] %s2994_s14 }
0x158f   : > { %s2993_s13 = scalar_lea.hbm %s5082_s4, %s3102_s10  ;;  %s2982_s22 = scalar_lea.sflag [#allocation5], %s217_s23 }
0x1590   : > { %s2996_s20 = sshll.u32 %s2993_s13, 4  ;;  %s3322_s19 = scalar_lea.hbm %s5082_s4, 32  ;;  %s2997_s20 = int_to_ptr.hbm [resolvable:$true] %s2996_s20 }
0x1591   : > { %s3316_s28 = sshra.s32 %s2997_s20, 4  ;;  %s3317_s28 = int_to_ptr.hbm [resolvable:$true] %s3316_s28 }
0x1592   : > { %s3318_s27 = scalar_lea.hbm %s3317_s28, 16  ;;  %p3323_p4 = scmp.lt.s32.totalorder %s3317_s28, %s5082_s4 }
0x1593   : > { %p3319_p1 = scmp.ne.s32.totalorder %s3317_s28, %s3318_s27  ;;  %p3324_p7 = scmp.lt.s32.totalorder %s3322_s19, %s3318_s27 }
0x1595   : > { %p3320_p2 = pnand %p3319_p1, %p3448_p5  ;;  %p3325_p8 = por %p3324_p7, %p3323_p4 }
0x1597   : > { %p3321_p3 = pneg %p3320_p2 }
0x1599   : > { %p3326_p9 = pnand %p3325_p8, %p3321_p3 }
0x159b   : > { %3329 = shalt.err (!%p3326_p9)
}
0x159c   : > { %s3383_s23 = smov 32   ;;  %s3384_s29 = smov 2  }
0x159d   : > { %3115 = dma.vmem_to_hbm [thread:$0]  (%p3448_p5), %s2995_s14, 256, %s2997_s20, %s2982_s22, %s3383_s23, %s3383_s23, %s3384_s29  }
0x159e PF: > { %p3137_p10 = scmp.ge.s32.totalorder %s3372_s18, 2  ;;  %s3011_s8 = sand.u32 1, %s3360_s15  }
0x159f   : > { %s3012_s9 = scalar_lea.sflag [#allocation5], %s3011_s8 }
0x15a0   : > { %p3128_p11 = pnand %p3137_p10, %p3452_p6 }
0x15a2   : > { %p3129_p12 = pneg %p3128_p11 }
0x15a4   : > { %3355 = dma.done.wait (%p3129_p12), %s3012_s9, 256  }
0x15a5   : > { %3357 = vsyncadd (%p3129_p12), %s3012_s9, 4294967040  ;;  %p16_p13 = scmp.ge.s32.totalorder %s3435_s21, 4   ;;  %s5198_s15 = smov %s3364_s16 }
0x15a6   : > { %s5199_s16 = smov %s3368_s17  ;;  %s5200_s17 = smov %s3446_s24 }
0x15a7   : > { %s5201_s18 = smov %s3435_s21  ;;  %18 = sbr.rel (!%p16_p13) target bundleno = 5 (0x5), region = 96 }
0x15ac   :  { %3018 = vsyncpa [#allocation4], 1 }
0x15ad   :  { %3020 = vsyncpa [#allocation4 + $0x1], 1 }
0x15ae   :  { %3021 = vsyncpa [#allocation7], 1 }
0x15af   :  { %3022 = vsyncpa [#allocation5], 1 }
0x15b0   :  { %3024 = vsyncpa [#allocation5 + $0x1], 1 }

</bundles_post_ra>
